<compile_context>
chip_gen: v7x
topology: tpu7x:2x2x1
jax: 0.10.0
libtpu: 0.0.40
codegen_flags: <defaults>
</compile_context>

<pallas_src>
import jax
import jax.numpy as jnp
from jax.experimental import pallas as pl
from jax.experimental.pallas import tpu as pltpu

CP = 128      # padded channel width (lanes) for all intermediate activations
CIN_P = 8     # padded input-image channel width (3 -> 8)


# ----------------------------------------------------------------------------
# Fused encoder kernel builder (all geometry is static Python).
# Activation buffers are 2-D: (flattened spatial rows, channels) with channels
# on lanes.  A stride-s 3x3 conv output at q = oy*Wp + ox is
#     sum_{taps (i,j)}  A[s*q + i*Wp + j, :] @ W[i,j]
# so each tap is one strided-slice matmul over the whole image.
# ----------------------------------------------------------------------------
def _make_encoder_kernel(H, W, hidden):
    # conv1: stride 2, pad 1
    Hp1, Wp1 = H + 2, W + 2
    OH1, OW1 = (H - 1) // 2 + 1, (W - 1) // 2 + 1
    # conv2: stride 2, pad 1
    H2, W2 = OH1, OW1
    Hp2, Wp2 = H2 + 2, W2 + 2
    OH2, OW2 = (H2 - 1) // 2 + 1, (W2 - 1) // 2 + 1
    # conv3: stride 1, pad 1 (same spatial size)
    H3, W3 = OH2, OW2
    Hp3, Wp3 = H3 + 2, W3 + 2
    OH3, OW3 = H3, W3
    P = OH3 * OW3                      # spatial positions feeding the FC

    Q1 = (OH1 - 1) * Wp1 + OW1         # accumulator row counts per layer
    Q2 = (OH2 - 1) * Wp2 + OW2
    Q3 = (OH3 - 1) * Wp3 + OW3

    def kernel(x_ref, w1_ref, b1_ref, w2_ref, b2_ref, w3_ref, b3_ref,
               wf_ref, bf_ref, out_ref,
               a2_ref, a3_ref, acc1_ref, acc2_ref, acc3_ref, act3_ref):
        cdt = w1_ref.dtype                      # bf16 compute dtype for the MXU

        # zero the padded activation buffers (their halo must be exact zeros)
        a2_ref[...] = jnp.zeros_like(a2_ref)
        a3_ref[...] = jnp.zeros_like(a3_ref)

        def conv_taps(src_ref, w_ref, acc_ref, wp, q, stride):
            for idx in range(9):
                i, j = idx // 3, idx % 3
                t = i * wp + j
                if stride == 1:
                    lhs = src_ref[t:t + q, :]
                else:
                    lhs = src_ref[pl.ds(t, q, stride=stride), :]
                contrib = jnp.dot(lhs.astype(cdt), w_ref[idx],
                                  preferred_element_type=jnp.float32)
                if idx == 0:
                    acc_ref[...] = contrib
                else:
                    acc_ref[...] = acc_ref[...] + contrib

        def bias_relu_compact(acc_ref, b_ref, dst_ref, wp_src, oh, ow,
                              dst_wp, dst_padded):
            b = b_ref[...]                                   # (1, CP) f32
            for oy in range(oh):
                v = jnp.maximum(acc_ref[oy * wp_src:oy * wp_src + ow, :] + b,
                                0.0)
                start = (oy + 1) * dst_wp + 1 if dst_padded else oy * dst_wp
                dst_ref[start:start + ow, :] = v

        # conv1 (K=8 -> 128 ch), stride 2
        conv_taps(x_ref, w1_ref, acc1_ref, Wp1, Q1, 2)
        bias_relu_compact(acc1_ref, b1_ref, a2_ref, Wp1, OH1, OW1, Wp2, True)
        # conv2, stride 2
        conv_taps(a2_ref, w2_ref, acc2_ref, Wp2, Q2, 2)
        bias_relu_compact(acc2_ref, b2_ref, a3_ref, Wp2, OH2, OW2, Wp3, True)
        # conv3, stride 1
        conv_taps(a3_ref, w3_ref, acc3_ref, Wp3, Q3, 1)
        bias_relu_compact(acc3_ref, b3_ref, act3_ref, Wp3, OH3, OW3, OW3, False)

        # FC: torch's channel-major flatten is already folded into wf_ref,
        # which is laid out as (position p, padded channel, hidden).
        acc = bf_ref[...].astype(jnp.float32)                # (1, hidden)
        for p in range(P):
            lhs = act3_ref[p:p + 1, :].astype(cdt)           # (1, CP)
            acc = acc + jnp.dot(lhs, wf_ref[p],
                                preferred_element_type=jnp.float32)
        out_ref[...] = acc.reshape(out_ref.shape)

    scratch = [
        pltpu.VMEM((Hp2 * Wp2 + 8, CP), jnp.float32),   # conv2 padded input
        pltpu.VMEM((Hp3 * Wp3 + 8, CP), jnp.float32),   # conv3 padded input
        pltpu.VMEM((Q1, CP), jnp.float32),              # conv1 accumulator
        pltpu.VMEM((Q2, CP), jnp.float32),              # conv2 accumulator
        pltpu.VMEM((Q3, CP), jnp.float32),              # conv3 accumulator
        pltpu.VMEM((P, CP), jnp.float32),               # conv3 compact output
    ]
    return kernel, scratch


# ----------------------------------------------------------------------------
# One-time parameter preparation (done at init, NOT per forward):
#  * conv weights -> (9, Cin_pad, Cout_pad) bf16, tap-major, zero padded
#  * biases       -> (1, CP) f32
#  * fc weight    -> (P, CP, hidden) bf16 with torch's (c, y, x) flatten
#                    permutation folded in; fc bias -> (1, hidden) f32
# ----------------------------------------------------------------------------
def prepare_encoder_params(params, input_size=(16, 16),
                           compute_dtype=jnp.bfloat16):
    fh, fw = input_size[0] // 4, input_size[1] // 4

    def conv_w(w, cin_p):
        cout, cin, kh, kw = w.shape
        wr = jnp.transpose(w, (2, 3, 1, 0)).reshape(kh * kw, cin, cout)
        wr = jnp.pad(wr, ((0, 0), (0, cin_p - cin), (0, CP - cout)))
        return wr.astype(compute_dtype)

    def conv_b(b):
        return jnp.pad(b, (0, CP - b.shape[0])).reshape(1, CP).astype(jnp.float32)

    wf = params["wf"]                                  # (hidden, 64*fh*fw)
    hidden = wf.shape[0]
    wf3 = wf.reshape(hidden, 64, fh * fw)              # [h, c, p]
    wfr = jnp.transpose(wf3, (2, 1, 0))                # [p, c, h]
    wfr = jnp.pad(wfr, ((0, 0), (0, CP - 64), (0, 0))).astype(compute_dtype)

    return {
        "w1": conv_w(params["w1"], CIN_P), "b1": conv_b(params["b1"]),
        "w2": conv_w(params["w2"], CP),    "b2": conv_b(params["b2"]),
        "w3": conv_w(params["w3"], CP),    "b3": conv_b(params["b3"]),
        "wf": wfr,
        "bf": params["bf"].reshape(1, hidden).astype(jnp.float32),
    }


# ----------------------------------------------------------------------------
# Forward: one input-side layout transform (NCHW -> padded NHWC rows), then a
# single fused pallas_call over a batch-parallel grid.
# ----------------------------------------------------------------------------
def encoder_forward(prep, x):
    B, C, H, W = x.shape
    assert C <= CIN_P and H % 16 == 0 and W % 16 == 0
    hidden = prep["bf"].shape[-1]

    Hp, Wp = H + 2, W + 2
    rows = Hp * Wp
    rows_pad = ((rows + 7) // 8) * 8

    xt = jnp.transpose(x, (0, 2, 3, 1))                        # NCHW -> NHWC once
    xt = jnp.pad(xt, ((0, 0), (1, 1), (1, 1), (0, CIN_P - C))) # spatial+chan pad
    xr = xt.reshape(B, rows, CIN_P)
    xr = jnp.pad(xr, ((0, 0), (0, rows_pad - rows), (0, 0)))
    xr = xr.reshape(B * rows_pad, CIN_P)

    kernel, scratch = _make_encoder_kernel(H, W, hidden)

    out = pl.pallas_call(
        kernel,
        out_shape=jax.ShapeDtypeStruct((B, 1, hidden), jnp.float32),
        grid=(B,),
        in_specs=[
            pl.BlockSpec((rows_pad, CIN_P), lambda b: (b, 0)),
            pl.BlockSpec(prep["w1"].shape, lambda b: (0, 0, 0)),
            pl.BlockSpec(prep["b1"].shape, lambda b: (0, 0)),
            pl.BlockSpec(prep["w2"].shape, lambda b: (0, 0, 0)),
            pl.BlockSpec(prep["b2"].shape, lambda b: (0, 0)),
            pl.BlockSpec(prep["w3"].shape, lambda b: (0, 0, 0)),
            pl.BlockSpec(prep["b3"].shape, lambda b: (0, 0)),
            pl.BlockSpec(prep["wf"].shape, lambda b: (0, 0, 0)),
            pl.BlockSpec(prep["bf"].shape, lambda b: (0, 0)),
        ],
        out_specs=pl.BlockSpec((1, 1, hidden), lambda b: (b, 0, 0)),
        scratch_shapes=scratch,
        compiler_params=pltpu.CompilerParams(
            dimension_semantics=("parallel",)),
    )(xr, prep["w1"], prep["b1"], prep["w2"], prep["b2"],
      prep["w3"], prep["b3"], prep["wf"], prep["bf"])
    return out.reshape(B, hidden)


# ----------------------------------------------------------------------------
# Parameter init (PyTorch-like uniform bounds) and pure-JAX reference.
# ----------------------------------------------------------------------------
def init_encoder_params(key, hidden_size=512, input_size=(16, 16)):
    fh, fw = input_size[0] // 4, input_size[1] // 4
    fc_in = 64 * fh * fw
    ks = jax.random.split(key, 8)

    def uinit(k, shape, fan_in):
        bound = 1.0 / jnp.sqrt(fan_in)
        return jax.random.uniform(k, shape, jnp.float32, -bound, bound)

    return {
        "w1": uinit(ks[0], (32, 3, 3, 3), 3 * 9),
        "b1": uinit(ks[1], (32,), 3 * 9),
        "w2": uinit(ks[2], (64, 32, 3, 3), 32 * 9),
        "b2": uinit(ks[3], (64,), 32 * 9),
        "w3": uinit(ks[4], (64, 64, 3, 3), 64 * 9),
        "b3": uinit(ks[5], (64,), 64 * 9),
        "wf": uinit(ks[6], (hidden_size, fc_in), fc_in),
        "bf": uinit(ks[7], (hidden_size,), fc_in),
    }


def encoder_reference(params, x):
    def conv(x, w, b, stride):
        y = jax.lax.conv_general_dilated(
            x, w, window_strides=(stride, stride), padding=((1, 1), (1, 1)),
            dimension_numbers=("NCHW", "OIHW", "NCHW"))
        return jnp.maximum(y + b[None, :, None, None], 0.0)

    x = conv(x, params["w1"], params["b1"], 2)
    x = conv(x, params["w2"], params["b2"], 2)
    x = conv(x, params["w3"], params["b3"], 1)
    flat = x.reshape(x.shape[0], -1)
    return flat @ params["wf"].T + params["bf"]


if __name__ == "__main__":
    key = jax.random.PRNGKey(0)
    kp, kx = jax.random.split(key)

    hidden_size = 512
    input_size = (16, 16)
    params = init_encoder_params(kp, hidden_size=hidden_size, input_size=input_size)
    prep = prepare_encoder_params(params, input_size=input_size)

    # Input: (B, 3, H, W) NCHW, H = W = 16 (multiple of 16 as the module requires)
    x = jax.random.normal(kx, (2, 3, input_size[0], input_size[1]), jnp.float32)

    fwd = jax.jit(encoder_forward)
    out = jax.block_until_ready(fwd(prep, x))
    assert out.shape == (2, hidden_size), out.shape

    ref = encoder_reference(params, x)
    max_err = jnp.max(jnp.abs(out - ref))
    assert jnp.allclose(out, ref, rtol=1e-2, atol=1e-2), f"mismatch: {max_err}"

    print("KERNEL_OK")
</pallas_src>

<mosaic_0001>
module attributes {stable_mosaic.version = 11 : i64} {
  func.func @kernel(%arg0: i32, %arg1: memref<328x8xf32, #tpu.memory_space<vmem>>, %arg2: memref<9x8x128xbf16, #tpu.memory_space<vmem>>, %arg3: memref<1x128xf32, #tpu.memory_space<vmem>>, %arg4: memref<9x128x128xbf16, #tpu.memory_space<vmem>>, %arg5: memref<1x128xf32, #tpu.memory_space<vmem>>, %arg6: memref<9x128x128xbf16, #tpu.memory_space<vmem>>, %arg7: memref<1x128xf32, #tpu.memory_space<vmem>>, %arg8: memref<16x128x512xbf16, #tpu.memory_space<vmem>>, %arg9: memref<1x512xf32, #tpu.memory_space<vmem>>, %arg10: memref<1x1x512xf32, #tpu.memory_space<vmem>>, %arg11: memref<108x128xf32, #tpu.memory_space<vmem>>, %arg12: memref<44x128xf32, #tpu.memory_space<vmem>>, %arg13: memref<134x128xf32, #tpu.memory_space<vmem>>, %arg14: memref<34x128xf32, #tpu.memory_space<vmem>>, %arg15: memref<22x128xf32, #tpu.memory_space<vmem>>, %arg16: memref<16x128xf32, #tpu.memory_space<vmem>>) attributes {dimension_semantics = [#tpu.dimension_semantics<parallel>], iteration_bounds = array<i64: 2>, scalar_prefetch = 0 : i64, scratch_operands = 6 : i64, tpu.core_type = #tpu.core_type<tc>, window_params = [{transform_indices = @transform_0, window_bounds = array<i64: 328, 8>}, {pipeline_mode = #tpu.pipeline_mode<synchronous>, transform_indices = @transform_1, window_bounds = array<i64: 9, 8, 128>}, {pipeline_mode = #tpu.pipeline_mode<synchronous>, transform_indices = @transform_2, window_bounds = array<i64: 1, 128>}, {pipeline_mode = #tpu.pipeline_mode<synchronous>, transform_indices = @transform_3, window_bounds = array<i64: 9, 128, 128>}, {pipeline_mode = #tpu.pipeline_mode<synchronous>, transform_indices = @transform_4, window_bounds = array<i64: 1, 128>}, {pipeline_mode = #tpu.pipeline_mode<synchronous>, transform_indices = @transform_5, window_bounds = array<i64: 9, 128, 128>}, {pipeline_mode = #tpu.pipeline_mode<synchronous>, transform_indices = @transform_6, window_bounds = array<i64: 1, 128>}, {pipeline_mode = #tpu.pipeline_mode<synchronous>, transform_indices = @transform_7, window_bounds = array<i64: 16, 128, 512>}, {pipeline_mode = #tpu.pipeline_mode<synchronous>, transform_indices = @transform_8, window_bounds = array<i64: 1, 512>}, {transform_indices = @transform_9, window_bounds = array<i64: 1, 1, 512>}]} {
    %cst = arith.constant 0.000000e+00 : f32
    %0 = vector.broadcast %cst : f32 to vector<108x128xf32>
    %c0 = arith.constant 0 : index
    %c0_0 = arith.constant 0 : index
    %1 = vector.load %arg11[%c0, %c0_0] : memref<108x128xf32, #tpu.memory_space<vmem>>, vector<108x128xf32>
    tpu.vector_store %arg11[%c0, %c0_0], %0 {strides = array<i32>} : memref<108x128xf32, #tpu.memory_space<vmem>>, vector<108x128xf32>,
    %cst_1 = arith.constant 0.000000e+00 : f32
    %2 = vector.broadcast %cst_1 : f32 to vector<44x128xf32>
    %c0_2 = arith.constant 0 : index
    %c0_3 = arith.constant 0 : index
    %3 = vector.load %arg12[%c0_2, %c0_3] : memref<44x128xf32, #tpu.memory_space<vmem>>, vector<44x128xf32>
    tpu.vector_store %arg12[%c0_2, %c0_3], %2 {strides = array<i32>} : memref<44x128xf32, #tpu.memory_space<vmem>>, vector<44x128xf32>,
    %c0_4 = arith.constant 0 : index
    %c0_5 = arith.constant 0 : index
    %4 = tpu.strided_load %arg1[%c0_4, %c0_5] {strides = array<i32: 2, 1>} : memref<328x8xf32, #tpu.memory_space<vmem>>, vector<134x8xf32>
    %5 = arith.truncf %4 : vector<134x8xf32> to vector<134x8xbf16>
    %c0_6 = arith.constant 0 : index
    %c0_7 = arith.constant 0 : index
    %c0_8 = arith.constant 0 : index
    %6 = vector.load %arg2[%c0_6, %c0_7, %c0_8] : memref<9x8x128xbf16, #tpu.memory_space<vmem>>, vector<1x8x128xbf16>
    %7 = vector.shape_cast %6 : vector<1x8x128xbf16> to vector<8x128xbf16>
    %cst_9 = arith.constant dense<0.000000e+00> : vector<134x128xf32>
    %8 = tpu.matmul %5, %7, %cst_9 {dimension_numbers = #tpu.dot_dimension_numbers<[1], [0], [0], [1], [0, 0, 1, 1], [], []>} : vector<134x8xbf16>, vector<8x128xbf16>, vector<134x128xf32> -> vector<134x128xf32>
    %c0_10 = arith.constant 0 : index
    %c0_11 = arith.constant 0 : index
    %9 = vector.load %arg13[%c0_10, %c0_11] : memref<134x128xf32, #tpu.memory_space<vmem>>, vector<134x128xf32>
    tpu.vector_store %arg13[%c0_10, %c0_11], %8 {strides = array<i32>} : memref<134x128xf32, #tpu.memory_space<vmem>>, vector<134x128xf32>,
    %c1 = arith.constant 1 : index
    %c0_12 = arith.constant 0 : index
    %10 = tpu.strided_load %arg1[%c1, %c0_12] {strides = array<i32: 2, 1>} : memref<328x8xf32, #tpu.memory_space<vmem>>, vector<134x8xf32>
    %11 = arith.truncf %10 : vector<134x8xf32> to vector<134x8xbf16>
    %c1_13 = arith.constant 1 : index
    %c0_14 = arith.constant 0 : index
    %c0_15 = arith.constant 0 : index
    %12 = vector.load %arg2[%c1_13, %c0_14, %c0_15] : memref<9x8x128xbf16, #tpu.memory_space<vmem>>, vector<1x8x128xbf16>
    %13 = vector.shape_cast %12 : vector<1x8x128xbf16> to vector<8x128xbf16>
    %cst_16 = arith.constant dense<0.000000e+00> : vector<134x128xf32>
    %14 = tpu.matmul %11, %13, %cst_16 {dimension_numbers = #tpu.dot_dimension_numbers<[1], [0], [0], [1], [0, 0, 1, 1], [], []>} : vector<134x8xbf16>, vector<8x128xbf16>, vector<134x128xf32> -> vector<134x128xf32>
    %c0_17 = arith.constant 0 : index
    %c0_18 = arith.constant 0 : index
    %15 = vector.load %arg13[%c0_17, %c0_18] : memref<134x128xf32, #tpu.memory_space<vmem>>, vector<134x128xf32>
    %16 = arith.addf %15, %14 : vector<134x128xf32>
    %c0_19 = arith.constant 0 : index
    %c0_20 = arith.constant 0 : index
    %17 = vector.load %arg13[%c0_19, %c0_20] : memref<134x128xf32, #tpu.memory_space<vmem>>, vector<134x128xf32>
    tpu.vector_store %arg13[%c0_19, %c0_20], %16 {strides = array<i32>} : memref<134x128xf32, #tpu.memory_space<vmem>>, vector<134x128xf32>,
    %c2 = arith.constant 2 : index
    %c0_21 = arith.constant 0 : index
    %18 = tpu.strided_load %arg1[%c2, %c0_21] {strides = array<i32: 2, 1>} : memref<328x8xf32, #tpu.memory_space<vmem>>, vector<134x8xf32>
    %19 = arith.truncf %18 : vector<134x8xf32> to vector<134x8xbf16>
    %c2_22 = arith.constant 2 : index
    %c0_23 = arith.constant 0 : index
    %c0_24 = arith.constant 0 : index
    %20 = vector.load %arg2[%c2_22, %c0_23, %c0_24] : memref<9x8x128xbf16, #tpu.memory_space<vmem>>, vector<1x8x128xbf16>
    %21 = vector.shape_cast %20 : vector<1x8x128xbf16> to vector<8x128xbf16>
    %cst_25 = arith.constant dense<0.000000e+00> : vector<134x128xf32>
    %22 = tpu.matmul %19, %21, %cst_25 {dimension_numbers = #tpu.dot_dimension_numbers<[1], [0], [0], [1], [0, 0, 1, 1], [], []>} : vector<134x8xbf16>, vector<8x128xbf16>, vector<134x128xf32> -> vector<134x128xf32>
    %c0_26 = arith.constant 0 : index
    %c0_27 = arith.constant 0 : index
    %23 = vector.load %arg13[%c0_26, %c0_27] : memref<134x128xf32, #tpu.memory_space<vmem>>, vector<134x128xf32>
    %24 = arith.addf %23, %22 : vector<134x128xf32>
    %c0_28 = arith.constant 0 : index
    %c0_29 = arith.constant 0 : index
    %25 = vector.load %arg13[%c0_28, %c0_29] : memref<134x128xf32, #tpu.memory_space<vmem>>, vector<134x128xf32>
    tpu.vector_store %arg13[%c0_28, %c0_29], %24 {strides = array<i32>} : memref<134x128xf32, #tpu.memory_space<vmem>>, vector<134x128xf32>,
    %c18 = arith.constant 18 : index
    %c0_30 = arith.constant 0 : index
    %26 = tpu.strided_load %arg1[%c18, %c0_30] {strides = array<i32: 2, 1>} : memref<328x8xf32, #tpu.memory_space<vmem>>, vector<134x8xf32>
    %27 = arith.truncf %26 : vector<134x8xf32> to vector<134x8xbf16>
    %c3 = arith.constant 3 : index
    %c0_31 = arith.constant 0 : index
    %c0_32 = arith.constant 0 : index
    %28 = vector.load %arg2[%c3, %c0_31, %c0_32] : memref<9x8x128xbf16, #tpu.memory_space<vmem>>, vector<1x8x128xbf16>
    %29 = vector.shape_cast %28 : vector<1x8x128xbf16> to vector<8x128xbf16>
    %cst_33 = arith.constant dense<0.000000e+00> : vector<134x128xf32>
    %30 = tpu.matmul %27, %29, %cst_33 {dimension_numbers = #tpu.dot_dimension_numbers<[1], [0], [0], [1], [0, 0, 1, 1], [], []>} : vector<134x8xbf16>, vector<8x128xbf16>, vector<134x128xf32> -> vector<134x128xf32>
    %c0_34 = arith.constant 0 : index
    %c0_35 = arith.constant 0 : index
    %31 = vector.load %arg13[%c0_34, %c0_35] : memref<134x128xf32, #tpu.memory_space<vmem>>, vector<134x128xf32>
    %32 = arith.addf %31, %30 : vector<134x128xf32>
    %c0_36 = arith.constant 0 : index
    %c0_37 = arith.constant 0 : index
    %33 = vector.load %arg13[%c0_36, %c0_37] : memref<134x128xf32, #tpu.memory_space<vmem>>, vector<134x128xf32>
    tpu.vector_store %arg13[%c0_36, %c0_37], %32 {strides = array<i32>} : memref<134x128xf32, #tpu.memory_space<vmem>>, vector<134x128xf32>,
    %c19 = arith.constant 19 : index
    %c0_38 = arith.constant 0 : index
    %34 = tpu.strided_load %arg1[%c19, %c0_38] {strides = array<i32: 2, 1>} : memref<328x8xf32, #tpu.memory_space<vmem>>, vector<134x8xf32>
    %35 = arith.truncf %34 : vector<134x8xf32> to vector<134x8xbf16>
    %c4 = arith.constant 4 : index
    %c0_39 = arith.constant 0 : index
    %c0_40 = arith.constant 0 : index
    %36 = vector.load %arg2[%c4, %c0_39, %c0_40] : memref<9x8x128xbf16, #tpu.memory_space<vmem>>, vector<1x8x128xbf16>
    %37 = vector.shape_cast %36 : vector<1x8x128xbf16> to vector<8x128xbf16>
    %cst_41 = arith.constant dense<0.000000e+00> : vector<134x128xf32>
    %38 = tpu.matmul %35, %37, %cst_41 {dimension_numbers = #tpu.dot_dimension_numbers<[1], [0], [0], [1], [0, 0, 1, 1], [], []>} : vector<134x8xbf16>, vector<8x128xbf16>, vector<134x128xf32> -> vector<134x128xf32>
    %c0_42 = arith.constant 0 : index
    %c0_43 = arith.constant 0 : index
    %39 = vector.load %arg13[%c0_42, %c0_43] : memref<134x128xf32, #tpu.memory_space<vmem>>, vector<134x128xf32>
    %40 = arith.addf %39, %38 : vector<134x128xf32>
    %c0_44 = arith.constant 0 : index
    %c0_45 = arith.constant 0 : index
    %41 = vector.load %arg13[%c0_44, %c0_45] : memref<134x128xf32, #tpu.memory_space<vmem>>, vector<134x128xf32>
    tpu.vector_store %arg13[%c0_44, %c0_45], %40 {strides = array<i32>} : memref<134x128xf32, #tpu.memory_space<vmem>>, vector<134x128xf32>,
    %c20 = arith.constant 20 : index
    %c0_46 = arith.constant 0 : index
    %42 = tpu.strided_load %arg1[%c20, %c0_46] {strides = array<i32: 2, 1>} : memref<328x8xf32, #tpu.memory_space<vmem>>, vector<134x8xf32>
    %43 = arith.truncf %42 : vector<134x8xf32> to vector<134x8xbf16>
    %c5 = arith.constant 5 : index
    %c0_47 = arith.constant 0 : index
    %c0_48 = arith.constant 0 : index
    %44 = vector.load %arg2[%c5, %c0_47, %c0_48] : memref<9x8x128xbf16, #tpu.memory_space<vmem>>, vector<1x8x128xbf16>
    %45 = vector.shape_cast %44 : vector<1x8x128xbf16> to vector<8x128xbf16>
    %cst_49 = arith.constant dense<0.000000e+00> : vector<134x128xf32>
    %46 = tpu.matmul %43, %45, %cst_49 {dimension_numbers = #tpu.dot_dimension_numbers<[1], [0], [0], [1], [0, 0, 1, 1], [], []>} : vector<134x8xbf16>, vector<8x128xbf16>, vector<134x128xf32> -> vector<134x128xf32>
    %c0_50 = arith.constant 0 : index
    %c0_51 = arith.constant 0 : index
    %47 = vector.load %arg13[%c0_50, %c0_51] : memref<134x128xf32, #tpu.memory_space<vmem>>, vector<134x128xf32>
    %48 = arith.addf %47, %46 : vector<134x128xf32>
    %c0_52 = arith.constant 0 : index
    %c0_53 = arith.constant 0 : index
    %49 = vector.load %arg13[%c0_52, %c0_53] : memref<134x128xf32, #tpu.memory_space<vmem>>, vector<134x128xf32>
    tpu.vector_store %arg13[%c0_52, %c0_53], %48 {strides = array<i32>} : memref<134x128xf32, #tpu.memory_space<vmem>>, vector<134x128xf32>,
    %c36 = arith.constant 36 : index
    %c0_54 = arith.constant 0 : index
    %50 = tpu.strided_load %arg1[%c36, %c0_54] {strides = array<i32: 2, 1>} : memref<328x8xf32, #tpu.memory_space<vmem>>, vector<134x8xf32>
    %51 = arith.truncf %50 : vector<134x8xf32> to vector<134x8xbf16>
    %c6 = arith.constant 6 : index
    %c0_55 = arith.constant 0 : index
    %c0_56 = arith.constant 0 : index
    %52 = vector.load %arg2[%c6, %c0_55, %c0_56] : memref<9x8x128xbf16, #tpu.memory_space<vmem>>, vector<1x8x128xbf16>
    %53 = vector.shape_cast %52 : vector<1x8x128xbf16> to vector<8x128xbf16>
    %cst_57 = arith.constant dense<0.000000e+00> : vector<134x128xf32>
    %54 = tpu.matmul %51, %53, %cst_57 {dimension_numbers = #tpu.dot_dimension_numbers<[1], [0], [0], [1], [0, 0, 1, 1], [], []>} : vector<134x8xbf16>, vector<8x128xbf16>, vector<134x128xf32> -> vector<134x128xf32>
    %c0_58 = arith.constant 0 : index
    %c0_59 = arith.constant 0 : index
    %55 = vector.load %arg13[%c0_58, %c0_59] : memref<134x128xf32, #tpu.memory_space<vmem>>, vector<134x128xf32>
    %56 = arith.addf %55, %54 : vector<134x128xf32>
    %c0_60 = arith.constant 0 : index
    %c0_61 = arith.constant 0 : index
    %57 = vector.load %arg13[%c0_60, %c0_61] : memref<134x128xf32, #tpu.memory_space<vmem>>, vector<134x128xf32>
    tpu.vector_store %arg13[%c0_60, %c0_61], %56 {strides = array<i32>} : memref<134x128xf32, #tpu.memory_space<vmem>>, vector<134x128xf32>,
    %c37 = arith.constant 37 : index
    %c0_62 = arith.constant 0 : index
    %58 = tpu.strided_load %arg1[%c37, %c0_62] {strides = array<i32: 2, 1>} : memref<328x8xf32, #tpu.memory_space<vmem>>, vector<134x8xf32>
    %59 = arith.truncf %58 : vector<134x8xf32> to vector<134x8xbf16>
    %c7 = arith.constant 7 : index
    %c0_63 = arith.constant 0 : index
    %c0_64 = arith.constant 0 : index
    %60 = vector.load %arg2[%c7, %c0_63, %c0_64] : memref<9x8x128xbf16, #tpu.memory_space<vmem>>, vector<1x8x128xbf16>
    %61 = vector.shape_cast %60 : vector<1x8x128xbf16> to vector<8x128xbf16>
    %cst_65 = arith.constant dense<0.000000e+00> : vector<134x128xf32>
    %62 = tpu.matmul %59, %61, %cst_65 {dimension_numbers = #tpu.dot_dimension_numbers<[1], [0], [0], [1], [0, 0, 1, 1], [], []>} : vector<134x8xbf16>, vector<8x128xbf16>, vector<134x128xf32> -> vector<134x128xf32>
    %c0_66 = arith.constant 0 : index
    %c0_67 = arith.constant 0 : index
    %63 = vector.load %arg13[%c0_66, %c0_67] : memref<134x128xf32, #tpu.memory_space<vmem>>, vector<134x128xf32>
    %64 = arith.addf %63, %62 : vector<134x128xf32>
    %c0_68 = arith.constant 0 : index
    %c0_69 = arith.constant 0 : index
    %65 = vector.load %arg13[%c0_68, %c0_69] : memref<134x128xf32, #tpu.memory_space<vmem>>, vector<134x128xf32>
    tpu.vector_store %arg13[%c0_68, %c0_69], %64 {strides = array<i32>} : memref<134x128xf32, #tpu.memory_space<vmem>>, vector<134x128xf32>,
    %c38 = arith.constant 38 : index
    %c0_70 = arith.constant 0 : index
    %66 = tpu.strided_load %arg1[%c38, %c0_70] {strides = array<i32: 2, 1>} : memref<328x8xf32, #tpu.memory_space<vmem>>, vector<134x8xf32>
    %67 = arith.truncf %66 : vector<134x8xf32> to vector<134x8xbf16>
    %c8 = arith.constant 8 : index
    %c0_71 = arith.constant 0 : index
    %c0_72 = arith.constant 0 : index
    %68 = vector.load %arg2[%c8, %c0_71, %c0_72] : memref<9x8x128xbf16, #tpu.memory_space<vmem>>, vector<1x8x128xbf16>
    %69 = vector.shape_cast %68 : vector<1x8x128xbf16> to vector<8x128xbf16>
    %cst_73 = arith.constant dense<0.000000e+00> : vector<134x128xf32>
    %70 = tpu.matmul %67, %69, %cst_73 {dimension_numbers = #tpu.dot_dimension_numbers<[1], [0], [0], [1], [0, 0, 1, 1], [], []>} : vector<134x8xbf16>, vector<8x128xbf16>, vector<134x128xf32> -> vector<134x128xf32>
    %c0_74 = arith.constant 0 : index
    %c0_75 = arith.constant 0 : index
    %71 = vector.load %arg13[%c0_74, %c0_75] : memref<134x128xf32, #tpu.memory_space<vmem>>, vector<134x128xf32>
    %72 = arith.addf %71, %70 : vector<134x128xf32>
    %c0_76 = arith.constant 0 : index
    %c0_77 = arith.constant 0 : index
    %73 = vector.load %arg13[%c0_76, %c0_77] : memref<134x128xf32, #tpu.memory_space<vmem>>, vector<134x128xf32>
    tpu.vector_store %arg13[%c0_76, %c0_77], %72 {strides = array<i32>} : memref<134x128xf32, #tpu.memory_space<vmem>>, vector<134x128xf32>,
    %c0_78 = arith.constant 0 : index
    %c0_79 = arith.constant 0 : index
    %74 = vector.load %arg3[%c0_78, %c0_79] : memref<1x128xf32, #tpu.memory_space<vmem>>, vector<1x128xf32>
    %c0_80 = arith.constant 0 : index
    %c0_81 = arith.constant 0 : index
    %75 = vector.load %arg13[%c0_80, %c0_81] : memref<134x128xf32, #tpu.memory_space<vmem>>, vector<8x128xf32>
    %76 = vector.broadcast %74 : vector<1x128xf32> to vector<8x128xf32>
    %77 = arith.addf %75, %76 : vector<8x128xf32>
    %cst_82 = arith.constant 0.000000e+00 : f32
    %78 = vector.broadcast %cst_82 : f32 to vector<8x128xf32>
    %79 = arith.maximumf %77, %78 : vector<8x128xf32>
    %c11 = arith.constant 11 : index
    %c0_83 = arith.constant 0 : index
    %80 = vector.load %arg11[%c11, %c0_83] : memref<108x128xf32, #tpu.memory_space<vmem>>, vector<8x128xf32>
    tpu.vector_store %arg11[%c11, %c0_83], %79 {strides = array<i32>} : memref<108x128xf32, #tpu.memory_space<vmem>>, vector<8x128xf32>,
    %c18_84 = arith.constant 18 : index
    %c0_85 = arith.constant 0 : index
    %81 = vector.load %arg13[%c18_84, %c0_85] : memref<134x128xf32, #tpu.memory_space<vmem>>, vector<8x128xf32>
    %82 = vector.broadcast %74 : vector<1x128xf32> to vector<8x128xf32>
    %83 = arith.addf %81, %82 : vector<8x128xf32>
    %cst_86 = arith.constant 0.000000e+00 : f32
    %84 = vector.broadcast %cst_86 : f32 to vector<8x128xf32>
    %85 = arith.maximumf %83, %84 : vector<8x128xf32>
    %c21 = arith.constant 21 : index
    %c0_87 = arith.constant 0 : index
    %86 = vector.load %arg11[%c21, %c0_87] : memref<108x128xf32, #tpu.memory_space<vmem>>, vector<8x128xf32>
    tpu.vector_store %arg11[%c21, %c0_87], %85 {strides = array<i32>} : memref<108x128xf32, #tpu.memory_space<vmem>>, vector<8x128xf32>,
    %c36_88 = arith.constant 36 : index
    %c0_89 = arith.constant 0 : index
    %87 = vector.load %arg13[%c36_88, %c0_89] : memref<134x128xf32, #tpu.memory_space<vmem>>, vector<8x128xf32>
    %88 = vector.broadcast %74 : vector<1x128xf32> to vector<8x128xf32>
    %89 = arith.addf %87, %88 : vector<8x128xf32>
    %cst_90 = arith.constant 0.000000e+00 : f32
    %90 = vector.broadcast %cst_90 : f32 to vector<8x128xf32>
    %91 = arith.maximumf %89, %90 : vector<8x128xf32>
    %c31 = arith.constant 31 : index
    %c0_91 = arith.constant 0 : index
    %92 = vector.load %arg11[%c31, %c0_91] : memref<108x128xf32, #tpu.memory_space<vmem>>, vector<8x128xf32>
    tpu.vector_store %arg11[%c31, %c0_91], %91 {strides = array<i32>} : memref<108x128xf32, #tpu.memory_space<vmem>>, vector<8x128xf32>,
    %c54 = arith.constant 54 : index
    %c0_92 = arith.constant 0 : index
    %93 = vector.load %arg13[%c54, %c0_92] : memref<134x128xf32, #tpu.memory_space<vmem>>, vector<8x128xf32>
    %94 = vector.broadcast %74 : vector<1x128xf32> to vector<8x128xf32>
    %95 = arith.addf %93, %94 : vector<8x128xf32>
    %cst_93 = arith.constant 0.000000e+00 : f32
    %96 = vector.broadcast %cst_93 : f32 to vector<8x128xf32>
    %97 = arith.maximumf %95, %96 : vector<8x128xf32>
    %c41 = arith.constant 41 : index
    %c0_94 = arith.constant 0 : index
    %98 = vector.load %arg11[%c41, %c0_94] : memref<108x128xf32, #tpu.memory_space<vmem>>, vector<8x128xf32>
    tpu.vector_store %arg11[%c41, %c0_94], %97 {strides = array<i32>} : memref<108x128xf32, #tpu.memory_space<vmem>>, vector<8x128xf32>,
    %c72 = arith.constant 72 : index
    %c0_95 = arith.constant 0 : index
    %99 = vector.load %arg13[%c72, %c0_95] : memref<134x128xf32, #tpu.memory_space<vmem>>, vector<8x128xf32>
    %100 = vector.broadcast %74 : vector<1x128xf32> to vector<8x128xf32>
    %101 = arith.addf %99, %100 : vector<8x128xf32>
    %cst_96 = arith.constant 0.000000e+00 : f32
    %102 = vector.broadcast %cst_96 : f32 to vector<8x128xf32>
    %103 = arith.maximumf %101, %102 : vector<8x128xf32>
    %c51 = arith.constant 51 : index
    %c0_97 = arith.constant 0 : index
    %104 = vector.load %arg11[%c51, %c0_97] : memref<108x128xf32, #tpu.memory_space<vmem>>, vector<8x128xf32>
    tpu.vector_store %arg11[%c51, %c0_97], %103 {strides = array<i32>} : memref<108x128xf32, #tpu.memory_space<vmem>>, vector<8x128xf32>,
    %c90 = arith.constant 90 : index
    %c0_98 = arith.constant 0 : index
    %105 = vector.load %arg13[%c90, %c0_98] : memref<134x128xf32, #tpu.memory_space<vmem>>, vector<8x128xf32>
    %106 = vector.broadcast %74 : vector<1x128xf32> to vector<8x128xf32>
    %107 = arith.addf %105, %106 : vector<8x128xf32>
    %cst_99 = arith.constant 0.000000e+00 : f32
    %108 = vector.broadcast %cst_99 : f32 to vector<8x128xf32>
    %109 = arith.maximumf %107, %108 : vector<8x128xf32>
    %c61 = arith.constant 61 : index
    %c0_100 = arith.constant 0 : index
    %110 = vector.load %arg11[%c61, %c0_100] : memref<108x128xf32, #tpu.memory_space<vmem>>, vector<8x128xf32>
    tpu.vector_store %arg11[%c61, %c0_100], %109 {strides = array<i32>} : memref<108x128xf32, #tpu.memory_space<vmem>>, vector<8x128xf32>,
    %c108 = arith.constant 108 : index
    %c0_101 = arith.constant 0 : index
    %111 = vector.load %arg13[%c108, %c0_101] : memref<134x128xf32, #tpu.memory_space<vmem>>, vector<8x128xf32>
    %112 = vector.broadcast %74 : vector<1x128xf32> to vector<8x128xf32>
    %113 = arith.addf %111, %112 : vector<8x128xf32>
    %cst_102 = arith.constant 0.000000e+00 : f32
    %114 = vector.broadcast %cst_102 : f32 to vector<8x128xf32>
    %115 = arith.maximumf %113, %114 : vector<8x128xf32>
    %c71 = arith.constant 71 : index
    %c0_103 = arith.constant 0 : index
    %116 = vector.load %arg11[%c71, %c0_103] : memref<108x128xf32, #tpu.memory_space<vmem>>, vector<8x128xf32>
    tpu.vector_store %arg11[%c71, %c0_103], %115 {strides = array<i32>} : memref<108x128xf32, #tpu.memory_space<vmem>>, vector<8x128xf32>,
    %c126 = arith.constant 126 : index
    %c0_104 = arith.constant 0 : index
    %117 = vector.load %arg13[%c126, %c0_104] : memref<134x128xf32, #tpu.memory_space<vmem>>, vector<8x128xf32>
    %118 = vector.broadcast %74 : vector<1x128xf32> to vector<8x128xf32>
    %119 = arith.addf %117, %118 : vector<8x128xf32>
    %cst_105 = arith.constant 0.000000e+00 : f32
    %120 = vector.broadcast %cst_105 : f32 to vector<8x128xf32>
    %121 = arith.maximumf %119, %120 : vector<8x128xf32>
    %c81 = arith.constant 81 : index
    %c0_106 = arith.constant 0 : index
    %122 = vector.load %arg11[%c81, %c0_106] : memref<108x128xf32, #tpu.memory_space<vmem>>, vector<8x128xf32>
    tpu.vector_store %arg11[%c81, %c0_106], %121 {strides = array<i32>} : memref<108x128xf32, #tpu.memory_space<vmem>>, vector<8x128xf32>,
    %c0_107 = arith.constant 0 : index
    %c0_108 = arith.constant 0 : index
    %123 = tpu.strided_load %arg11[%c0_107, %c0_108] {strides = array<i32: 2, 1>} : memref<108x128xf32, #tpu.memory_space<vmem>>, vector<34x128xf32>
    %124 = arith.truncf %123 : vector<34x128xf32> to vector<34x128xbf16>
    %c0_109 = arith.constant 0 : index
    %c0_110 = arith.constant 0 : index
    %c0_111 = arith.constant 0 : index
    %125 = vector.load %arg4[%c0_109, %c0_110, %c0_111] : memref<9x128x128xbf16, #tpu.memory_space<vmem>>, vector<1x128x128xbf16>
    %126 = vector.shape_cast %125 : vector<1x128x128xbf16> to vector<128x128xbf16>
    %cst_112 = arith.constant dense<0.000000e+00> : vector<34x128xf32>
    %127 = tpu.matmul %124, %126, %cst_112 {dimension_numbers = #tpu.dot_dimension_numbers<[1], [0], [0], [1], [0, 0, 1, 1], [], []>} : vector<34x128xbf16>, vector<128x128xbf16>, vector<34x128xf32> -> vector<34x128xf32>
    %c0_113 = arith.constant 0 : index
    %c0_114 = arith.constant 0 : index
    %128 = vector.load %arg14[%c0_113, %c0_114] : memref<34x128xf32, #tpu.memory_space<vmem>>, vector<34x128xf32>
    tpu.vector_store %arg14[%c0_113, %c0_114], %127 {strides = array<i32>} : memref<34x128xf32, #tpu.memory_space<vmem>>, vector<34x128xf32>,
    %c1_115 = arith.constant 1 : index
    %c0_116 = arith.constant 0 : index
    %129 = tpu.strided_load %arg11[%c1_115, %c0_116] {strides = array<i32: 2, 1>} : memref<108x128xf32, #tpu.memory_space<vmem>>, vector<34x128xf32>
    %130 = arith.truncf %129 : vector<34x128xf32> to vector<34x128xbf16>
    %c1_117 = arith.constant 1 : index
    %c0_118 = arith.constant 0 : index
    %c0_119 = arith.constant 0 : index
    %131 = vector.load %arg4[%c1_117, %c0_118, %c0_119] : memref<9x128x128xbf16, #tpu.memory_space<vmem>>, vector<1x128x128xbf16>
    %132 = vector.shape_cast %131 : vector<1x128x128xbf16> to vector<128x128xbf16>
    %cst_120 = arith.constant dense<0.000000e+00> : vector<34x128xf32>
    %133 = tpu.matmul %130, %132, %cst_120 {dimension_numbers = #tpu.dot_dimension_numbers<[1], [0], [0], [1], [0, 0, 1, 1], [], []>} : vector<34x128xbf16>, vector<128x128xbf16>, vector<34x128xf32> -> vector<34x128xf32>
    %c0_121 = arith.constant 0 : index
    %c0_122 = arith.constant 0 : index
    %134 = vector.load %arg14[%c0_121, %c0_122] : memref<34x128xf32, #tpu.memory_space<vmem>>, vector<34x128xf32>
    %135 = arith.addf %134, %133 : vector<34x128xf32>
    %c0_123 = arith.constant 0 : index
    %c0_124 = arith.constant 0 : index
    %136 = vector.load %arg14[%c0_123, %c0_124] : memref<34x128xf32, #tpu.memory_space<vmem>>, vector<34x128xf32>
    tpu.vector_store %arg14[%c0_123, %c0_124], %135 {strides = array<i32>} : memref<34x128xf32, #tpu.memory_space<vmem>>, vector<34x128xf32>,
    %c2_125 = arith.constant 2 : index
    %c0_126 = arith.constant 0 : index
    %137 = tpu.strided_load %arg11[%c2_125, %c0_126] {strides = array<i32: 2, 1>} : memref<108x128xf32, #tpu.memory_space<vmem>>, vector<34x128xf32>
    %138 = arith.truncf %137 : vector<34x128xf32> to vector<34x128xbf16>
    %c2_127 = arith.constant 2 : index
    %c0_128 = arith.constant 0 : index
    %c0_129 = arith.constant 0 : index
    %139 = vector.load %arg4[%c2_127, %c0_128, %c0_129] : memref<9x128x128xbf16, #tpu.memory_space<vmem>>, vector<1x128x128xbf16>
    %140 = vector.shape_cast %139 : vector<1x128x128xbf16> to vector<128x128xbf16>
    %cst_130 = arith.constant dense<0.000000e+00> : vector<34x128xf32>
    %141 = tpu.matmul %138, %140, %cst_130 {dimension_numbers = #tpu.dot_dimension_numbers<[1], [0], [0], [1], [0, 0, 1, 1], [], []>} : vector<34x128xbf16>, vector<128x128xbf16>, vector<34x128xf32> -> vector<34x128xf32>
    %c0_131 = arith.constant 0 : index
    %c0_132 = arith.constant 0 : index
    %142 = vector.load %arg14[%c0_131, %c0_132] : memref<34x128xf32, #tpu.memory_space<vmem>>, vector<34x128xf32>
    %143 = arith.addf %142, %141 : vector<34x128xf32>
    %c0_133 = arith.constant 0 : index
    %c0_134 = arith.constant 0 : index
    %144 = vector.load %arg14[%c0_133, %c0_134] : memref<34x128xf32, #tpu.memory_space<vmem>>, vector<34x128xf32>
    tpu.vector_store %arg14[%c0_133, %c0_134], %143 {strides = array<i32>} : memref<34x128xf32, #tpu.memory_space<vmem>>, vector<34x128xf32>,
    %c10 = arith.constant 10 : index
    %c0_135 = arith.constant 0 : index
    %145 = tpu.strided_load %arg11[%c10, %c0_135] {strides = array<i32: 2, 1>} : memref<108x128xf32, #tpu.memory_space<vmem>>, vector<34x128xf32>
    %146 = arith.truncf %145 : vector<34x128xf32> to vector<34x128xbf16>
    %c3_136 = arith.constant 3 : index
    %c0_137 = arith.constant 0 : index
    %c0_138 = arith.constant 0 : index
    %147 = vector.load %arg4[%c3_136, %c0_137, %c0_138] : memref<9x128x128xbf16, #tpu.memory_space<vmem>>, vector<1x128x128xbf16>
    %148 = vector.shape_cast %147 : vector<1x128x128xbf16> to vector<128x128xbf16>
    %cst_139 = arith.constant dense<0.000000e+00> : vector<34x128xf32>
    %149 = tpu.matmul %146, %148, %cst_139 {dimension_numbers = #tpu.dot_dimension_numbers<[1], [0], [0], [1], [0, 0, 1, 1], [], []>} : vector<34x128xbf16>, vector<128x128xbf16>, vector<34x128xf32> -> vector<34x128xf32>
    %c0_140 = arith.constant 0 : index
    %c0_141 = arith.constant 0 : index
    %150 = vector.load %arg14[%c0_140, %c0_141] : memref<34x128xf32, #tpu.memory_space<vmem>>, vector<34x128xf32>
    %151 = arith.addf %150, %149 : vector<34x128xf32>
    %c0_142 = arith.constant 0 : index
    %c0_143 = arith.constant 0 : index
    %152 = vector.load %arg14[%c0_142, %c0_143] : memref<34x128xf32, #tpu.memory_space<vmem>>, vector<34x128xf32>
    tpu.vector_store %arg14[%c0_142, %c0_143], %151 {strides = array<i32>} : memref<34x128xf32, #tpu.memory_space<vmem>>, vector<34x128xf32>,
    %c11_144 = arith.constant 11 : index
    %c0_145 = arith.constant 0 : index
    %153 = tpu.strided_load %arg11[%c11_144, %c0_145] {strides = array<i32: 2, 1>} : memref<108x128xf32, #tpu.memory_space<vmem>>, vector<34x128xf32>
    %154 = arith.truncf %153 : vector<34x128xf32> to vector<34x128xbf16>
    %c4_146 = arith.constant 4 : index
    %c0_147 = arith.constant 0 : index
    %c0_148 = arith.constant 0 : index
    %155 = vector.load %arg4[%c4_146, %c0_147, %c0_148] : memref<9x128x128xbf16, #tpu.memory_space<vmem>>, vector<1x128x128xbf16>
    %156 = vector.shape_cast %155 : vector<1x128x128xbf16> to vector<128x128xbf16>
    %cst_149 = arith.constant dense<0.000000e+00> : vector<34x128xf32>
    %157 = tpu.matmul %154, %156, %cst_149 {dimension_numbers = #tpu.dot_dimension_numbers<[1], [0], [0], [1], [0, 0, 1, 1], [], []>} : vector<34x128xbf16>, vector<128x128xbf16>, vector<34x128xf32> -> vector<34x128xf32>
    %c0_150 = arith.constant 0 : index
    %c0_151 = arith.constant 0 : index
    %158 = vector.load %arg14[%c0_150, %c0_151] : memref<34x128xf32, #tpu.memory_space<vmem>>, vector<34x128xf32>
    %159 = arith.addf %158, %157 : vector<34x128xf32>
    %c0_152 = arith.constant 0 : index
    %c0_153 = arith.constant 0 : index
    %160 = vector.load %arg14[%c0_152, %c0_153] : memref<34x128xf32, #tpu.memory_space<vmem>>, vector<34x128xf32>
    tpu.vector_store %arg14[%c0_152, %c0_153], %159 {strides = array<i32>} : memref<34x128xf32, #tpu.memory_space<vmem>>, vector<34x128xf32>,
    %c12 = arith.constant 12 : index
    %c0_154 = arith.constant 0 : index
    %161 = tpu.strided_load %arg11[%c12, %c0_154] {strides = array<i32: 2, 1>} : memref<108x128xf32, #tpu.memory_space<vmem>>, vector<34x128xf32>
    %162 = arith.truncf %161 : vector<34x128xf32> to vector<34x128xbf16>
    %c5_155 = arith.constant 5 : index
    %c0_156 = arith.constant 0 : index
    %c0_157 = arith.constant 0 : index
    %163 = vector.load %arg4[%c5_155, %c0_156, %c0_157] : memref<9x128x128xbf16, #tpu.memory_space<vmem>>, vector<1x128x128xbf16>
    %164 = vector.shape_cast %163 : vector<1x128x128xbf16> to vector<128x128xbf16>
    %cst_158 = arith.constant dense<0.000000e+00> : vector<34x128xf32>
    %165 = tpu.matmul %162, %164, %cst_158 {dimension_numbers = #tpu.dot_dimension_numbers<[1], [0], [0], [1], [0, 0, 1, 1], [], []>} : vector<34x128xbf16>, vector<128x128xbf16>, vector<34x128xf32> -> vector<34x128xf32>
    %c0_159 = arith.constant 0 : index
    %c0_160 = arith.constant 0 : index
    %166 = vector.load %arg14[%c0_159, %c0_160] : memref<34x128xf32, #tpu.memory_space<vmem>>, vector<34x128xf32>
    %167 = arith.addf %166, %165 : vector<34x128xf32>
    %c0_161 = arith.constant 0 : index
    %c0_162 = arith.constant 0 : index
    %168 = vector.load %arg14[%c0_161, %c0_162] : memref<34x128xf32, #tpu.memory_space<vmem>>, vector<34x128xf32>
    tpu.vector_store %arg14[%c0_161, %c0_162], %167 {strides = array<i32>} : memref<34x128xf32, #tpu.memory_space<vmem>>, vector<34x128xf32>,
    %c20_163 = arith.constant 20 : index
    %c0_164 = arith.constant 0 : index
    %169 = tpu.strided_load %arg11[%c20_163, %c0_164] {strides = array<i32: 2, 1>} : memref<108x128xf32, #tpu.memory_space<vmem>>, vector<34x128xf32>
    %170 = arith.truncf %169 : vector<34x128xf32> to vector<34x128xbf16>
    %c6_165 = arith.constant 6 : index
    %c0_166 = arith.constant 0 : index
    %c0_167 = arith.constant 0 : index
    %171 = vector.load %arg4[%c6_165, %c0_166, %c0_167] : memref<9x128x128xbf16, #tpu.memory_space<vmem>>, vector<1x128x128xbf16>
    %172 = vector.shape_cast %171 : vector<1x128x128xbf16> to vector<128x128xbf16>
    %cst_168 = arith.constant dense<0.000000e+00> : vector<34x128xf32>
    %173 = tpu.matmul %170, %172, %cst_168 {dimension_numbers = #tpu.dot_dimension_numbers<[1], [0], [0], [1], [0, 0, 1, 1], [], []>} : vector<34x128xbf16>, vector<128x128xbf16>, vector<34x128xf32> -> vector<34x128xf32>
    %c0_169 = arith.constant 0 : index
    %c0_170 = arith.constant 0 : index
    %174 = vector.load %arg14[%c0_169, %c0_170] : memref<34x128xf32, #tpu.memory_space<vmem>>, vector<34x128xf32>
    %175 = arith.addf %174, %173 : vector<34x128xf32>
    %c0_171 = arith.constant 0 : index
    %c0_172 = arith.constant 0 : index
    %176 = vector.load %arg14[%c0_171, %c0_172] : memref<34x128xf32, #tpu.memory_space<vmem>>, vector<34x128xf32>
    tpu.vector_store %arg14[%c0_171, %c0_172], %175 {strides = array<i32>} : memref<34x128xf32, #tpu.memory_space<vmem>>, vector<34x128xf32>,
    %c21_173 = arith.constant 21 : index
    %c0_174 = arith.constant 0 : index
    %177 = tpu.strided_load %arg11[%c21_173, %c0_174] {strides = array<i32: 2, 1>} : memref<108x128xf32, #tpu.memory_space<vmem>>, vector<34x128xf32>
    %178 = arith.truncf %177 : vector<34x128xf32> to vector<34x128xbf16>
    %c7_175 = arith.constant 7 : index
    %c0_176 = arith.constant 0 : index
    %c0_177 = arith.constant 0 : index
    %179 = vector.load %arg4[%c7_175, %c0_176, %c0_177] : memref<9x128x128xbf16, #tpu.memory_space<vmem>>, vector<1x128x128xbf16>
    %180 = vector.shape_cast %179 : vector<1x128x128xbf16> to vector<128x128xbf16>
    %cst_178 = arith.constant dense<0.000000e+00> : vector<34x128xf32>
    %181 = tpu.matmul %178, %180, %cst_178 {dimension_numbers = #tpu.dot_dimension_numbers<[1], [0], [0], [1], [0, 0, 1, 1], [], []>} : vector<34x128xbf16>, vector<128x128xbf16>, vector<34x128xf32> -> vector<34x128xf32>
    %c0_179 = arith.constant 0 : index
    %c0_180 = arith.constant 0 : index
    %182 = vector.load %arg14[%c0_179, %c0_180] : memref<34x128xf32, #tpu.memory_space<vmem>>, vector<34x128xf32>
    %183 = arith.addf %182, %181 : vector<34x128xf32>
    %c0_181 = arith.constant 0 : index
    %c0_182 = arith.constant 0 : index
    %184 = vector.load %arg14[%c0_181, %c0_182] : memref<34x128xf32, #tpu.memory_space<vmem>>, vector<34x128xf32>
    tpu.vector_store %arg14[%c0_181, %c0_182], %183 {strides = array<i32>} : memref<34x128xf32, #tpu.memory_space<vmem>>, vector<34x128xf32>,
    %c22 = arith.constant 22 : index
    %c0_183 = arith.constant 0 : index
    %185 = tpu.strided_load %arg11[%c22, %c0_183] {strides = array<i32: 2, 1>} : memref<108x128xf32, #tpu.memory_space<vmem>>, vector<34x128xf32>
    %186 = arith.truncf %185 : vector<34x128xf32> to vector<34x128xbf16>
    %c8_184 = arith.constant 8 : index
    %c0_185 = arith.constant 0 : index
    %c0_186 = arith.constant 0 : index
    %187 = vector.load %arg4[%c8_184, %c0_185, %c0_186] : memref<9x128x128xbf16, #tpu.memory_space<vmem>>, vector<1x128x128xbf16>
    %188 = vector.shape_cast %187 : vector<1x128x128xbf16> to vector<128x128xbf16>
    %cst_187 = arith.constant dense<0.000000e+00> : vector<34x128xf32>
    %189 = tpu.matmul %186, %188, %cst_187 {dimension_numbers = #tpu.dot_dimension_numbers<[1], [0], [0], [1], [0, 0, 1, 1], [], []>} : vector<34x128xbf16>, vector<128x128xbf16>, vector<34x128xf32> -> vector<34x128xf32>
    %c0_188 = arith.constant 0 : index
    %c0_189 = arith.constant 0 : index
    %190 = vector.load %arg14[%c0_188, %c0_189] : memref<34x128xf32, #tpu.memory_space<vmem>>, vector<34x128xf32>
    %191 = arith.addf %190, %189 : vector<34x128xf32>
    %c0_190 = arith.constant 0 : index
    %c0_191 = arith.constant 0 : index
    %192 = vector.load %arg14[%c0_190, %c0_191] : memref<34x128xf32, #tpu.memory_space<vmem>>, vector<34x128xf32>
    tpu.vector_store %arg14[%c0_190, %c0_191], %191 {strides = array<i32>} : memref<34x128xf32, #tpu.memory_space<vmem>>, vector<34x128xf32>,
    %c0_192 = arith.constant 0 : index
    %c0_193 = arith.constant 0 : index
    %193 = vector.load %arg5[%c0_192, %c0_193] : memref<1x128xf32, #tpu.memory_space<vmem>>, vector<1x128xf32>
    %c0_194 = arith.constant 0 : index
    %c0_195 = arith.constant 0 : index
    %194 = vector.load %arg14[%c0_194, %c0_195] : memref<34x128xf32, #tpu.memory_space<vmem>>, vector<4x128xf32>
    %195 = vector.broadcast %193 : vector<1x128xf32> to vector<4x128xf32>
    %196 = arith.addf %194, %195 : vector<4x128xf32>
    %cst_196 = arith.constant 0.000000e+00 : f32
    %197 = vector.broadcast %cst_196 : f32 to vector<4x128xf32>
    %198 = arith.maximumf %196, %197 : vector<4x128xf32>
    %c7_197 = arith.constant 7 : index
    %c0_198 = arith.constant 0 : index
    %199 = vector.load %arg12[%c7_197, %c0_198] : memref<44x128xf32, #tpu.memory_space<vmem>>, vector<4x128xf32>
    tpu.vector_store %arg12[%c7_197, %c0_198], %198 {strides = array<i32>} : memref<44x128xf32, #tpu.memory_space<vmem>>, vector<4x128xf32>,
    %c10_199 = arith.constant 10 : index
    %c0_200 = arith.constant 0 : index
    %200 = vector.load %arg14[%c10_199, %c0_200] : memref<34x128xf32, #tpu.memory_space<vmem>>, vector<4x128xf32>
    %201 = vector.broadcast %193 : vector<1x128xf32> to vector<4x128xf32>
    %202 = arith.addf %200, %201 : vector<4x128xf32>
    %cst_201 = arith.constant 0.000000e+00 : f32
    %203 = vector.broadcast %cst_201 : f32 to vector<4x128xf32>
    %204 = arith.maximumf %202, %203 : vector<4x128xf32>
    %c13 = arith.constant 13 : index
    %c0_202 = arith.constant 0 : index
    %205 = vector.load %arg12[%c13, %c0_202] : memref<44x128xf32, #tpu.memory_space<vmem>>, vector<4x128xf32>
    tpu.vector_store %arg12[%c13, %c0_202], %204 {strides = array<i32>} : memref<44x128xf32, #tpu.memory_space<vmem>>, vector<4x128xf32>,
    %c20_203 = arith.constant 20 : index
    %c0_204 = arith.constant 0 : index
    %206 = vector.load %arg14[%c20_203, %c0_204] : memref<34x128xf32, #tpu.memory_space<vmem>>, vector<4x128xf32>
    %207 = vector.broadcast %193 : vector<1x128xf32> to vector<4x128xf32>
    %208 = arith.addf %206, %207 : vector<4x128xf32>
    %cst_205 = arith.constant 0.000000e+00 : f32
    %209 = vector.broadcast %cst_205 : f32 to vector<4x128xf32>
    %210 = arith.maximumf %208, %209 : vector<4x128xf32>
    %c19_206 = arith.constant 19 : index
    %c0_207 = arith.constant 0 : index
    %211 = vector.load %arg12[%c19_206, %c0_207] : memref<44x128xf32, #tpu.memory_space<vmem>>, vector<4x128xf32>
    tpu.vector_store %arg12[%c19_206, %c0_207], %210 {strides = array<i32>} : memref<44x128xf32, #tpu.memory_space<vmem>>, vector<4x128xf32>,
    %c30 = arith.constant 30 : index
    %c0_208 = arith.constant 0 : index
    %212 = vector.load %arg14[%c30, %c0_208] : memref<34x128xf32, #tpu.memory_space<vmem>>, vector<4x128xf32>
    %213 = vector.broadcast %193 : vector<1x128xf32> to vector<4x128xf32>
    %214 = arith.addf %212, %213 : vector<4x128xf32>
    %cst_209 = arith.constant 0.000000e+00 : f32
    %215 = vector.broadcast %cst_209 : f32 to vector<4x128xf32>
    %216 = arith.maximumf %214, %215 : vector<4x128xf32>
    %c25 = arith.constant 25 : index
    %c0_210 = arith.constant 0 : index
    %217 = vector.load %arg12[%c25, %c0_210] : memref<44x128xf32, #tpu.memory_space<vmem>>, vector<4x128xf32>
    tpu.vector_store %arg12[%c25, %c0_210], %216 {strides = array<i32>} : memref<44x128xf32, #tpu.memory_space<vmem>>, vector<4x128xf32>,
    %c0_211 = arith.constant 0 : index
    %c0_212 = arith.constant 0 : index
    %218 = vector.load %arg12[%c0_211, %c0_212] : memref<44x128xf32, #tpu.memory_space<vmem>>, vector<22x128xf32>
    %219 = arith.truncf %218 : vector<22x128xf32> to vector<22x128xbf16>
    %c0_213 = arith.constant 0 : index
    %c0_214 = arith.constant 0 : index
    %c0_215 = arith.constant 0 : index
    %220 = vector.load %arg6[%c0_213, %c0_214, %c0_215] : memref<9x128x128xbf16, #tpu.memory_space<vmem>>, vector<1x128x128xbf16>
    %221 = vector.shape_cast %220 : vector<1x128x128xbf16> to vector<128x128xbf16>
    %cst_216 = arith.constant dense<0.000000e+00> : vector<22x128xf32>
    %222 = tpu.matmul %219, %221, %cst_216 {dimension_numbers = #tpu.dot_dimension_numbers<[1], [0], [0], [1], [0, 0, 1, 1], [], []>} : vector<22x128xbf16>, vector<128x128xbf16>, vector<22x128xf32> -> vector<22x128xf32>
    %c0_217 = arith.constant 0 : index
    %c0_218 = arith.constant 0 : index
    %223 = vector.load %arg15[%c0_217, %c0_218] : memref<22x128xf32, #tpu.memory_space<vmem>>, vector<22x128xf32>
    tpu.vector_store %arg15[%c0_217, %c0_218], %222 {strides = array<i32>} : memref<22x128xf32, #tpu.memory_space<vmem>>, vector<22x128xf32>,
    %c1_219 = arith.constant 1 : index
    %c0_220 = arith.constant 0 : index
    %224 = vector.load %arg12[%c1_219, %c0_220] : memref<44x128xf32, #tpu.memory_space<vmem>>, vector<22x128xf32>
    %225 = arith.truncf %224 : vector<22x128xf32> to vector<22x128xbf16>
    %c1_221 = arith.constant 1 : index
    %c0_222 = arith.constant 0 : index
    %c0_223 = arith.constant 0 : index
    %226 = vector.load %arg6[%c1_221, %c0_222, %c0_223] : memref<9x128x128xbf16, #tpu.memory_space<vmem>>, vector<1x128x128xbf16>
    %227 = vector.shape_cast %226 : vector<1x128x128xbf16> to vector<128x128xbf16>
    %cst_224 = arith.constant dense<0.000000e+00> : vector<22x128xf32>
    %228 = tpu.matmul %225, %227, %cst_224 {dimension_numbers = #tpu.dot_dimension_numbers<[1], [0], [0], [1], [0, 0, 1, 1], [], []>} : vector<22x128xbf16>, vector<128x128xbf16>, vector<22x128xf32> -> vector<22x128xf32>
    %c0_225 = arith.constant 0 : index
    %c0_226 = arith.constant 0 : index
    %229 = vector.load %arg15[%c0_225, %c0_226] : memref<22x128xf32, #tpu.memory_space<vmem>>, vector<22x128xf32>
    %230 = arith.addf %229, %228 : vector<22x128xf32>
    %c0_227 = arith.constant 0 : index
    %c0_228 = arith.constant 0 : index
    %231 = vector.load %arg15[%c0_227, %c0_228] : memref<22x128xf32, #tpu.memory_space<vmem>>, vector<22x128xf32>
    tpu.vector_store %arg15[%c0_227, %c0_228], %230 {strides = array<i32>} : memref<22x128xf32, #tpu.memory_space<vmem>>, vector<22x128xf32>,
    %c2_229 = arith.constant 2 : index
    %c0_230 = arith.constant 0 : index
    %232 = vector.load %arg12[%c2_229, %c0_230] : memref<44x128xf32, #tpu.memory_space<vmem>>, vector<22x128xf32>
    %233 = arith.truncf %232 : vector<22x128xf32> to vector<22x128xbf16>
    %c2_231 = arith.constant 2 : index
    %c0_232 = arith.constant 0 : index
    %c0_233 = arith.constant 0 : index
    %234 = vector.load %arg6[%c2_231, %c0_232, %c0_233] : memref<9x128x128xbf16, #tpu.memory_space<vmem>>, vector<1x128x128xbf16>
    %235 = vector.shape_cast %234 : vector<1x128x128xbf16> to vector<128x128xbf16>
    %cst_234 = arith.constant dense<0.000000e+00> : vector<22x128xf32>
    %236 = tpu.matmul %233, %235, %cst_234 {dimension_numbers = #tpu.dot_dimension_numbers<[1], [0], [0], [1], [0, 0, 1, 1], [], []>} : vector<22x128xbf16>, vector<128x128xbf16>, vector<22x128xf32> -> vector<22x128xf32>
    %c0_235 = arith.constant 0 : index
    %c0_236 = arith.constant 0 : index
    %237 = vector.load %arg15[%c0_235, %c0_236] : memref<22x128xf32, #tpu.memory_space<vmem>>, vector<22x128xf32>
    %238 = arith.addf %237, %236 : vector<22x128xf32>
    %c0_237 = arith.constant 0 : index
    %c0_238 = arith.constant 0 : index
    %239 = vector.load %arg15[%c0_237, %c0_238] : memref<22x128xf32, #tpu.memory_space<vmem>>, vector<22x128xf32>
    tpu.vector_store %arg15[%c0_237, %c0_238], %238 {strides = array<i32>} : memref<22x128xf32, #tpu.memory_space<vmem>>, vector<22x128xf32>,
    %c6_239 = arith.constant 6 : index
    %c0_240 = arith.constant 0 : index
    %240 = vector.load %arg12[%c6_239, %c0_240] : memref<44x128xf32, #tpu.memory_space<vmem>>, vector<22x128xf32>
    %241 = arith.truncf %240 : vector<22x128xf32> to vector<22x128xbf16>
    %c3_241 = arith.constant 3 : index
    %c0_242 = arith.constant 0 : index
    %c0_243 = arith.constant 0 : index
    %242 = vector.load %arg6[%c3_241, %c0_242, %c0_243] : memref<9x128x128xbf16, #tpu.memory_space<vmem>>, vector<1x128x128xbf16>
    %243 = vector.shape_cast %242 : vector<1x128x128xbf16> to vector<128x128xbf16>
    %cst_244 = arith.constant dense<0.000000e+00> : vector<22x128xf32>
    %244 = tpu.matmul %241, %243, %cst_244 {dimension_numbers = #tpu.dot_dimension_numbers<[1], [0], [0], [1], [0, 0, 1, 1], [], []>} : vector<22x128xbf16>, vector<128x128xbf16>, vector<22x128xf32> -> vector<22x128xf32>
    %c0_245 = arith.constant 0 : index
    %c0_246 = arith.constant 0 : index
    %245 = vector.load %arg15[%c0_245, %c0_246] : memref<22x128xf32, #tpu.memory_space<vmem>>, vector<22x128xf32>
    %246 = arith.addf %245, %244 : vector<22x128xf32>
    %c0_247 = arith.constant 0 : index
    %c0_248 = arith.constant 0 : index
    %247 = vector.load %arg15[%c0_247, %c0_248] : memref<22x128xf32, #tpu.memory_space<vmem>>, vector<22x128xf32>
    tpu.vector_store %arg15[%c0_247, %c0_248], %246 {strides = array<i32>} : memref<22x128xf32, #tpu.memory_space<vmem>>, vector<22x128xf32>,
    %c7_249 = arith.constant 7 : index
    %c0_250 = arith.constant 0 : index
    %248 = vector.load %arg12[%c7_249, %c0_250] : memref<44x128xf32, #tpu.memory_space<vmem>>, vector<22x128xf32>
    %249 = arith.truncf %248 : vector<22x128xf32> to vector<22x128xbf16>
    %c4_251 = arith.constant 4 : index
    %c0_252 = arith.constant 0 : index
    %c0_253 = arith.constant 0 : index
    %250 = vector.load %arg6[%c4_251, %c0_252, %c0_253] : memref<9x128x128xbf16, #tpu.memory_space<vmem>>, vector<1x128x128xbf16>
    %251 = vector.shape_cast %250 : vector<1x128x128xbf16> to vector<128x128xbf16>
    %cst_254 = arith.constant dense<0.000000e+00> : vector<22x128xf32>
    %252 = tpu.matmul %249, %251, %cst_254 {dimension_numbers = #tpu.dot_dimension_numbers<[1], [0], [0], [1], [0, 0, 1, 1], [], []>} : vector<22x128xbf16>, vector<128x128xbf16>, vector<22x128xf32> -> vector<22x128xf32>
    %c0_255 = arith.constant 0 : index
    %c0_256 = arith.constant 0 : index
    %253 = vector.load %arg15[%c0_255, %c0_256] : memref<22x128xf32, #tpu.memory_space<vmem>>, vector<22x128xf32>
    %254 = arith.addf %253, %252 : vector<22x128xf32>
    %c0_257 = arith.constant 0 : index
    %c0_258 = arith.constant 0 : index
    %255 = vector.load %arg15[%c0_257, %c0_258] : memref<22x128xf32, #tpu.memory_space<vmem>>, vector<22x128xf32>
    tpu.vector_store %arg15[%c0_257, %c0_258], %254 {strides = array<i32>} : memref<22x128xf32, #tpu.memory_space<vmem>>, vector<22x128xf32>,
    %c8_259 = arith.constant 8 : index
    %c0_260 = arith.constant 0 : index
    %256 = vector.load %arg12[%c8_259, %c0_260] : memref<44x128xf32, #tpu.memory_space<vmem>>, vector<22x128xf32>
    %257 = arith.truncf %256 : vector<22x128xf32> to vector<22x128xbf16>
    %c5_261 = arith.constant 5 : index
    %c0_262 = arith.constant 0 : index
    %c0_263 = arith.constant 0 : index
    %258 = vector.load %arg6[%c5_261, %c0_262, %c0_263] : memref<9x128x128xbf16, #tpu.memory_space<vmem>>, vector<1x128x128xbf16>
    %259 = vector.shape_cast %258 : vector<1x128x128xbf16> to vector<128x128xbf16>
    %cst_264 = arith.constant dense<0.000000e+00> : vector<22x128xf32>
    %260 = tpu.matmul %257, %259, %cst_264 {dimension_numbers = #tpu.dot_dimension_numbers<[1], [0], [0], [1], [0, 0, 1, 1], [], []>} : vector<22x128xbf16>, vector<128x128xbf16>, vector<22x128xf32> -> vector<22x128xf32>
    %c0_265 = arith.constant 0 : index
    %c0_266 = arith.constant 0 : index
    %261 = vector.load %arg15[%c0_265, %c0_266] : memref<22x128xf32, #tpu.memory_space<vmem>>, vector<22x128xf32>
    %262 = arith.addf %261, %260 : vector<22x128xf32>
    %c0_267 = arith.constant 0 : index
    %c0_268 = arith.constant 0 : index
    %263 = vector.load %arg15[%c0_267, %c0_268] : memref<22x128xf32, #tpu.memory_space<vmem>>, vector<22x128xf32>
    tpu.vector_store %arg15[%c0_267, %c0_268], %262 {strides = array<i32>} : memref<22x128xf32, #tpu.memory_space<vmem>>, vector<22x128xf32>,
    %c12_269 = arith.constant 12 : index
    %c0_270 = arith.constant 0 : index
    %264 = vector.load %arg12[%c12_269, %c0_270] : memref<44x128xf32, #tpu.memory_space<vmem>>, vector<22x128xf32>
    %265 = arith.truncf %264 : vector<22x128xf32> to vector<22x128xbf16>
    %c6_271 = arith.constant 6 : index
    %c0_272 = arith.constant 0 : index
    %c0_273 = arith.constant 0 : index
    %266 = vector.load %arg6[%c6_271, %c0_272, %c0_273] : memref<9x128x128xbf16, #tpu.memory_space<vmem>>, vector<1x128x128xbf16>
    %267 = vector.shape_cast %266 : vector<1x128x128xbf16> to vector<128x128xbf16>
    %cst_274 = arith.constant dense<0.000000e+00> : vector<22x128xf32>
    %268 = tpu.matmul %265, %267, %cst_274 {dimension_numbers = #tpu.dot_dimension_numbers<[1], [0], [0], [1], [0, 0, 1, 1], [], []>} : vector<22x128xbf16>, vector<128x128xbf16>, vector<22x128xf32> -> vector<22x128xf32>
    %c0_275 = arith.constant 0 : index
    %c0_276 = arith.constant 0 : index
    %269 = vector.load %arg15[%c0_275, %c0_276] : memref<22x128xf32, #tpu.memory_space<vmem>>, vector<22x128xf32>
    %270 = arith.addf %269, %268 : vector<22x128xf32>
    %c0_277 = arith.constant 0 : index
    %c0_278 = arith.constant 0 : index
    %271 = vector.load %arg15[%c0_277, %c0_278] : memref<22x128xf32, #tpu.memory_space<vmem>>, vector<22x128xf32>
    tpu.vector_store %arg15[%c0_277, %c0_278], %270 {strides = array<i32>} : memref<22x128xf32, #tpu.memory_space<vmem>>, vector<22x128xf32>,
    %c13_279 = arith.constant 13 : index
    %c0_280 = arith.constant 0 : index
    %272 = vector.load %arg12[%c13_279, %c0_280] : memref<44x128xf32, #tpu.memory_space<vmem>>, vector<22x128xf32>
    %273 = arith.truncf %272 : vector<22x128xf32> to vector<22x128xbf16>
    %c7_281 = arith.constant 7 : index
    %c0_282 = arith.constant 0 : index
    %c0_283 = arith.constant 0 : index
    %274 = vector.load %arg6[%c7_281, %c0_282, %c0_283] : memref<9x128x128xbf16, #tpu.memory_space<vmem>>, vector<1x128x128xbf16>
    %275 = vector.shape_cast %274 : vector<1x128x128xbf16> to vector<128x128xbf16>
    %cst_284 = arith.constant dense<0.000000e+00> : vector<22x128xf32>
    %276 = tpu.matmul %273, %275, %cst_284 {dimension_numbers = #tpu.dot_dimension_numbers<[1], [0], [0], [1], [0, 0, 1, 1], [], []>} : vector<22x128xbf16>, vector<128x128xbf16>, vector<22x128xf32> -> vector<22x128xf32>
    %c0_285 = arith.constant 0 : index
    %c0_286 = arith.constant 0 : index
    %277 = vector.load %arg15[%c0_285, %c0_286] : memref<22x128xf32, #tpu.memory_space<vmem>>, vector<22x128xf32>
    %278 = arith.addf %277, %276 : vector<22x128xf32>
    %c0_287 = arith.constant 0 : index
    %c0_288 = arith.constant 0 : index
    %279 = vector.load %arg15[%c0_287, %c0_288] : memref<22x128xf32, #tpu.memory_space<vmem>>, vector<22x128xf32>
    tpu.vector_store %arg15[%c0_287, %c0_288], %278 {strides = array<i32>} : memref<22x128xf32, #tpu.memory_space<vmem>>, vector<22x128xf32>,
    %c14 = arith.constant 14 : index
    %c0_289 = arith.constant 0 : index
    %280 = vector.load %arg12[%c14, %c0_289] : memref<44x128xf32, #tpu.memory_space<vmem>>, vector<22x128xf32>
    %281 = arith.truncf %280 : vector<22x128xf32> to vector<22x128xbf16>
    %c8_290 = arith.constant 8 : index
    %c0_291 = arith.constant 0 : index
    %c0_292 = arith.constant 0 : index
    %282 = vector.load %arg6[%c8_290, %c0_291, %c0_292] : memref<9x128x128xbf16, #tpu.memory_space<vmem>>, vector<1x128x128xbf16>
    %283 = vector.shape_cast %282 : vector<1x128x128xbf16> to vector<128x128xbf16>
    %cst_293 = arith.constant dense<0.000000e+00> : vector<22x128xf32>
    %284 = tpu.matmul %281, %283, %cst_293 {dimension_numbers = #tpu.dot_dimension_numbers<[1], [0], [0], [1], [0, 0, 1, 1], [], []>} : vector<22x128xbf16>, vector<128x128xbf16>, vector<22x128xf32> -> vector<22x128xf32>
    %c0_294 = arith.constant 0 : index
    %c0_295 = arith.constant 0 : index
    %285 = vector.load %arg15[%c0_294, %c0_295] : memref<22x128xf32, #tpu.memory_space<vmem>>, vector<22x128xf32>
    %286 = arith.addf %285, %284 : vector<22x128xf32>
    %c0_296 = arith.constant 0 : index
    %c0_297 = arith.constant 0 : index
    %287 = vector.load %arg15[%c0_296, %c0_297] : memref<22x128xf32, #tpu.memory_space<vmem>>, vector<22x128xf32>
    tpu.vector_store %arg15[%c0_296, %c0_297], %286 {strides = array<i32>} : memref<22x128xf32, #tpu.memory_space<vmem>>, vector<22x128xf32>,
    %c0_298 = arith.constant 0 : index
    %c0_299 = arith.constant 0 : index
    %288 = vector.load %arg7[%c0_298, %c0_299] : memref<1x128xf32, #tpu.memory_space<vmem>>, vector<1x128xf32>
    %c0_300 = arith.constant 0 : index
    %c0_301 = arith.constant 0 : index
    %289 = vector.load %arg15[%c0_300, %c0_301] : memref<22x128xf32, #tpu.memory_space<vmem>>, vector<4x128xf32>
    %290 = vector.broadcast %288 : vector<1x128xf32> to vector<4x128xf32>
    %291 = arith.addf %289, %290 : vector<4x128xf32>
    %cst_302 = arith.constant 0.000000e+00 : f32
    %292 = vector.broadcast %cst_302 : f32 to vector<4x128xf32>
    %293 = arith.maximumf %291, %292 : vector<4x128xf32>
    %c0_303 = arith.constant 0 : index
    %c0_304 = arith.constant 0 : index
    %294 = vector.load %arg16[%c0_303, %c0_304] : memref<16x128xf32, #tpu.memory_space<vmem>>, vector<4x128xf32>
    tpu.vector_store %arg16[%c0_303, %c0_304], %293 {strides = array<i32>} : memref<16x128xf32, #tpu.memory_space<vmem>>, vector<4x128xf32>,
    %c6_305 = arith.constant 6 : index
    %c0_306 = arith.constant 0 : index
    %295 = vector.load %arg15[%c6_305, %c0_306] : memref<22x128xf32, #tpu.memory_space<vmem>>, vector<4x128xf32>
    %296 = vector.broadcast %288 : vector<1x128xf32> to vector<4x128xf32>
    %297 = arith.addf %295, %296 : vector<4x128xf32>
    %cst_307 = arith.constant 0.000000e+00 : f32
    %298 = vector.broadcast %cst_307 : f32 to vector<4x128xf32>
    %299 = arith.maximumf %297, %298 : vector<4x128xf32>
    %c4_308 = arith.constant 4 : index
    %c0_309 = arith.constant 0 : index
    %300 = vector.load %arg16[%c4_308, %c0_309] : memref<16x128xf32, #tpu.memory_space<vmem>>, vector<4x128xf32>
    tpu.vector_store %arg16[%c4_308, %c0_309], %299 {strides = array<i32>} : memref<16x128xf32, #tpu.memory_space<vmem>>, vector<4x128xf32>,
    %c12_310 = arith.constant 12 : index
    %c0_311 = arith.constant 0 : index
    %301 = vector.load %arg15[%c12_310, %c0_311] : memref<22x128xf32, #tpu.memory_space<vmem>>, vector<4x128xf32>
    %302 = vector.broadcast %288 : vector<1x128xf32> to vector<4x128xf32>
    %303 = arith.addf %301, %302 : vector<4x128xf32>
    %cst_312 = arith.constant 0.000000e+00 : f32
    %304 = vector.broadcast %cst_312 : f32 to vector<4x128xf32>
    %305 = arith.maximumf %303, %304 : vector<4x128xf32>
    %c8_313 = arith.constant 8 : index
    %c0_314 = arith.constant 0 : index
    %306 = vector.load %arg16[%c8_313, %c0_314] : memref<16x128xf32, #tpu.memory_space<vmem>>, vector<4x128xf32>
    tpu.vector_store %arg16[%c8_313, %c0_314], %305 {strides = array<i32>} : memref<16x128xf32, #tpu.memory_space<vmem>>, vector<4x128xf32>,
    %c18_315 = arith.constant 18 : index
    %c0_316 = arith.constant 0 : index
    %307 = vector.load %arg15[%c18_315, %c0_316] : memref<22x128xf32, #tpu.memory_space<vmem>>, vector<4x128xf32>
    %308 = vector.broadcast %288 : vector<1x128xf32> to vector<4x128xf32>
    %309 = arith.addf %307, %308 : vector<4x128xf32>
    %cst_317 = arith.constant 0.000000e+00 : f32
    %310 = vector.broadcast %cst_317 : f32 to vector<4x128xf32>
    %311 = arith.maximumf %309, %310 : vector<4x128xf32>
    %c12_318 = arith.constant 12 : index
    %c0_319 = arith.constant 0 : index
    %312 = vector.load %arg16[%c12_318, %c0_319] : memref<16x128xf32, #tpu.memory_space<vmem>>, vector<4x128xf32>
    tpu.vector_store %arg16[%c12_318, %c0_319], %311 {strides = array<i32>} : memref<16x128xf32, #tpu.memory_space<vmem>>, vector<4x128xf32>,
    %c0_320 = arith.constant 0 : index
    %c0_321 = arith.constant 0 : index
    %313 = vector.load %arg9[%c0_320, %c0_321] : memref<1x512xf32, #tpu.memory_space<vmem>>, vector<1x512xf32>
    %c0_322 = arith.constant 0 : index
    %c0_323 = arith.constant 0 : index
    %314 = vector.load %arg16[%c0_322, %c0_323] : memref<16x128xf32, #tpu.memory_space<vmem>>, vector<1x128xf32>
    %315 = arith.truncf %314 : vector<1x128xf32> to vector<1x128xbf16>
    %c0_324 = arith.constant 0 : index
    %c0_325 = arith.constant 0 : index
    %c0_326 = arith.constant 0 : index
    %316 = vector.load %arg8[%c0_324, %c0_325, %c0_326] : memref<16x128x512xbf16, #tpu.memory_space<vmem>>, vector<1x128x512xbf16>
    %317 = vector.shape_cast %316 : vector<1x128x512xbf16> to vector<128x512xbf16>
    %cst_327 = arith.constant dense<0.000000e+00> : vector<1x512xf32>
    %318 = tpu.matmul %315, %317, %cst_327 {dimension_numbers = #tpu.dot_dimension_numbers<[1], [0], [0], [1], [0, 0, 1, 1], [], []>} : vector<1x128xbf16>, vector<128x512xbf16>, vector<1x512xf32> -> vector<1x512xf32>
    %319 = arith.addf %313, %318 : vector<1x512xf32>
    %c1_328 = arith.constant 1 : index
    %c0_329 = arith.constant 0 : index
    %320 = vector.load %arg16[%c1_328, %c0_329] : memref<16x128xf32, #tpu.memory_space<vmem>>, vector<1x128xf32>
    %321 = arith.truncf %320 : vector<1x128xf32> to vector<1x128xbf16>
    %c1_330 = arith.constant 1 : index
    %c0_331 = arith.constant 0 : index
    %c0_332 = arith.constant 0 : index
    %322 = vector.load %arg8[%c1_330, %c0_331, %c0_332] : memref<16x128x512xbf16, #tpu.memory_space<vmem>>, vector<1x128x512xbf16>
    %323 = vector.shape_cast %322 : vector<1x128x512xbf16> to vector<128x512xbf16>
    %cst_333 = arith.constant dense<0.000000e+00> : vector<1x512xf32>
    %324 = tpu.matmul %321, %323, %cst_333 {dimension_numbers = #tpu.dot_dimension_numbers<[1], [0], [0], [1], [0, 0, 1, 1], [], []>} : vector<1x128xbf16>, vector<128x512xbf16>, vector<1x512xf32> -> vector<1x512xf32>
    %325 = arith.addf %319, %324 : vector<1x512xf32>
    %c2_334 = arith.constant 2 : index
    %c0_335 = arith.constant 0 : index
    %326 = vector.load %arg16[%c2_334, %c0_335] : memref<16x128xf32, #tpu.memory_space<vmem>>, vector<1x128xf32>
    %327 = arith.truncf %326 : vector<1x128xf32> to vector<1x128xbf16>
    %c2_336 = arith.constant 2 : index
    %c0_337 = arith.constant 0 : index
    %c0_338 = arith.constant 0 : index
    %328 = vector.load %arg8[%c2_336, %c0_337, %c0_338] : memref<16x128x512xbf16, #tpu.memory_space<vmem>>, vector<1x128x512xbf16>
    %329 = vector.shape_cast %328 : vector<1x128x512xbf16> to vector<128x512xbf16>
    %cst_339 = arith.constant dense<0.000000e+00> : vector<1x512xf32>
    %330 = tpu.matmul %327, %329, %cst_339 {dimension_numbers = #tpu.dot_dimension_numbers<[1], [0], [0], [1], [0, 0, 1, 1], [], []>} : vector<1x128xbf16>, vector<128x512xbf16>, vector<1x512xf32> -> vector<1x512xf32>
    %331 = arith.addf %325, %330 : vector<1x512xf32>
    %c3_340 = arith.constant 3 : index
    %c0_341 = arith.constant 0 : index
    %332 = vector.load %arg16[%c3_340, %c0_341] : memref<16x128xf32, #tpu.memory_space<vmem>>, vector<1x128xf32>
    %333 = arith.truncf %332 : vector<1x128xf32> to vector<1x128xbf16>
    %c3_342 = arith.constant 3 : index
    %c0_343 = arith.constant 0 : index
    %c0_344 = arith.constant 0 : index
    %334 = vector.load %arg8[%c3_342, %c0_343, %c0_344] : memref<16x128x512xbf16, #tpu.memory_space<vmem>>, vector<1x128x512xbf16>
    %335 = vector.shape_cast %334 : vector<1x128x512xbf16> to vector<128x512xbf16>
    %cst_345 = arith.constant dense<0.000000e+00> : vector<1x512xf32>
    %336 = tpu.matmul %333, %335, %cst_345 {dimension_numbers = #tpu.dot_dimension_numbers<[1], [0], [0], [1], [0, 0, 1, 1], [], []>} : vector<1x128xbf16>, vector<128x512xbf16>, vector<1x512xf32> -> vector<1x512xf32>
    %337 = arith.addf %331, %336 : vector<1x512xf32>
    %c4_346 = arith.constant 4 : index
    %c0_347 = arith.constant 0 : index
    %338 = vector.load %arg16[%c4_346, %c0_347] : memref<16x128xf32, #tpu.memory_space<vmem>>, vector<1x128xf32>
    %339 = arith.truncf %338 : vector<1x128xf32> to vector<1x128xbf16>
    %c4_348 = arith.constant 4 : index
    %c0_349 = arith.constant 0 : index
    %c0_350 = arith.constant 0 : index
    %340 = vector.load %arg8[%c4_348, %c0_349, %c0_350] : memref<16x128x512xbf16, #tpu.memory_space<vmem>>, vector<1x128x512xbf16>
    %341 = vector.shape_cast %340 : vector<1x128x512xbf16> to vector<128x512xbf16>
    %cst_351 = arith.constant dense<0.000000e+00> : vector<1x512xf32>
    %342 = tpu.matmul %339, %341, %cst_351 {dimension_numbers = #tpu.dot_dimension_numbers<[1], [0], [0], [1], [0, 0, 1, 1], [], []>} : vector<1x128xbf16>, vector<128x512xbf16>, vector<1x512xf32> -> vector<1x512xf32>
    %343 = arith.addf %337, %342 : vector<1x512xf32>
    %c5_352 = arith.constant 5 : index
    %c0_353 = arith.constant 0 : index
    %344 = vector.load %arg16[%c5_352, %c0_353] : memref<16x128xf32, #tpu.memory_space<vmem>>, vector<1x128xf32>
    %345 = arith.truncf %344 : vector<1x128xf32> to vector<1x128xbf16>
    %c5_354 = arith.constant 5 : index
    %c0_355 = arith.constant 0 : index
    %c0_356 = arith.constant 0 : index
    %346 = vector.load %arg8[%c5_354, %c0_355, %c0_356] : memref<16x128x512xbf16, #tpu.memory_space<vmem>>, vector<1x128x512xbf16>
    %347 = vector.shape_cast %346 : vector<1x128x512xbf16> to vector<128x512xbf16>
    %cst_357 = arith.constant dense<0.000000e+00> : vector<1x512xf32>
    %348 = tpu.matmul %345, %347, %cst_357 {dimension_numbers = #tpu.dot_dimension_numbers<[1], [0], [0], [1], [0, 0, 1, 1], [], []>} : vector<1x128xbf16>, vector<128x512xbf16>, vector<1x512xf32> -> vector<1x512xf32>
    %349 = arith.addf %343, %348 : vector<1x512xf32>
    %c6_358 = arith.constant 6 : index
    %c0_359 = arith.constant 0 : index
    %350 = vector.load %arg16[%c6_358, %c0_359] : memref<16x128xf32, #tpu.memory_space<vmem>>, vector<1x128xf32>
    %351 = arith.truncf %350 : vector<1x128xf32> to vector<1x128xbf16>
    %c6_360 = arith.constant 6 : index
    %c0_361 = arith.constant 0 : index
    %c0_362 = arith.constant 0 : index
    %352 = vector.load %arg8[%c6_360, %c0_361, %c0_362] : memref<16x128x512xbf16, #tpu.memory_space<vmem>>, vector<1x128x512xbf16>
    %353 = vector.shape_cast %352 : vector<1x128x512xbf16> to vector<128x512xbf16>
    %cst_363 = arith.constant dense<0.000000e+00> : vector<1x512xf32>
    %354 = tpu.matmul %351, %353, %cst_363 {dimension_numbers = #tpu.dot_dimension_numbers<[1], [0], [0], [1], [0, 0, 1, 1], [], []>} : vector<1x128xbf16>, vector<128x512xbf16>, vector<1x512xf32> -> vector<1x512xf32>
    %355 = arith.addf %349, %354 : vector<1x512xf32>
    %c7_364 = arith.constant 7 : index
    %c0_365 = arith.constant 0 : index
    %356 = vector.load %arg16[%c7_364, %c0_365] : memref<16x128xf32, #tpu.memory_space<vmem>>, vector<1x128xf32>
    %357 = arith.truncf %356 : vector<1x128xf32> to vector<1x128xbf16>
    %c7_366 = arith.constant 7 : index
    %c0_367 = arith.constant 0 : index
    %c0_368 = arith.constant 0 : index
    %358 = vector.load %arg8[%c7_366, %c0_367, %c0_368] : memref<16x128x512xbf16, #tpu.memory_space<vmem>>, vector<1x128x512xbf16>
    %359 = vector.shape_cast %358 : vector<1x128x512xbf16> to vector<128x512xbf16>
    %cst_369 = arith.constant dense<0.000000e+00> : vector<1x512xf32>
    %360 = tpu.matmul %357, %359, %cst_369 {dimension_numbers = #tpu.dot_dimension_numbers<[1], [0], [0], [1], [0, 0, 1, 1], [], []>} : vector<1x128xbf16>, vector<128x512xbf16>, vector<1x512xf32> -> vector<1x512xf32>
    %361 = arith.addf %355, %360 : vector<1x512xf32>
    %c8_370 = arith.constant 8 : index
    %c0_371 = arith.constant 0 : index
    %362 = vector.load %arg16[%c8_370, %c0_371] : memref<16x128xf32, #tpu.memory_space<vmem>>, vector<1x128xf32>
    %363 = arith.truncf %362 : vector<1x128xf32> to vector<1x128xbf16>
    %c8_372 = arith.constant 8 : index
    %c0_373 = arith.constant 0 : index
    %c0_374 = arith.constant 0 : index
    %364 = vector.load %arg8[%c8_372, %c0_373, %c0_374] : memref<16x128x512xbf16, #tpu.memory_space<vmem>>, vector<1x128x512xbf16>
    %365 = vector.shape_cast %364 : vector<1x128x512xbf16> to vector<128x512xbf16>
    %cst_375 = arith.constant dense<0.000000e+00> : vector<1x512xf32>
    %366 = tpu.matmul %363, %365, %cst_375 {dimension_numbers = #tpu.dot_dimension_numbers<[1], [0], [0], [1], [0, 0, 1, 1], [], []>} : vector<1x128xbf16>, vector<128x512xbf16>, vector<1x512xf32> -> vector<1x512xf32>
    %367 = arith.addf %361, %366 : vector<1x512xf32>
    %c9 = arith.constant 9 : index
    %c0_376 = arith.constant 0 : index
    %368 = vector.load %arg16[%c9, %c0_376] : memref<16x128xf32, #tpu.memory_space<vmem>>, vector<1x128xf32>
    %369 = arith.truncf %368 : vector<1x128xf32> to vector<1x128xbf16>
    %c9_377 = arith.constant 9 : index
    %c0_378 = arith.constant 0 : index
    %c0_379 = arith.constant 0 : index
    %370 = vector.load %arg8[%c9_377, %c0_378, %c0_379] : memref<16x128x512xbf16, #tpu.memory_space<vmem>>, vector<1x128x512xbf16>
    %371 = vector.shape_cast %370 : vector<1x128x512xbf16> to vector<128x512xbf16>
    %cst_380 = arith.constant dense<0.000000e+00> : vector<1x512xf32>
    %372 = tpu.matmul %369, %371, %cst_380 {dimension_numbers = #tpu.dot_dimension_numbers<[1], [0], [0], [1], [0, 0, 1, 1], [], []>} : vector<1x128xbf16>, vector<128x512xbf16>, vector<1x512xf32> -> vector<1x512xf32>
    %373 = arith.addf %367, %372 : vector<1x512xf32>
    %c10_381 = arith.constant 10 : index
    %c0_382 = arith.constant 0 : index
    %374 = vector.load %arg16[%c10_381, %c0_382] : memref<16x128xf32, #tpu.memory_space<vmem>>, vector<1x128xf32>
    %375 = arith.truncf %374 : vector<1x128xf32> to vector<1x128xbf16>
    %c10_383 = arith.constant 10 : index
    %c0_384 = arith.constant 0 : index
    %c0_385 = arith.constant 0 : index
    %376 = vector.load %arg8[%c10_383, %c0_384, %c0_385] : memref<16x128x512xbf16, #tpu.memory_space<vmem>>, vector<1x128x512xbf16>
    %377 = vector.shape_cast %376 : vector<1x128x512xbf16> to vector<128x512xbf16>
    %cst_386 = arith.constant dense<0.000000e+00> : vector<1x512xf32>
    %378 = tpu.matmul %375, %377, %cst_386 {dimension_numbers = #tpu.dot_dimension_numbers<[1], [0], [0], [1], [0, 0, 1, 1], [], []>} : vector<1x128xbf16>, vector<128x512xbf16>, vector<1x512xf32> -> vector<1x512xf32>
    %379 = arith.addf %373, %378 : vector<1x512xf32>
    %c11_387 = arith.constant 11 : index
    %c0_388 = arith.constant 0 : index
    %380 = vector.load %arg16[%c11_387, %c0_388] : memref<16x128xf32, #tpu.memory_space<vmem>>, vector<1x128xf32>
    %381 = arith.truncf %380 : vector<1x128xf32> to vector<1x128xbf16>
    %c11_389 = arith.constant 11 : index
    %c0_390 = arith.constant 0 : index
    %c0_391 = arith.constant 0 : index
    %382 = vector.load %arg8[%c11_389, %c0_390, %c0_391] : memref<16x128x512xbf16, #tpu.memory_space<vmem>>, vector<1x128x512xbf16>
    %383 = vector.shape_cast %382 : vector<1x128x512xbf16> to vector<128x512xbf16>
    %cst_392 = arith.constant dense<0.000000e+00> : vector<1x512xf32>
    %384 = tpu.matmul %381, %383, %cst_392 {dimension_numbers = #tpu.dot_dimension_numbers<[1], [0], [0], [1], [0, 0, 1, 1], [], []>} : vector<1x128xbf16>, vector<128x512xbf16>, vector<1x512xf32> -> vector<1x512xf32>
    %385 = arith.addf %379, %384 : vector<1x512xf32>
    %c12_393 = arith.constant 12 : index
    %c0_394 = arith.constant 0 : index
    %386 = vector.load %arg16[%c12_393, %c0_394] : memref<16x128xf32, #tpu.memory_space<vmem>>, vector<1x128xf32>
    %387 = arith.truncf %386 : vector<1x128xf32> to vector<1x128xbf16>
    %c12_395 = arith.constant 12 : index
    %c0_396 = arith.constant 0 : index
    %c0_397 = arith.constant 0 : index
    %388 = vector.load %arg8[%c12_395, %c0_396, %c0_397] : memref<16x128x512xbf16, #tpu.memory_space<vmem>>, vector<1x128x512xbf16>
    %389 = vector.shape_cast %388 : vector<1x128x512xbf16> to vector<128x512xbf16>
    %cst_398 = arith.constant dense<0.000000e+00> : vector<1x512xf32>
    %390 = tpu.matmul %387, %389, %cst_398 {dimension_numbers = #tpu.dot_dimension_numbers<[1], [0], [0], [1], [0, 0, 1, 1], [], []>} : vector<1x128xbf16>, vector<128x512xbf16>, vector<1x512xf32> -> vector<1x512xf32>
    %391 = arith.addf %385, %390 : vector<1x512xf32>
    %c13_399 = arith.constant 13 : index
    %c0_400 = arith.constant 0 : index
    %392 = vector.load %arg16[%c13_399, %c0_400] : memref<16x128xf32, #tpu.memory_space<vmem>>, vector<1x128xf32>
    %393 = arith.truncf %392 : vector<1x128xf32> to vector<1x128xbf16>
    %c13_401 = arith.constant 13 : index
    %c0_402 = arith.constant 0 : index
    %c0_403 = arith.constant 0 : index
    %394 = vector.load %arg8[%c13_401, %c0_402, %c0_403] : memref<16x128x512xbf16, #tpu.memory_space<vmem>>, vector<1x128x512xbf16>
    %395 = vector.shape_cast %394 : vector<1x128x512xbf16> to vector<128x512xbf16>
    %cst_404 = arith.constant dense<0.000000e+00> : vector<1x512xf32>
    %396 = tpu.matmul %393, %395, %cst_404 {dimension_numbers = #tpu.dot_dimension_numbers<[1], [0], [0], [1], [0, 0, 1, 1], [], []>} : vector<1x128xbf16>, vector<128x512xbf16>, vector<1x512xf32> -> vector<1x512xf32>
    %397 = arith.addf %391, %396 : vector<1x512xf32>
    %c14_405 = arith.constant 14 : index
    %c0_406 = arith.constant 0 : index
    %398 = vector.load %arg16[%c14_405, %c0_406] : memref<16x128xf32, #tpu.memory_space<vmem>>, vector<1x128xf32>
    %399 = arith.truncf %398 : vector<1x128xf32> to vector<1x128xbf16>
    %c14_407 = arith.constant 14 : index
    %c0_408 = arith.constant 0 : index
    %c0_409 = arith.constant 0 : index
    %400 = vector.load %arg8[%c14_407, %c0_408, %c0_409] : memref<16x128x512xbf16, #tpu.memory_space<vmem>>, vector<1x128x512xbf16>
    %401 = vector.shape_cast %400 : vector<1x128x512xbf16> to vector<128x512xbf16>
    %cst_410 = arith.constant dense<0.000000e+00> : vector<1x512xf32>
    %402 = tpu.matmul %399, %401, %cst_410 {dimension_numbers = #tpu.dot_dimension_numbers<[1], [0], [0], [1], [0, 0, 1, 1], [], []>} : vector<1x128xbf16>, vector<128x512xbf16>, vector<1x512xf32> -> vector<1x512xf32>
    %403 = arith.addf %397, %402 : vector<1x512xf32>
    %c15 = arith.constant 15 : index
    %c0_411 = arith.constant 0 : index
    %404 = vector.load %arg16[%c15, %c0_411] : memref<16x128xf32, #tpu.memory_space<vmem>>, vector<1x128xf32>
    %405 = arith.truncf %404 : vector<1x128xf32> to vector<1x128xbf16>
    %c15_412 = arith.constant 15 : index
    %c0_413 = arith.constant 0 : index
    %c0_414 = arith.constant 0 : index
    %406 = vector.load %arg8[%c15_412, %c0_413, %c0_414] : memref<16x128x512xbf16, #tpu.memory_space<vmem>>, vector<1x128x512xbf16>
    %407 = vector.shape_cast %406 : vector<1x128x512xbf16> to vector<128x512xbf16>
    %cst_415 = arith.constant dense<0.000000e+00> : vector<1x512xf32>
    %408 = tpu.matmul %405, %407, %cst_415 {dimension_numbers = #tpu.dot_dimension_numbers<[1], [0], [0], [1], [0, 0, 1, 1], [], []>} : vector<1x128xbf16>, vector<128x512xbf16>, vector<1x512xf32> -> vector<1x512xf32>
    %409 = arith.addf %403, %408 : vector<1x512xf32>
    %410 = vector.shape_cast %409 : vector<1x512xf32> to vector<1x1x512xf32>
    %c0_416 = arith.constant 0 : index
    %c0_417 = arith.constant 0 : index
    %c0_418 = arith.constant 0 : index
    %411 = vector.load %arg10[%c0_416, %c0_417, %c0_418] : memref<1x1x512xf32, #tpu.memory_space<vmem>>, vector<1x1x512xf32>
    tpu.vector_store %arg10[%c0_416, %c0_417, %c0_418], %410 {strides = array<i32>} : memref<1x1x512xf32, #tpu.memory_space<vmem>>, vector<1x1x512xf32>,
    return
  }
  func.func @transform_0(%arg0: i32) -> (i32, i32) {
    %c0_i32 = arith.constant 0 : i32
    %c0_i32_0 = arith.constant 0 : i32
    return %arg0, %c0_i32 : i32, i32
  }
  func.func @transform_1(%arg0: i32) -> (i32, i32, i32) {
    %c0_i32 = arith.constant 0 : i32
    %c0_i32_0 = arith.constant 0 : i32
    %c0_i32_1 = arith.constant 0 : i32
    %c0_i32_2 = arith.constant 0 : i32
    return %c0_i32, %c0_i32_0, %c0_i32_1 : i32, i32, i32
  }
  func.func @transform_2(%arg0: i32) -> (i32, i32) {
    %c0_i32 = arith.constant 0 : i32
    %c0_i32_0 = arith.constant 0 : i32
    %c0_i32_1 = arith.constant 0 : i32
    return %c0_i32, %c0_i32_0 : i32, i32
  }
  func.func @transform_3(%arg0: i32) -> (i32, i32, i32) {
    %c0_i32 = arith.constant 0 : i32
    %c0_i32_0 = arith.constant 0 : i32
    %c0_i32_1 = arith.constant 0 : i32
    %c0_i32_2 = arith.constant 0 : i32
    return %c0_i32, %c0_i32_0, %c0_i32_1 : i32, i32, i32
  }
  func.func @transform_4(%arg0: i32) -> (i32, i32) {
    %c0_i32 = arith.constant 0 : i32
    %c0_i32_0 = arith.constant 0 : i32
    %c0_i32_1 = arith.constant 0 : i32
    return %c0_i32, %c0_i32_0 : i32, i32
  }
  func.func @transform_5(%arg0: i32) -> (i32, i32, i32) {
    %c0_i32 = arith.constant 0 : i32
    %c0_i32_0 = arith.constant 0 : i32
    %c0_i32_1 = arith.constant 0 : i32
    %c0_i32_2 = arith.constant 0 : i32
    return %c0_i32, %c0_i32_0, %c0_i32_1 : i32, i32, i32
  }
  func.func @transform_6(%arg0: i32) -> (i32, i32) {
    %c0_i32 = arith.constant 0 : i32
    %c0_i32_0 = arith.constant 0 : i32
    %c0_i32_1 = arith.constant 0 : i32
    return %c0_i32, %c0_i32_0 : i32, i32
  }
  func.func @transform_7(%arg0: i32) -> (i32, i32, i32) {
    %c0_i32 = arith.constant 0 : i32
    %c0_i32_0 = arith.constant 0 : i32
    %c0_i32_1 = arith.constant 0 : i32
    %c0_i32_2 = arith.constant 0 : i32
    return %c0_i32, %c0_i32_0, %c0_i32_1 : i32, i32, i32
  }
  func.func @transform_8(%arg0: i32) -> (i32, i32) {
    %c0_i32 = arith.constant 0 : i32
    %c0_i32_0 = arith.constant 0 : i32
    %c0_i32_1 = arith.constant 0 : i32
    return %c0_i32, %c0_i32_0 : i32, i32
  }
  func.func @transform_9(%arg0: i32) -> (i32, i32, i32) {
    %c0_i32 = arith.constant 0 : i32
    %c0_i32_0 = arith.constant 0 : i32
    %c0_i32_1 = arith.constant 0 : i32
    return %arg0, %c0_i32, %c0_i32_0 : i32, i32, i32
  }
}

</mosaic_0001>

<bundles_post_ra>
// kernel: encoder_forward.1
= control target key start
LH: loop header
LB: loop body
LE: loop exit
PB: predicated region body
PF: predicated region fallthrough
CT: control target
= control target key end

     0   :  { %14 = vsyncpa [#allocation9], 0  ;;  %s14743_s0 = inlined_call_operand.vmem [shape: f32[656,8], index: 0, kind: input, shape index: {}]   ;;  %s14744_s1 = inlined_call_operand.hbm [shape: bf16[9,8,128], index: 1, kind: input, shape index: {}]   ;;  %s14745_s2 = inlined_call_operand.hbm [shape: f32[1,128], index: 2, kind: input, shape index: {}]   ;;  %s14746_s3 = inlined_call_operand.hbm [shape: bf16[9,128,128], index: 3, kind: input, shape index: {}]   ;;  %s14747_s4 = inlined_call_operand.hbm [shape: f32[1,128], index: 4, kind: input, shape index: {}]   ;;  %s14748_s5 = inlined_call_operand.hbm [shape: bf16[9,128,128], index: 5, kind: input, shape index: {}]   ;;  %s14749_s6 = inlined_call_operand.hbm [shape: f32[1,128], index: 6, kind: input, shape index: {}]   ;;  %s14750_s7 = inlined_call_operand.hbm [shape: bf16[16,128,512], index: 7, kind: input, shape index: {}]   ;;  %s14751_s8 = inlined_call_operand.hbm [shape: f32[1,512], index: 8, kind: input, shape index: {}]   ;;  %s14752_s9 = inlined_call_operand.vmem [shape: f32[2,1,512], index: 9, kind: output, shape index: {}]  }
   0x1   :  { %15 = vsyncpa [#allocation11], 0 }
   0x2   :  { %16 = vsyncpa [#allocation14], 0 }
   0x3   :  { %17 = vsyncpa [#allocation17], 0 }
   0x4   :  { %18 = vsyncpa [#allocation20], 0  ;;  %s13622_s30 = smov 0  }
   0x5 LB: > { %s13556_s10 = smov [#allocation10]   ;;  %s13628_s12 = sadd.s32 4294967295, %s13554_s30   ;;  %s13554_s30 = sphi %s13622_s30, %s24_s30  }
   0x6   : > { %s275_s11 = sshll.u32 %s13556_s10, 4  ;;  %p10068_p0 = scmp.ge.s32.totalorder %s13554_s30, 1  ;;  %s13633_s11 = int_to_ptr.vmem [resolvable:$true] %s275_s11 }
   0x7   : > { %p249_p1 = scmp.lt.s32.totalorder %s13554_s30, 3  ;;  %p14753_p2 = scmp.eq.s32.totalorder %s13628_s12, 0 }
   0x8   : > { %s13557_s14 = smov [#allocation13]   ;;  %s13558_s16 = smov [#allocation16]  }
   0x9   : > { %p13635_p3 = pnand %p10068_p0, %p249_p1  ;;  %s299_s15 = sshll.u32 %s13557_s14, 4  ;;  %s13641_s15 = int_to_ptr.vmem [resolvable:$true] %s299_s15 }
   0xa   : > { %s323_s17 = sshll.u32 %s13558_s16, 4  ;;  %s13559_s19 = smov [#allocation8]   ;;  %s13649_s17 = int_to_ptr.vmem [resolvable:$true] %s323_s17 }
   0xb   : > { %s14755_s13 = scalar_select %p13635_p3, 1, 0 }
   0xc   : > { %p12324_p4 = pneg %p13635_p3  ;;  %s261_s20 = sshll.u32 %s13559_s19, 4  ;;  %s13651_s20 = int_to_ptr.vmem [resolvable:$true] %s261_s20 }
   0xd   : > { %s13304_s23 = scalar_lea.hbm %s14745_s2, 16 }
   0xe   : > { %p13645_p5 = pnand %p14753_p2, %p12324_p4  ;;  %p13305_p6 = scmp.ne.s32.totalorder %s14745_s2, %s13304_s23 }
   0xf   : > { %p13311_p10 = scmp.lt.u32.totalorder %s13304_s23, %s14745_s2 }
  0x10   : > { %p13661_p7 = pneg %p13645_p5 }
  0x12   : > { %p13307_p8 = pnand %p13661_p7, %p13305_p6 }
  0x14   : > { %p13308_p9 = pneg %p13307_p8 }
  0x16   : > { %p13313_p11 = pnand %p13311_p10, %p13308_p9 }
  0x18   : > { %13316 = shalt.err (!%p13313_p11)
}
  0x19   : > { %s13317_s29 = scalar_lea.vmem %s13633_s11, 16  ;;  %s13324_s10 = scalar_lea.vmem %s13633_s11, 32 }
  0x1a   : > { %p13318_p12 = scmp.ne.s32.totalorder %s13633_s11, %s13317_s29  ;;  %p13325_p1 = scmp.lt.s32.totalorder %s13633_s11, %s13633_s11 }
  0x1b   : > { %p13326_p4 = scmp.lt.s32.totalorder %s13324_s10, %s13317_s29 }
  0x1c   : > { %p13320_p13 = pnand %p13318_p12, %p13661_p7 }
  0x1d   : > { %p13327_p6 = por %p13326_p4, %p13325_p1 }
  0x1e   : > { %p13321_p0 = pneg %p13320_p13 }
  0x20   : > { %p13328_p8 = pnand %p13327_p6, %p13321_p0 }
  0x22   : > { %13331 = shalt.err (!%p13328_p8)
}
  0x23   : > { %12330 = dma.hbm_to_vmem [thread:$0]  (!%p13645_p5), %s14745_s2, 16, %s13633_s11, [#allocation11]  }
  0x24   : > { %s13332_s22 = scalar_lea.hbm %s14747_s4, 16 }
  0x25   : > { %p13333_p9 = scmp.ne.s32.totalorder %s14747_s4, %s13332_s22  ;;  %p13339_p12 = scmp.lt.u32.totalorder %s13332_s22, %s14747_s4 }
  0x27   : > { %p13335_p10 = pnand %p13333_p9, %p13661_p7 }
  0x29   : > { %p13336_p11 = pneg %p13335_p10 }
  0x2b   : > { %p13341_p13 = pnand %p13339_p12, %p13336_p11 }
  0x2d   : > { %13344 = shalt.err (!%p13341_p13)
}
  0x2e   : > { %s13345_s11 = scalar_lea.vmem %s13641_s15, 16  ;;  %s13352_s28 = scalar_lea.vmem %s13641_s15, 32 }
  0x2f   : > { %p13346_p0 = scmp.ne.s32.totalorder %s13641_s15, %s13345_s11  ;;  %p13353_p6 = scmp.lt.s32.totalorder %s13641_s15, %s13641_s15 }
  0x30   : > { %p13354_p8 = scmp.lt.s32.totalorder %s13352_s28, %s13345_s11 }
  0x31   : > { %p13348_p1 = pnand %p13346_p0, %p13661_p7 }
  0x32   : > { %p13355_p9 = por %p13354_p8, %p13353_p6 }
  0x33   : > { %p13349_p4 = pneg %p13348_p1 }
  0x35   : > { %p13356_p10 = pnand %p13355_p9, %p13349_p4 }
  0x37   : > { %13359 = shalt.err (!%p13356_p10)
}
  0x38   : > { %12336 = dma.hbm_to_vmem [thread:$0]  (!%p13645_p5), %s14747_s4, 16, %s13641_s15, [#allocation14]  }
  0x39   : > { %s13360_s19 = scalar_lea.hbm %s14749_s6, 16 }
  0x3a   : > { %p13361_p11 = scmp.ne.s32.totalorder %s14749_s6, %s13360_s19  ;;  %p13367_p0 = scmp.lt.u32.totalorder %s13360_s19, %s14749_s6 }
  0x3c   : > { %p13363_p12 = pnand %p13361_p11, %p13661_p7 }
  0x3e   : > { %p13364_p13 = pneg %p13363_p12 }
  0x40   : > { %p13369_p1 = pnand %p13367_p0, %p13364_p13 }
  0x42   : > { %13372 = shalt.err (!%p13369_p1)
}
  0x43   : > { %s13373_s15 = scalar_lea.vmem %s13649_s17, 16  ;;  %s13380_s25 = scalar_lea.vmem %s13649_s17, 32 }
  0x44   : > { %p13374_p4 = scmp.ne.s32.totalorder %s13649_s17, %s13373_s15  ;;  %p13381_p9 = scmp.lt.s32.totalorder %s13649_s17, %s13649_s17 }
  0x45   : > { %p13382_p10 = scmp.lt.s32.totalorder %s13380_s25, %s13373_s15 }
  0x46   : > { %p13376_p6 = pnand %p13374_p4, %p13661_p7 }
  0x47   : > { %p13383_p11 = por %p13382_p10, %p13381_p9 }
  0x48   : > { %p13377_p8 = pneg %p13376_p6 }
  0x4a   : > { %p13384_p12 = pnand %p13383_p11, %p13377_p8 }
  0x4c   : > { %13387 = shalt.err (!%p13384_p12)
}
  0x4d   : > { %12342 = dma.hbm_to_vmem [thread:$0]  (!%p13645_p5), %s14749_s6, 16, %s13649_s17, [#allocation17]  }
  0x4e   : > { %s13388_s10 = scalar_lea.hbm %s14744_s1, 576 }
  0x4f   : > { %p13389_p13 = scmp.ne.s32.totalorder %s14744_s1, %s13388_s10  ;;  %p13395_p4 = scmp.lt.u32.totalorder %s13388_s10, %s14744_s1 }
  0x51   : > { %p13391_p0 = pnand %p13389_p13, %p13661_p7 }
  0x53   : > { %p13392_p1 = pneg %p13391_p0 }
  0x55   : > { %p13397_p6 = pnand %p13395_p4, %p13392_p1 }
  0x57   : > { %13400 = shalt.err (!%p13397_p6)
}
  0x58   : > { %s13401_s17 = scalar_lea.vmem %s13651_s20, 576  ;;  %p13409_p11 = scmp.lt.s32.totalorder %s13651_s20, %s13651_s20 }
  0x59   : > { %p13402_p8 = scmp.ne.s32.totalorder %s13651_s20, %s13401_s17  ;;  %p13410_p12 = scmp.lt.s32.totalorder %s13401_s17, %s13401_s17 }
  0x5b   : > { %p13404_p9 = pnand %p13402_p8, %p13661_p7  ;;  %p13411_p13 = por %p13410_p12, %p13409_p11 }
  0x5d   : > { %p13405_p10 = pneg %p13404_p9 }
  0x5f   : > { %p13412_p0 = pnand %p13411_p13, %p13405_p10 }
  0x61   : > { %13415 = shalt.err (!%p13412_p0)
}
  0x62   : > { %s13560_s22 = smov 64   ;;  %s13561_s23 = smov 4  }
  0x63   : > { %12327 = dma.hbm_to_vmem [thread:$0]  (!%p13645_p5), %s14744_s1, 576, %s13651_s20, [#allocation9], %s13560_s22, %s13560_s22, %s13561_s23  }
  0x64   : > { %s13562_s25 = smov [#allocation12]   ;;  %s13563_s11 = smov [#allocation15]  }
  0x65   : > { %s285_s27 = sshll.u32 %s13562_s25, 4  ;;  %s309_s28 = sshll.u32 %s13563_s11, 4  ;;  %s286_s27 = int_to_ptr.vmem [resolvable:$true] %s285_s27  ;;  %s310_s28 = int_to_ptr.vmem [resolvable:$true] %s309_s28 }
  0x66   : > { %s13416_s14 = scalar_lea.hbm %s14746_s3, 9216 }
  0x67   : > { %p13417_p1 = scmp.ne.s32.totalorder %s14746_s3, %s13416_s14  ;;  %p13423_p8 = scmp.lt.u32.totalorder %s13416_s14, %s14746_s3 }
  0x69   : > { %p13419_p4 = pnand %p13417_p1, %p13661_p7 }
  0x6b   : > { %p13420_p6 = pneg %p13419_p4 }
  0x6d   : > { %p13425_p9 = pnand %p13423_p8, %p13420_p6 }
  0x6f   : > { %13428 = shalt.err (!%p13425_p9)
}
  0x70   : > { %s13429_s20 = scalar_lea.vmem %s286_s27, 9216  ;;  %p13437_p13 = scmp.lt.s32.totalorder %s286_s27, %s286_s27 }
  0x71   : > { %p13430_p10 = scmp.ne.s32.totalorder %s286_s27, %s13429_s20  ;;  %p13438_p0 = scmp.lt.s32.totalorder %s13429_s20, %s13429_s20 }
  0x73   : > { %p13432_p11 = pnand %p13430_p10, %p13661_p7  ;;  %p13439_p2 = por %p13438_p0, %p13437_p13 }
  0x75   : > { %p13433_p12 = pneg %p13432_p11 }
  0x77   : > { %p13440_p3 = pnand %p13439_p2, %p13433_p12 }
  0x79   : > { %13443 = shalt.err (!%p13440_p3)
}
  0x7a   : > { %12333 = dma.hbm_to_vmem [thread:$0]  (!%p13645_p5), %s14746_s3, 9216, %s286_s27, [#allocation11], %s13560_s22, %s13560_s22, %s13561_s23  }
  0x7b   : > { %s13444_s29 = scalar_lea.hbm %s14748_s5, 9216 }
  0x7c   : > { %p13445_p2 = scmp.ne.s32.totalorder %s14748_s5, %s13444_s29  ;;  %p13451_p4 = scmp.lt.u32.totalorder %s13444_s29, %s14748_s5 }
  0x7e   : > { %p13447_p3 = pnand %p13445_p2, %p13661_p7 }
  0x80   : > { %p13448_p1 = pneg %p13447_p3 }
  0x82   : > { %p13453_p6 = pnand %p13451_p4, %p13448_p1 }
  0x84   : > { %13456 = shalt.err (!%p13453_p6)
}
  0x85   : > { %s13457_s21 = scalar_lea.vmem %s310_s28, 9216  ;;  %p13465_p11 = scmp.lt.s32.totalorder %s310_s28, %s310_s28 }
  0x86   : > { %p13458_p8 = scmp.ne.s32.totalorder %s310_s28, %s13457_s21  ;;  %p13466_p12 = scmp.lt.s32.totalorder %s13457_s21, %s13457_s21 }
  0x88   : > { %p13460_p9 = pnand %p13458_p8, %p13661_p7  ;;  %p13467_p13 = por %p13466_p12, %p13465_p11 }
  0x8a   : > { %p13461_p10 = pneg %p13460_p9 }
  0x8c   : > { %p13468_p0 = pnand %p13467_p13, %p13461_p10 }
  0x8e   : > { %13471 = shalt.err (!%p13468_p0)
}
  0x8f   : > { %12339 = dma.hbm_to_vmem [thread:$0]  (!%p13645_p5), %s14748_s5, 9216, %s310_s28, [#allocation14], %s13560_s22, %s13560_s22, %s13561_s23  }
  0x90   : > { %s13564_s20 = smov [#allocation18]   ;;  %s13472_s11 = scalar_lea.hbm %s14750_s7, 65536 }
  0x91   : > { %s333_s24 = sshll.u32 %s13564_s20, 4  ;;  %p13473_p2 = scmp.ne.s32.totalorder %s14750_s7, %s13472_s11  ;;  %s334_s24 = int_to_ptr.vmem [resolvable:$true] %s333_s24 }
  0x92   : > { %p13479_p4 = scmp.lt.u32.totalorder %s13472_s11, %s14750_s7 }
  0x93   : > { %p13475_p3 = pnand %p13473_p2, %p13661_p7 }
  0x95   : > { %p13476_p1 = pneg %p13475_p3 }
  0x97   : > { %p13481_p6 = pnand %p13479_p4, %p13476_p1 }
  0x99   : > { %13484 = shalt.err (!%p13481_p6)
}
  0x9a   : > { %s13485_s22 = scalar_lea.vmem %s334_s24, 65536  ;;  %p13493_p11 = scmp.lt.s32.totalorder %s334_s24, %s334_s24 }
  0x9b   : > { %p13486_p8 = scmp.ne.s32.totalorder %s334_s24, %s13485_s22  ;;  %p13494_p12 = scmp.lt.s32.totalorder %s13485_s22, %s13485_s22 }
  0x9d   : > { %p13488_p9 = pnand %p13486_p8, %p13661_p7  ;;  %p13495_p13 = por %p13494_p12, %p13493_p11 }
  0x9f   : > { %p13489_p10 = pneg %p13488_p9 }
  0xa1   : > { %p13496_p0 = pnand %p13495_p13, %p13489_p10 }
  0xa3   : > { %13499 = shalt.err (!%p13496_p0)
}
  0xa4   : > { %s13565_s23 = smov 256   ;;  %s13566_s28 = smov 16  }
  0xa5   : > { %12345 = dma.hbm_to_vmem [thread:$0]  (!%p13645_p5), %s14750_s7, 65536, %s334_s24, [#allocation17], %s13565_s23, %s13565_s23, %s13566_s28  }
  0xa6   : > { %s13567_s27 = smov [#allocation19]   ;;  %s13500_s25 = scalar_lea.hbm %s14751_s8, 64 }
  0xa7   : > { %s347_s17 = sshll.u32 %s13567_s27, 4  ;;  %p13501_p2 = scmp.ne.s32.totalorder %s14751_s8, %s13500_s25  ;;  %s348_s17 = int_to_ptr.vmem [resolvable:$true] %s347_s17 }
  0xa8   : > { %p13507_p4 = scmp.lt.u32.totalorder %s13500_s25, %s14751_s8 }
  0xa9   : > { %p13503_p3 = pnand %p13501_p2, %p13661_p7 }
  0xab   : > { %p13504_p1 = pneg %p13503_p3 }
  0xad   : > { %p13509_p6 = pnand %p13507_p4, %p13504_p1 }
  0xaf   : > { %13512 = shalt.err (!%p13509_p6)
}
  0xb0   : > { %s13513_s24 = scalar_lea.vmem %s348_s17, 64  ;;  %p13521_p11 = scmp.lt.s32.totalorder %s348_s17, %s348_s17 }
  0xb1   : > { %p13514_p8 = scmp.ne.s32.totalorder %s348_s17, %s13513_s24  ;;  %p13522_p12 = scmp.lt.s32.totalorder %s13513_s24, %s13513_s24 }
  0xb3   : > { %p13516_p9 = pnand %p13514_p8, %p13661_p7  ;;  %p13523_p13 = por %p13522_p12, %p13521_p11 }
  0xb5   : > { %p13517_p10 = pneg %p13516_p9 }
  0xb7   : > { %p13524_p0 = pnand %p13523_p13, %p13517_p10 }
  0xb9   : > { %13527 = shalt.err (!%p13524_p0)
}
  0xba   : > { %12348 = dma.hbm_to_vmem [thread:$0]  (!%p13645_p5), %s14751_s8, 64, %s348_s17, [#allocation20]  }
  0xbb   : > { %p14758_p2 = scmp.ne.s32.totalorder %s14755_s13, 0 }
  0xbc   : > { %p14759_p3 = scmp.eq.s32.totalorder (!%p14758_p2), %s13628_s12, 0 }
  0xbd   : > { %369 = sbr.rel (%p14758_p2) target bundleno = 2788 (0xae4), region = 56 }
  0xc4   : > { %13533 = dma.done.wait (%p14759_p3), [#allocation9], 576   ;;  %p14760_p7 = pmov %p14759_p3 }
  0xc5   : > { %p14761_p1 = pmov %p14759_p3 }
  0xc6   : > { %13535 = vsyncadd (%p14760_p7), [#allocation9], 4294966720 }
  0xc7   : > { %13537 = dma.done.wait (%p14761_p1), [#allocation11], 9232   ;;  %p14762_p4 = pmov %p14761_p1 }
  0xc8   : > { %p14763_p6 = pmov %p14761_p1 }
  0xc9   : > { %13539 = vsyncadd (%p14762_p4), [#allocation11], 4294958064 }
  0xca   : > { %13541 = dma.done.wait (%p14763_p6), [#allocation14], 9232   ;;  %p14764_p5 = pmov %p14761_p1 }
  0xcb   : > { %p14765_p8 = pmov %p14761_p1 }
  0xcc   : > { %13543 = vsyncadd (%p14764_p5), [#allocation14], 4294958064 }
  0xcd   : > { %13545 = dma.done.wait (%p14765_p8), [#allocation17], 65552   ;;  %p14766_p9 = pmov %p14761_p1 }
  0xce   : > { %p14767_p10 = pmov %p14761_p1 }
  0xcf   : > { %13547 = vsyncadd (%p14766_p9), [#allocation17], 4294901744 }
  0xd0   : > { %13549 = dma.done.wait (%p14767_p10), [#allocation20], 64   ;;  %p14768_p11 = pmov %p14761_p1 }
  0xd1   : > { %s432_s13 = smul.u32 41, %s13628_s12  ;;  %v13568_v0 = vmov 0.0   ;;  %vm13569_vm0 = vmmov 0   ;;  %vm534_vm1 = vcmask 1043456   ;;  %v505_v1 = vld [vmem:[#allocation8] sm:$0xf] }
  0xd2   : > { %13551 = vsyncadd (%p14768_p11), [#allocation20], 4294967232  ;;  %455 = vst [vmem:[#allocation2 + $0x60] sm:$0xff] %v13568_v0  ;;  %11262 = vmatprep.subr.bf16.mxu0 %v13568_v0  ;;  %11264 = vmatprep.mubr.msk.bf16.mxu0 %vm13569_vm0, %v13568_v0  ;;  %v703_v2 = vld [vmem:[#allocation8 + $0x4] sm:$0xf]  ;;  %v536_v3 = vsel %vm534_vm1, %v505_v1, 0 }
  0xd3   : > { %443 = vst [vmem:[#allocation2] sm:$0xff] %v13568_v0  ;;  %444 = vst [vmem:[#allocation2 + $0x8] sm:$0xff] %v13568_v0  ;;  %p433_p12 = scmp.lt.s32.totalorder %s432_s13, 81  ;;  %11604 = vmatprep.subr.bf16.mxu1 %v13568_v0  ;;  %11620 = vmatprep.mubr.msk.bf16.mxu1 %vm13569_vm0, %v13568_v0  ;;  %vm506_vm2 = vcmask 64512   ;;  %v732_v7 = vsel %vm534_vm1, %v703_v2, 0  ;;  %p438_p13 = scmp.lt.s32.totalorder %s13628_s12, 1 }
  0xd4   : > { %445 = vst [vmem:[#allocation2 + $0x10] sm:$0xff] %v13568_v0  ;;  %446 = vst [vmem:[#allocation2 + $0x18] sm:$0xff] %v13568_v0  ;;  %11263 = vmatpush3.bf16.msra.mxu0 %v536_v3  ;;  %v933_v31 = vld [vmem:[#allocation8 + $0x8] sm:$0xf]  ;;  %v1147_v61 = vld [vmem:[#allocation8 + $0xc] sm:$0xf] }
  0xd5   : > { %447 = vst [vmem:[#allocation2 + $0x20] sm:$0xff] %v13568_v0  ;;  %448 = vst [vmem:[#allocation2 + $0x28] sm:$0xff] %v13568_v0  ;;  %s14770_s13 = smov (!%p433_p12, %s432_s13), 81  ;;  %11300 = vmatprep.subr.bf16.mxu0 %v13568_v0  ;;  %v962_v34 = vsel %vm534_vm1, %v933_v31, 0  ;;  %v1176_v63 = vsel %vm534_vm1, %v1147_v61, 0  ;;  %s14772_s12 = smov (!%p438_p13, %s13628_s12), 1 }
  0xd6   : > { %449 = vst [vmem:[#allocation2 + $0x30] sm:$0xff] %v13568_v0  ;;  %450 = vst [vmem:[#allocation2 + $0x38] sm:$0xff] %v13568_v0  ;;  %s10087_s18 = sshll.u32 %s14770_s13, 3  ;;  %s10088_s19 = sshll.u32 %s14772_s12, 2 }
  0xd7   : > { %451 = vst [vmem:[#allocation2 + $0x40] sm:$0xff] %v13568_v0  ;;  %452 = vst [vmem:[#allocation2 + $0x48] sm:$0xff] %v13568_v0  ;;  %s13885_s28 = scalar_lea.vmem %s14743_s0, %s10087_s18  ;;  %s441_s17 = scalar_lea.vmem %s14752_s9, %s10088_s19 }
  0xd8   : > { %453 = vst [vmem:[#allocation2 + $0x50] sm:$0xff] %v13568_v0  ;;  %454 = vst [vmem:[#allocation2 + $0x58] sm:$0xff] %v13568_v0  ;;  %v463_v4 = vld [vmem:[%s13885_s28] ss:$2 sm:$0xff]  ;;  %v10089_v5 = vld [vmem:[%s13885_s28 + $0x10] ss:$2 sm:$0xff] }
  0xd9   : > { %457 = vst [vmem:[#allocation3] sm:$0xff] %v13568_v0  ;;  %458 = vst [vmem:[#allocation3 + $0x8] sm:$0xff] %v13568_v0  ;;  %v496_v6 = vpack.c.bf16 %v10089_v5, %v463_v4  ;;  %v10090_v8 = vld [vmem:[%s13885_s28 + $0x20] ss:$2 sm:$0xff]  ;;  %v10091_v9 = vld [vmem:[%s13885_s28 + $0x30] ss:$2 sm:$0xff] }
  0xda   : > { %459 = vst [vmem:[#allocation3 + $0x10] sm:$0xff] %v13568_v0  ;;  %460 = vst [vmem:[#allocation3 + $0x18] sm:$0xff] %v13568_v0  ;;  %v497_v10 = vpack.c.bf16 %v10091_v9, %v10090_v8  ;;  %v10092_v11 = vld [vmem:[%s13885_s28 + $0x40] ss:$2 sm:$0xff]  ;;  %v10093_v12 = vld [vmem:[%s13885_s28 + $0x50] ss:$2 sm:$0xff] }
  0xdb   : > { %461 = vst [vmem:[#allocation3 + $0x20] sm:$0xff] %v13568_v0  ;;  %11265 = vmatmul.mubr.msk.bf16.vlgmr.msra.gmra.mrb[0].mxu0 %vm506_vm2, %v496_v6  ;;  %v498_v13 = vpack.c.bf16 %v10093_v12, %v10092_v11  ;;  %v10094_v14 = vld [vmem:[%s13885_s28 + $0x60] ss:$2 sm:$0xff]  ;;  %v10095_v15 = vld [vmem:[%s13885_s28 + $0x70] ss:$2 sm:$0xff] }
  0xdc   : > { %11301 = vmatpush3.bf16.msra.mxu0 %v732_v7  ;;  %11268 = vmatprep.mubr.msk.bf16.mxu0 %vm13569_vm0, %v13568_v0  ;;  %v499_v16 = vpack.c.bf16 %v10095_v15, %v10094_v14  ;;  %v10096_v17 = vld [vmem:[%s13885_s28 + $0x80] ss:$2 sm:$0xff]  ;;  %v10097_v18 = vld [vmem:[%s13885_s28 + $0x90] ss:$2 sm:$0xff]  ;;  %v10114_v32 = vld [vmem:[%s13885_s28 + $0x1] ss:$2 sm:$0xff] }
  0xdd   : > { %11338 = vmatprep.subr.bf16.mxu0 %v13568_v0  ;;  %v500_v19 = vpack.c.bf16 %v10097_v18, %v10096_v17  ;;  %v10098_v20 = vld [vmem:[%s13885_s28 + $0xa0] ss:$2 sm:$0xff]  ;;  %v10099_v21 = vld [vmem:[%s13885_s28 + $0xb0] ss:$2 sm:$0xff]  ;;  %v10115_v33 = vld [vmem:[%s13885_s28 + $0x11] ss:$2 sm:$0xff] }
  0xde   : > { %v501_v22 = vpack.c.bf16 %v10099_v21, %v10098_v20  ;;  %v10100_v23 = vld [vmem:[%s13885_s28 + $0xc0] ss:$2 sm:$0xff]  ;;  %v10101_v24 = vld [vmem:[%s13885_s28 + $0xd0] ss:$2 sm:$0xff]  ;;  %v693_v35 = vpack.c.bf16 %v10115_v33, %v10114_v32  ;;  %v10116_v36 = vld [vmem:[%s13885_s28 + $0x21] ss:$2 sm:$0xff] }
  0xdf   : > { %v502_v25 = vpack.c.bf16 %v10101_v24, %v10100_v23  ;;  %v10102_v26 = vld [vmem:[%s13885_s28 + $0xe0] ss:$2 sm:$0xff]  ;;  %v10103_v27 = vld [vmem:[%s13885_s28 + $0xf0] ss:$2 sm:$0xff]  ;;  %v10117_v37 = vld [vmem:[%s13885_s28 + $0x31] ss:$2 sm:$0xff] }
  0xe0   : > { %v503_v28 = vpack.c.bf16 %v10103_v27, %v10102_v26  ;;  %v10104_v29 = vld [vmem:[%s13885_s28 + $0x100] ss:$2 sm:$0x3f]  ;;  %v694_v38 = vpack.c.bf16 %v10117_v37, %v10116_v36  ;;  %v10118_v39 = vld [vmem:[%s13885_s28 + $0x41] ss:$2 sm:$0xff] }
  0xe1   : > { %v504_v30 = vpack.c.bf16 %v10104_v29, %v10104_v29  ;;  %v10119_v40 = vld [vmem:[%s13885_s28 + $0x51] ss:$2 sm:$0xff]  ;;  %v10120_v42 = vld [vmem:[%s13885_s28 + $0x61] ss:$2 sm:$0xff]  ;;  %v10140_v59 = vld [vmem:[%s13885_s28 + $0x2] ss:$2 sm:$0xff] }
  0xe2   : > { %v695_v41 = vpack.c.bf16 %v10119_v40, %v10118_v39  ;;  %v10121_v43 = vld [vmem:[%s13885_s28 + $0x71] ss:$2 sm:$0xff]  ;;  %v10122_v45 = vld [vmem:[%s13885_s28 + $0x81] ss:$2 sm:$0xff]  ;;  %v10141_v60 = vld [vmem:[%s13885_s28 + $0x12] ss:$2 sm:$0xff] }
  0xe3   : > { %11269 = vmatmul.mubr.msk.bf16.gmra.mrb[4].mxu0 %vm506_vm2, %v497_v10  ;;  %v696_v44 = vpack.c.bf16 %v10121_v43, %v10120_v42  ;;  %v10123_v46 = vld [vmem:[%s13885_s28 + $0x91] ss:$2 sm:$0xff]  ;;  %v10124_v48 = vld [vmem:[%s13885_s28 + $0xa1] ss:$2 sm:$0xff]  ;;  %v923_v62 = vpack.c.bf16 %v10141_v60, %v10140_v59  ;;  %v10142_v1 = vld [vmem:[%s13885_s28 + $0x22] ss:$2 sm:$0xff] }
  0xe4   : > { %11272 = vmatprep.mubr.msk.bf16.mxu0 %vm13569_vm0, %v13568_v0  ;;  %v697_v47 = vpack.c.bf16 %v10123_v46, %v10122_v45  ;;  %v10125_v49 = vld [vmem:[%s13885_s28 + $0xb1] ss:$2 sm:$0xff]  ;;  %v10126_v51 = vld [vmem:[%s13885_s28 + $0xc1] ss:$2 sm:$0xff]  ;;  %v10143_v2 = vld [vmem:[%s13885_s28 + $0x32] ss:$2 sm:$0xff] }
  0xe5   : > { %v698_v50 = vpack.c.bf16 %v10125_v49, %v10124_v48  ;;  %v10127_v52 = vld [vmem:[%s13885_s28 + $0xd1] ss:$2 sm:$0xff]  ;;  %v10128_v54 = vld [vmem:[%s13885_s28 + $0xe1] ss:$2 sm:$0xff]  ;;  %v10144_v4 = vld [vmem:[%s13885_s28 + $0x42] ss:$2 sm:$0xff] }
  0xe6   : > { %v699_v53 = vpack.c.bf16 %v10127_v52, %v10126_v51  ;;  %v10129_v55 = vld [vmem:[%s13885_s28 + $0xf1] ss:$2 sm:$0xff]  ;;  %v10130_v57 = vld [vmem:[%s13885_s28 + $0x101] ss:$2 sm:$0x3f] }
  0xe7   : > { %v700_v56 = vpack.c.bf16 %v10129_v55, %v10128_v54  ;;  %v701_v58 = vpack.c.bf16 %v10130_v57, %v10130_v57  ;;  %v13987_v3 = vld [vmem:[#allocation2 + $0x60] sm:$0xff]  ;;  %v1377_v26 = vld [vmem:[#allocation8 + $0x10] sm:$0xf] }
  0xe8   : > { %v10145_v5 = vld [vmem:[%s13885_s28 + $0x52] ss:$2 sm:$0xff]  ;;  %v10146_v7 = vld [vmem:[%s13885_s28 + $0x62] ss:$2 sm:$0xff]  ;;  %v1406_v32 = vsel %vm534_vm1, %v1377_v26, 0 }
  0xe9   : > { %v925_v6 = vpack.c.bf16 %v10145_v5, %v10144_v4  ;;  %v10147_v8 = vld [vmem:[%s13885_s28 + $0x72] ss:$2 sm:$0xff]  ;;  %v10148_v10 = vld [vmem:[%s13885_s28 + $0x82] ss:$2 sm:$0xff] }
  0xea   : > { %v926_v9 = vpack.c.bf16 %v10147_v8, %v10146_v7  ;;  %v10149_v11 = vld [vmem:[%s13885_s28 + $0x92] ss:$2 sm:$0xff]  ;;  %v10171_v37 = vld [vmem:[%s13885_s28 + $0x62] ss:$2 sm:$0xff] }
  0xeb   : > { %11273 = vmatmul.mubr.msk.bf16.gmra.mrb[8].mxu0 %vm506_vm2, %v498_v13  ;;  %v927_v12 = vpack.c.bf16 %v10149_v11, %v10148_v10  ;;  %v10150_v13 = vld [vmem:[%s13885_s28 + $0xa2] ss:$2 sm:$0xff]  ;;  %v10151_v14 = vld [vmem:[%s13885_s28 + $0xb2] ss:$2 sm:$0xff]  ;;  %v10194_v11 = vld [vmem:[%s13885_s28 + $0x33] ss:$2 sm:$0xff] }
  0xec   : > { %11276 = vmatprep.mubr.msk.bf16.mxu0 %vm13569_vm0, %v13568_v0  ;;  %v928_v15 = vpack.c.bf16 %v10151_v14, %v10150_v13  ;;  %v10153_v17 = vld [vmem:[%s13885_s28 + $0xd2] ss:$2 sm:$0xff]  ;;  %v10173_v40 = vld [vmem:[%s13885_s28 + $0x82] ss:$2 sm:$0xff] }
  0xed   : > { %v10155_v20 = vld [vmem:[%s13885_s28 + $0xf2] ss:$2 sm:$0xff]  ;;  %v10175_v43 = vld [vmem:[%s13885_s28 + $0xa2] ss:$2 sm:$0xff] }
  0xee   : > { %v10166_v24 = vld [vmem:[%s13885_s28 + $0x12] ss:$2 sm:$0xff]  ;;  %v1607_v4 = vld [vmem:[#allocation8 + $0x14] sm:$0xf] }
  0xef   : > { %v10168_v33 = vld [vmem:[%s13885_s28 + $0x32] ss:$2 sm:$0xff]  ;;  %v1636_v10 = vsel %vm534_vm1, %v1607_v4, 0 }
  0xf0   : > { %v10170_v36 = vld [vmem:[%s13885_s28 + $0x52] ss:$2 sm:$0xff] }
  0xf1   : > { %v10172_v39 = vld [vmem:[%s13885_s28 + $0x72] ss:$2 sm:$0xff] }
  0xf2   : > { %v10174_v42 = vld [vmem:[%s13885_s28 + $0x92] ss:$2 sm:$0xff] }
  0xf3   : > { %11277 = vmatmul.mubr.msk.bf16.gmra.mrb[12].mxu0 %vm506_vm2, %v499_v16  ;;  %v10152_v16 = vld [vmem:[%s13885_s28 + $0xc2] ss:$2 sm:$0xff]  ;;  %v1141_v46 = vpack.c.bf16 %v10175_v43, %v10174_v42  ;;  %v10176_v49 = vld [vmem:[%s13885_s28 + $0xb2] ss:$2 sm:$0xff] }
  0xf4   : > { %11280 = vmatprep.mubr.msk.bf16.mxu0 %vm13569_vm0, %v13568_v0  ;;  %v929_v18 = vpack.c.bf16 %v10153_v17, %v10152_v16  ;;  %v10178_v52 = vld [vmem:[%s13885_s28 + $0xd2] ss:$2 sm:$0xff]  ;;  %v10197_v16 = vld [vmem:[%s13885_s28 + $0x63] ss:$2 sm:$0xff] }
  0xf5   : > { %v10180_v55 = vld [vmem:[%s13885_s28 + $0xf2] ss:$2 sm:$0xff] }
  0xf6   : > { %v14087_v13 = vld [vmem:[#allocation2 + $0x60] sm:$0xff] }
  0xfb   : > { %11281 = vmatmul.mubr.msk.bf16.gmra.mrb[16].mxu0 %vm506_vm2, %v500_v19  ;;  %v10154_v19 = vld [vmem:[%s13885_s28 + $0xe2] ss:$2 sm:$0xff] }
  0xfc   : > { %11284 = vmatprep.mubr.msk.bf16.mxu0 %vm13569_vm0, %v13568_v0  ;;  %v930_v21 = vpack.c.bf16 %v10155_v20, %v10154_v19  ;;  %v10200_v20 = vld [vmem:[%s13885_s28 + $0x93] ss:$2 sm:$0xff] }
 0x103   : > { %11285 = vmatmul.mubr.msk.bf16.gmra.mrb[20].mxu0 %vm506_vm2, %v501_v22  ;;  %v10156_v22 = vld [vmem:[%s13885_s28 + $0x102] ss:$2 sm:$0x3f] }
 0x104   : > { %11288 = vmatprep.mubr.msk.bf16.mxu0 %vm13569_vm0, %v13568_v0  ;;  %v931_v23 = vpack.c.bf16 %v10156_v22, %v10156_v22 }
 0x10b   : > { %11289 = vmatmul.mubr.msk.bf16.gmra.mrb[24].mxu0 %vm506_vm2, %v502_v25  ;;  %v10167_v25 = vld [vmem:[%s13885_s28 + $0x22] ss:$2 sm:$0xff] }
 0x10c   : > { %11292 = vmatprep.mubr.msk.bf16.mxu0 %vm13569_vm0, %v13568_v0  ;;  %v1137_v29 = vpack.c.bf16 %v10167_v25, %v10166_v24 }
 0x113   : > { %11293 = vmatmul.mubr.msk.bf16.gmra.mrb[28].mxu0 %vm506_vm2, %v503_v28 }
 0x114   : > { %11296 = vmatprep.mubr.msk.bf16.mxu0 %vm13569_vm0, %v13568_v0 }
 0x11b   : > { %11297 = vmatmul.mubr.msk.bf16.gmra.mrb[32].mxu0 %vm506_vm2, %v504_v30 }
 0x11c   : > { %11302 = vmatprep.mubr.msk.bf16.mxu0 %vm13569_vm0, %v13568_v0 }
 0x123   : > { %11303 = vmatmul.mubr.msk.bf16.vlgmr.msra.gmra.mrb[36].mxu0 %vm506_vm2, %v693_v35 }
 0x124   : > { %11339 = vmatpush3.bf16.msra.mxu0 %v962_v34  ;;  %11306 = vmatprep.mubr.msk.bf16.mxu0 %vm13569_vm0, %v13568_v0  ;;  %v10169_v34 = vld [vmem:[%s13885_s28 + $0x42] ss:$2 sm:$0xff] }
 0x125   : > { %11376 = vmatprep.subr.bf16.mxu0 %v13568_v0  ;;  %v1138_v35 = vpack.c.bf16 %v10169_v34, %v10168_v33  ;;  %v10206_v34 = vld [vmem:[%s13885_s28 + $0xf3] ss:$2 sm:$0xff] }
 0x12b   : > { %11307 = vmatmul.mubr.msk.bf16.gmra.mrb[4].mxu0 %vm506_vm2, %v694_v38  ;;  %v1139_v38 = vpack.c.bf16 %v10171_v37, %v10170_v36  ;;  %v10208_v37 = vld [vmem:[%s13885_s28 + $0x113] ss:$2 sm:$0x3f] }
 0x12c   : > { %11310 = vmatprep.mubr.msk.bf16.mxu0 %vm13569_vm0, %v13568_v0  ;;  %v1375_v42 = vpack.c.bf16 %v10208_v37, %v10208_v37  ;;  %v10247_v37 = vld [vmem:[%s13885_s28 + $0x54] ss:$2 sm:$0xff] }
 0x133   : > { %11311 = vmatmul.mubr.msk.bf16.gmra.mrb[8].mxu0 %vm506_vm2, %v695_v41  ;;  %v1140_v41 = vpack.c.bf16 %v10173_v40, %v10172_v39 }
 0x134   : > { %11314 = vmatprep.mubr.msk.bf16.mxu0 %vm13569_vm0, %v13568_v0 }
 0x13b   : > { %11315 = vmatmul.mubr.msk.bf16.gmra.mrb[12].mxu0 %vm506_vm2, %v696_v44 }
 0x13c   : > { %11318 = vmatprep.mubr.msk.bf16.mxu0 %vm13569_vm0, %v13568_v0 }
 0x143   : > { %11319 = vmatmul.mubr.msk.bf16.gmra.mrb[40].mxu0 %vm506_vm2, %v697_v47 }
 0x144   : > { %11322 = vmatprep.mubr.msk.bf16.mxu0 %vm13569_vm0, %v13568_v0 }
 0x14b   : > { %11323 = vmatmul.mubr.msk.bf16.gmra.mrb[20].mxu0 %vm506_vm2, %v698_v50  ;;  %v10177_v50 = vld [vmem:[%s13885_s28 + $0xc2] ss:$2 sm:$0xff] }
 0x14c   : > { %11326 = vmatprep.mubr.msk.bf16.mxu0 %vm13569_vm0, %v13568_v0  ;;  %v1142_v51 = vpack.c.bf16 %v10177_v50, %v10176_v49 }
 0x153   : > { %11327 = vmatmul.mubr.msk.bf16.gmra.mrb[24].mxu0 %vm506_vm2, %v699_v53  ;;  %v10179_v53 = vld [vmem:[%s13885_s28 + $0xe2] ss:$2 sm:$0xff] }
 0x154   : > { %11330 = vmatprep.mubr.msk.bf16.mxu0 %vm13569_vm0, %v13568_v0  ;;  %v1143_v54 = vpack.c.bf16 %v10179_v53, %v10178_v52 }
 0x15b   : > { %11331 = vmatmul.mubr.msk.bf16.gmra.mrb[28].mxu0 %vm506_vm2, %v700_v56  ;;  %v10181_v56 = vld [vmem:[%s13885_s28 + $0x102] ss:$2 sm:$0xff] }
 0x15c   : > { %11334 = vmatprep.mubr.msk.bf16.mxu0 %vm13569_vm0, %v13568_v0  ;;  %v1144_v57 = vpack.c.bf16 %v10181_v56, %v10180_v55  ;;  %v10220_v55 = vld [vmem:[%s13885_s28 + $0x34] ss:$2 sm:$0xff]  ;;  %v10221_v56 = vld [vmem:[%s13885_s28 + $0x44] ss:$2 sm:$0xff] }
 0x163   : > { %11335 = vmatmul.mubr.msk.bf16.gmra.mrb[44].mxu0 %vm506_vm2, %v701_v58  ;;  %v10182_v58 = vld [vmem:[%s13885_s28 + $0x112] ss:$2 sm:$0x3f] }
 0x164   : > { %11340 = vmatprep.mubr.msk.bf16.mxu0 %vm13569_vm0, %v13568_v0  ;;  %v924_v0 = vpack.c.bf16 %v10143_v2, %v10142_v1  ;;  %v1145_v61 = vpack.c.bf16 %v10182_v58, %v10182_v58  ;;  %v10192_v1 = vld [vmem:[%s13885_s28 + $0x13] ss:$2 sm:$0xff]  ;;  %v10193_v2 = vld [vmem:[%s13885_s28 + $0x23] ss:$2 sm:$0xff]  ;;  %v10222_v58 = vld [vmem:[%s13885_s28 + $0x54] ss:$2 sm:$0xff] }
 0x165   : > { %v1367_v7 = vpack.c.bf16 %v10193_v2, %v10192_v1  ;;  %v10226_v1 = vld [vmem:[%s13885_s28 + $0x94] ss:$2 sm:$0xff]  ;;  %v10227_v2 = vld [vmem:[%s13885_s28 + $0xa4] ss:$2 sm:$0xff] }
 0x16b   : > { %11341 = vmatmul.mubr.msk.bf16.vlgmr.msra.gmra.mrb[48].mxu0 %vm506_vm2, %v923_v62 }
 0x16c   : > { %11377 = vmatpush3.bf16.msra.mxu0 %v1176_v63  ;;  %11344 = vmatprep.mubr.msk.bf16.mxu0 %vm13569_vm0, %v13987_v3 }
 0x16d   : > { %11414 = vmatprep.subr.bf16.mxu0 %v13987_v3 }
 0x173   : > { %11345 = vmatmul.mubr.msk.bf16.gmra.mrb[4].mxu0 %vm506_vm2, %v924_v0 }
 0x174   : > { %11348 = vmatprep.mubr.msk.bf16.mxu0 %vm13569_vm0, %v13987_v3 }
 0x17b   : > { %11349 = vmatmul.mubr.msk.bf16.gmra.mrb[8].mxu0 %vm506_vm2, %v925_v6 }
 0x17c   : > { %11352 = vmatprep.mubr.msk.bf16.mxu0 %vm13569_vm0, %v13987_v3 }
 0x183   : > { %11353 = vmatmul.mubr.msk.bf16.gmra.mrb[12].mxu0 %vm506_vm2, %v926_v9 }
 0x184   : > { %11356 = vmatprep.mubr.msk.bf16.mxu0 %vm13569_vm0, %v13987_v3 }
 0x18b   : > { %11357 = vmatmul.mubr.msk.bf16.gmra.mrb[52].mxu0 %vm506_vm2, %v927_v12  ;;  %v10195_v12 = vld [vmem:[%s13885_s28 + $0x43] ss:$2 sm:$0xff] }
 0x18c   : > { %11360 = vmatprep.mubr.msk.bf16.mxu0 %vm13569_vm0, %v13987_v3  ;;  %v1368_v14 = vpack.c.bf16 %v10195_v12, %v10194_v11  ;;  %v10230_v12 = vld [vmem:[%s13885_s28 + $0xd4] ss:$2 sm:$0xff] }
 0x193   : > { %11361 = vmatmul.mubr.msk.bf16.gmra.mrb[20].mxu0 %vm506_vm2, %v928_v15  ;;  %v10196_v15 = vld [vmem:[%s13885_s28 + $0x53] ss:$2 sm:$0xff] }
 0x194   : > { %11364 = vmatprep.mubr.msk.bf16.mxu0 %vm13569_vm0, %v13987_v3  ;;  %v1369_v17 = vpack.c.bf16 %v10197_v16, %v10196_v15  ;;  %v10232_v16 = vld [vmem:[%s13885_s28 + $0xf4] ss:$2 sm:$0xff] }
 0x19b   : > { %11365 = vmatmul.mubr.msk.bf16.gmra.mrb[24].mxu0 %vm506_vm2, %v929_v18  ;;  %v10199_v18 = vld [vmem:[%s13885_s28 + $0x83] ss:$2 sm:$0xff] }
 0x19c   : > { %11368 = vmatprep.mubr.msk.bf16.mxu0 %vm13569_vm0, %v13987_v3 }
 0x1a3   : > { %11369 = vmatmul.mubr.msk.bf16.gmra.mrb[28].mxu0 %vm506_vm2, %v930_v21  ;;  %v10201_v21 = vld [vmem:[%s13885_s28 + $0xa3] ss:$2 sm:$0xff] }
 0x1a4   : > { %11372 = vmatprep.mubr.msk.bf16.mxu0 %vm13569_vm0, %v13987_v3  ;;  %v1371_v24 = vpack.c.bf16 %v10201_v21, %v10200_v20 }
 0x1ab   : > { %11373 = vmatmul.mubr.msk.bf16.gmra.mrb[56].mxu0 %vm506_vm2, %v931_v23 }
 0x1ac   : > { %11378 = vmatprep.mubr.msk.bf16.mxu0 %vm13569_vm0, %v13987_v3 }
 0x1ae   : > { %v572_v27 = vpop.f32.mrb[0].mxu0 }
 0x1af   : > { %v11266_v28 = vpop.f32.mrb[1].mxu0 }
 0x1b0   : > { %v575_v30 = vpop.f32.mrb[2].mxu0  ;;  %v10202_v28 = vld [vmem:[%s13885_s28 + $0xb3] ss:$2 sm:$0xff] }
 0x1b1   : > { %v11267_v31 = vpop.f32.mrb[3].mxu0 }
 0x1b2   : > { %v10204_v31 = vld [vmem:[%s13885_s28 + $0xd3] ss:$2 sm:$0xff] }
 0x1b3   : > { %11379 = vmatmul.mubr.msk.bf16.vlgmr.msra.gmra.mrb[60].mxu0 %vm506_vm2, %v1137_v29  ;;  %v10203_v29 = vld [vmem:[%s13885_s28 + $0xc3] ss:$2 sm:$0xff] }
 0x1b4   : > { %11415 = vmatpush3.bf16.msra.mxu0 %v1406_v32  ;;  %11382 = vmatprep.mubr.msk.bf16.mxu0 %vm13569_vm0, %v13987_v3  ;;  %v1372_v30 = vpack.c.bf16 %v10203_v29, %v10202_v28  ;;  %v10205_v32 = vld [vmem:[%s13885_s28 + $0xe3] ss:$2 sm:$0xff]  ;;  %v2051_v29 = vld [vmem:[#allocation8 + $0x1c] sm:$0xf] }
 0x1b5   : > { %11452 = vmatprep.subr.bf16.mxu0 %v13987_v3  ;;  %v1373_v33 = vpack.c.bf16 %v10205_v32, %v10204_v31 }
 0x1bb   : > { %11383 = vmatmul.mubr.msk.bf16.gmra.mrb[4].mxu0 %vm506_vm2, %v1138_v35  ;;  %v10207_v35 = vld [vmem:[%s13885_s28 + $0x103] ss:$2 sm:$0xff] }
 0x1bc   : > { %11386 = vmatprep.mubr.msk.bf16.mxu0 %vm13569_vm0, %v13987_v3  ;;  %v1374_v36 = vpack.c.bf16 %v10207_v35, %v10206_v34  ;;  %v2080_v35 = vsel %vm534_vm1, %v2051_v29, 0 }
 0x1c3   : > { %11387 = vmatmul.mubr.msk.bf16.gmra.mrb[8].mxu0 %vm506_vm2, %v1139_v38 }
 0x1c4   : > { %11390 = vmatprep.mubr.msk.bf16.mxu0 %vm13569_vm0, %v13987_v3 }
 0x1cb   : > { %11391 = vmatmul.mubr.msk.bf16.gmra.mrb[12].mxu0 %vm506_vm2, %v1140_v41 }
 0x1cc   : > { %11394 = vmatprep.mubr.msk.bf16.mxu0 %vm13569_vm0, %v13987_v3 }
 0x1ce   : > { %v604_v44 = vpop.f32.mrb[16].mxu0 }
 0x1cf   : > { %v11282_v45 = vpop.f32.mrb[17].mxu0 }
 0x1d0   : > { %v14053_v47 = vpop.f32.mrb[18].mxu0  ;;  %v10218_v45 = vld [vmem:[%s13885_s28 + $0x14] ss:$2 sm:$0xff] }
 0x1d1   : > { %v11283_v48 = vpop.f32.mrb[19].mxu0 }
 0x1d2   : > { %v1821_v48 = vld [vmem:[#allocation8 + $0x18] sm:$0xf] }
 0x1d3   : > { %11395 = vmatmul.mubr.msk.bf16.gmra.mrb[64].mxu0 %vm506_vm2, %v1141_v46  ;;  %v10219_v46 = vld [vmem:[%s13885_s28 + $0x24] ss:$2 sm:$0xff] }
 0x1d4   : > { %11398 = vmatprep.mubr.msk.bf16.mxu0 %vm13569_vm0, %v13987_v3 }
 0x1db   : > { %11399 = vmatmul.mubr.msk.bf16.gmra.mrb[20].mxu0 %vm506_vm2, %v1142_v51  ;;  %v1597_v51 = vpack.c.bf16 %v10219_v46, %v10218_v45  ;;  %v10252_v45 = vld [vmem:[%s13885_s28 + $0xa4] ss:$2 sm:$0xff]  ;;  %v10253_v46 = vld [vmem:[%s13885_s28 + $0xb4] ss:$2 sm:$0xff] }
 0x1dc   : > { %11402 = vmatprep.mubr.msk.bf16.mxu0 %vm13569_vm0, %v13987_v3 }
 0x1e3   : > { %11403 = vmatmul.mubr.msk.bf16.gmra.mrb[24].mxu0 %vm506_vm2, %v1143_v54  ;;  %v1850_v54 = vsel %vm534_vm1, %v1821_v48, 0 }
 0x1e4   : > { %11406 = vmatprep.mubr.msk.bf16.mxu0 %vm13569_vm0, %v13987_v3 }
 0x1eb   : > { %11407 = vmatmul.mubr.msk.bf16.gmra.mrb[28].mxu0 %vm506_vm2, %v1144_v57  ;;  %v1598_v57 = vpack.c.bf16 %v10221_v56, %v10220_v55  ;;  %v10256_v56 = vld [vmem:[%s13885_s28 + $0xe4] ss:$2 sm:$0xff] }
 0x1ec   : > { %11410 = vmatprep.mubr.msk.bf16.mxu0 %vm13569_vm0, %v13987_v3 }
 0x1ee   : > { %v636_v59 = vpop.f32.mrb[32].mxu0 }
 0x1ef   : > { %658 = vst [vmem:[#allocation4 + $0x80] sm:$0x3f] %v636_v59  ;;  %v11298_v60 = vpop.f32.mrb[33].mxu0  ;;  %v10223_v59 = vld [vmem:[%s13885_s28 + $0x64] ss:$2 sm:$0xff] }
 0x1f0   : > { %v639_v62 = vpop.f32.mrb[34].mxu0  ;;  %v1599_v60 = vpack.c.bf16 %v10223_v59, %v10222_v58  ;;  %v10258_v59 = vld [vmem:[%s13885_s28 + $0x104] ss:$2 sm:$0xff] }
 0x1f1   : > { %v11299_v63 = vpop.f32.mrb[35].mxu0  ;;  %v10225_v62 = vld [vmem:[%s13885_s28 + $0x84] ss:$2 sm:$0xff] }
 0x1f3   : > { %11411 = vmatmul.mubr.msk.bf16.gmra.mrb[68].mxu0 %vm506_vm2, %v1145_v61  ;;  %v10224_v61 = vld [vmem:[%s13885_s28 + $0x74] ss:$2 sm:$0xff] }
 0x1f4   : > { %11416 = vmatprep.mubr.msk.bf16.mxu0 %vm13569_vm0, %v13987_v3  ;;  %v1600_v63 = vpack.c.bf16 %v10225_v62, %v10224_v61  ;;  %v10260_v62 = vld [vmem:[%s13885_s28 + $0x124] ss:$2 sm:$0x3f] }
 0x1f6   : > { %v768_v0 = vpop.f32.mrb[36].mxu0  ;;  %v854_v39 = vld [vmem:[#allocation4 + $0x80] sm:$0x3f] }
 0x1f7   : > { %v14079_v5 = vadd.f32 %v768_v0, %v572_v27  ;;  %v11304_v6 = vpop.f32.mrb[37].mxu0 }
 0x1f8   : > { %v771_v8 = vpop.f32.mrb[38].mxu0 }
 0x1f9   : > { %v11305_v9 = vpop.f32.mrb[39].mxu0 }
 0x1fa   : > { %v10228_v9 = vld [vmem:[%s13885_s28 + $0xb4] ss:$2 sm:$0xff] }
 0x1fb   : > { %11417 = vmatmul.mubr.msk.bf16.vlgmr.msra.gmra.mrb[72].mxu0 %vm506_vm2, %v1367_v7 }
 0x1fc   : > { %11453 = vmatpush3.bf16.msra.mxu0 %v1636_v10  ;;  %11420 = vmatprep.mubr.msk.bf16.mxu0 %vm13569_vm0, %v13987_v3  ;;  %v10198_v3 = vld [vmem:[%s13885_s28 + $0x73] ss:$2 sm:$0xff]  ;;  %v10229_v10 = vld [vmem:[%s13885_s28 + $0xc4] ss:$2 sm:$0xff] }
 0x1fd   : > { %11490 = vmatprep.subr.bf16.mxu0 %v14087_v13  ;;  %v1370_v19 = vpack.c.bf16 %v10199_v18, %v10198_v3  ;;  %v1602_v11 = vpack.c.bf16 %v10229_v10, %v10228_v9  ;;  %v10234_v18 = vld [vmem:[%s13885_s28 + $0x114] ss:$2 sm:$0x3f] }
 0x1fe   : > { %v2281_v10 = vld [vmem:[#allocation8 + $0x20] sm:$0xf] }
 0x203   : > { %11421 = vmatmul.mubr.msk.bf16.gmra.mrb[4].mxu0 %vm506_vm2, %v1368_v14  ;;  %v10231_v14 = vld [vmem:[%s13885_s28 + $0xe4] ss:$2 sm:$0xff] }
 0x204   : > { %11424 = vmatprep.mubr.msk.bf16.mxu0 %vm13569_vm0, %v14087_v13  ;;  %v1603_v15 = vpack.c.bf16 %v10231_v14, %v10230_v12 }
 0x20b   : > { %11425 = vmatmul.mubr.msk.bf16.gmra.mrb[8].mxu0 %vm506_vm2, %v1369_v17  ;;  %v10233_v17 = vld [vmem:[%s13885_s28 + $0x104] ss:$2 sm:$0xff] }
 0x20c   : > { %11428 = vmatprep.mubr.msk.bf16.mxu0 %vm13569_vm0, %v14087_v13  ;;  %v1604_v3 = vpack.c.bf16 %v10233_v17, %v10232_v16  ;;  %v2310_v17 = vsel %vm534_vm1, %v2281_v10, 0 }
 0x213   : > { %11429 = vmatmul.mubr.msk.bf16.gmra.mrb[12].mxu0 %vm506_vm2, %v1370_v19 }
 0x214   : > { %11432 = vmatprep.mubr.msk.bf16.mxu0 %vm13569_vm0, %v14087_v13 }
 0x216   : > { %v800_v22 = vpop.f32.mrb[40].mxu0 }
 0x217   : > { %v11320_v23 = vpop.f32.mrb[41].mxu0 }
 0x218   : > { %v803_v25 = vpop.f32.mrb[42].mxu0  ;;  %v1605_v23 = vpack.c.bf16 %v10234_v18, %v10234_v18  ;;  %v10273_v18 = vld [vmem:[%s13885_s28 + $0x55] ss:$2 sm:$0xff] }
 0x219   : > { %v14106_v26 = vadd.f32 %v803_v25, %v14053_v47  ;;  %v11321_v27 = vpop.f32.mrb[43].mxu0 }
 0x21a   : > { %v10245_v27 = vld [vmem:[%s13885_s28 + $0x34] ss:$2 sm:$0xff] }
 0x21b   : > { %11433 = vmatmul.mubr.msk.bf16.gmra.mrb[76].mxu0 %vm506_vm2, %v1371_v24 }
 0x21c   : > { %11436 = vmatprep.mubr.msk.bf16.mxu0 %vm13569_vm0, %v14087_v13 }
 0x223   : > { %11437 = vmatmul.mubr.msk.bf16.gmra.mrb[20].mxu0 %vm506_vm2, %v1372_v30 }
 0x224   : > { %11440 = vmatprep.mubr.msk.bf16.mxu0 %vm13569_vm0, %v14087_v13 }
 0x22b   : > { %11441 = vmatmul.mubr.msk.bf16.gmra.mrb[24].mxu0 %vm506_vm2, %v1373_v33 }
 0x22c   : > { %11444 = vmatprep.mubr.msk.bf16.mxu0 %vm13569_vm0, %v14087_v13 }
 0x233   : > { %11445 = vmatmul.mubr.msk.bf16.gmra.mrb[28].mxu0 %vm506_vm2, %v1374_v36  ;;  %v10246_v36 = vld [vmem:[%s13885_s28 + $0x44] ss:$2 sm:$0xff] }
 0x234   : > { %11448 = vmatprep.mubr.msk.bf16.mxu0 %vm13569_vm0, %v14087_v13 }
 0x236   : > { %v832_v38 = vpop.f32.mrb[44].mxu0 }
 0x237   : > { %v871_v40 = vadd.f32 %v854_v39, %v832_v38  ;;  %v11336_v41 = vpop.f32.mrb[45].mxu0  ;;  %v1812_v38 = vpack.c.bf16 %v10247_v37, %v10246_v36  ;;  %v10248_v39 = vld [vmem:[%s13885_s28 + $0x64] ss:$2 sm:$0xff]  ;;  %v10282_v37 = vld [vmem:[%s13885_s28 + $0xe5] ss:$2 sm:$0xff] }
 0x238   : > { %v835_v43 = vpop.f32.mrb[46].mxu0 }
 0x239   : > { %888 = vst [vmem:[#allocation4 + $0x80] sm:$0x3f] %v871_v40  ;;  %v11337_v44 = vpop.f32.mrb[47].mxu0  ;;  %v10249_v40 = vld [vmem:[%s13885_s28 + $0x74] ss:$2 sm:$0xff] }
 0x23a   : > { %v1813_v41 = vpack.c.bf16 %v10249_v40, %v10248_v39  ;;  %v10251_v43 = vld [vmem:[%s13885_s28 + $0x94] ss:$2 sm:$0xff]  ;;  %v10284_v40 = vld [vmem:[%s13885_s28 + $0x105] ss:$2 sm:$0xff] }
 0x23b   : > { %11449 = vmatmul.mubr.msk.bf16.gmra.mrb[80].mxu0 %vm506_vm2, %v1375_v42  ;;  %v10250_v42 = vld [vmem:[%s13885_s28 + $0x84] ss:$2 sm:$0xff] }
 0x23c   : > { %11454 = vmatprep.mubr.msk.bf16.mxu0 %vm13569_vm0, %v14087_v13  ;;  %v1814_v44 = vpack.c.bf16 %v10251_v43, %v10250_v42  ;;  %v10286_v43 = vld [vmem:[%s13885_s28 + $0x125] ss:$2 sm:$0x3f] }
 0x23e   : > { %v998_v47 = vpop.f32.mrb[48].mxu0 }
 0x23f   : > { %v14133_v49 = vadd.f32 %v998_v47, %v14079_v5  ;;  %v11342_v50 = vpop.f32.mrb[49].mxu0  ;;  %v1601_v5 = vpack.c.bf16 %v10227_v2, %v10226_v1 }
 0x240   : > { %v1001_v52 = vpop.f32.mrb[50].mxu0  ;;  %v1084_v20 = vld [vmem:[#allocation4 + $0x80] sm:$0x3f] }
 0x241   : > { %v11343_v53 = vpop.f32.mrb[51].mxu0 }
 0x242   : > { %v10254_v53 = vld [vmem:[%s13885_s28 + $0xc4] ss:$2 sm:$0xff] }
 0x243   : > { %11455 = vmatmul.mubr.msk.bf16.vlgmr.msra.gmra.mrb[84].mxu0 %vm506_vm2, %v1597_v51 }
 0x244   : > { %11491 = vmatpush3.bf16.msra.mxu0 %v1850_v54  ;;  %11458 = vmatprep.mubr.msk.bf16.mxu0 %vm13569_vm0, %v14087_v13  ;;  %v10255_v54 = vld [vmem:[%s13885_s28 + $0xd4] ss:$2 sm:$0xff] }
 0x245   : > { %11528 = vmatprep.subr.bf16.mxu0 %v14087_v13  ;;  %v1816_v55 = vpack.c.bf16 %v10255_v54, %v10254_v53 }
 0x24b   : > { %11459 = vmatmul.mubr.msk.bf16.gmra.mrb[4].mxu0 %vm506_vm2, %v1598_v57  ;;  %v10257_v57 = vld [vmem:[%s13885_s28 + $0xf4] ss:$2 sm:$0xff] }
 0x24c   : > { %11462 = vmatprep.mubr.msk.bf16.mxu0 %vm13569_vm0, %v14087_v13  ;;  %v1817_v58 = vpack.c.bf16 %v10257_v57, %v10256_v56 }
 0x253   : > { %11463 = vmatmul.mubr.msk.bf16.gmra.mrb[8].mxu0 %vm506_vm2, %v1599_v60  ;;  %v10259_v60 = vld [vmem:[%s13885_s28 + $0x114] ss:$2 sm:$0xff] }
 0x254   : > { %11466 = vmatprep.mubr.msk.bf16.mxu0 %vm13569_vm0, %v14087_v13  ;;  %v1818_v61 = vpack.c.bf16 %v10259_v60, %v10258_v59  ;;  %v10298_v59 = vld [vmem:[%s13885_s28 + $0x46] ss:$2 sm:$0xff]  ;;  %v10299_v60 = vld [vmem:[%s13885_s28 + $0x56] ss:$2 sm:$0xff] }
 0x25b   : > { %11467 = vmatmul.mubr.msk.bf16.gmra.mrb[12].mxu0 %vm506_vm2, %v1600_v63 }
 0x25c   : > { %11470 = vmatprep.mubr.msk.bf16.mxu0 %vm13569_vm0, %v14087_v13 }
 0x25e   : > { %v1030_v0 = vpop.f32.mrb[52].mxu0 }
 0x25f   : > { %v11358_v4 = vpop.f32.mrb[53].mxu0 }
 0x260   : > { %v1033_v6 = vpop.f32.mrb[54].mxu0  ;;  %v1819_v4 = vpack.c.bf16 %v10260_v62, %v10260_v62  ;;  %v10300_v62 = vld [vmem:[%s13885_s28 + $0x66] ss:$2 sm:$0xff] }
 0x261   : > { %v14158_v7 = vadd.f32 %v1033_v6, %v14106_v26  ;;  %v11359_v8 = vpop.f32.mrb[55].mxu0  ;;  %v10244_v26 = vld [vmem:[%s13885_s28 + $0x24] ss:$2 sm:$0xff] }
 0x262   : > { %v1811_v32 = vpack.c.bf16 %v10245_v27, %v10244_v26  ;;  %v10271_v8 = vld [vmem:[%s13885_s28 + $0x35] ss:$2 sm:$0xff]  ;;  %v10278_v26 = vld [vmem:[%s13885_s28 + $0xa5] ss:$2 sm:$0xff] }
 0x263   : > { %11471 = vmatmul.mubr.msk.bf16.gmra.mrb[88].mxu0 %vm506_vm2, %v1601_v5  ;;  %v10279_v27 = vld [vmem:[%s13885_s28 + $0xb5] ss:$2 sm:$0xff] }
 0x264   : > { %11474 = vmatprep.mubr.msk.bf16.mxu0 %vm13569_vm0, %v14087_v13 }
 0x26b   : > { %11475 = vmatmul.mubr.msk.bf16.gmra.mrb[20].mxu0 %vm506_vm2, %v1602_v11 }
 0x26c   : > { %11478 = vmatprep.mubr.msk.bf16.mxu0 %vm13569_vm0, %v14087_v13 }
 0x273   : > { %11479 = vmatmul.mubr.msk.bf16.gmra.mrb[24].mxu0 %vm506_vm2, %v1603_v15 }
 0x274   : > { %11482 = vmatprep.mubr.msk.bf16.mxu0 %vm13569_vm0, %v14087_v13 }
 0x27b   : > { %11483 = vmatmul.mubr.msk.bf16.gmra.mrb[28].mxu0 %vm506_vm2, %v1604_v3  ;;  %v10272_v3 = vld [vmem:[%s13885_s28 + $0x45] ss:$2 sm:$0xff] }
 0x27c   : > { %11486 = vmatprep.mubr.msk.bf16.mxu0 %vm13569_vm0, %v14087_v13 }
 0x27e   : > { %v1062_v19 = vpop.f32.mrb[56].mxu0 }
 0x27f   : > { %v1101_v21 = vadd.f32 %v1084_v20, %v1062_v19  ;;  %v11374_v22 = vpop.f32.mrb[57].mxu0  ;;  %v2042_v19 = vpack.c.bf16 %v10273_v18, %v10272_v3  ;;  %v10274_v20 = vld [vmem:[%s13885_s28 + $0x65] ss:$2 sm:$0xff]  ;;  %v10309_v3 = vld [vmem:[%s13885_s28 + $0xf6] ss:$2 sm:$0xff] }
 0x280   : > { %v1065_v24 = vpop.f32.mrb[58].mxu0 }
 0x281   : > { %1118 = vst [vmem:[#allocation4 + $0x80] sm:$0x3f] %v1101_v21  ;;  %v11375_v25 = vpop.f32.mrb[59].mxu0  ;;  %v10275_v21 = vld [vmem:[%s13885_s28 + $0x75] ss:$2 sm:$0xff] }
 0x282   : > { %v2043_v22 = vpack.c.bf16 %v10275_v21, %v10274_v20  ;;  %v10277_v24 = vld [vmem:[%s13885_s28 + $0x95] ss:$2 sm:$0xff]  ;;  %v10311_v20 = vld [vmem:[%s13885_s28 + $0x116] ss:$2 sm:$0xff] }
 0x283   : > { %11487 = vmatmul.mubr.msk.bf16.gmra.mrb[92].mxu0 %vm506_vm2, %v1605_v23  ;;  %v10276_v23 = vld [vmem:[%s13885_s28 + $0x85] ss:$2 sm:$0xff] }
 0x284   : > { %11492 = vmatprep.mubr.msk.bf16.mxu0 %vm13569_vm0, %v14087_v13  ;;  %v2044_v25 = vpack.c.bf16 %v10277_v24, %v10276_v23 }
 0x286   : > { %v1212_v28 = vpop.f32.mrb[60].mxu0 }
 0x287   : > { %v14185_v30 = vadd.f32 %v1212_v28, %v14133_v49  ;;  %v11380_v31 = vpop.f32.mrb[61].mxu0  ;;  %v1815_v49 = vpack.c.bf16 %v10253_v46, %v10252_v45 }
 0x288   : > { %v1215_v33 = vpop.f32.mrb[62].mxu0  ;;  %v1298_v1 = vld [vmem:[#allocation4 + $0x80] sm:$0x3f] }
 0x289   : > { %v11381_v34 = vpop.f32.mrb[63].mxu0 }
 0x28a   : > { %v10280_v34 = vld [vmem:[%s13885_s28 + $0xc5] ss:$2 sm:$0xff] }
 0x28b   : > { %11493 = vmatmul.mubr.msk.bf16.vlgmr.msra.gmra.mrb[96].mxu0 %vm506_vm2, %v1811_v32 }
 0x28c   : > { %11529 = vmatpush3.bf16.msra.mxu0 %v2080_v35  ;;  %11496 = vmatprep.mubr.msk.bf16.mxu0 %vm13569_vm0, %v14087_v13  ;;  %v10281_v35 = vld [vmem:[%s13885_s28 + $0xd5] ss:$2 sm:$0xff] }
 0x28d   : > { %11566 = vmatprep.subr.bf16.mxu0 %v14087_v13  ;;  %v2046_v36 = vpack.c.bf16 %v10281_v35, %v10280_v34  ;;  %v12389_v35 = vld [vmem:[#allocation12] sm:$0xff]  }
 0x28e   : > { %11605 = vmatpush3.bf16.msra.mxu1 %v12389_v35  ;;  %v12397_v35 = vld [vmem:[#allocation12 + $0x40] sm:$0xff]  }
 0x28f   : > { %11606 = vmatprep.subr.bf16.mxu1 %v14087_v13 }
 0x293   : > { %11497 = vmatmul.mubr.msk.bf16.gmra.mrb[4].mxu0 %vm506_vm2, %v1812_v38  ;;  %v10283_v38 = vld [vmem:[%s13885_s28 + $0xf5] ss:$2 sm:$0xff] }
 0x294   : > { %11500 = vmatprep.mubr.msk.bf16.mxu0 %vm13569_vm0, %v14087_v13  ;;  %v2047_v39 = vpack.c.bf16 %v10283_v38, %v10282_v37  ;;  %v12391_v37 = vld [vmem:[#allocation12 + $0x10] sm:$0xff]   ;;  %v12392_v38 = vld [vmem:[#allocation12 + $0x18] sm:$0xff]  }
 0x29b   : > { %11501 = vmatmul.mubr.msk.bf16.gmra.mrb[8].mxu0 %vm506_vm2, %v1813_v41  ;;  %v10285_v41 = vld [vmem:[%s13885_s28 + $0x115] ss:$2 sm:$0xff] }
 0x29c   : > { %11504 = vmatprep.mubr.msk.bf16.mxu0 %vm13569_vm0, %v14087_v13  ;;  %v2048_v42 = vpack.c.bf16 %v10285_v41, %v10284_v40  ;;  %v12393_v40 = vld [vmem:[#allocation12 + $0x20] sm:$0xff]  }
 0x2a3   : > { %11505 = vmatmul.mubr.msk.bf16.gmra.mrb[12].mxu0 %vm506_vm2, %v1814_v44 }
 0x2a4   : > { %11508 = vmatprep.mubr.msk.bf16.mxu0 %vm13569_vm0, %v14087_v13 }
 0x2a6   : > { %v1244_v47 = vpop.f32.mrb[64].mxu0 }
 0x2a7   : > { %v11396_v48 = vpop.f32.mrb[65].mxu0 }
 0x2a8   : > { %v1247_v50 = vpop.f32.mrb[66].mxu0  ;;  %v2049_v48 = vpack.c.bf16 %v10286_v43, %v10286_v43 }
 0x2a9   : > { %v14210_v51 = vadd.f32 %v1247_v50, %v14158_v7  ;;  %v11397_v52 = vpop.f32.mrb[67].mxu0  ;;  %v10270_v7 = vld [vmem:[%s13885_s28 + $0x25] ss:$2 sm:$0xff] }
 0x2aa   : > { %v2041_v14 = vpack.c.bf16 %v10271_v8, %v10270_v7  ;;  %v10297_v52 = vld [vmem:[%s13885_s28 + $0x36] ss:$2 sm:$0xff] }
 0x2ab   : > { %11509 = vmatmul.mubr.msk.bf16.gmra.mrb[100].mxu0 %vm506_vm2, %v1815_v49 }
 0x2ac   : > { %11512 = vmatprep.mubr.msk.bf16.mxu0 %vm13569_vm0, %v14087_v13 }
 0x2b3   : > { %11513 = vmatmul.mubr.msk.bf16.gmra.mrb[20].mxu0 %vm506_vm2, %v1816_v55 }
 0x2b4   : > { %11516 = vmatprep.mubr.msk.bf16.mxu0 %vm13569_vm0, %v14087_v13 }
 0x2bb   : > { %11517 = vmatmul.mubr.msk.bf16.gmra.mrb[24].mxu0 %vm506_vm2, %v1817_v58 }
 0x2bc   : > { %11520 = vmatprep.mubr.msk.bf16.mxu0 %vm13569_vm0, %v14087_v13 }
 0x2c3   : > { %11521 = vmatmul.mubr.msk.bf16.gmra.mrb[28].mxu0 %vm506_vm2, %v1818_v61  ;;  %v2272_v61 = vpack.c.bf16 %v10299_v60, %v10298_v59 }
 0x2c4   : > { %11524 = vmatprep.mubr.msk.bf16.mxu0 %vm13569_vm0, %v14087_v13 }
 0x2c6   : > { %v1276_v63 = vpop.f32.mrb[68].mxu0 }
 0x2c7   : > { %v1315_v2 = vadd.f32 %v1298_v1, %v1276_v63  ;;  %v11412_v0 = vpop.f32.mrb[69].mxu0  ;;  %v10301_v63 = vld [vmem:[%s13885_s28 + $0x76] ss:$2 sm:$0xff] }
 0x2c8   : > { %v1279_v5 = vpop.f32.mrb[70].mxu0  ;;  %v2273_v1 = vpack.c.bf16 %v10301_v63, %v10300_v62  ;;  %v10303_v0 = vld [vmem:[%s13885_s28 + $0x96] ss:$2 sm:$0xff] }
 0x2c9   : > { %1332 = vst [vmem:[#allocation4 + $0x80] sm:$0x3f] %v1315_v2  ;;  %v11413_v6 = vpop.f32.mrb[71].mxu0  ;;  %v10302_v2 = vld [vmem:[%s13885_s28 + $0x86] ss:$2 sm:$0xff] }
 0x2ca   : > { %v10304_v5 = vld [vmem:[%s13885_s28 + $0xa6] ss:$2 sm:$0xff]  ;;  %v10305_v6 = vld [vmem:[%s13885_s28 + $0xb6] ss:$2 sm:$0xff] }
 0x2cb   : > { %11525 = vmatmul.mubr.msk.bf16.gmra.mrb[104].mxu0 %vm506_vm2, %v1819_v4  ;;  %v2274_v4 = vpack.c.bf16 %v10303_v0, %v10302_v2 }
 0x2cc   : > { %11530 = vmatprep.mubr.msk.bf16.mxu0 %vm13569_vm0, %v14087_v13 }
 0x2ce   : > { %v1442_v9 = vpop.f32.mrb[72].mxu0 }
 0x2cf   : > { %v14237_v11 = vadd.f32 %v1442_v9, %v14185_v30  ;;  %v11418_v12 = vpop.f32.mrb[73].mxu0  ;;  %v2045_v30 = vpack.c.bf16 %v10279_v27, %v10278_v26  ;;  %v2275_v9 = vpack.c.bf16 %v10305_v6, %v10304_v5 }
 0x2d0   : > { %v1445_v15 = vpop.f32.mrb[74].mxu0  ;;  %v1528_v45 = vld [vmem:[#allocation4 + $0x80] sm:$0x3f] }
 0x2d1   : > { %v11419_v16 = vpop.f32.mrb[75].mxu0  ;;  %v10307_v15 = vld [vmem:[%s13885_s28 + $0xd6] ss:$2 sm:$0xff] }
 0x2d3   : > { %11531 = vmatmul.mubr.msk.bf16.vlgmr.msra.gmra.mrb[108].mxu0 %vm506_vm2, %v2041_v14  ;;  %v10306_v14 = vld [vmem:[%s13885_s28 + $0xc6] ss:$2 sm:$0xff] }
 0x2d4   : > { %11567 = vmatpush3.bf16.msra.mxu0 %v2310_v17  ;;  %11534 = vmatprep.mubr.msk.bf16.mxu0 %vm13569_vm0, %v14087_v13  ;;  %v2276_v16 = vpack.c.bf16 %v10307_v15, %v10306_v14  ;;  %v10308_v17 = vld [vmem:[%s13885_s28 + $0xe6] ss:$2 sm:$0xff] }
 0x2d5   : > { %v2277_v18 = vpack.c.bf16 %v10309_v3, %v10308_v17 }
 0x2db   : > { %11535 = vmatmul.mubr.msk.bf16.gmra.mrb[4].mxu0 %vm506_vm2, %v2042_v19  ;;  %v10310_v19 = vld [vmem:[%s13885_s28 + $0x106] ss:$2 sm:$0xff] }
 0x2dc   : > { %11538 = vmatprep.mubr.msk.bf16.mxu0 %vm13569_vm0, %v14087_v13  ;;  %v2278_v21 = vpack.c.bf16 %v10311_v20, %v10310_v19 }
 0x2e3   : > { %11539 = vmatmul.mubr.msk.bf16.gmra.mrb[8].mxu0 %vm506_vm2, %v2043_v22  ;;  %v10312_v22 = vld [vmem:[%s13885_s28 + $0x126] ss:$2 sm:$0x3f] }
 0x2e4   : > { %11542 = vmatprep.mubr.msk.bf16.mxu0 %vm13569_vm0, %v14087_v13  ;;  %v2279_v27 = vpack.c.bf16 %v10312_v22, %v10312_v22 }
 0x2eb   : > { %11543 = vmatmul.mubr.msk.bf16.gmra.mrb[12].mxu0 %vm506_vm2, %v2044_v25 }
 0x2ec   : > { %11546 = vmatprep.mubr.msk.bf16.mxu0 %vm13569_vm0, %v14087_v13 }
 0x2ee   : > { %v1474_v28 = vpop.f32.mrb[76].mxu0 }
 0x2ef   : > { %v11434_v29 = vpop.f32.mrb[77].mxu0 }
 0x2f0   : > { %v1477_v31 = vpop.f32.mrb[78].mxu0 }
 0x2f1   : > { %v1538_v32 = vadd.f32 %v1477_v31, %v14210_v51  ;;  %v11435_v33 = vpop.f32.mrb[79].mxu0  ;;  %v10296_v51 = vld [vmem:[%s13885_s28 + $0x26] ss:$2 sm:$0xff] }
 0x2f2   : > { %v2271_v56 = vpack.c.bf16 %v10297_v52, %v10296_v51 }
 0x2f3   : > { %11547 = vmatmul.mubr.msk.bf16.gmra.mrb[112].mxu0 %vm506_vm2, %v2045_v30 }
 0x2f4   : > { %11550 = vmatprep.mubr.msk.bf16.mxu0 %vm13569_vm0, %v14087_v13 }
 0x2fb   : > { %11551 = vmatmul.mubr.msk.bf16.gmra.mrb[20].mxu0 %vm506_vm2, %v2046_v36  ;;  %v12390_v36 = vld [vmem:[#allocation12 + $0x8] sm:$0xff]  }
 0x2fc   : > { %11554 = vmatprep.mubr.msk.bf16.mxu0 %vm13569_vm0, %v14087_v13  ;;  %11607 = vmatpush3.bf16.msra.mxu1 %v12390_v36 }
 0x2fd   : > { %11608 = vmatprep.subr.bf16.mxu1 %v14087_v13 }
 0x300   : > { %11609 = vmatpush3.bf16.msra.mxu1 %v12391_v37 }
 0x301   : > { %11610 = vmatprep.subr.bf16.mxu1 %v14087_v13 }
 0x303   : > { %11555 = vmatmul.mubr.msk.bf16.gmra.mrb[24].mxu0 %vm506_vm2, %v2047_v39 }
 0x304   : > { %11558 = vmatprep.mubr.msk.bf16.mxu0 %vm13569_vm0, %v14087_v13  ;;  %11611 = vmatpush3.bf16.msra.mxu1 %v12392_v38 }
 0x305   : > { %11612 = vmatprep.subr.bf16.mxu1 %v14087_v13 }
 0x308   : > { %11613 = vmatpush3.bf16.msra.mxu1 %v12393_v40 }
 0x309   : > { %11614 = vmatprep.subr.bf16.mxu1 %v14087_v13 }
 0x30b   : > { %11559 = vmatmul.mubr.msk.bf16.gmra.mrb[28].mxu0 %vm506_vm2, %v2048_v42 }
 0x30c   : > { %11562 = vmatprep.mubr.msk.bf16.mxu0 %vm13569_vm0, %v14087_v13 }
 0x30e   : > { %v1506_v44 = vpop.f32.mrb[80].mxu0 }
 0x30f   : > { %v1545_v46 = vadd.f32 %v1528_v45, %v1506_v44  ;;  %v11450_v47 = vpop.f32.mrb[81].mxu0  ;;  %v12394_v45 = vld [vmem:[#allocation12 + $0x28] sm:$0xff]  }
 0x310   : > { %v1509_v49 = vpop.f32.mrb[82].mxu0  ;;  %11615 = vmatpush3.bf16.msra.mxu1 %v12394_v45  ;;  %v12396_v47 = vld [vmem:[#allocation12 + $0x38] sm:$0xff]  }
 0x311   : > { %1562 = vst [vmem:[#allocation4 + $0x80] sm:$0x3f] %v1545_v46  ;;  %v11451_v50 = vpop.f32.mrb[83].mxu0  ;;  %11616 = vmatprep.subr.bf16.mxu1 %v14087_v13  ;;  %v12395_v46 = vld [vmem:[#allocation12 + $0x30] sm:$0xff]  }
 0x313   : > { %11563 = vmatmul.mubr.msk.bf16.gmra.mrb[116].mxu0 %vm506_vm2, %v2049_v48 }
 0x314   : > { %11568 = vmatprep.mubr.msk.bf16.mxu0 %vm13569_vm0, %v14087_v13  ;;  %11617 = vmatpush3.bf16.msra.mxu1 %v12395_v46 }
 0x315   : > { %11618 = vmatprep.subr.bf16.mxu1 %v14087_v13 }
 0x316   : > { %v1672_v53 = vpop.f32.mrb[84].mxu0 }
 0x317   : > { %v1759_v54 = vadd.f32 %v1672_v53, %v14237_v11  ;;  %v11456_v55 = vpop.f32.mrb[85].mxu0 }
 0x318   : > { %v1675_v57 = vpop.f32.mrb[86].mxu0  ;;  %v1758_v24 = vld [vmem:[#allocation4 + $0x80] sm:$0x3f]  ;;  %11619 = vmatpush3.bf16.msra.mxu1 %v12396_v47  ;;  %v12399_v47 = vld [vmem:[#allocation12 + $0x50] sm:$0xff]  }
 0x319   : > { %v11457_v58 = vpop.f32.mrb[87].mxu0  ;;  %11632 = vmatprep.subr.bf16.mxu1 %v14087_v13 }
 0x31b   : > { %11569 = vmatmul.mubr.msk.bf16.vlgmr.msra.gmra.mrb[120].mxu0 %vm506_vm2, %v2271_v56 }
 0x31c   : > { %11572 = vmatprep.mubr.msk.bf16.mxu0 %vm13569_vm0, %v14087_v13 }
 0x323   : > { %11573 = vmatmul.mubr.msk.bf16.gmra.mrb[4].mxu0 %vm506_vm2, %v2272_v61 }
 0x324   : > { %11576 = vmatprep.mubr.msk.bf16.mxu0 %vm13569_vm0, %v14087_v13 }
 0x32b   : > { %11577 = vmatmul.mubr.msk.bf16.gmra.mrb[8].mxu0 %vm506_vm2, %v2273_v1 }
 0x32c   : > { %11580 = vmatprep.mubr.msk.bf16.mxu0 %vm13569_vm0, %v14087_v13 }
 0x333   : > { %11581 = vmatmul.mubr.msk.bf16.gmra.mrb[12].mxu0 %vm506_vm2, %v2274_v4 }
 0x334   : > { %11584 = vmatprep.mubr.msk.bf16.mxu0 %vm13569_vm0, %v14087_v13 }
 0x336   : > { %v1704_v7 = vpop.f32.mrb[88].mxu0 }
 0x337   : > { %v11472_v8 = vpop.f32.mrb[89].mxu0 }
 0x338   : > { %v1707_v10 = vpop.f32.mrb[90].mxu0  ;;  %v14334_v8 = vld [vmem:[#allocation10] ss:$0 sm:$0xff] }
 0x339   : > { %v1768_v11 = vadd.f32 %v1707_v10, %v1538_v32  ;;  %v11473_v12 = vpop.f32.mrb[91].mxu0 }
 0x33b   : > { %11585 = vmatmul.mubr.msk.bf16.gmra.mrb[124].mxu0 %vm506_vm2, %v2275_v9 }
 0x33c   : > { %11588 = vmatprep.mubr.msk.bf16.mxu0 %vm13569_vm0, %v14087_v13 }
 0x343   : > { %11589 = vmatmul.mubr.msk.bf16.gmra.mrb[20].mxu0 %vm506_vm2, %v2276_v16 }
 0x344   : > { %11592 = vmatprep.mubr.msk.bf16.mxu0 %vm13569_vm0, %v14087_v13 }
 0x34b   : > { %11593 = vmatmul.mubr.msk.bf16.gmra.mrb[24].mxu0 %vm506_vm2, %v2277_v18 }
 0x34c   : > { %11596 = vmatprep.mubr.msk.bf16.mxu0 %vm13569_vm0, %v14087_v13 }
 0x353   : > { %11597 = vmatmul.mubr.msk.bf16.gmra.mrb[28].mxu0 %vm506_vm2, %v2278_v21 }
 0x354   : > { %11600 = vmatprep.mubr.msk.bf16.mxu0 %vm13569_vm0, %v14087_v13 }
 0x356   : > { %v1736_v23 = vpop.f32.mrb[92].mxu0 }
 0x357   : > { %v1775_v25 = vadd.f32 %v1758_v24, %v1736_v23  ;;  %v11488_v26 = vpop.f32.mrb[93].mxu0 }
 0x358   : > { %v1739_v28 = vpop.f32.mrb[94].mxu0 }
 0x359   : > { %1792 = vst [vmem:[#allocation4 + $0x80] sm:$0x3f] %v1775_v25  ;;  %v11489_v29 = vpop.f32.mrb[95].mxu0 }
 0x35b   : > { %11601 = vmatmul.mubr.msk.bf16.gmra.mrb[128].mxu0 %vm506_vm2, %v2279_v27 }
 0x35e   : > { %v1886_v30 = vpop.f32.mrb[96].mxu0 }
 0x35f   : > { %v1973_v31 = vadd.f32 %v1886_v30, %v1759_v54  ;;  %v11494_v32 = vpop.f32.mrb[97].mxu0 }
 0x360   : > { %v1889_v33 = vpop.f32.mrb[98].mxu0  ;;  %v1972_v49 = vld [vmem:[#allocation4 + $0x80] sm:$0x3f] }
 0x361   : > { %v11495_v34 = vpop.f32.mrb[99].mxu0 }
 0x37e   : > { %v1918_v39 = vpop.f32.mrb[100].mxu0 }
 0x37f   : > { %v11510_v41 = vpop.f32.mrb[101].mxu0 }
 0x380   : > { %v1921_v42 = vpop.f32.mrb[102].mxu0  ;;  %v12398_v41 = vld [vmem:[#allocation12 + $0x48] sm:$0xff]  }
 0x381   : > { %v1982_v43 = vadd.f32 %v1921_v42, %v1768_v11  ;;  %v11511_v44 = vpop.f32.mrb[103].mxu0 }
 0x39e   : > { %v1950_v48 = vpop.f32.mrb[104].mxu0 }
 0x39f   : > { %v1989_v50 = vadd.f32 %v1972_v49, %v1950_v48  ;;  %v11526_v51 = vpop.f32.mrb[105].mxu0 }
 0x3a0   : > { %v1953_v52 = vpop.f32.mrb[106].mxu0 }
 0x3a1   : > { %2006 = vst [vmem:[#allocation4 + $0x80] sm:$0x3f] %v1989_v50  ;;  %v11527_v53 = vpop.f32.mrb[107].mxu0  ;;  %v12400_v52 = vld [vmem:[#allocation12 + $0x58] sm:$0xff]  }
 0x3a6   : > { %v2116_v54 = vpop.f32.mrb[108].mxu0 }
 0x3a7   : > { %v2203_v55 = vadd.f32 %v2116_v54, %v1973_v31  ;;  %v11532_v56 = vpop.f32.mrb[109].mxu0  ;;  %v12401_v54 = vld [vmem:[#allocation12 + $0x60] sm:$0xff]  }
 0x3a8   : > { %v2119_v57 = vpop.f32.mrb[110].mxu0  ;;  %v2202_v2 = vld [vmem:[#allocation4 + $0x80] sm:$0x3f] }
 0x3a9   : > { %v11533_v58 = vpop.f32.mrb[111].mxu0 }
 0x3aa   : > { %v12402_v58 = vld [vmem:[#allocation12 + $0x68] sm:$0xff]  }
 0x3c6   : > { %v2148_v59 = vpop.f32.mrb[112].mxu0 }
 0x3c7   : > { %v11548_v60 = vpop.f32.mrb[113].mxu0 }
 0x3c8   : > { %v2151_v61 = vpop.f32.mrb[114].mxu0  ;;  %v12403_v60 = vld [vmem:[#allocation12 + $0x70] sm:$0xff]  }
 0x3c9   : > { %v2212_v62 = vadd.f32 %v2151_v61, %v1982_v43  ;;  %v11549_v63 = vpop.f32.mrb[115].mxu0 }
 0x3e6   : > { %v2180_v1 = vpop.f32.mrb[116].mxu0 }
 0x3e7   : > { %v2219_v0 = vadd.f32 %v2202_v2, %v2180_v1  ;;  %v11564_v4 = vpop.f32.mrb[117].mxu0 }
 0x3e8   : > { %v2183_v5 = vpop.f32.mrb[118].mxu0 }
 0x3e9   : > { %2236 = vst [vmem:[#allocation4 + $0x80] sm:$0x3f] %v2219_v0  ;;  %v11565_v6 = vpop.f32.mrb[119].mxu0  ;;  %v12404_v0 = vld [vmem:[#allocation12 + $0x78] sm:$0xff]  }
 0x3ee   : > { %v2346_v7 = vpop.f32.mrb[120].mxu0 }
 0x3ef   : > { %v2433_v9 = vadd.f32 %v2346_v7, %v2203_v55  ;;  %v11570_v10 = vpop.f32.mrb[121].mxu0 }
 0x3f0   : > { %v2349_v11 = vpop.f32.mrb[122].mxu0 }
 0x3f1   : > { %v2475_v12 = vadd.f32 %v14334_v8, %v2433_v9  ;;  %v11571_v14 = vpop.f32.mrb[123].mxu0  ;;  %v2432_v9 = vld [vmem:[#allocation4 + $0x80] sm:$0x3f] }
 0x3f3   : > { %v2476_v15 = vmax.f32 %v2475_v12, 0.0 }
 0x3f5   : > { %2477 = vst [vmem:[#allocation2 + $0xb] sm:$0xff] %v2476_v15 }
 0x3f6   : > { %v2354_v16 = vpop.f32.mrb[4].mxu0 }
 0x3f7   : > { %2452 = vst [vmem:[#allocation4 + $0x10] sm:$0xff] %v2354_v16  ;;  %v11574_v17 = vpop.f32.mrb[5].mxu0 }
 0x3f8   : > { %v2357_v3 = vpop.f32.mrb[6].mxu0 }
 0x3f9   : > { %2453 = vst [vmem:[#allocation4 + $0x18] sm:$0xff] %v2357_v3  ;;  %v11575_v18 = vpop.f32.mrb[7].mxu0 }
 0x3fc   : > { %v2506_v33 = vld [vmem:[#allocation2] ss:$2 sm:$0xff] }
 0x3fe   : > { %v2362_v19 = vpop.f32.mrb[8].mxu0 }
 0x3ff   : > { %2454 = vst [vmem:[#allocation4 + $0x20] sm:$0xff] %v2362_v19  ;;  %v11578_v20 = vpop.f32.mrb[9].mxu0  ;;  %v14353_v19 = vld [vmem:[#allocation2 + $0x60] sm:$0xff] }
 0x400   : > { %v2478_v21 = vld [vmem:[#allocation4 + $0x12] sm:$0xff]  ;;  %v2365_v22 = vpop.f32.mrb[10].mxu0 }
 0x401   : > { %v2479_v23 = vadd.f32 %v14334_v8, %v2478_v21  ;;  %2455 = vst [vmem:[#allocation4 + $0x28] sm:$0xff] %v2365_v22  ;;  %v11579_v24 = vpop.f32.mrb[11].mxu0 }
 0x403   : > { %v2480_v25 = vmax.f32 %v2479_v23, 0.0 }
 0x405   : > { %2481 = vst [vmem:[#allocation2 + $0x15] sm:$0xff] %v2480_v25  ;;  %v2644_v25 = vld [vmem:[#allocation2 + $0x1] ss:$2 sm:$0xff] }
 0x406   : > { %v2370_v26 = vpop.f32.mrb[12].mxu0 }
 0x407   : > { %2456 = vst [vmem:[#allocation4 + $0x30] sm:$0xff] %v2370_v26  ;;  %v11582_v27 = vpop.f32.mrb[13].mxu0  ;;  %v12405_v26 = vld [vmem:[#allocation12 + $0x80] sm:$0xff]  }
 0x408   : > { %v2482_v28 = vld [vmem:[#allocation4 + $0x24] sm:$0xff]  ;;  %v2373_v29 = vpop.f32.mrb[14].mxu0 }
 0x409   : > { %v2483_v30 = vadd.f32 %v14334_v8, %v2482_v28  ;;  %2457 = vst [vmem:[#allocation4 + $0x38] sm:$0xff] %v2373_v29  ;;  %v11583_v31 = vpop.f32.mrb[15].mxu0  ;;  %v12406_v28 = vld [vmem:[#allocation12 + $0x88] sm:$0xff]  }
 0x40b   : > { %v2484_v32 = vmax.f32 %v2483_v30, 0.0  ;;  %v12407_v30 = vld [vmem:[#allocation12 + $0x90] sm:$0xff]  }
 0x40c   : > { %v2508_v34 = vld [vmem:[#allocation2 + $0x10] ss:$2 sm:$0xff] }
 0x40d   : > { %2485 = vst [vmem:[#allocation2 + $0x1f] sm:$0xff] %v2484_v32  ;;  %v2515_v36 = vpack.c.bf16 %v2508_v34, %v2506_v33  ;;  %v12408_v32 = vld [vmem:[#allocation12 + $0x98] sm:$0xff]   ;;  %v12409_v34 = vld [vmem:[#allocation12 + $0xa0] sm:$0xff]  }
 0x40e   : > { %v2378_v37 = vpop.f32.mrb[124].mxu0 }
 0x40f   : > { %v11586_v38 = vpop.f32.mrb[125].mxu0  ;;  %11621 = vmatmul.mubr.bf16.vlgmr.msra.gmra.mrb[0].mxu1 %v2515_v36  ;;  %v12410_v36 = vld [vmem:[#allocation12 + $0xa8] sm:$0xff]   ;;  %v12411_v37 = vld [vmem:[#allocation12 + $0xb0] sm:$0xff]  }
 0x410   : > { %v2486_v39 = vld [vmem:[#allocation4 + $0x36] sm:$0xff]  ;;  %v2381_v40 = vpop.f32.mrb[126].mxu0  ;;  %11633 = vmatpush3.bf16.msra.mxu1 %v12397_v35  ;;  %11624 = vmatprep.mubr.msk.bf16.mxu1 %vm13569_vm0, %v14087_v13 }
 0x411   : > { %v2487_v42 = vadd.f32 %v14334_v8, %v2486_v39  ;;  %v2442_v43 = vadd.f32 %v2381_v40, %v2212_v62  ;;  %v11587_v44 = vpop.f32.mrb[127].mxu0  ;;  %11634 = vmatprep.subr.bf16.mxu1 %v14087_v13  ;;  %v12412_v38 = vld [vmem:[#allocation12 + $0xb8] sm:$0xff]   ;;  %v2793_v40 = vld [vmem:[#allocation2 + $0x2] ss:$2 sm:$0xff] }
 0x413   : > { %v2488_v45 = vmax.f32 %v2487_v42, 0.0  ;;  %v2491_v46 = vadd.f32 %v14334_v8, %v2442_v43  ;;  %v12414_v43 = vld [vmem:[#allocation12 + $0xc8] sm:$0xff]  }
 0x414   : > { %11635 = vmatpush3.bf16.msra.mxu1 %v12398_v41  ;;  %v2646_v24 = vld [vmem:[#allocation2 + $0x11] ss:$2 sm:$0xff]  ;;  %v2795_v39 = vld [vmem:[#allocation2 + $0x12] ss:$2 sm:$0xff] }
 0x415   : > { %2489 = vst [vmem:[#allocation2 + $0x29] sm:$0xff] %v2488_v45  ;;  %v2492_v48 = vmax.f32 %v2491_v46, 0.0  ;;  %11636 = vmatprep.subr.bf16.mxu1 %v14087_v13  ;;  %v2653_v27 = vpack.c.bf16 %v2646_v24, %v2644_v25  ;;  %v12413_v41 = vld [vmem:[#allocation12 + $0xc0] sm:$0xff]   ;;  %v2802_v42 = vpack.c.bf16 %v2795_v39, %v2793_v40  ;;  %v12415_v46 = vld [vmem:[#allocation12 + $0xd0] sm:$0xff]   ;;  %v12436_v24 = vld [vmem:[#allocation12 + $0x178] sm:$0xff]  }
 0x416   : > { %v2386_v49 = vpop.f32.mrb[20].mxu0  ;;  %v12444_v39 = vld [vmem:[#allocation12 + $0x1b8] sm:$0xff]  }
 0x417   : > { %2493 = vst [vmem:[#allocation2 + $0x33] sm:$0xff] %v2492_v48  ;;  %v11590_v50 = vpop.f32.mrb[21].mxu0  ;;  %v12416_v48 = vld [vmem:[#allocation12 + $0xd8] sm:$0xff]  }
 0x418   : > { %v2389_v51 = vpop.f32.mrb[22].mxu0  ;;  %11637 = vmatpush3.bf16.msra.mxu1 %v12399_v47  ;;  %v12417_v50 = vld [vmem:[#allocation12 + $0xe0] sm:$0xff]  }
 0x419   : > { %2461 = vst [vmem:[#allocation4 + $0x58] sm:$0xff] %v2389_v51  ;;  %v11591_v53 = vpop.f32.mrb[23].mxu0  ;;  %11638 = vmatprep.subr.bf16.mxu1 %v14087_v13 }
 0x41a   : > { %v12419_v53 = vld [vmem:[#allocation12 + $0xf0] sm:$0xff]  }
 0x41c   : > { %11639 = vmatpush3.bf16.msra.mxu1 %v12400_v52  ;;  %v2510_v17 = vld [vmem:[#allocation2 + $0x20] ss:$2 sm:$0xff]  ;;  %v2648_v29 = vld [vmem:[#allocation2 + $0x21] ss:$2 sm:$0xff] }
 0x41d   : > { %11640 = vmatprep.subr.bf16.mxu1 %v14087_v13  ;;  %v2797_v45 = vld [vmem:[#allocation2 + $0x22] ss:$2 sm:$0xff] }
 0x41e   : > { %v2394_v55 = vpop.f32.mrb[24].mxu0  ;;  %v12418_v52 = vld [vmem:[#allocation12 + $0xe8] sm:$0xff]  }
 0x41f   : > { %2462 = vst [vmem:[#allocation4 + $0x60] sm:$0xff] %v2394_v55  ;;  %v11594_v56 = vpop.f32.mrb[25].mxu0  ;;  %v2944_v55 = vld [vmem:[#allocation2 + $0x1a] ss:$2 sm:$0xff] }
 0x420   : > { %v2397_v57 = vpop.f32.mrb[26].mxu0  ;;  %11641 = vmatpush3.bf16.msra.mxu1 %v12401_v54  ;;  %v12420_v54 = vld [vmem:[#allocation12 + $0xf8] sm:$0xff]   ;;  %v3391_v40 = vld [vmem:[#allocation2 + $0x24] ss:$2 sm:$0xff] }
 0x421   : > { %2463 = vst [vmem:[#allocation4 + $0x68] sm:$0xff] %v2397_v57  ;;  %v11595_v59 = vpop.f32.mrb[27].mxu0  ;;  %11642 = vmatprep.subr.bf16.mxu1 %v14087_v13  ;;  %v2942_v56 = vld [vmem:[#allocation2 + $0xa] ss:$2 sm:$0xff]  ;;  %v12421_v57 = vld [vmem:[#allocation12 + $0x100] sm:$0xff]  }
 0x422   : > { %v12422_v59 = vld [vmem:[#allocation12 + $0x108] sm:$0xff]  }
 0x423   : > { %v3242_v25 = vld [vmem:[#allocation2 + $0x1c] ss:$2 sm:$0xff] }
 0x424   : > { %11643 = vmatpush3.bf16.msra.mxu1 %v12402_v58  ;;  %v2951_v58 = vpack.c.bf16 %v2944_v55, %v2942_v56  ;;  %v12452_v55 = vld [vmem:[#allocation12 + $0x1f8] sm:$0xff]   ;;  %v3540_v56 = vld [vmem:[#allocation2 + $0x25] ss:$2 sm:$0xff] }
 0x425   : > { %11644 = vmatprep.subr.bf16.mxu1 %v14087_v13 }
 0x426   : > { %v2494_v61 = vld [vmem:[#allocation4 + $0x5a] sm:$0xff]  ;;  %v2402_v62 = vpop.f32.mrb[28].mxu0 }
 0x427   : > { %v2495_v63 = vadd.f32 %v14334_v8, %v2494_v61  ;;  %2464 = vst [vmem:[#allocation4 + $0x70] sm:$0xff] %v2402_v62  ;;  %v11598_v1 = vpop.f32.mrb[29].mxu0  ;;  %v2946_v61 = vld [vmem:[#allocation2 + $0x2a] ss:$2 sm:$0xff] }
 0x428   : > { %v2405_v2 = vpop.f32.mrb[30].mxu0  ;;  %11645 = vmatpush3.bf16.msra.mxu1 %v12403_v60  ;;  %v12423_v62 = vld [vmem:[#allocation12 + $0x110] sm:$0xff]   ;;  %v12424_v1 = vld [vmem:[#allocation12 + $0x118] sm:$0xff]  }
 0x429   : > { %v2496_v4 = vmax.f32 %v2495_v63, 0.0  ;;  %2465 = vst [vmem:[#allocation4 + $0x78] sm:$0xff] %v2405_v2  ;;  %v11599_v5 = vpop.f32.mrb[31].mxu0  ;;  %11646 = vmatprep.subr.bf16.mxu1 %v14087_v13 }
 0x42a   : > { %v12426_v5 = vld [vmem:[#allocation12 + $0x128] sm:$0xff]  }
 0x42b   : > { %2497 = vst [vmem:[#allocation2 + $0x3d] sm:$0xff] %v2496_v4 }
 0x42c   : > { %11647 = vmatpush3.bf16.msra.mxu1 %v12404_v0  ;;  %v12425_v0 = vld [vmem:[#allocation12 + $0x120] sm:$0xff]  }
 0x42d   : > { %11660 = vmatprep.subr.bf16.mxu1 %v14087_v13 }
 0x42e   : > { %v2498_v6 = vld [vmem:[#allocation4 + $0x6c] sm:$0xff]  ;;  %v2410_v7 = vpop.f32.mrb[128].mxu0 }
 0x42f   : > { %v2499_v10 = vadd.f32 %v14334_v8, %v2498_v6  ;;  %v2449_v11 = vadd.f32 %v2432_v9, %v2410_v7  ;;  %v11602_v12 = vpop.f32.mrb[129].mxu0  ;;  %v12427_v6 = vld [vmem:[#allocation12 + $0x130] sm:$0xff]   ;;  %v12428_v7 = vld [vmem:[#allocation12 + $0x138] sm:$0xff]  }
 0x430   : > { %v2413_v14 = vpop.f32.mrb[130].mxu0  ;;  %v3093_v9 = vld [vmem:[#allocation2 + $0x1b] ss:$2 sm:$0xff] }
 0x431   : > { %v2500_v15 = vmax.f32 %v2499_v10, 0.0  ;;  %2466 = vst [vmem:[#allocation4 + $0x80] sm:$0x3f] %v2449_v11  ;;  %v11603_v16 = vpop.f32.mrb[131].mxu0  ;;  %v3091_v10 = vld [vmem:[#allocation2 + $0xb] ss:$2 sm:$0xff] }
 0x432   : > { %v2512_v3 = vld [vmem:[#allocation2 + $0x30] ss:$2 sm:$0xff]  ;;  %v2514_v13 = vld [vmem:[#allocation2 + $0x40] ss:$2 sm:$0x3]  ;;  %v3100_v12 = vpack.c.bf16 %v3093_v9, %v3091_v10  ;;  %v12430_v14 = vld [vmem:[#allocation12 + $0x148] sm:$0xff]  }
 0x433   : > { %2501 = vst [vmem:[#allocation2 + $0x47] sm:$0xff] %v2500_v15  ;;  %v2516_v18 = vpack.c.bf16 %v2512_v3, %v2510_v17  ;;  %v2517_v22 = vpack.c.bf16 %v2514_v13, %v2514_v13  ;;  %v2652_v33 = vld [vmem:[#allocation2 + $0x41] ss:$2 sm:$0x3]  ;;  %v2799_v44 = vld [vmem:[#allocation2 + $0x32] ss:$2 sm:$0xff] }
 0x434   : > { %v2655_v35 = vpack.c.bf16 %v2652_v33, %v2652_v33  ;;  %v2803_v47 = vpack.c.bf16 %v2799_v44, %v2797_v45  ;;  %v2801_v49 = vld [vmem:[#allocation2 + $0x42] ss:$2 sm:$0x3]  ;;  %v3095_v16 = vld [vmem:[#allocation2 + $0x2b] ss:$2 sm:$0xff] }
 0x435   : > { %11625 = vmatmul.mubr.bf16.gmra.mrb[4].mxu1 %v2516_v18  ;;  %v2804_v51 = vpack.c.bf16 %v2801_v49, %v2801_v49  ;;  %v12429_v11 = vld [vmem:[#allocation12 + $0x140] sm:$0xff]   ;;  %v12431_v17 = vld [vmem:[#allocation12 + $0x150] sm:$0xff]   ;;  %v12432_v18 = vld [vmem:[#allocation12 + $0x158] sm:$0xff]  }
 0x436   : > { %11628 = vmatprep.mubr.msk.bf16.mxu1 %vm13569_vm0, %v14353_v19  ;;  %v12440_v33 = vld [vmem:[#allocation12 + $0x198] sm:$0xff]   ;;  %v12446_v44 = vld [vmem:[#allocation12 + $0x1c8] sm:$0xff]  }
 0x437   : > { %v12448_v49 = vld [vmem:[#allocation12 + $0x1d8] sm:$0xff]  }
 0x438   : > { %v2502_v20 = vld [vmem:[#allocation4 + $0x7e] sm:$0xff] }
 0x439   : > { %v2503_v21 = vadd.f32 %v14334_v8, %v2502_v20  ;;  %v2650_v8 = vld [vmem:[#allocation2 + $0x31] ss:$2 sm:$0xff] }
 0x43a   : > { %v2654_v31 = vpack.c.bf16 %v2650_v8, %v2648_v29  ;;  %v2948_v60 = vld [vmem:[#allocation2 + $0x3a] ss:$2 sm:$0xff]  ;;  %v2950_v2 = vld [vmem:[#allocation2 + $0x4a] ss:$2 sm:$0x3] }
 0x43b   : > { %v2504_v23 = vmax.f32 %v2503_v21, 0.0  ;;  %v2952_v63 = vpack.c.bf16 %v2948_v60, %v2946_v61  ;;  %v2953_v4 = vpack.c.bf16 %v2950_v2, %v2950_v2  ;;  %v3097_v15 = vld [vmem:[#allocation2 + $0x3b] ss:$2 sm:$0xff]  ;;  %v3099_v13 = vld [vmem:[#allocation2 + $0x4b] ss:$2 sm:$0x3] }
 0x43c   : > { %v3101_v3 = vpack.c.bf16 %v3097_v15, %v3095_v16  ;;  %v12433_v20 = vld [vmem:[#allocation12 + $0x160] sm:$0xff]   ;;  %v3102_v21 = vpack.c.bf16 %v3099_v13, %v3099_v13  ;;  %v12438_v8 = vld [vmem:[#allocation12 + $0x188] sm:$0xff]   ;;  %v12456_v2 = vld [vmem:[#allocation12 + $0x218] sm:$0xff]  }
 0x43d   : > { %11629 = vmatmul.mubr.bf16.gmra.mrb[8].mxu1 %v2517_v22  ;;  %2505 = vst [vmem:[#allocation2 + $0x51] sm:$0xff] %v2504_v23  ;;  %v12434_v22 = vld [vmem:[#allocation12 + $0x168] sm:$0xff]   ;;  %v12435_v23 = vld [vmem:[#allocation12 + $0x170] sm:$0xff]   ;;  %v3687_v16 = vld [vmem:[#allocation2 + $0x16] ss:$2 sm:$0xff] }
 0x43e   : > { %11648 = vmatprep.mubr.msk.bf16.mxu1 %vm13569_vm0, %v14353_v19  ;;  %v3246_v29 = vld [vmem:[#allocation2 + $0x3c] ss:$2 sm:$0xff] }
 0x43f   : > { %v12454_v60 = vld [vmem:[#allocation12 + $0x208] sm:$0xff]  }
 0x440   : > { %v3689_v15 = vld [vmem:[#allocation2 + $0x26] ss:$2 sm:$0xff] }
 0x444   : > { %v3395_v45 = vld [vmem:[#allocation2 + $0x44] ss:$2 sm:$0xff]  ;;  %v3544_v61 = vld [vmem:[#allocation2 + $0x45] ss:$2 sm:$0xff] }
 0x445   : > { %11649 = vmatmul.mubr.bf16.vlgmr.msra.gmra.mrb[0].mxu1 %v2653_v27  ;;  %v12437_v27 = vld [vmem:[#allocation12 + $0x180] sm:$0xff]   ;;  %v3693_v13 = vld [vmem:[#allocation2 + $0x46] ss:$2 sm:$0xff] }
 0x446   : > { %11661 = vmatpush3.bf16.msra.mxu1 %v12405_v26  ;;  %11652 = vmatprep.mubr.msk.bf16.mxu1 %vm13569_vm0, %v14353_v19  ;;  %v3240_v26 = vld [vmem:[#allocation2 + $0xc] ss:$2 sm:$0xff] }
 0x447   : > { %11662 = vmatprep.subr.bf16.mxu1 %v14353_v19 }
 0x44a   : > { %11663 = vmatpush3.bf16.msra.mxu1 %v12406_v28  ;;  %v3249_v28 = vpack.c.bf16 %v3242_v25, %v3240_v26  ;;  %v3695_v26 = vld [vmem:[#allocation2 + $0x56] ss:$2 sm:$0x3] }
 0x44b   : > { %11664 = vmatprep.subr.bf16.mxu1 %v14353_v19 }
 0x44d   : > { %11653 = vmatmul.mubr.bf16.gmra.mrb[4].mxu1 %v2654_v31  ;;  %v12439_v31 = vld [vmem:[#allocation12 + $0x190] sm:$0xff]  }
 0x44e   : > { %11665 = vmatpush3.bf16.msra.mxu1 %v12407_v30  ;;  %11656 = vmatprep.mubr.msk.bf16.mxu1 %vm13569_vm0, %v14353_v19  ;;  %v3244_v30 = vld [vmem:[#allocation2 + $0x2c] ss:$2 sm:$0xff] }
 0x44f   : > { %11666 = vmatprep.subr.bf16.mxu1 %v14353_v19 }
 0x452   : > { %11667 = vmatpush3.bf16.msra.mxu1 %v12408_v32  ;;  %v3250_v32 = vpack.c.bf16 %v3246_v29, %v3244_v30 }
 0x453   : > { %11668 = vmatprep.subr.bf16.mxu1 %v14353_v19 }
 0x455   : > { %11657 = vmatmul.mubr.bf16.gmra.mrb[12].mxu1 %v2655_v35  ;;  %v12441_v35 = vld [vmem:[#allocation12 + $0x1a0] sm:$0xff]  }
 0x456   : > { %11669 = vmatpush3.bf16.msra.mxu1 %v12409_v34  ;;  %11676 = vmatprep.mubr.msk.bf16.mxu1 %vm13569_vm0, %v14353_v19  ;;  %v3248_v34 = vld [vmem:[#allocation2 + $0x4c] ss:$2 sm:$0x3] }
 0x457   : > { %11670 = vmatprep.subr.bf16.mxu1 %v14353_v19 }
 0x45a   : > { %11671 = vmatpush3.bf16.msra.mxu1 %v12410_v36  ;;  %v3251_v36 = vpack.c.bf16 %v3248_v34, %v3248_v34 }
 0x45b   : > { %11672 = vmatprep.subr.bf16.mxu1 %v14353_v19 }
 0x45e   : > { %11673 = vmatpush3.bf16.msra.mxu1 %v12411_v37  ;;  %v12442_v37 = vld [vmem:[#allocation12 + $0x1a8] sm:$0xff]  }
 0x45f   : > { %11674 = vmatprep.subr.bf16.mxu1 %v14353_v19 }
 0x462   : > { %11675 = vmatpush3.bf16.msra.mxu1 %v12412_v38  ;;  %v12443_v38 = vld [vmem:[#allocation12 + $0x1b0] sm:$0xff]  }
 0x463   : > { %11688 = vmatprep.subr.bf16.mxu1 %v14353_v19 }
 0x465   : > { %11677 = vmatmul.mubr.bf16.vlgmr.msra.gmra.mrb[0].mxu1 %v2802_v42  ;;  %v12445_v42 = vld [vmem:[#allocation12 + $0x1c0] sm:$0xff]  }
 0x466   : > { %11689 = vmatpush3.bf16.msra.mxu1 %v12413_v41  ;;  %11680 = vmatprep.mubr.msk.bf16.mxu1 %vm13569_vm0, %v14353_v19  ;;  %v3389_v41 = vld [vmem:[#allocation2 + $0x14] ss:$2 sm:$0xff] }
 0x467   : > { %11690 = vmatprep.subr.bf16.mxu1 %v14353_v19 }
 0x46a   : > { %11691 = vmatpush3.bf16.msra.mxu1 %v12414_v43  ;;  %v3398_v43 = vpack.c.bf16 %v3391_v40, %v3389_v41  ;;  %v12463_v40 = vld [vmem:[#allocation15 + $0x10] sm:$0xff]   ;;  %v12464_v41 = vld [vmem:[#allocation15 + $0x18] sm:$0xff]  }
 0x46b   : > { %11692 = vmatprep.subr.bf16.mxu1 %v14353_v19 }
 0x46d   : > { %11681 = vmatmul.mubr.bf16.gmra.mrb[4].mxu1 %v2803_v47  ;;  %v12447_v47 = vld [vmem:[#allocation12 + $0x1d0] sm:$0xff]  }
 0x46e   : > { %11693 = vmatpush3.bf16.msra.mxu1 %v12415_v46  ;;  %11684 = vmatprep.mubr.msk.bf16.mxu1 %vm13569_vm0, %v14353_v19  ;;  %v3393_v46 = vld [vmem:[#allocation2 + $0x34] ss:$2 sm:$0xff] }
 0x46f   : > { %11694 = vmatprep.subr.bf16.mxu1 %v14353_v19 }
 0x472   : > { %11695 = vmatpush3.bf16.msra.mxu1 %v12416_v48  ;;  %v3399_v48 = vpack.c.bf16 %v3395_v45, %v3393_v46 }
 0x473   : > { %11696 = vmatprep.subr.bf16.mxu1 %v14353_v19 }
 0x475   : > { %11685 = vmatmul.mubr.bf16.gmra.mrb[16].mxu1 %v2804_v51  ;;  %v12449_v51 = vld [vmem:[#allocation12 + $0x1e0] sm:$0xff]  }
 0x476   : > { %11697 = vmatpush3.bf16.msra.mxu1 %v12417_v50  ;;  %11704 = vmatprep.mubr.msk.bf16.mxu1 %vm13569_vm0, %v14353_v19  ;;  %v3397_v50 = vld [vmem:[#allocation2 + $0x54] ss:$2 sm:$0x3] }
 0x477   : > { %11698 = vmatprep.subr.bf16.mxu1 %v14353_v19 }
 0x47a   : > { %11699 = vmatpush3.bf16.msra.mxu1 %v12418_v52  ;;  %v3400_v52 = vpack.c.bf16 %v3397_v50, %v3397_v50  ;;  %v12467_v50 = vld [vmem:[#allocation15 + $0x30] sm:$0xff]  }
 0x47b   : > { %11700 = vmatprep.subr.bf16.mxu1 %v14353_v19 }
 0x47e   : > { %11701 = vmatpush3.bf16.msra.mxu1 %v12419_v53  ;;  %v12450_v53 = vld [vmem:[#allocation12 + $0x1e8] sm:$0xff]  }
 0x47f   : > { %11702 = vmatprep.subr.bf16.mxu1 %v14353_v19 }
 0x482   : > { %11703 = vmatpush3.bf16.msra.mxu1 %v12420_v54  ;;  %v12451_v54 = vld [vmem:[#allocation12 + $0x1f0] sm:$0xff]  }
 0x483   : > { %11716 = vmatprep.subr.bf16.mxu1 %v14353_v19 }
 0x485   : > { %11705 = vmatmul.mubr.bf16.vlgmr.msra.gmra.mrb[0].mxu1 %v2951_v58  ;;  %v12453_v58 = vld [vmem:[#allocation12 + $0x200] sm:$0xff]  }
 0x486   : > { %11717 = vmatpush3.bf16.msra.mxu1 %v12421_v57  ;;  %11708 = vmatprep.mubr.msk.bf16.mxu1 %vm13569_vm0, %v14353_v19  ;;  %v3538_v57 = vld [vmem:[#allocation2 + $0x15] ss:$2 sm:$0xff] }
 0x487   : > { %11718 = vmatprep.subr.bf16.mxu1 %v14353_v19 }
 0x48a   : > { %11719 = vmatpush3.bf16.msra.mxu1 %v12422_v59  ;;  %v3547_v59 = vpack.c.bf16 %v3540_v56, %v3538_v57 }
 0x48b   : > { %11720 = vmatprep.subr.bf16.mxu1 %v14353_v19 }
 0x48d   : > { %11709 = vmatmul.mubr.bf16.gmra.mrb[4].mxu1 %v2952_v63  ;;  %v12455_v63 = vld [vmem:[#allocation12 + $0x210] sm:$0xff]  }
 0x48e   : > { %11721 = vmatpush3.bf16.msra.mxu1 %v12423_v62  ;;  %11712 = vmatprep.mubr.msk.bf16.mxu1 %vm13569_vm0, %v14353_v19  ;;  %v3542_v62 = vld [vmem:[#allocation2 + $0x35] ss:$2 sm:$0xff] }
 0x48f   : > { %11722 = vmatprep.subr.bf16.mxu1 %v14353_v19 }
 0x492   : > { %11723 = vmatpush3.bf16.msra.mxu1 %v12424_v1  ;;  %v3548_v1 = vpack.c.bf16 %v3544_v61, %v3542_v62 }
 0x493   : > { %11724 = vmatprep.subr.bf16.mxu1 %v14353_v19 }
 0x495   : > { %11713 = vmatmul.mubr.bf16.gmra.mrb[20].mxu1 %v2953_v4  ;;  %v3546_v4 = vld [vmem:[#allocation2 + $0x55] ss:$2 sm:$0x3] }
 0x496   : > { %11725 = vmatpush3.bf16.msra.mxu1 %v12425_v0  ;;  %11732 = vmatprep.mubr.msk.bf16.mxu1 %vm13569_vm0, %v14353_v19  ;;  %v3549_v10 = vpack.c.bf16 %v3546_v4, %v3546_v4 }
 0x497   : > { %11726 = vmatprep.subr.bf16.mxu1 %v14353_v19 }
 0x49a   : > { %11727 = vmatpush3.bf16.msra.mxu1 %v12426_v5 }
 0x49b   : > { %11728 = vmatprep.subr.bf16.mxu1 %v14353_v19 }
 0x49e   : > { %11729 = vmatpush3.bf16.msra.mxu1 %v12427_v6 }
 0x49f   : > { %11730 = vmatprep.subr.bf16.mxu1 %v14353_v19 }
 0x4a2   : > { %11731 = vmatpush3.bf16.msra.mxu1 %v12428_v7  ;;  %v12457_v7 = vld [vmem:[#allocation12 + $0x220] sm:$0xff]  }
 0x4a3   : > { %11744 = vmatprep.subr.bf16.mxu1 %v14353_v19 }
 0x4a5   : > { %11733 = vmatmul.mubr.bf16.vlgmr.msra.gmra.mrb[0].mxu1 %v3100_v12  ;;  %v12459_v12 = vld [vmem:[#allocation12 + $0x230] sm:$0xff]  }
 0x4a6   : > { %11745 = vmatpush3.bf16.msra.mxu1 %v12429_v11  ;;  %11736 = vmatprep.mubr.msk.bf16.mxu1 %vm13569_vm0, %v14353_v19  ;;  %v12458_v11 = vld [vmem:[#allocation12 + $0x228] sm:$0xff]  }
 0x4a7   : > { %11746 = vmatprep.subr.bf16.mxu1 %v14353_v19 }
 0x4aa   : > { %11747 = vmatpush3.bf16.msra.mxu1 %v12430_v14  ;;  %v12460_v14 = vld [vmem:[#allocation12 + $0x238] sm:$0xff]  }
 0x4ab   : > { %11748 = vmatprep.subr.bf16.mxu1 %v14353_v19 }
 0x4ad   : > { %11737 = vmatmul.mubr.bf16.gmra.mrb[4].mxu1 %v3101_v3 }
 0x4ae   : > { %11749 = vmatpush3.bf16.msra.mxu1 %v12431_v17  ;;  %11740 = vmatprep.mubr.msk.bf16.mxu1 %vm13569_vm0, %v14353_v19  ;;  %v3696_v17 = vpack.c.bf16 %v3689_v15, %v3687_v16 }
 0x4af   : > { %11750 = vmatprep.subr.bf16.mxu1 %v14353_v19 }
 0x4b2   : > { %11751 = vmatpush3.bf16.msra.mxu1 %v12432_v18 }
 0x4b3   : > { %11752 = vmatprep.subr.bf16.mxu1 %v14353_v19 }
 0x4b5   : > { %11741 = vmatmul.mubr.bf16.gmra.mrb[24].mxu1 %v3102_v21 }
 0x4b6   : > { %11753 = vmatpush3.bf16.msra.mxu1 %v12433_v20  ;;  %11760 = vmatprep.mubr.msk.bf16.mxu1 %vm13569_vm0, %v14353_v19 }
 0x4b7   : > { %11754 = vmatprep.subr.bf16.mxu1 %v14353_v19 }
 0x4ba   : > { %11755 = vmatpush3.bf16.msra.mxu1 %v12434_v22 }
 0x4bb   : > { %11756 = vmatprep.subr.bf16.mxu1 %v14353_v19 }
 0x4be   : > { %11757 = vmatpush3.bf16.msra.mxu1 %v12435_v23  ;;  %v3691_v23 = vld [vmem:[#allocation2 + $0x36] ss:$2 sm:$0xff] }
 0x4bf   : > { %11758 = vmatprep.subr.bf16.mxu1 %v14353_v19  ;;  %v3697_v25 = vpack.c.bf16 %v3693_v13, %v3691_v23 }
 0x4c2   : > { %11759 = vmatpush3.bf16.msra.mxu1 %v12436_v24 }
 0x4c3   : > { %11772 = vmatprep.subr.bf16.mxu1 %v14353_v19 }
 0x4c5   : > { %11761 = vmatmul.mubr.bf16.vlgmr.msra.gmra.mrb[0].mxu1 %v3249_v28 }
 0x4c6   : > { %11773 = vmatpush3.bf16.msra.mxu1 %v12437_v27  ;;  %11764 = vmatprep.mubr.msk.bf16.mxu1 %vm13569_vm0, %v14353_v19  ;;  %v3698_v27 = vpack.c.bf16 %v3695_v26, %v3695_v26 }
 0x4c7   : > { %11774 = vmatprep.subr.bf16.mxu1 %v14353_v19 }
 0x4ca   : > { %11775 = vmatpush3.bf16.msra.mxu1 %v12438_v8 }
 0x4cb   : > { %11776 = vmatprep.subr.bf16.mxu1 %v14353_v19 }
 0x4cd   : > { %11765 = vmatmul.mubr.bf16.gmra.mrb[4].mxu1 %v3250_v32 }
 0x4ce   : > { %11777 = vmatpush3.bf16.msra.mxu1 %v12439_v31  ;;  %11768 = vmatprep.mubr.msk.bf16.mxu1 %vm13569_vm0, %v14353_v19 }
 0x4cf   : > { %11778 = vmatprep.subr.bf16.mxu1 %v14353_v19 }
 0x4d2   : > { %11779 = vmatpush3.bf16.msra.mxu1 %v12440_v33 }
 0x4d3   : > { %11780 = vmatprep.subr.bf16.mxu1 %v14353_v19 }
 0x4d5   : > { %11769 = vmatmul.mubr.bf16.gmra.mrb[28].mxu1 %v3251_v36 }
 0x4d6   : > { %11781 = vmatpush3.bf16.msra.mxu1 %v12441_v35  ;;  %11788 = vmatprep.mubr.msk.bf16.mxu1 %vm13569_vm0, %v14353_v19 }
 0x4d7   : > { %11782 = vmatprep.subr.bf16.mxu1 %v14353_v19 }
 0x4da   : > { %11783 = vmatpush3.bf16.msra.mxu1 %v12442_v37 }
 0x4db   : > { %11784 = vmatprep.subr.bf16.mxu1 %v14353_v19 }
 0x4de   : > { %11785 = vmatpush3.bf16.msra.mxu1 %v12443_v38 }
 0x4df   : > { %11786 = vmatprep.subr.bf16.mxu1 %v14353_v19 }
 0x4e2   : > { %11787 = vmatpush3.bf16.msra.mxu1 %v12444_v39  ;;  %v12461_v39 = vld [vmem:[#allocation15] sm:$0xff]  }
 0x4e3   : > { %11800 = vmatprep.subr.bf16.mxu1 %v14353_v19 }
 0x4e5   : > { %11789 = vmatmul.mubr.bf16.vlgmr.msra.gmra.mrb[0].mxu1 %v3398_v43 }
 0x4e6   : > { %11801 = vmatpush3.bf16.msra.mxu1 %v12445_v42  ;;  %11792 = vmatprep.mubr.msk.bf16.mxu1 %vm13569_vm0, %v14353_v19  ;;  %v12465_v42 = vld [vmem:[#allocation15 + $0x20] sm:$0xff]  }
 0x4e7   : > { %11802 = vmatprep.subr.bf16.mxu1 %v14353_v19 }
 0x4ea   : > { %11803 = vmatpush3.bf16.msra.mxu1 %v12446_v44 }
 0x4eb   : > { %11804 = vmatprep.subr.bf16.mxu1 %v14353_v19 }
 0x4ed   : > { %11793 = vmatmul.mubr.bf16.gmra.mrb[4].mxu1 %v3399_v48 }
 0x4ee   : > { %11805 = vmatpush3.bf16.msra.mxu1 %v12447_v47  ;;  %11796 = vmatprep.mubr.msk.bf16.mxu1 %vm13569_vm0, %v14353_v19 }
 0x4ef   : > { %11806 = vmatprep.subr.bf16.mxu1 %v14353_v19 }
 0x4f2   : > { %11807 = vmatpush3.bf16.msra.mxu1 %v12448_v49  ;;  %v12466_v49 = vld [vmem:[#allocation15 + $0x28] sm:$0xff]  }
 0x4f3   : > { %11808 = vmatprep.subr.bf16.mxu1 %v14353_v19 }
 0x4f5   : > { %11797 = vmatmul.mubr.bf16.gmra.mrb[32].mxu1 %v3400_v52  ;;  %v14461_v52 = vld [vmem:[#allocation15 + $0x40] sm:$0xff]  }
 0x4f6   : > { %11809 = vmatpush3.bf16.msra.mxu1 %v12449_v51  ;;  %11816 = vmatprep.mubr.msk.bf16.mxu1 %vm13569_vm0, %v14353_v19  ;;  %v12468_v51 = vld [vmem:[#allocation15 + $0x38] sm:$0xff]  }
 0x4f7   : > { %11810 = vmatprep.subr.bf16.mxu1 %v14353_v19 }
 0x4fa   : > { %11811 = vmatpush3.bf16.msra.mxu1 %v12450_v53 }
 0x4fb   : > { %11812 = vmatprep.subr.bf16.mxu1 %v14353_v19 }
 0x4fe   : > { %11813 = vmatpush3.bf16.msra.mxu1 %v12451_v54 }
 0x4ff   : > { %11814 = vmatprep.subr.bf16.mxu1 %v14353_v19 }
 0x502   : > { %11815 = vmatpush3.bf16.msra.mxu1 %v12452_v55 }
 0x503   : > { %11828 = vmatprep.subr.bf16.mxu1 %v14353_v19 }
 0x505   : > { %11817 = vmatmul.mubr.bf16.vlgmr.msra.gmra.mrb[0].mxu1 %v3547_v59 }
 0x506   : > { %11829 = vmatpush3.bf16.msra.mxu1 %v12453_v58  ;;  %11820 = vmatprep.mubr.msk.bf16.mxu1 %vm13569_vm0, %v14353_v19 }
 0x507   : > { %11830 = vmatprep.subr.bf16.mxu1 %v14353_v19 }
 0x50a   : > { %11831 = vmatpush3.bf16.msra.mxu1 %v12454_v60 }
 0x50b   : > { %11832 = vmatprep.subr.bf16.mxu1 %v14353_v19 }
 0x50d   : > { %11821 = vmatmul.mubr.bf16.gmra.mrb[4].mxu1 %v3548_v1 }
 0x50e   : > { %11833 = vmatpush3.bf16.msra.mxu1 %v12455_v63  ;;  %11824 = vmatprep.mubr.msk.bf16.mxu1 %vm13569_vm0, %v14353_v19 }
 0x50f   : > { %11834 = vmatprep.subr.bf16.mxu1 %v14353_v19 }
 0x510   : > { %v2632_v0 = vpop.f32.mrb[8].mxu1 }
 0x511   : > { %2642 = vst [vmem:[#allocation5 + $0x20] sm:$0x3] %v2632_v0  ;;  %v11630_v5 = vpop.f32.mrb[9].mxu1 }
 0x512   : > { %11835 = vmatpush3.bf16.msra.mxu1 %v12456_v2  ;;  %v2635_v6 = vpop.f32.mrb[10].mxu1 }
 0x513   : > { %v11631_v9 = vpop.f32.mrb[11].mxu1  ;;  %11836 = vmatprep.subr.bf16.mxu1 %v14353_v19 }
 0x515   : > { %11825 = vmatmul.mubr.bf16.gmra.mrb[36].mxu1 %v3549_v10 }
 0x516   : > { %11837 = vmatpush3.bf16.msra.mxu1 %v12457_v7  ;;  %11844 = vmatprep.mubr.msk.bf16.mxu1 %vm13569_vm0, %v14353_v19 }
 0x517   : > { %11838 = vmatprep.subr.bf16.mxu1 %v14353_v19 }
 0x518   : > { %v2781_v18 = vld [vmem:[#allocation5 + $0x20] sm:$0x3] }
 0x51a   : > { %11839 = vmatpush3.bf16.msra.mxu1 %v12458_v11 }
 0x51b   : > { %11840 = vmatprep.subr.bf16.mxu1 %v14353_v19 }
 0x51e   : > { %11841 = vmatpush3.bf16.msra.mxu1 %v12459_v12 }
 0x51f   : > { %11842 = vmatprep.subr.bf16.mxu1 %v14353_v19 }
 0x522   : > { %11843 = vmatpush3.bf16.msra.mxu1 %v12460_v14  ;;  %v10395_v14 = vld [vmem:[#allocation13] ss:$0 sm:$0xff] }
 0x523   : > { %11856 = vmatprep.subr.bf16.mxu1 %v12461_v39 }
 0x525   : > { %11845 = vmatmul.mubr.bf16.vlgmr.msra.gmra.mrb[0].mxu1 %v3696_v17 }
 0x526   : > { %11848 = vmatprep.mubr.msk.bf16.mxu1 %vm13569_vm0, %v14353_v19  ;;  %11857 = vmatpush3.bf16.msra.mxu1 %v12461_v39 }
 0x528   : > { %v2771_v3 = vpop.f32.mrb[12].mxu1 }
 0x529   : > { %v2786_v20 = vadd.f32 %v2781_v18, %v2771_v3  ;;  %v11658_v21 = vpop.f32.mrb[13].mxu1 }
 0x52a   : > { %v2774_v22 = vpop.f32.mrb[14].mxu1 }
 0x52b   : > { %2791 = vst [vmem:[#allocation5 + $0x20] sm:$0x3] %v2786_v20  ;;  %v11659_v24 = vpop.f32.mrb[15].mxu1 }
 0x52d   : > { %11849 = vmatmul.mubr.bf16.gmra.mrb[4].mxu1 %v3697_v25 }
 0x52e   : > { %11852 = vmatprep.mubr.msk.bf16.mxu1 %vm13569_vm0, %v14353_v19  ;;  %v12462_v19 = vld [vmem:[#allocation15 + $0x8] sm:$0xff]  }
 0x52f   : > { %11858 = vmatprep.subr.bf16.mxu1 %v12462_v19 }
 0x530   : > { %11859 = vmatpush3.bf16.msra.mxu1 %v12462_v19 }
 0x531   : > { %11860 = vmatprep.subr.bf16.mxu1 %v12463_v40 }
 0x532   : > { %v2930_v8 = vld [vmem:[#allocation5 + $0x20] sm:$0x3] }
 0x534   : > { %11861 = vmatpush3.bf16.msra.mxu1 %v12463_v40  ;;  %v12470_v40 = vld [vmem:[#allocation15 + $0x48] sm:$0xff]  }
 0x535   : > { %11853 = vmatmul.mubr.bf16.gmra.mrb[40].mxu1 %v3698_v27  ;;  %11862 = vmatprep.subr.bf16.mxu1 %v12464_v41 }
 0x538   : > { %11863 = vmatpush3.bf16.msra.mxu1 %v12464_v41 }
 0x539   : > { %11864 = vmatprep.subr.bf16.mxu1 %v12465_v42 }
 0x53c   : > { %11865 = vmatpush3.bf16.msra.mxu1 %v12465_v42 }
 0x53d   : > { %11866 = vmatprep.subr.bf16.mxu1 %v12466_v49 }
 0x540   : > { %11867 = vmatpush3.bf16.msra.mxu1 %v12466_v49  ;;  %v12477_v49 = vld [vmem:[#allocation15 + $0x80] sm:$0xff]  }
 0x541   : > { %11868 = vmatprep.subr.bf16.mxu1 %v12467_v50 }
 0x544   : > { %11869 = vmatpush3.bf16.msra.mxu1 %v12467_v50 }
 0x545   : > { %11870 = vmatprep.subr.bf16.mxu1 %v12468_v51 }
 0x548   : > { %v2920_v28 = vpop.f32.mrb[16].mxu1  ;;  %11871 = vmatpush3.bf16.msra.mxu1 %v12468_v51 }
 0x549   : > { %v2935_v29 = vadd.f32 %v2930_v8, %v2920_v28  ;;  %v11686_v30 = vpop.f32.mrb[17].mxu1  ;;  %11876 = vmatprep.subr.bf16.mxu1 %v14461_v52 }
 0x54a   : > { %v2923_v31 = vpop.f32.mrb[18].mxu1 }
 0x54b   : > { %2940 = vst [vmem:[#allocation5 + $0x20] sm:$0x3] %v2935_v29  ;;  %v11687_v32 = vpop.f32.mrb[19].mxu1 }
 0x552   : > { %v3079_v34 = vld [vmem:[#allocation5 + $0x20] sm:$0x3] }
 0x568   : > { %v3069_v33 = vpop.f32.mrb[20].mxu1 }
 0x569   : > { %v3084_v35 = vadd.f32 %v3079_v34, %v3069_v33  ;;  %v11714_v36 = vpop.f32.mrb[21].mxu1 }
 0x56a   : > { %v3072_v37 = vpop.f32.mrb[22].mxu1 }
 0x56b   : > { %3089 = vst [vmem:[#allocation5 + $0x20] sm:$0x3] %v3084_v35  ;;  %v11715_v38 = vpop.f32.mrb[23].mxu1 }
 0x572   : > { %v3228_v44 = vld [vmem:[#allocation5 + $0x20] sm:$0x3] }
 0x588   : > { %v3218_v43 = vpop.f32.mrb[24].mxu1 }
 0x589   : > { %v3233_v45 = vadd.f32 %v3228_v44, %v3218_v43  ;;  %v11742_v46 = vpop.f32.mrb[25].mxu1  ;;  %v12471_v43 = vld [vmem:[#allocation15 + $0x50] sm:$0xff]   ;;  %v12472_v44 = vld [vmem:[#allocation15 + $0x58] sm:$0xff]  }
 0x58a   : > { %v3221_v47 = vpop.f32.mrb[26].mxu1  ;;  %v12474_v46 = vld [vmem:[#allocation15 + $0x68] sm:$0xff]  }
 0x58b   : > { %3238 = vst [vmem:[#allocation5 + $0x20] sm:$0x3] %v3233_v45  ;;  %v11743_v48 = vpop.f32.mrb[27].mxu1  ;;  %v12473_v45 = vld [vmem:[#allocation15 + $0x60] sm:$0xff]   ;;  %v12475_v47 = vld [vmem:[#allocation15 + $0x70] sm:$0xff]  }
 0x58c   : > { %v12476_v48 = vld [vmem:[#allocation15 + $0x78] sm:$0xff]  }
 0x592   : > { %v3377_v54 = vld [vmem:[#allocation5 + $0x20] sm:$0x3] }
 0x5a8   : > { %v3367_v53 = vpop.f32.mrb[28].mxu1 }
 0x5a9   : > { %v3382_v55 = vadd.f32 %v3377_v54, %v3367_v53  ;;  %v11770_v56 = vpop.f32.mrb[29].mxu1  ;;  %v12478_v54 = vld [vmem:[#allocation15 + $0x88] sm:$0xff]  }
 0x5aa   : > { %v3370_v57 = vpop.f32.mrb[30].mxu1  ;;  %v12479_v56 = vld [vmem:[#allocation15 + $0x90] sm:$0xff]  }
 0x5ab   : > { %3387 = vst [vmem:[#allocation5 + $0x20] sm:$0x3] %v3382_v55  ;;  %v11771_v58 = vpop.f32.mrb[31].mxu1  ;;  %v12480_v57 = vld [vmem:[#allocation15 + $0x98] sm:$0xff]  }
 0x5ac   : > { %v12481_v58 = vld [vmem:[#allocation15 + $0xa0] sm:$0xff]  }
 0x5b2   : > { %v3526_v60 = vld [vmem:[#allocation5 + $0x20] sm:$0x3] }
 0x5c8   : > { %v3516_v59 = vpop.f32.mrb[32].mxu1 }
 0x5c9   : > { %v3531_v61 = vadd.f32 %v3526_v60, %v3516_v59  ;;  %v11798_v62 = vpop.f32.mrb[33].mxu1  ;;  %v12482_v59 = vld [vmem:[#allocation15 + $0xa8] sm:$0xff]   ;;  %v12483_v60 = vld [vmem:[#allocation15 + $0xb0] sm:$0xff]  }
 0x5ca   : > { %v3519_v63 = vpop.f32.mrb[34].mxu1  ;;  %v12485_v62 = vld [vmem:[#allocation15 + $0xc0] sm:$0xff]  }
 0x5cb   : > { %3536 = vst [vmem:[#allocation5 + $0x20] sm:$0x3] %v3531_v61  ;;  %v11799_v1 = vpop.f32.mrb[35].mxu1  ;;  %v12484_v61 = vld [vmem:[#allocation15 + $0xb8] sm:$0xff]  }
 0x5d2   : > { %v3675_v0 = vld [vmem:[#allocation5 + $0x20] sm:$0x3] }
 0x5e8   : > { %v3665_v2 = vpop.f32.mrb[36].mxu1 }
 0x5e9   : > { %v3680_v4 = vadd.f32 %v3675_v0, %v3665_v2  ;;  %v11826_v5 = vpop.f32.mrb[37].mxu1 }
 0x5ea   : > { %v3668_v6 = vpop.f32.mrb[38].mxu1 }
 0x5eb   : > { %3685 = vst [vmem:[#allocation5 + $0x20] sm:$0x3] %v3680_v4  ;;  %v11827_v7 = vpop.f32.mrb[39].mxu1  ;;  %v12486_v4 = vld [vmem:[#allocation15 + $0xc8] sm:$0xff]   ;;  %v12487_v6 = vld [vmem:[#allocation15 + $0xd0] sm:$0xff]  }
 0x5ec   : > { %v12488_v7 = vld [vmem:[#allocation15 + $0xd8] sm:$0xff]  }
 0x5f2   : > { %v3824_v26 = vld [vmem:[#allocation5 + $0x20] sm:$0x3] }
 0x5f8   : > { %v3798_v9 = vpop.f32.mrb[0].mxu1 }
 0x5f9   : > { %3830 = vst [vmem:[#allocation5] sm:$0xff] %v3798_v9  ;;  %v11846_v10 = vpop.f32.mrb[1].mxu1  ;;  %v12489_v9 = vld [vmem:[#allocation15 + $0xe0] sm:$0xff]  }
 0x5fa   : > { %v3801_v11 = vpop.f32.mrb[2].mxu1  ;;  %v12490_v10 = vld [vmem:[#allocation15 + $0xe8] sm:$0xff]  }
 0x5fb   : > { %3831 = vst [vmem:[#allocation5 + $0x8] sm:$0xff] %v3801_v11  ;;  %v11847_v12 = vpop.f32.mrb[3].mxu1  ;;  %v12491_v11 = vld [vmem:[#allocation15 + $0xf0] sm:$0xff]  }
 0x5fc   : > { %v12492_v12 = vld [vmem:[#allocation15 + $0xf8] sm:$0xff]  }
 0x600   : > { %v3836_v15 = vld [vmem:[#allocation5] sm:$0xf]  ;;  %v3806_v16 = vpop.f32.mrb[4].mxu1 }
 0x601   : > { %v3843_v17 = vadd.f32 %v10395_v14, %v3836_v15  ;;  %3832 = vst [vmem:[#allocation5 + $0x10] sm:$0xff] %v3806_v16  ;;  %v11850_v3 = vpop.f32.mrb[5].mxu1 }
 0x602   : > { %v3846_v18 = vld [vmem:[#allocation5 + $0xa] sm:$0xf]  ;;  %v3809_v13 = vpop.f32.mrb[6].mxu1 }
 0x603   : > { %v3844_v20 = vmax.f32 %v3843_v17, 0.0  ;;  %v3847_v21 = vadd.f32 %v10395_v14, %v3846_v18  ;;  %3833 = vst [vmem:[#allocation5 + $0x18] sm:$0xff] %v3809_v13  ;;  %v11851_v22 = vpop.f32.mrb[7].mxu1  ;;  %v12494_v18 = vld [vmem:[#allocation15 + $0x108] sm:$0xff]  }
 0x604   : > { %v12497_v22 = vld [vmem:[#allocation15 + $0x120] sm:$0xff]  }
 0x605   : > { %3845 = vst [vmem:[#allocation3 + $0x7] sm:$0xf] %v3844_v20  ;;  %v3848_v23 = vmax.f32 %v3847_v21, 0.0  ;;  %v12495_v20 = vld [vmem:[#allocation15 + $0x110] sm:$0xff]   ;;  %v12496_v21 = vld [vmem:[#allocation15 + $0x118] sm:$0xff]  }
 0x607   : > { %3849 = vst [vmem:[#allocation3 + $0xd] sm:$0xf] %v3848_v23  ;;  %v12498_v23 = vld [vmem:[#allocation15 + $0x128] sm:$0xff]  }
 0x608   : > { %v3850_v24 = vld [vmem:[#allocation5 + $0x14] sm:$0xf]  ;;  %v3814_v25 = vpop.f32.mrb[40].mxu1 }
 0x609   : > { %v3851_v27 = vadd.f32 %v10395_v14, %v3850_v24  ;;  %v3829_v28 = vadd.f32 %v3824_v26, %v3814_v25  ;;  %v11854_v8 = vpop.f32.mrb[41].mxu1  ;;  %v12499_v24 = vld [vmem:[#allocation15 + $0x130] sm:$0xff]   ;;  %v12500_v25 = vld [vmem:[#allocation15 + $0x138] sm:$0xff]   ;;  %v12501_v26 = vld [vmem:[#allocation15 + $0x140] sm:$0xff]  }
 0x60a   : > { %v3817_v29 = vpop.f32.mrb[42].mxu1 }
 0x60b   : > { %v3852_v30 = vmax.f32 %v3851_v27, 0.0  ;;  %3834 = vst [vmem:[#allocation5 + $0x20] sm:$0x3] %v3829_v28  ;;  %v11855_v31 = vpop.f32.mrb[43].mxu1  ;;  %v12502_v29 = vld [vmem:[#allocation15 + $0x148] sm:$0xff]  }
 0x60c   : > { %v3858_v32 = vld [vmem:[#allocation3] sm:$0xff] }
 0x60d   : > { %3853 = vst [vmem:[#allocation3 + $0x13] sm:$0xf] %v3852_v30  ;;  %v3978_v19 = vld [vmem:[#allocation3 + $0x1] sm:$0xff] }
 0x60e   : > { %v14464_v33 = vld [vmem:[#allocation3 + $0x8] sm:$0xff]  ;;  %v12503_v31 = vld [vmem:[#allocation15 + $0x150] sm:$0xff]  }
 0x60f   : > { %v3861_v34 = vpack.c.bf16 %v14464_v33, %v3858_v32  ;;  %v3979_v36 = vld [vmem:[#allocation3 + $0x9] sm:$0xff] }
 0x610   : > { %v3981_v42 = vpack.c.bf16 %v3979_v36, %v3978_v19  ;;  %v4106_v51 = vld [vmem:[#allocation3 + $0xa] sm:$0xff]  ;;  %v4105_v53 = vld [vmem:[#allocation3 + $0x2] sm:$0xff] }
 0x611   : > { %11872 = vmatprep.mubr.bf16.mxu1 %v3861_v34  ;;  %v4108_v55 = vpack.c.bf16 %v4106_v51, %v4105_v53  ;;  %v4232_v0 = vld [vmem:[#allocation3 + $0x6] sm:$0xff]  ;;  %v12505_v34 = vld [vmem:[#allocation15 + $0x160] sm:$0xff]  }
 0x612   : > { %v3854_v35 = vld [vmem:[#allocation5 + $0x1e] sm:$0xf]  ;;  %v4359_v3 = vld [vmem:[#allocation3 + $0x7] sm:$0xff] }
 0x613   : > { %v3855_v37 = vadd.f32 %v10395_v14, %v3854_v35  ;;  %v12493_v14 = vld [vmem:[#allocation15 + $0x100] sm:$0xff]   ;;  %v12504_v32 = vld [vmem:[#allocation15 + $0x158] sm:$0xff]   ;;  %v12506_v35 = vld [vmem:[#allocation15 + $0x168] sm:$0xff]  }
 0x614   : > { %v3860_v38 = vld [vmem:[#allocation3 + $0x10] sm:$0x3f]  ;;  %v12507_v36 = vld [vmem:[#allocation15 + $0x170] sm:$0xff]  }
 0x615   : > { %v3862_v39 = vpack.c.bf16 %v3860_v38, %v3860_v38  ;;  %v3856_v41 = vmax.f32 %v3855_v37, 0.0  ;;  %v3980_v50 = vld [vmem:[#allocation3 + $0x11] sm:$0x3f] }
 0x616   : > { %v4107_v63 = vld [vmem:[#allocation3 + $0x12] sm:$0x3f] }
 0x617   : > { %11873 = vmatmul.mubr.bf16.vlgmr.msra.gmra.mrb[44].mxu1 %v3862_v39  ;;  %3857 = vst [vmem:[#allocation3 + $0x19] sm:$0xf] %v3856_v41  ;;  %v14468_v1 = vld [vmem:[#allocation3 + $0xe] sm:$0xff]  ;;  %v4109_v2 = vpack.c.bf16 %v4107_v63, %v4107_v63  ;;  %v12510_v41 = vld [vmem:[#allocation15 + $0x188] sm:$0xff]  }
 0x618   : > { %11877 = vmatpush3.bf16.msra.mxu1 %v14461_v52  ;;  %11892 = vmatprep.mubr.bf16.mxu1 %v3981_v42  ;;  %v3982_v52 = vpack.c.bf16 %v3980_v50, %v3980_v50  ;;  %v4235_v5 = vpack.c.bf16 %v14468_v1, %v4232_v0  ;;  %v4360_v16 = vld [vmem:[#allocation3 + $0xf] sm:$0xff] }
 0x619   : > { %11878 = vmatprep.subr.bf16.mxu1 %v12470_v40  ;;  %v4362_v13 = vpack.c.bf16 %v4360_v16, %v4359_v3  ;;  %v4487_v28 = vld [vmem:[#allocation3 + $0x10] sm:$0xff]  ;;  %v12524_v0 = vld [vmem:[#allocation15 + $0x1f8] sm:$0xff]   ;;  %v12531_v16 = vld [vmem:[#allocation15 + $0x230] sm:$0xff]  }
 0x61a   : > { %v4489_v30 = vpack.c.bf16 %v4487_v28, %v14464_v33  ;;  %v12508_v33 = vld [vmem:[#allocation15 + $0x178] sm:$0xff]   ;;  %v12509_v37 = vld [vmem:[#allocation15 + $0x180] sm:$0xff]  }
 0x61b   : > { %v4740_v53 = vld [vmem:[#allocation3 + $0xd] sm:$0xff] }
 0x61c   : > { %11879 = vmatpush3.bf16.msra.mxu1 %v12470_v40  ;;  %v4613_v40 = vld [vmem:[#allocation3 + $0xc] sm:$0xff] }
 0x61d   : > { %11880 = vmatprep.subr.bf16.mxu1 %v12471_v43 }
 0x61e   : > { %v4234_v15 = vld [vmem:[#allocation3 + $0x16] sm:$0x3f]  ;;  %v4615_v50 = vld [vmem:[#allocation3 + $0x1c] sm:$0x3f] }
 0x61f   : > { %v4236_v17 = vpack.c.bf16 %v4234_v15, %v4234_v15  ;;  %v4361_v27 = vld [vmem:[#allocation3 + $0x17] sm:$0x3f] }
 0x620   : > { %11881 = vmatpush3.bf16.msra.mxu1 %v12471_v43  ;;  %v4363_v8 = vpack.c.bf16 %v4361_v27, %v4361_v27  ;;  %v4488_v38 = vld [vmem:[#allocation3 + $0x18] sm:$0x3f]  ;;  %v12511_v43 = vld [vmem:[#allocation15 + $0x190] sm:$0xff]  }
 0x621   : > { %11882 = vmatprep.subr.bf16.mxu1 %v12472_v44  ;;  %v4614_v39 = vld [vmem:[#allocation3 + $0x14] sm:$0xff]  ;;  %v4490_v19 = vpack.c.bf16 %v4488_v38, %v4488_v38 }
 0x622   : > { %v4616_v42 = vpack.c.bf16 %v4614_v39, %v4613_v40  ;;  %v4741_v51 = vld [vmem:[#allocation3 + $0x15] sm:$0xff] }
 0x623   : > { %v12530_v15 = vld [vmem:[#allocation15 + $0x228] sm:$0xff]   ;;  %v12533_v40 = vld [vmem:[#allocation18] ss:$16 sps:$4 sm:$0xff]  }
 0x624   : > { %11883 = vmatpush3.bf16.msra.mxu1 %v12472_v44  ;;  %v12512_v44 = vld [vmem:[#allocation15 + $0x198] sm:$0xff]  }
 0x625   : > { %11884 = vmatprep.subr.bf16.mxu1 %v12473_v45 }
 0x628   : > { %11885 = vmatpush3.bf16.msra.mxu1 %v12473_v45  ;;  %v12513_v45 = vld [vmem:[#allocation15 + $0x1a0] sm:$0xff]  }
 0x629   : > { %11886 = vmatprep.subr.bf16.mxu1 %v12474_v46 }
 0x62c   : > { %11887 = vmatpush3.bf16.msra.mxu1 %v12474_v46  ;;  %v12514_v46 = vld [vmem:[#allocation15 + $0x1a8] sm:$0xff]  }
 0x62d   : > { %11888 = vmatprep.subr.bf16.mxu1 %v12475_v47 }
 0x630   : > { %11889 = vmatpush3.bf16.msra.mxu1 %v12475_v47  ;;  %v12515_v47 = vld [vmem:[#allocation15 + $0x1b0] sm:$0xff]  }
 0x631   : > { %11890 = vmatprep.subr.bf16.mxu1 %v12476_v48 }
 0x634   : > { %11891 = vmatpush3.bf16.msra.mxu1 %v12476_v48  ;;  %v12516_v48 = vld [vmem:[#allocation15 + $0x1b8] sm:$0xff]  }
 0x635   : > { %11896 = vmatprep.subr.bf16.mxu1 %v12477_v49 }
 0x637   : > { %11893 = vmatmul.mubr.bf16.vlgmr.msra.gmra.mrb[48].mxu1 %v3982_v52  ;;  %v4617_v52 = vpack.c.bf16 %v4615_v50, %v4615_v50 }
 0x638   : > { %11897 = vmatpush3.bf16.msra.mxu1 %v12477_v49  ;;  %11912 = vmatprep.mubr.bf16.mxu1 %v4108_v55  ;;  %v12517_v49 = vld [vmem:[#allocation15 + $0x1c0] sm:$0xff]   ;;  %v4743_v55 = vpack.c.bf16 %v4741_v51, %v4740_v53 }
 0x639   : > { %11898 = vmatprep.subr.bf16.mxu1 %v12478_v54  ;;  %v12550_v53 = vld [vmem:[#allocation18 + $0x144] ss:$16 sps:$4 sm:$0xff]  }
 0x63c   : > { %11899 = vmatpush3.bf16.msra.mxu1 %v12478_v54  ;;  %v12518_v54 = vld [vmem:[#allocation15 + $0x1c8] sm:$0xff]  }
 0x63d   : > { %11900 = vmatprep.subr.bf16.mxu1 %v12479_v56 }
 0x640   : > { %11901 = vmatpush3.bf16.msra.mxu1 %v12479_v56  ;;  %v12519_v56 = vld [vmem:[#allocation15 + $0x1d0] sm:$0xff]  }
 0x641   : > { %11902 = vmatprep.subr.bf16.mxu1 %v12480_v57 }
 0x644   : > { %11903 = vmatpush3.bf16.msra.mxu1 %v12480_v57  ;;  %v12520_v57 = vld [vmem:[#allocation15 + $0x1d8] sm:$0xff]  }
 0x645   : > { %11904 = vmatprep.subr.bf16.mxu1 %v12481_v58 }
 0x648   : > { %11905 = vmatpush3.bf16.msra.mxu1 %v12481_v58  ;;  %v12521_v58 = vld [vmem:[#allocation15 + $0x1e0] sm:$0xff]  }
 0x649   : > { %11906 = vmatprep.subr.bf16.mxu1 %v12482_v59 }
 0x64c   : > { %11907 = vmatpush3.bf16.msra.mxu1 %v12482_v59  ;;  %v12522_v59 = vld [vmem:[#allocation15 + $0x1e8] sm:$0xff]  }
 0x64d   : > { %11908 = vmatprep.subr.bf16.mxu1 %v12483_v60 }
 0x650   : > { %11909 = vmatpush3.bf16.msra.mxu1 %v12483_v60  ;;  %v12523_v60 = vld [vmem:[#allocation15 + $0x1f0] sm:$0xff]  }
 0x651   : > { %11910 = vmatprep.subr.bf16.mxu1 %v12484_v61 }
 0x654   : > { %11911 = vmatpush3.bf16.msra.mxu1 %v12484_v61 }
 0x655   : > { %11916 = vmatprep.subr.bf16.mxu1 %v12485_v62 }
 0x657   : > { %11913 = vmatmul.mubr.bf16.vlgmr.msra.gmra.mrb[52].mxu1 %v4109_v2 }
 0x658   : > { %11917 = vmatpush3.bf16.msra.mxu1 %v12485_v62  ;;  %11932 = vmatprep.mubr.bf16.mxu1 %v4235_v5  ;;  %v12525_v5 = vld [vmem:[#allocation15 + $0x200] sm:$0xff]  }
 0x659   : > { %11918 = vmatprep.subr.bf16.mxu1 %v12486_v4 }
 0x65c   : > { %11919 = vmatpush3.bf16.msra.mxu1 %v12486_v4  ;;  %v4742_v4 = vld [vmem:[#allocation3 + $0x1d] sm:$0x3f] }
 0x65d   : > { %11920 = vmatprep.subr.bf16.mxu1 %v12487_v6 }
 0x660   : > { %11921 = vmatpush3.bf16.msra.mxu1 %v12487_v6  ;;  %v4744_v6 = vpack.c.bf16 %v4742_v4, %v4742_v4  ;;  %v12557_v4 = vld [vmem:[#allocation18 + $0x80] ss:$16 sps:$4 sm:$0xff]  }
 0x661   : > { %11922 = vmatprep.subr.bf16.mxu1 %v12488_v7 }
 0x664   : > { %11923 = vmatpush3.bf16.msra.mxu1 %v12488_v7  ;;  %v4868_v7 = vld [vmem:[#allocation3 + $0x16] sm:$0xff] }
 0x665   : > { %11924 = vmatprep.subr.bf16.mxu1 %v12489_v9 }
 0x668   : > { %11925 = vmatpush3.bf16.msra.mxu1 %v12489_v9  ;;  %v12526_v9 = vld [vmem:[#allocation15 + $0x208] sm:$0xff]  }
 0x669   : > { %11926 = vmatprep.subr.bf16.mxu1 %v12490_v10 }
 0x66c   : > { %11927 = vmatpush3.bf16.msra.mxu1 %v12490_v10  ;;  %v4870_v10 = vpack.c.bf16 %v4868_v7, %v14468_v1  ;;  %v12568_v7 = vld [vmem:[#allocation18 + $0x1a4] ss:$16 sps:$4 sm:$0xff]  }
 0x66d   : > { %11928 = vmatprep.subr.bf16.mxu1 %v12491_v11 }
 0x670   : > { %11929 = vmatpush3.bf16.msra.mxu1 %v12491_v11  ;;  %v12527_v11 = vld [vmem:[#allocation15 + $0x210] sm:$0xff]  }
 0x671   : > { %11930 = vmatprep.subr.bf16.mxu1 %v12492_v12 }
 0x674   : > { %11931 = vmatpush3.bf16.msra.mxu1 %v12492_v12  ;;  %v12528_v12 = vld [vmem:[#allocation15 + $0x218] sm:$0xff]  }
 0x675   : > { %11936 = vmatprep.subr.bf16.mxu1 %v12493_v14 }
 0x677   : > { %11933 = vmatmul.mubr.bf16.vlgmr.msra.gmra.mrb[56].mxu1 %v4236_v17 }
 0x678   : > { %11937 = vmatpush3.bf16.msra.mxu1 %v12493_v14  ;;  %11952 = vmatprep.mubr.bf16.mxu1 %v4362_v13  ;;  %v12529_v14 = vld [vmem:[#allocation15 + $0x220] sm:$0xff]  }
 0x679   : > { %11938 = vmatprep.subr.bf16.mxu1 %v12494_v18 }
 0x67c   : > { %11939 = vmatpush3.bf16.msra.mxu1 %v12494_v18 }
 0x67d   : > { %11940 = vmatprep.subr.bf16.mxu1 %v12495_v20 }
 0x680   : > { %11941 = vmatpush3.bf16.msra.mxu1 %v12495_v20 }
 0x681   : > { %11942 = vmatprep.subr.bf16.mxu1 %v12496_v21 }
 0x684   : > { %11943 = vmatpush3.bf16.msra.mxu1 %v12496_v21 }
 0x685   : > { %11944 = vmatprep.subr.bf16.mxu1 %v12497_v22 }
 0x688   : > { %11945 = vmatpush3.bf16.msra.mxu1 %v12497_v22  ;;  %v12532_v22 = vld [vmem:[#allocation15 + $0x238] sm:$0xff]  }
 0x689   : > { %11946 = vmatprep.subr.bf16.mxu1 %v12498_v23 }
 0x68c   : > { %11947 = vmatpush3.bf16.msra.mxu1 %v12498_v23 }
 0x68d   : > { %11948 = vmatprep.subr.bf16.mxu1 %v12499_v24 }
 0x690   : > { %11949 = vmatpush3.bf16.msra.mxu1 %v12499_v24  ;;  %v4869_v24 = vld [vmem:[#allocation3 + $0x1e] sm:$0x3f] }
 0x691   : > { %11950 = vmatprep.subr.bf16.mxu1 %v12500_v25 }
 0x694   : > { %11951 = vmatpush3.bf16.msra.mxu1 %v12500_v25  ;;  %v4871_v25 = vpack.c.bf16 %v4869_v24, %v4869_v24 }
 0x695   : > { %11956 = vmatprep.subr.bf16.mxu1 %v12501_v26 }
 0x697   : > { %11953 = vmatmul.mubr.bf16.vlgmr.msra.gmra.mrb[60].mxu1 %v4363_v8 }
 0x698   : > { %11957 = vmatpush3.bf16.msra.mxu1 %v12501_v26  ;;  %11972 = vmatprep.mubr.bf16.mxu1 %v4489_v30 }
 0x699   : > { %11958 = vmatprep.subr.bf16.mxu1 %v12502_v29 }
 0x69c   : > { %11959 = vmatpush3.bf16.msra.mxu1 %v12502_v29 }
 0x69d   : > { %11960 = vmatprep.subr.bf16.mxu1 %v12503_v31 }
 0x6a0   : > { %11961 = vmatpush3.bf16.msra.mxu1 %v12503_v31 }
 0x6a1   : > { %11962 = vmatprep.subr.bf16.mxu1 %v12504_v32 }
 0x6a4   : > { %11963 = vmatpush3.bf16.msra.mxu1 %v12504_v32 }
 0x6a5   : > { %11964 = vmatprep.subr.bf16.mxu1 %v12505_v34 }
 0x6a8   : > { %11965 = vmatpush3.bf16.msra.mxu1 %v12505_v34 }
 0x6a9   : > { %11966 = vmatprep.subr.bf16.mxu1 %v12506_v35 }
 0x6ac   : > { %11967 = vmatpush3.bf16.msra.mxu1 %v12506_v35 }
 0x6ad   : > { %11968 = vmatprep.subr.bf16.mxu1 %v12507_v36 }
 0x6b0   : > { %11969 = vmatpush3.bf16.msra.mxu1 %v12507_v36 }
 0x6b1   : > { %11970 = vmatprep.subr.bf16.mxu1 %v12508_v33 }
 0x6b4   : > { %11971 = vmatpush3.bf16.msra.mxu1 %v12508_v33 }
 0x6b5   : > { %11976 = vmatprep.subr.bf16.mxu1 %v12509_v37 }
 0x6b7   : > { %11973 = vmatmul.mubr.bf16.vlgmr.msra.gmra.mrb[64].mxu1 %v4490_v19 }
 0x6b8   : > { %11977 = vmatpush3.bf16.msra.mxu1 %v12509_v37  ;;  %11992 = vmatprep.mubr.bf16.mxu1 %v4616_v42  ;;  %v12536_v42 = vld [vmem:[#allocation18 + $0x100] ss:$16 sps:$4 sm:$0xff]  }
 0x6b9   : > { %11978 = vmatprep.subr.bf16.mxu1 %v12510_v41 }
 0x6bc   : > { %11979 = vmatpush3.bf16.msra.mxu1 %v12510_v41  ;;  %v12535_v41 = vld [vmem:[#allocation18 + $0x4] ss:$16 sps:$4 sm:$0xff]  }
 0x6bd   : > { %11980 = vmatprep.subr.bf16.mxu1 %v12511_v43 }
 0x6c0   : > { %11981 = vmatpush3.bf16.msra.mxu1 %v12511_v43  ;;  %v12538_v43 = vld [vmem:[#allocation18 + $0x104] ss:$16 sps:$4 sm:$0xff]  }
 0x6c1   : > { %11982 = vmatprep.subr.bf16.mxu1 %v12512_v44  ;;  %5519 = vmatprep.subr.bf16.mxu0 %v12538_v43 }
 0x6c2   : > { %5520 = vmatpush1.bf16.msra.mxu0 %v12536_v42 }
 0x6c4   : > { %11983 = vmatpush3.bf16.msra.mxu1 %v12512_v44  ;;  %v12541_v44 = vld [vmem:[#allocation18 + $0x24] ss:$16 sps:$4 sm:$0xff]  }
 0x6c5   : > { %11984 = vmatprep.subr.bf16.mxu1 %v12513_v45 }
 0x6c8   : > { %11985 = vmatpush3.bf16.msra.mxu1 %v12513_v45  ;;  %v12544_v45 = vld [vmem:[#allocation18 + $0x124] ss:$16 sps:$4 sm:$0xff]  }
 0x6c9   : > { %11986 = vmatprep.subr.bf16.mxu1 %v12514_v46  ;;  %5521 = vmatprep.subr.bf16.mxu0 %v12544_v45 }
 0x6cc   : > { %11987 = vmatpush3.bf16.msra.mxu1 %v12514_v46  ;;  %v12539_v46 = vld [vmem:[#allocation18 + $0x20] ss:$16 sps:$4 sm:$0xff]  }
 0x6cd   : > { %11988 = vmatprep.subr.bf16.mxu1 %v12515_v47 }
 0x6d0   : > { %11989 = vmatpush3.bf16.msra.mxu1 %v12515_v47  ;;  %v12542_v47 = vld [vmem:[#allocation18 + $0x120] ss:$16 sps:$4 sm:$0xff]  }
 0x6d1   : > { %11990 = vmatprep.subr.bf16.mxu1 %v12516_v48  ;;  %5522 = vmatpush1.bf16.msra.mxu0 %v12542_v47 }
 0x6d2   : > { %5523 = vmatprep.subr.bf16.mxu0 %v12550_v53 }
 0x6d4   : > { %11991 = vmatpush3.bf16.msra.mxu1 %v12516_v48 }
 0x6d5   : > { %11996 = vmatprep.subr.bf16.mxu1 %v12517_v49 }
 0x6d7   : > { %11993 = vmatmul.mubr.bf16.vlgmr.msra.gmra.mrb[68].mxu1 %v4617_v52  ;;  %v12547_v52 = vld [vmem:[#allocation18 + $0x44] ss:$16 sps:$4 sm:$0xff]  }
 0x6d8   : > { %11997 = vmatpush3.bf16.msra.mxu1 %v12517_v49  ;;  %12012 = vmatprep.mubr.bf16.mxu1 %v4743_v55 }
 0x6d9   : > { %11998 = vmatprep.subr.bf16.mxu1 %v12518_v54 }
 0x6dc   : > { %11999 = vmatpush3.bf16.msra.mxu1 %v12518_v54 }
 0x6dd   : > { %12000 = vmatprep.subr.bf16.mxu1 %v12519_v56 }
 0x6e0   : > { %12001 = vmatpush3.bf16.msra.mxu1 %v12519_v56  ;;  %v12545_v56 = vld [vmem:[#allocation18 + $0x40] ss:$16 sps:$4 sm:$0xff]  }
 0x6e1   : > { %12002 = vmatprep.subr.bf16.mxu1 %v12520_v57 }
 0x6e4   : > { %12003 = vmatpush3.bf16.msra.mxu1 %v12520_v57  ;;  %v12548_v57 = vld [vmem:[#allocation18 + $0x140] ss:$16 sps:$4 sm:$0xff]  }
 0x6e5   : > { %12004 = vmatprep.subr.bf16.mxu1 %v12521_v58  ;;  %5524 = vmatpush1.bf16.msra.mxu0 %v12548_v57 }
 0x6e8   : > { %12005 = vmatpush3.bf16.msra.mxu1 %v12521_v58 }
 0x6e9   : > { %12006 = vmatprep.subr.bf16.mxu1 %v12522_v59 }
 0x6ea   : > { %v11874_v61 = vpop.f32.mrb[44].mxu1 }
 0x6eb   : > { %3977 = vst [vmem:[#allocation6 + $0x10] sm:$0x3f] %v11874_v61  ;;  %v3961_v62 = vpop.f32.mrb[45].mxu1  ;;  %v12556_v61 = vld [vmem:[#allocation18 + $0x164] ss:$16 sps:$4 sm:$0xff]  }
 0x6ec   : > { %12007 = vmatpush3.bf16.msra.mxu1 %v12522_v59  ;;  %v11875_v63 = vpop.f32.mrb[46].mxu1  ;;  %5525 = vmatprep.subr.bf16.mxu0 %v12556_v61 }
 0x6ed   : > { %v3964_v2 = vpop.f32.mrb[47].mxu1  ;;  %12008 = vmatprep.subr.bf16.mxu1 %v12523_v60  ;;  %v12554_v63 = vld [vmem:[#allocation18 + $0x160] ss:$16 sps:$4 sm:$0xff]  }
 0x6ee   : > { %5526 = vmatpush1.bf16.msra.mxu0 %v12554_v63 }
 0x6f0   : > { %12009 = vmatpush3.bf16.msra.mxu1 %v12523_v60  ;;  %v12553_v60 = vld [vmem:[#allocation18 + $0x64] ss:$16 sps:$4 sm:$0xff]  }
 0x6f1   : > { %12010 = vmatprep.subr.bf16.mxu1 %v12524_v0 }
 0x6f2   : > { %v4098_v3 = vld [vmem:[#allocation6 + $0x10] sm:$0x3f] }
 0x6f4   : > { %12011 = vmatpush3.bf16.msra.mxu1 %v12524_v0  ;;  %v12562_v0 = vld [vmem:[#allocation18 + $0x184] ss:$16 sps:$4 sm:$0xff]  }
 0x6f5   : > { %12016 = vmatprep.subr.bf16.mxu1 %v12525_v5  ;;  %5527 = vmatprep.subr.bf16.mxu0 %v12562_v0  ;;  %v12584_v0 = vld [vmem:[#allocation18 + $0x200] ss:$16 sps:$4 sm:$0xff]  }
 0x6f7   : > { %12013 = vmatmul.mubr.bf16.vlgmr.msra.gmra.mrb[72].mxu1 %v4744_v6  ;;  %v12565_v6 = vld [vmem:[#allocation18 + $0xa4] ss:$16 sps:$4 sm:$0xff]  }
 0x6f8   : > { %12017 = vmatpush3.bf16.msra.mxu1 %v12525_v5  ;;  %12032 = vmatprep.mubr.bf16.mxu1 %v4870_v10  ;;  %v12560_v5 = vld [vmem:[#allocation18 + $0x180] ss:$16 sps:$4 sm:$0xff]  }
 0x6f9   : > { %12018 = vmatprep.subr.bf16.mxu1 %v12526_v9  ;;  %5528 = vmatpush1.bf16.msra.mxu0 %v12560_v5  ;;  %v12566_v10 = vld [vmem:[#allocation18 + $0x1a0] ss:$16 sps:$4 sm:$0xff]  }
 0x6fa   : > { %5529 = vmatprep.subr.bf16.mxu0 %v12568_v7 }
 0x6fc   : > { %12019 = vmatpush3.bf16.msra.mxu1 %v12526_v9  ;;  %v12563_v9 = vld [vmem:[#allocation18 + $0xa0] ss:$16 sps:$4 sm:$0xff]  }
 0x6fd   : > { %12020 = vmatprep.subr.bf16.mxu1 %v12527_v11  ;;  %5530 = vmatpush1.bf16.msra.mxu0 %v12566_v10  ;;  %v12592_v10 = vld [vmem:[#allocation18 + $0x224] ss:$16 sps:$4 sm:$0xff]  }
 0x700   : > { %12021 = vmatpush3.bf16.msra.mxu1 %v12527_v11  ;;  %v12571_v11 = vld [vmem:[#allocation18 + $0xc4] ss:$16 sps:$4 sm:$0xff]  }
 0x701   : > { %12022 = vmatprep.subr.bf16.mxu1 %v12528_v12 }
 0x704   : > { %12023 = vmatpush3.bf16.msra.mxu1 %v12528_v12  ;;  %v12574_v12 = vld [vmem:[#allocation18 + $0x1c4] ss:$16 sps:$4 sm:$0xff]  }
 0x705   : > { %12024 = vmatprep.subr.bf16.mxu1 %v12529_v14  ;;  %5531 = vmatprep.subr.bf16.mxu0 %v12574_v12  ;;  %v12590_v12 = vld [vmem:[#allocation18 + $0x220] ss:$16 sps:$4 sm:$0xff]  }
 0x708   : > { %12025 = vmatpush3.bf16.msra.mxu1 %v12529_v14  ;;  %v12569_v14 = vld [vmem:[#allocation18 + $0xc0] ss:$16 sps:$4 sm:$0xff]  }
 0x709   : > { %12026 = vmatprep.subr.bf16.mxu1 %v12530_v15 }
 0x70a   : > { %v11894_v17 = vpop.f32.mrb[48].mxu1 }
 0x70b   : > { %v4101_v1 = vadd.f32 %v11894_v17, %v4098_v3  ;;  %v4082_v18 = vpop.f32.mrb[49].mxu1  ;;  %v12580_v17 = vld [vmem:[#allocation18 + $0x1e4] ss:$16 sps:$4 sm:$0xff]   ;;  %v12575_v3 = vld [vmem:[#allocation18 + $0xe0] ss:$16 sps:$4 sm:$0xff]  }
 0x70c   : > { %v4099_v13 = vadd.f32 %v4082_v18, %v3961_v62  ;;  %v11895_v20 = vpop.f32.mrb[50].mxu1  ;;  %12027 = vmatpush3.bf16.msra.mxu1 %v12530_v15  ;;  %v12551_v62 = vld [vmem:[#allocation18 + $0x60] ss:$16 sps:$4 sm:$0xff]   ;;  %v12583_v18 = vld [vmem:[#allocation18 + $0xc] ss:$16 sps:$4 sm:$0xff]  }
 0x70d   : > { %4104 = vst [vmem:[#allocation6 + $0x10] sm:$0x3f] %v4101_v1  ;;  %v4085_v21 = vpop.f32.mrb[51].mxu1  ;;  %12028 = vmatprep.subr.bf16.mxu1 %v12531_v16  ;;  %v12572_v15 = vld [vmem:[#allocation18 + $0x1c0] ss:$16 sps:$4 sm:$0xff]   ;;  %v13570_v20 = vmov 0  }
 0x70e   : > { %v4100_v23 = vadd.f32 %v4085_v21, %v3964_v2  ;;  %v12559_v2 = vld [vmem:[#allocation18 + $0x84] ss:$16 sps:$4 sm:$0xff]   ;;  %5532 = vmatpush1.bf16.msra.mxu0 %v12572_v15  ;;  %v12578_v1 = vld [vmem:[#allocation18 + $0x1e0] ss:$16 sps:$4 sm:$0xff]   ;;  %5551 = vmatprep.mubr.bf16.mxu0 %v13570_v20 }
 0x70f   : > { %5533 = vmatprep.subr.bf16.mxu0 %v12580_v17  ;;  %v12598_v15 = vld [vmem:[#allocation18 + $0x244] ss:$16 sps:$4 sm:$0xff]   ;;  %v12596_v17 = vld [vmem:[#allocation18 + $0x240] ss:$16 sps:$4 sm:$0xff]  }
 0x710   : > { %12029 = vmatpush3.bf16.msra.mxu1 %v12531_v16  ;;  %v12577_v16 = vld [vmem:[#allocation18 + $0xe4] ss:$16 sps:$4 sm:$0xff]  }
 0x711   : > { %12030 = vmatprep.subr.bf16.mxu1 %v12532_v22 }
 0x712   : > { %5534 = vmatpush1.bf16.msra.mxu0 %v12578_v1  ;;  %v12604_v1 = vld [vmem:[#allocation18 + $0x264] ss:$16 sps:$4 sm:$0xff]  }
 0x714   : > { %12031 = vmatpush3.bf16.msra.mxu1 %v12532_v22  ;;  %v4225_v27 = vld [vmem:[#allocation6 + $0x10] sm:$0x3f] }
 0x715   : > { %5212 = vmatprep.subr.bf16.mxu1 %v12535_v41 }
 0x717   : > { %12033 = vmatmul.mubr.bf16.vlgmr.msra.gmra.mrb[76].mxu1 %v4871_v25 }
 0x718   : > { %5213 = vmatpush1.bf16.msra.mxu1 %v12533_v40  ;;  %5244 = vmatprep.mubr.bf16.mxu1 %v13570_v20 }
 0x719   : > { %5214 = vmatprep.subr.bf16.mxu1 %v12541_v44 }
 0x71c   : > { %5215 = vmatpush1.bf16.msra.mxu1 %v12539_v46 }
 0x71d   : > { %5216 = vmatprep.subr.bf16.mxu1 %v12547_v52 }
 0x720   : > { %5217 = vmatpush1.bf16.msra.mxu1 %v12545_v56 }
 0x721   : > { %5218 = vmatprep.subr.bf16.mxu1 %v12553_v60 }
 0x724   : > { %5219 = vmatpush1.bf16.msra.mxu1 %v12551_v62 }
 0x725   : > { %5220 = vmatprep.subr.bf16.mxu1 %v12559_v2  ;;  %v12581_v2 = vld [vmem:[#allocation18 + $0x8] ss:$16 sps:$4 sm:$0xff]  }
 0x728   : > { %5221 = vmatpush1.bf16.msra.mxu1 %v12557_v4 }
 0x729   : > { %5222 = vmatprep.subr.bf16.mxu1 %v12565_v6 }
 0x72a   : > { %v11914_v26 = vpop.f32.mrb[52].mxu1 }
 0x72b   : > { %v4228_v28 = vadd.f32 %v11914_v26, %v4225_v27  ;;  %v4209_v8 = vpop.f32.mrb[53].mxu1 }
 0x72c   : > { %v4226_v29 = vadd.f32 %v4209_v8, %v4099_v13  ;;  %v11915_v30 = vpop.f32.mrb[54].mxu1  ;;  %5223 = vmatpush1.bf16.msra.mxu1 %v12563_v9  ;;  %v12586_v13 = vld [vmem:[#allocation18 + $0x204] ss:$16 sps:$4 sm:$0xff]   ;;  %v12589_v9 = vld [vmem:[#allocation18 + $0x2c] ss:$16 sps:$4 sm:$0xff]  }
 0x72d   : > { %4231 = vst [vmem:[#allocation6 + $0x10] sm:$0x3f] %v4228_v28  ;;  %v4212_v31 = vpop.f32.mrb[55].mxu1  ;;  %5224 = vmatprep.subr.bf16.mxu1 %v12571_v11  ;;  %5826 = vmatprep.subr.bf16.mxu0 %v12586_v13  ;;  %v12587_v11 = vld [vmem:[#allocation18 + $0x28] ss:$16 sps:$4 sm:$0xff]  }
 0x72e   : > { %v4227_v32 = vadd.f32 %v4212_v31, %v4100_v23  ;;  %v12602_v13 = vld [vmem:[#allocation18 + $0x260] ss:$16 sps:$4 sm:$0xff]  }
 0x730   : > { %5225 = vmatpush1.bf16.msra.mxu1 %v12569_v14  ;;  %v12595_v14 = vld [vmem:[#allocation18 + $0x4c] ss:$16 sps:$4 sm:$0xff]  }
 0x731   : > { %5226 = vmatprep.subr.bf16.mxu1 %v12577_v16  ;;  %v12593_v16 = vld [vmem:[#allocation18 + $0x48] ss:$16 sps:$4 sm:$0xff]  }
 0x734   : > { %v4352_v35 = vld [vmem:[#allocation6 + $0x10] sm:$0x3f]  ;;  %5227 = vmatpush1.bf16.msra.mxu1 %v12575_v3 }
 0x735   : > { %5253 = vmatprep.subr.bf16.mxu1 %v12583_v18  ;;  %v12601_v3 = vld [vmem:[#allocation18 + $0x6c] ss:$16 sps:$4 sm:$0xff]   ;;  %v12599_v18 = vld [vmem:[#allocation18 + $0x68] ss:$16 sps:$4 sm:$0xff]  }
 0x74a   : > { %v11934_v34 = vpop.f32.mrb[56].mxu1 }
 0x74b   : > { %v4355_v36 = vadd.f32 %v11934_v34, %v4352_v35  ;;  %v4336_v33 = vpop.f32.mrb[57].mxu1 }
 0x74c   : > { %v4353_v37 = vadd.f32 %v4336_v33, %v4226_v29  ;;  %v11935_v38 = vpop.f32.mrb[58].mxu1 }
 0x74d   : > { %4358 = vst [vmem:[#allocation6 + $0x10] sm:$0x3f] %v4355_v36  ;;  %v4339_v39 = vpop.f32.mrb[59].mxu1 }
 0x74e   : > { %v4354_v19 = vadd.f32 %v4339_v39, %v4227_v32 }
 0x754   : > { %v4479_v49 = vld [vmem:[#allocation6 + $0x10] sm:$0x3f] }
 0x76a   : > { %v11954_v48 = vpop.f32.mrb[60].mxu1 }
 0x76b   : > { %v4482_v50 = vadd.f32 %v11954_v48, %v4479_v49  ;;  %v4463_v51 = vpop.f32.mrb[61].mxu1 }
 0x76c   : > { %v4480_v54 = vadd.f32 %v4463_v51, %v4353_v37  ;;  %v11955_v55 = vpop.f32.mrb[62].mxu1  ;;  %v10468_v51 = vld [vmem:[#allocation16] ss:$0 sm:$0xff] }
 0x76d   : > { %4485 = vst [vmem:[#allocation6 + $0x10] sm:$0x3f] %v4482_v50  ;;  %v4466_v58 = vpop.f32.mrb[63].mxu1 }
 0x76e   : > { %v4481_v59 = vadd.f32 %v4466_v58, %v4354_v19 }
 0x774   : > { %v4606_v22 = vld [vmem:[#allocation6 + $0x10] sm:$0x3f] }
 0x78a   : > { %v11974_v21 = vpop.f32.mrb[64].mxu1 }
 0x78b   : > { %v4609_v23 = vadd.f32 %v11974_v21, %v4606_v22  ;;  %v4590_v24 = vpop.f32.mrb[65].mxu1  ;;  %v12607_v21 = vld [vmem:[#allocation18 + $0x8c] ss:$16 sps:$4 sm:$0xff]   ;;  %v12610_v22 = vld [vmem:[#allocation18 + $0x284] ss:$16 sps:$4 sm:$0xff]  }
 0x78c   : > { %v4607_v25 = vadd.f32 %v4590_v24, %v4480_v54  ;;  %v11975_v26 = vpop.f32.mrb[66].mxu1  ;;  %v12608_v24 = vld [vmem:[#allocation18 + $0x280] ss:$16 sps:$4 sm:$0xff]  }
 0x78d   : > { %4612 = vst [vmem:[#allocation6 + $0x10] sm:$0x3f] %v4609_v23  ;;  %v4593_v27 = vpop.f32.mrb[67].mxu1  ;;  %v12605_v23 = vld [vmem:[#allocation18 + $0x88] ss:$16 sps:$4 sm:$0xff]  }
 0x78e   : > { %v4608_v28 = vadd.f32 %v4593_v27, %v4481_v59  ;;  %v12616_v26 = vld [vmem:[#allocation18 + $0x2a4] ss:$16 sps:$4 sm:$0xff]   ;;  %v12611_v27 = vld [vmem:[#allocation18 + $0xa8] ss:$16 sps:$4 sm:$0xff]  }
 0x794   : > { %v4733_v29 = vld [vmem:[#allocation6 + $0x10] sm:$0x3f] }
 0x7aa   : > { %v11994_v8 = vpop.f32.mrb[68].mxu1 }
 0x7ab   : > { %v4736_v30 = vadd.f32 %v11994_v8, %v4733_v29  ;;  %v4717_v31 = vpop.f32.mrb[69].mxu1  ;;  %v12619_v8 = vld [vmem:[#allocation18 + $0xcc] ss:$16 sps:$4 sm:$0xff]   ;;  %v12622_v29 = vld [vmem:[#allocation18 + $0x2c4] ss:$16 sps:$4 sm:$0xff]  }
 0x7ac   : > { %v4734_v32 = vadd.f32 %v4717_v31, %v4607_v25  ;;  %v11995_v34 = vpop.f32.mrb[70].mxu1  ;;  %v12613_v25 = vld [vmem:[#allocation18 + $0xac] ss:$16 sps:$4 sm:$0xff]   ;;  %v12620_v31 = vld [vmem:[#allocation18 + $0x2c0] ss:$16 sps:$4 sm:$0xff]  }
 0x7ad   : > { %4739 = vst [vmem:[#allocation6 + $0x10] sm:$0x3f] %v4736_v30  ;;  %v4720_v35 = vpop.f32.mrb[71].mxu1  ;;  %v12617_v30 = vld [vmem:[#allocation18 + $0xc8] ss:$16 sps:$4 sm:$0xff]  }
 0x7ae   : > { %v4735_v36 = vadd.f32 %v4720_v35, %v4608_v28  ;;  %v12614_v28 = vld [vmem:[#allocation18 + $0x2a0] ss:$16 sps:$4 sm:$0xff]   ;;  %v12628_v34 = vld [vmem:[#allocation18 + $0x2e4] ss:$16 sps:$4 sm:$0xff]   ;;  %v12623_v35 = vld [vmem:[#allocation18 + $0xe8] ss:$16 sps:$4 sm:$0xff]  }
 0x7b4   : > { %v4860_v37 = vld [vmem:[#allocation6 + $0x10] sm:$0x3f] }
 0x7ca   : > { %v12014_v33 = vpop.f32.mrb[72].mxu1 }
 0x7cb   : > { %v4863_v38 = vadd.f32 %v12014_v33, %v4860_v37  ;;  %v4844_v39 = vpop.f32.mrb[73].mxu1  ;;  %v12631_v33 = vld [vmem:[#allocation18 + $0x10c] ss:$16 sps:$4 sm:$0xff]   ;;  %v12634_v37 = vld [vmem:[#allocation18 + $0x304] ss:$16 sps:$4 sm:$0xff]  }
 0x7cc   : > { %v4861_v19 = vadd.f32 %v4844_v39, %v4734_v32  ;;  %v12015_v40 = vpop.f32.mrb[74].mxu1  ;;  %v12625_v32 = vld [vmem:[#allocation18 + $0xec] ss:$16 sps:$4 sm:$0xff]   ;;  %v12629_v39 = vld [vmem:[#allocation18 + $0x108] ss:$16 sps:$4 sm:$0xff]  }
 0x7cd   : > { %4866 = vst [vmem:[#allocation6 + $0x10] sm:$0x3f] %v4863_v38  ;;  %v4847_v41 = vpop.f32.mrb[75].mxu1 }
 0x7ce   : > { %v4862_v42 = vadd.f32 %v4847_v41, %v4735_v36  ;;  %v12626_v36 = vld [vmem:[#allocation18 + $0x2e0] ss:$16 sps:$4 sm:$0xff]   ;;  %v12637_v41 = vld [vmem:[#allocation18 + $0x12c] ss:$16 sps:$4 sm:$0xff]  }
 0x7d4   : > { %v4987_v44 = vld [vmem:[#allocation6 + $0x10] sm:$0x3f] }
 0x7ea   : > { %v12034_v43 = vpop.f32.mrb[76].mxu1 }
 0x7eb   : > { %v4990_v45 = vadd.f32 %v12034_v43, %v4987_v44  ;;  %v4971_v46 = vpop.f32.mrb[77].mxu1  ;;  %v12635_v43 = vld [vmem:[#allocation18 + $0x128] ss:$16 sps:$4 sm:$0xff]   ;;  %v12638_v44 = vld [vmem:[#allocation18 + $0x320] ss:$16 sps:$4 sm:$0xff]  }
 0x7ec   : > { %v4988_v47 = vadd.f32 %v4971_v46, %v4861_v19  ;;  %v12035_v48 = vpop.f32.mrb[78].mxu1  ;;  %v12632_v19 = vld [vmem:[#allocation18 + $0x300] ss:$16 sps:$4 sm:$0xff]   ;;  %v12646_v46 = vld [vmem:[#allocation18 + $0x344] ss:$16 sps:$4 sm:$0xff]  }
 0x7ed   : > { %4993 = vst [vmem:[#allocation6 + $0x10] sm:$0x3f] %v4990_v45  ;;  %v4974_v49 = vpop.f32.mrb[79].mxu1  ;;  %v12643_v45 = vld [vmem:[#allocation18 + $0x14c] ss:$16 sps:$4 sm:$0xff]  }
 0x7ee   : > { %4991 = vst [vmem:[#allocation6] sm:$0xff] %v4988_v47  ;;  %v4989_v50 = vadd.f32 %v4974_v49, %v4862_v42  ;;  %v12640_v42 = vld [vmem:[#allocation18 + $0x324] ss:$16 sps:$4 sm:$0xff]   ;;  %v12641_v47 = vld [vmem:[#allocation18 + $0x148] ss:$16 sps:$4 sm:$0xff]  }
 0x7ef   : > { %v12644_v48 = vld [vmem:[#allocation18 + $0x340] ss:$16 sps:$4 sm:$0xff]   ;;  %v12649_v49 = vld [vmem:[#allocation18 + $0x16c] ss:$16 sps:$4 sm:$0xff]  }
 0x7f0   : > { %4992 = vst [vmem:[#allocation6 + $0x8] sm:$0xff] %v4989_v50  ;;  %v12652_v50 = vld [vmem:[#allocation18 + $0x364] ss:$16 sps:$4 sm:$0xff]  }
 0x7f4   : > { %v5013_v52 = vld [vmem:[#allocation6 + $0x12] sm:$0xf] }
 0x7f5   : > { %v4995_v53 = vld [vmem:[#allocation6] sm:$0xf]  ;;  %v5014_v54 = vadd.f32 %v10468_v51, %v5013_v52 }
 0x7f6   : > { %v5002_v55 = vadd.f32 %v10468_v51, %v4995_v53  ;;  %v12650_v52 = vld [vmem:[#allocation18 + $0x360] ss:$16 sps:$4 sm:$0xff]   ;;  %v12655_v53 = vld [vmem:[#allocation18 + $0x18c] ss:$16 sps:$4 sm:$0xff]  }
 0x7f7   : > { %v5005_v56 = vld [vmem:[#allocation6 + $0x6] sm:$0xf]  ;;  %v5009_v57 = vld [vmem:[#allocation6 + $0xc] sm:$0xf]  ;;  %v5015_v58 = vmax.f32 %v5014_v54, 0.0 }
 0x7f8   : > { %v5003_v59 = vmax.f32 %v5002_v55, 0.0  ;;  %v5006_v60 = vadd.f32 %v10468_v51, %v5005_v56  ;;  %v5010_v61 = vadd.f32 %v10468_v51, %v5009_v57  ;;  %v12647_v51 = vld [vmem:[#allocation18 + $0x168] ss:$16 sps:$4 sm:$0xff]   ;;  %v12658_v54 = vld [vmem:[#allocation18 + $0x384] ss:$16 sps:$4 sm:$0xff]  }
 0x7f9   : > { %5016 = vst [vmem:[#allocation7 + $0xc] sm:$0xf] %v5015_v58  ;;  %v12653_v55 = vld [vmem:[#allocation18 + $0x188] ss:$16 sps:$4 sm:$0xff]   ;;  %v12656_v56 = vld [vmem:[#allocation18 + $0x380] ss:$16 sps:$4 sm:$0xff]  }
 0x7fa   : > { %5004 = vst [vmem:[#allocation7] sm:$0xf] %v5003_v59  ;;  %v5007_v62 = vmax.f32 %v5006_v60, 0.0  ;;  %v5011_v63 = vmax.f32 %v5010_v61, 0.0  ;;  %v12661_v57 = vld [vmem:[#allocation18 + $0x1ac] ss:$16 sps:$4 sm:$0xff]  }
 0x7fb   : > { %v12664_v58 = vld [vmem:[#allocation18 + $0x3a4] ss:$16 sps:$4 sm:$0xff]   ;;  %v12659_v59 = vld [vmem:[#allocation18 + $0x1a8] ss:$16 sps:$4 sm:$0xff]   ;;  %v12662_v60 = vld [vmem:[#allocation18 + $0x3a0] ss:$16 sps:$4 sm:$0xff]  }
 0x7fc   : > { %5008 = vst [vmem:[#allocation7 + $0x4] sm:$0xf] %v5007_v62  ;;  %5012 = vst [vmem:[#allocation7 + $0x8] sm:$0xf] %v5011_v63  ;;  %v12667_v61 = vld [vmem:[#allocation18 + $0x1cc] ss:$16 sps:$4 sm:$0xff]  }
 0x7fd   : > { %v12670_v62 = vld [vmem:[#allocation18 + $0x3c4] ss:$16 sps:$4 sm:$0xff]   ;;  %v12665_v63 = vld [vmem:[#allocation18 + $0x1c8] ss:$16 sps:$4 sm:$0xff]  }
 0x801   : > { %v5018_v4 = vld [vmem:[#allocation7] sm:$0x1]  ;;  %v5324_v5 = vld [vmem:[#allocation7 + $0x1] sm:$0x1]  ;;  %v5631_v38 = vld [vmem:[#allocation7 + $0x2] sm:$0x1] }
 0x802   : > { %v14475_v6 = vpack.c.bf16 %v5018_v4, %v5018_v4  ;;  %v14477_v7 = vpack.c.bf16 %v5324_v5, %v5324_v5  ;;  %v14483_v40 = vpack.c.bf16 %v5631_v38, %v5631_v38  ;;  %v12676_v4 = vld [vmem:[#allocation18 + $0x3e4] ss:$16 sps:$4 sm:$0xff]   ;;  %v12671_v5 = vld [vmem:[#allocation18 + $0x1e8] ss:$16 sps:$4 sm:$0xff]  }
 0x803   : > { %v12724_v38 = vld [vmem:[#allocation18 + $0x4e4] ss:$16 sps:$4 sm:$0xff]  }
 0x804   : > { %5245 = vmatmul.mubr.bf16.vlgmr.msra.gmra.mrb[80].mxu1 %v14475_v6  ;;  %5552 = vmatmul.mubr.bf16.vlgmr.msra.gmra.mrb[132].mxu0 %v14477_v7 }
 0x805   : > { %5254 = vmatpush1.bf16.msra.mxu1 %v12581_v2  ;;  %5827 = vmatpush1.bf16.msra.mxu0 %v12584_v0  ;;  %v12668_v2 = vld [vmem:[#allocation18 + $0x3c0] ss:$16 sps:$4 sm:$0xff]   ;;  %v12673_v0 = vld [vmem:[#allocation18 + $0x1ec] ss:$16 sps:$4 sm:$0xff]  }
 0x806   : > { %5255 = vmatprep.subr.bf16.mxu1 %v12589_v9  ;;  %5828 = vmatprep.subr.bf16.mxu0 %v12592_v10  ;;  %v12679_v9 = vld [vmem:[#allocation18 + $0x20c] ss:$16 sps:$4 sm:$0xff]   ;;  %v12682_v10 = vld [vmem:[#allocation18 + $0x404] ss:$16 sps:$4 sm:$0xff]  }
 0x807   : > { %5285 = vmatprep.mubr.bf16.mxu1 %v13570_v20  ;;  %5858 = vmatprep.mubr.bf16.mxu0 %v13570_v20 }
 0x809   : > { %5256 = vmatpush1.bf16.msra.mxu1 %v12587_v11  ;;  %5829 = vmatpush1.bf16.msra.mxu0 %v12590_v12  ;;  %v5938_v11 = vld [vmem:[#allocation7 + $0x3] sm:$0x1] }
 0x80a   : > { %5257 = vmatprep.subr.bf16.mxu1 %v12595_v14  ;;  %5830 = vmatprep.subr.bf16.mxu0 %v12598_v15  ;;  %v12677_v12 = vld [vmem:[#allocation18 + $0x208] ss:$16 sps:$4 sm:$0xff]   ;;  %v12680_v14 = vld [vmem:[#allocation18 + $0x400] ss:$16 sps:$4 sm:$0xff]   ;;  %v14489_v15 = vpack.c.bf16 %v5938_v11, %v5938_v11  ;;  %v12772_v11 = vld [vmem:[#allocation18 + $0x5e4] ss:$16 sps:$4 sm:$0xff]  }
 0x80d   : > { %5258 = vmatpush1.bf16.msra.mxu1 %v12593_v16  ;;  %5831 = vmatpush1.bf16.msra.mxu0 %v12596_v17  ;;  %v12685_v16 = vld [vmem:[#allocation18 + $0x22c] ss:$16 sps:$4 sm:$0xff]   ;;  %v12688_v17 = vld [vmem:[#allocation18 + $0x424] ss:$16 sps:$4 sm:$0xff]  }
 0x80e   : > { %5259 = vmatprep.subr.bf16.mxu1 %v12601_v3  ;;  %5832 = vmatprep.subr.bf16.mxu0 %v12604_v1  ;;  %v12683_v3 = vld [vmem:[#allocation18 + $0x228] ss:$16 sps:$4 sm:$0xff]   ;;  %v12686_v1 = vld [vmem:[#allocation18 + $0x420] ss:$16 sps:$4 sm:$0xff]  }
 0x811   : > { %5260 = vmatpush1.bf16.msra.mxu1 %v12599_v18  ;;  %5833 = vmatpush1.bf16.msra.mxu0 %v12602_v13  ;;  %v12691_v18 = vld [vmem:[#allocation18 + $0x24c] ss:$16 sps:$4 sm:$0xff]   ;;  %v12694_v13 = vld [vmem:[#allocation18 + $0x444] ss:$16 sps:$4 sm:$0xff]  }
 0x812   : > { %5261 = vmatprep.subr.bf16.mxu1 %v12607_v21  ;;  %5834 = vmatprep.subr.bf16.mxu0 %v12610_v22  ;;  %v12689_v21 = vld [vmem:[#allocation18 + $0x248] ss:$16 sps:$4 sm:$0xff]   ;;  %v12692_v22 = vld [vmem:[#allocation18 + $0x440] ss:$16 sps:$4 sm:$0xff]  }
 0x815   : > { %5262 = vmatpush1.bf16.msra.mxu1 %v12605_v23  ;;  %5835 = vmatpush1.bf16.msra.mxu0 %v12608_v24  ;;  %v12700_v23 = vld [vmem:[#allocation18 + $0x464] ss:$16 sps:$4 sm:$0xff]   ;;  %v12695_v24 = vld [vmem:[#allocation18 + $0x268] ss:$16 sps:$4 sm:$0xff]  }
 0x816   : > { %5263 = vmatprep.subr.bf16.mxu1 %v12613_v25  ;;  %5836 = vmatprep.subr.bf16.mxu0 %v12616_v26  ;;  %v12698_v25 = vld [vmem:[#allocation18 + $0x460] ss:$16 sps:$4 sm:$0xff]   ;;  %v12703_v26 = vld [vmem:[#allocation18 + $0x28c] ss:$16 sps:$4 sm:$0xff]  }
 0x819   : > { %5264 = vmatpush1.bf16.msra.mxu1 %v12611_v27  ;;  %5837 = vmatpush1.bf16.msra.mxu0 %v12614_v28  ;;  %v12706_v27 = vld [vmem:[#allocation18 + $0x484] ss:$16 sps:$4 sm:$0xff]   ;;  %v12701_v28 = vld [vmem:[#allocation18 + $0x288] ss:$16 sps:$4 sm:$0xff]  }
 0x81a   : > { %5265 = vmatprep.subr.bf16.mxu1 %v12619_v8  ;;  %5838 = vmatprep.subr.bf16.mxu0 %v12622_v29  ;;  %v12704_v8 = vld [vmem:[#allocation18 + $0x480] ss:$16 sps:$4 sm:$0xff]   ;;  %v12709_v29 = vld [vmem:[#allocation18 + $0x2ac] ss:$16 sps:$4 sm:$0xff]  }
 0x81d   : > { %5266 = vmatpush1.bf16.msra.mxu1 %v12617_v30  ;;  %5839 = vmatpush1.bf16.msra.mxu0 %v12620_v31  ;;  %v12712_v30 = vld [vmem:[#allocation18 + $0x4a4] ss:$16 sps:$4 sm:$0xff]   ;;  %v12707_v31 = vld [vmem:[#allocation18 + $0x2a8] ss:$16 sps:$4 sm:$0xff]  }
 0x81e   : > { %5267 = vmatprep.subr.bf16.mxu1 %v12625_v32  ;;  %5840 = vmatprep.subr.bf16.mxu0 %v12628_v34  ;;  %v12710_v32 = vld [vmem:[#allocation18 + $0x4a0] ss:$16 sps:$4 sm:$0xff]   ;;  %v12715_v34 = vld [vmem:[#allocation18 + $0x2cc] ss:$16 sps:$4 sm:$0xff]  }
 0x821   : > { %5268 = vmatpush1.bf16.msra.mxu1 %v12623_v35  ;;  %5841 = vmatpush1.bf16.msra.mxu0 %v12626_v36  ;;  %v12718_v35 = vld [vmem:[#allocation18 + $0x4c4] ss:$16 sps:$4 sm:$0xff]   ;;  %v12713_v36 = vld [vmem:[#allocation18 + $0x2c8] ss:$16 sps:$4 sm:$0xff]  }
 0x822   : > { %5560 = vmatprep.subr.bf16.mxu1 %v12631_v33  ;;  %6133 = vmatprep.subr.bf16.mxu0 %v12634_v37  ;;  %v12716_v33 = vld [vmem:[#allocation18 + $0x4c0] ss:$16 sps:$4 sm:$0xff]   ;;  %v12721_v37 = vld [vmem:[#allocation18 + $0x2ec] ss:$16 sps:$4 sm:$0xff]  }
 0x824   : > { %5286 = vmatmul.mubr.bf16.vlgmr.msra.gmra.mrb[84].mxu1 %v14475_v6  ;;  %5859 = vmatmul.mubr.bf16.vlgmr.msra.gmra.mrb[136].mxu0 %v14483_v40  ;;  %v12674_v6 = vld [vmem:[#allocation18 + $0x3e0] ss:$16 sps:$4 sm:$0xff]  }
 0x825   : > { %5561 = vmatpush1.bf16.msra.mxu1 %v12629_v39  ;;  %6134 = vmatpush1.bf16.msra.mxu0 %v12632_v19  ;;  %v12719_v39 = vld [vmem:[#allocation18 + $0x2e8] ss:$16 sps:$4 sm:$0xff]   ;;  %v12722_v19 = vld [vmem:[#allocation18 + $0x4e0] ss:$16 sps:$4 sm:$0xff]  }
 0x826   : > { %5562 = vmatprep.subr.bf16.mxu1 %v12637_v41  ;;  %6135 = vmatprep.subr.bf16.mxu0 %v12640_v42  ;;  %v12727_v41 = vld [vmem:[#allocation18 + $0x30c] ss:$16 sps:$4 sm:$0xff]   ;;  %v12730_v42 = vld [vmem:[#allocation18 + $0x504] ss:$16 sps:$4 sm:$0xff]  }
 0x827   : > { %5592 = vmatprep.mubr.bf16.mxu1 %v13570_v20  ;;  %6165 = vmatprep.mubr.bf16.mxu0 %v13570_v20 }
 0x829   : > { %5563 = vmatpush1.bf16.msra.mxu1 %v12635_v43  ;;  %6136 = vmatpush1.bf16.msra.mxu0 %v12638_v44  ;;  %v6245_v43 = vld [vmem:[#allocation7 + $0x4] sm:$0x1] }
 0x82a   : > { %5564 = vmatprep.subr.bf16.mxu1 %v12643_v45  ;;  %6137 = vmatprep.subr.bf16.mxu0 %v12646_v46  ;;  %v12725_v44 = vld [vmem:[#allocation18 + $0x308] ss:$16 sps:$4 sm:$0xff]   ;;  %v12728_v45 = vld [vmem:[#allocation18 + $0x500] ss:$16 sps:$4 sm:$0xff]   ;;  %v14495_v46 = vpack.c.bf16 %v6245_v43, %v6245_v43  ;;  %v12820_v43 = vld [vmem:[#allocation18 + $0x6e4] ss:$16 sps:$4 sm:$0xff]  }
 0x82d   : > { %5565 = vmatpush1.bf16.msra.mxu1 %v12641_v47  ;;  %6138 = vmatpush1.bf16.msra.mxu0 %v12644_v48  ;;  %v12733_v47 = vld [vmem:[#allocation18 + $0x32c] ss:$16 sps:$4 sm:$0xff]   ;;  %v12736_v48 = vld [vmem:[#allocation18 + $0x524] ss:$16 sps:$4 sm:$0xff]  }
 0x82e   : > { %5566 = vmatprep.subr.bf16.mxu1 %v12649_v49  ;;  %6139 = vmatprep.subr.bf16.mxu0 %v12652_v50  ;;  %v12731_v49 = vld [vmem:[#allocation18 + $0x328] ss:$16 sps:$4 sm:$0xff]   ;;  %v12734_v50 = vld [vmem:[#allocation18 + $0x520] ss:$16 sps:$4 sm:$0xff]  }
 0x831   : > { %5567 = vmatpush1.bf16.msra.mxu1 %v12647_v51  ;;  %6140 = vmatpush1.bf16.msra.mxu0 %v12650_v52  ;;  %v12739_v51 = vld [vmem:[#allocation18 + $0x34c] ss:$16 sps:$4 sm:$0xff]   ;;  %v12742_v52 = vld [vmem:[#allocation18 + $0x544] ss:$16 sps:$4 sm:$0xff]  }
 0x832   : > { %5568 = vmatprep.subr.bf16.mxu1 %v12655_v53  ;;  %6141 = vmatprep.subr.bf16.mxu0 %v12658_v54  ;;  %v12737_v53 = vld [vmem:[#allocation18 + $0x348] ss:$16 sps:$4 sm:$0xff]   ;;  %v12740_v54 = vld [vmem:[#allocation18 + $0x540] ss:$16 sps:$4 sm:$0xff]  }
 0x835   : > { %5569 = vmatpush1.bf16.msra.mxu1 %v12653_v55  ;;  %6142 = vmatpush1.bf16.msra.mxu0 %v12656_v56  ;;  %v12748_v55 = vld [vmem:[#allocation18 + $0x564] ss:$16 sps:$4 sm:$0xff]   ;;  %v12743_v56 = vld [vmem:[#allocation18 + $0x368] ss:$16 sps:$4 sm:$0xff]  }
 0x836   : > { %5570 = vmatprep.subr.bf16.mxu1 %v12661_v57  ;;  %6143 = vmatprep.subr.bf16.mxu0 %v12664_v58  ;;  %v12746_v57 = vld [vmem:[#allocation18 + $0x560] ss:$16 sps:$4 sm:$0xff]   ;;  %v12751_v58 = vld [vmem:[#allocation18 + $0x38c] ss:$16 sps:$4 sm:$0xff]  }
 0x839   : > { %5571 = vmatpush1.bf16.msra.mxu1 %v12659_v59  ;;  %6144 = vmatpush1.bf16.msra.mxu0 %v12662_v60  ;;  %v12754_v59 = vld [vmem:[#allocation18 + $0x584] ss:$16 sps:$4 sm:$0xff]   ;;  %v12749_v60 = vld [vmem:[#allocation18 + $0x388] ss:$16 sps:$4 sm:$0xff]  }
 0x83a   : > { %5572 = vmatprep.subr.bf16.mxu1 %v12667_v61  ;;  %6145 = vmatprep.subr.bf16.mxu0 %v12670_v62  ;;  %v12752_v61 = vld [vmem:[#allocation18 + $0x580] ss:$16 sps:$4 sm:$0xff]   ;;  %v12757_v62 = vld [vmem:[#allocation18 + $0x3ac] ss:$16 sps:$4 sm:$0xff]  }
 0x83d   : > { %5573 = vmatpush1.bf16.msra.mxu1 %v12665_v63  ;;  %6146 = vmatpush1.bf16.msra.mxu0 %v12668_v2  ;;  %v12760_v63 = vld [vmem:[#allocation18 + $0x5a4] ss:$16 sps:$4 sm:$0xff]   ;;  %v12755_v2 = vld [vmem:[#allocation18 + $0x3a8] ss:$16 sps:$4 sm:$0xff]  }
 0x83e   : > { %5574 = vmatprep.subr.bf16.mxu1 %v12673_v0  ;;  %6147 = vmatprep.subr.bf16.mxu0 %v12676_v4  ;;  %v12758_v0 = vld [vmem:[#allocation18 + $0x5a0] ss:$16 sps:$4 sm:$0xff]   ;;  %v12763_v4 = vld [vmem:[#allocation18 + $0x3cc] ss:$16 sps:$4 sm:$0xff]  }
 0x841   : > { %5575 = vmatpush1.bf16.msra.mxu1 %v12671_v5  ;;  %6148 = vmatpush1.bf16.msra.mxu0 %v12674_v6  ;;  %v12766_v5 = vld [vmem:[#allocation18 + $0x5c4] ss:$16 sps:$4 sm:$0xff]   ;;  %v12761_v6 = vld [vmem:[#allocation18 + $0x3c8] ss:$16 sps:$4 sm:$0xff]  }
 0x842   : > { %5867 = vmatprep.subr.bf16.mxu1 %v12679_v9  ;;  %6440 = vmatprep.subr.bf16.mxu0 %v12682_v10  ;;  %v12764_v9 = vld [vmem:[#allocation18 + $0x5c0] ss:$16 sps:$4 sm:$0xff]   ;;  %v12769_v10 = vld [vmem:[#allocation18 + $0x3ec] ss:$16 sps:$4 sm:$0xff]  }
 0x844   : > { %5593 = vmatmul.mubr.bf16.vlgmr.msra.gmra.mrb[88].mxu1 %v14477_v7  ;;  %6166 = vmatmul.mubr.bf16.vlgmr.msra.gmra.mrb[140].mxu0 %v14489_v15  ;;  %v12697_v7 = vld [vmem:[#allocation18 + $0x26c] ss:$16 sps:$4 sm:$0xff]  }
 0x845   : > { %5868 = vmatpush1.bf16.msra.mxu1 %v12677_v12  ;;  %6441 = vmatpush1.bf16.msra.mxu0 %v12680_v14  ;;  %v12767_v12 = vld [vmem:[#allocation18 + $0x3e8] ss:$16 sps:$4 sm:$0xff]   ;;  %v12770_v14 = vld [vmem:[#allocation18 + $0x5e0] ss:$16 sps:$4 sm:$0xff]  }
 0x846   : > { %5869 = vmatprep.subr.bf16.mxu1 %v12685_v16  ;;  %6442 = vmatprep.subr.bf16.mxu0 %v12688_v17  ;;  %v12775_v16 = vld [vmem:[#allocation18 + $0x40c] ss:$16 sps:$4 sm:$0xff]   ;;  %v12778_v17 = vld [vmem:[#allocation18 + $0x604] ss:$16 sps:$4 sm:$0xff]  }
 0x847   : > { %5899 = vmatprep.mubr.bf16.mxu1 %v13570_v20  ;;  %6472 = vmatprep.mubr.bf16.mxu0 %v13570_v20 }
 0x849   : > { %5870 = vmatpush1.bf16.msra.mxu1 %v12683_v3  ;;  %6443 = vmatpush1.bf16.msra.mxu0 %v12686_v1  ;;  %v6552_v3 = vld [vmem:[#allocation7 + $0x5] sm:$0x1] }
 0x84a   : > { %5871 = vmatprep.subr.bf16.mxu1 %v12691_v18  ;;  %6444 = vmatprep.subr.bf16.mxu0 %v12694_v13  ;;  %v12773_v1 = vld [vmem:[#allocation18 + $0x408] ss:$16 sps:$4 sm:$0xff]   ;;  %v12776_v18 = vld [vmem:[#allocation18 + $0x600] ss:$16 sps:$4 sm:$0xff]   ;;  %v14501_v13 = vpack.c.bf16 %v6552_v3, %v6552_v3  ;;  %v12868_v3 = vld [vmem:[#allocation18 + $0x7e4] ss:$16 sps:$4 sm:$0xff]  }
 0x84d   : > { %5872 = vmatpush1.bf16.msra.mxu1 %v12689_v21  ;;  %6445 = vmatpush1.bf16.msra.mxu0 %v12692_v22  ;;  %v12781_v21 = vld [vmem:[#allocation18 + $0x42c] ss:$16 sps:$4 sm:$0xff]   ;;  %v12784_v22 = vld [vmem:[#allocation18 + $0x624] ss:$16 sps:$4 sm:$0xff]  }
 0x84e   : > { %5873 = vmatprep.subr.bf16.mxu1 %v12697_v7  ;;  %6446 = vmatprep.subr.bf16.mxu0 %v12700_v23  ;;  %v12779_v7 = vld [vmem:[#allocation18 + $0x428] ss:$16 sps:$4 sm:$0xff]   ;;  %v12782_v23 = vld [vmem:[#allocation18 + $0x620] ss:$16 sps:$4 sm:$0xff]  }
 0x851   : > { %5874 = vmatpush1.bf16.msra.mxu1 %v12695_v24  ;;  %6447 = vmatpush1.bf16.msra.mxu0 %v12698_v25  ;;  %v12787_v24 = vld [vmem:[#allocation18 + $0x44c] ss:$16 sps:$4 sm:$0xff]   ;;  %v12790_v25 = vld [vmem:[#allocation18 + $0x644] ss:$16 sps:$4 sm:$0xff]  }
 0x852   : > { %5875 = vmatprep.subr.bf16.mxu1 %v12703_v26  ;;  %6448 = vmatprep.subr.bf16.mxu0 %v12706_v27  ;;  %v12785_v26 = vld [vmem:[#allocation18 + $0x448] ss:$16 sps:$4 sm:$0xff]   ;;  %v12788_v27 = vld [vmem:[#allocation18 + $0x640] ss:$16 sps:$4 sm:$0xff]  }
 0x855   : > { %5876 = vmatpush1.bf16.msra.mxu1 %v12701_v28  ;;  %6449 = vmatpush1.bf16.msra.mxu0 %v12704_v8  ;;  %v12796_v28 = vld [vmem:[#allocation18 + $0x664] ss:$16 sps:$4 sm:$0xff]   ;;  %v12791_v8 = vld [vmem:[#allocation18 + $0x468] ss:$16 sps:$4 sm:$0xff]  }
 0x856   : > { %5877 = vmatprep.subr.bf16.mxu1 %v12709_v29  ;;  %6450 = vmatprep.subr.bf16.mxu0 %v12712_v30  ;;  %v12794_v29 = vld [vmem:[#allocation18 + $0x660] ss:$16 sps:$4 sm:$0xff]   ;;  %v12799_v30 = vld [vmem:[#allocation18 + $0x48c] ss:$16 sps:$4 sm:$0xff]  }
 0x859   : > { %5878 = vmatpush1.bf16.msra.mxu1 %v12707_v31  ;;  %6451 = vmatpush1.bf16.msra.mxu0 %v12710_v32  ;;  %v12802_v31 = vld [vmem:[#allocation18 + $0x684] ss:$16 sps:$4 sm:$0xff]   ;;  %v12797_v32 = vld [vmem:[#allocation18 + $0x488] ss:$16 sps:$4 sm:$0xff]  }
 0x85a   : > { %5879 = vmatprep.subr.bf16.mxu1 %v12715_v34  ;;  %6452 = vmatprep.subr.bf16.mxu0 %v12718_v35  ;;  %v12800_v34 = vld [vmem:[#allocation18 + $0x680] ss:$16 sps:$4 sm:$0xff]   ;;  %v12805_v35 = vld [vmem:[#allocation18 + $0x4ac] ss:$16 sps:$4 sm:$0xff]  }
 0x85d   : > { %5880 = vmatpush1.bf16.msra.mxu1 %v12713_v36  ;;  %6453 = vmatpush1.bf16.msra.mxu0 %v12716_v33  ;;  %v12808_v36 = vld [vmem:[#allocation18 + $0x6a4] ss:$16 sps:$4 sm:$0xff]   ;;  %v12803_v33 = vld [vmem:[#allocation18 + $0x4a8] ss:$16 sps:$4 sm:$0xff]  }
 0x85e   : > { %5881 = vmatprep.subr.bf16.mxu1 %v12721_v37  ;;  %6454 = vmatprep.subr.bf16.mxu0 %v12724_v38  ;;  %v12806_v37 = vld [vmem:[#allocation18 + $0x6a0] ss:$16 sps:$4 sm:$0xff]   ;;  %v12811_v38 = vld [vmem:[#allocation18 + $0x4cc] ss:$16 sps:$4 sm:$0xff]  }
 0x861   : > { %5882 = vmatpush1.bf16.msra.mxu1 %v12719_v39  ;;  %6455 = vmatpush1.bf16.msra.mxu0 %v12722_v19  ;;  %v12814_v39 = vld [vmem:[#allocation18 + $0x6c4] ss:$16 sps:$4 sm:$0xff]   ;;  %v12809_v19 = vld [vmem:[#allocation18 + $0x4c8] ss:$16 sps:$4 sm:$0xff]  }
 0x862   : > { %6174 = vmatprep.subr.bf16.mxu1 %v12727_v41  ;;  %6747 = vmatprep.subr.bf16.mxu0 %v12730_v42  ;;  %v12812_v41 = vld [vmem:[#allocation18 + $0x6c0] ss:$16 sps:$4 sm:$0xff]   ;;  %v12817_v42 = vld [vmem:[#allocation18 + $0x4ec] ss:$16 sps:$4 sm:$0xff]  }
 0x864   : > { %5900 = vmatmul.mubr.bf16.vlgmr.msra.gmra.mrb[92].mxu1 %v14483_v40  ;;  %6473 = vmatmul.mubr.bf16.vlgmr.msra.gmra.mrb[144].mxu0 %v14495_v46  ;;  %v12745_v40 = vld [vmem:[#allocation18 + $0x36c] ss:$16 sps:$4 sm:$0xff]  }
 0x865   : > { %6175 = vmatpush1.bf16.msra.mxu1 %v12725_v44  ;;  %6748 = vmatpush1.bf16.msra.mxu0 %v12728_v45  ;;  %v12815_v44 = vld [vmem:[#allocation18 + $0x4e8] ss:$16 sps:$4 sm:$0xff]   ;;  %v12818_v45 = vld [vmem:[#allocation18 + $0x6e0] ss:$16 sps:$4 sm:$0xff]  }
 0x866   : > { %6176 = vmatprep.subr.bf16.mxu1 %v12733_v47  ;;  %6749 = vmatprep.subr.bf16.mxu0 %v12736_v48  ;;  %v12823_v47 = vld [vmem:[#allocation18 + $0x50c] ss:$16 sps:$4 sm:$0xff]   ;;  %v12826_v48 = vld [vmem:[#allocation18 + $0x704] ss:$16 sps:$4 sm:$0xff]  }
 0x867   : > { %6206 = vmatprep.mubr.bf16.mxu1 %v13570_v20  ;;  %6779 = vmatprep.mubr.bf16.mxu0 %v13570_v20 }
 0x869   : > { %6177 = vmatpush1.bf16.msra.mxu1 %v12731_v49  ;;  %6750 = vmatpush1.bf16.msra.mxu0 %v12734_v50  ;;  %v6859_v49 = vld [vmem:[#allocation7 + $0x6] sm:$0x1]  ;;  %v12821_v50 = vld [vmem:[#allocation18 + $0x508] ss:$16 sps:$4 sm:$0xff]  }
 0x86a   : > { %6178 = vmatprep.subr.bf16.mxu1 %v12739_v51  ;;  %6751 = vmatprep.subr.bf16.mxu0 %v12742_v52  ;;  %v12824_v51 = vld [vmem:[#allocation18 + $0x700] ss:$16 sps:$4 sm:$0xff]   ;;  %v14507_v52 = vpack.c.bf16 %v6859_v49, %v6859_v49 }
 0x86d   : > { %6179 = vmatpush1.bf16.msra.mxu1 %v12737_v53  ;;  %6752 = vmatpush1.bf16.msra.mxu0 %v12740_v54  ;;  %v12829_v53 = vld [vmem:[#allocation18 + $0x52c] ss:$16 sps:$4 sm:$0xff]   ;;  %v12832_v54 = vld [vmem:[#allocation18 + $0x724] ss:$16 sps:$4 sm:$0xff]  }
 0x86e   : > { %6180 = vmatprep.subr.bf16.mxu1 %v12745_v40  ;;  %6753 = vmatprep.subr.bf16.mxu0 %v12748_v55  ;;  %v12827_v40 = vld [vmem:[#allocation18 + $0x528] ss:$16 sps:$4 sm:$0xff]   ;;  %v12830_v55 = vld [vmem:[#allocation18 + $0x720] ss:$16 sps:$4 sm:$0xff]  }
 0x871   : > { %6181 = vmatpush1.bf16.msra.mxu1 %v12743_v56  ;;  %6754 = vmatpush1.bf16.msra.mxu0 %v12746_v57  ;;  %v12835_v56 = vld [vmem:[#allocation18 + $0x54c] ss:$16 sps:$4 sm:$0xff]   ;;  %v12838_v57 = vld [vmem:[#allocation18 + $0x744] ss:$16 sps:$4 sm:$0xff]  }
 0x872   : > { %6182 = vmatprep.subr.bf16.mxu1 %v12751_v58  ;;  %6755 = vmatprep.subr.bf16.mxu0 %v12754_v59  ;;  %v12833_v58 = vld [vmem:[#allocation18 + $0x548] ss:$16 sps:$4 sm:$0xff]   ;;  %v12836_v59 = vld [vmem:[#allocation18 + $0x740] ss:$16 sps:$4 sm:$0xff]  }
 0x875   : > { %6183 = vmatpush1.bf16.msra.mxu1 %v12749_v60  ;;  %6756 = vmatpush1.bf16.msra.mxu0 %v12752_v61  ;;  %v12844_v60 = vld [vmem:[#allocation18 + $0x764] ss:$16 sps:$4 sm:$0xff]   ;;  %v12839_v61 = vld [vmem:[#allocation18 + $0x568] ss:$16 sps:$4 sm:$0xff]  }
 0x876   : > { %6184 = vmatprep.subr.bf16.mxu1 %v12757_v62  ;;  %6757 = vmatprep.subr.bf16.mxu0 %v12760_v63  ;;  %v12842_v62 = vld [vmem:[#allocation18 + $0x760] ss:$16 sps:$4 sm:$0xff]   ;;  %v12847_v63 = vld [vmem:[#allocation18 + $0x58c] ss:$16 sps:$4 sm:$0xff]  }
 0x879   : > { %6185 = vmatpush1.bf16.msra.mxu1 %v12755_v2  ;;  %6758 = vmatpush1.bf16.msra.mxu0 %v12758_v0  ;;  %v12850_v2 = vld [vmem:[#allocation18 + $0x784] ss:$16 sps:$4 sm:$0xff]   ;;  %v12845_v0 = vld [vmem:[#allocation18 + $0x588] ss:$16 sps:$4 sm:$0xff]  }
 0x87a   : > { %6186 = vmatprep.subr.bf16.mxu1 %v12763_v4  ;;  %6759 = vmatprep.subr.bf16.mxu0 %v12766_v5  ;;  %v12848_v4 = vld [vmem:[#allocation18 + $0x780] ss:$16 sps:$4 sm:$0xff]   ;;  %v12853_v5 = vld [vmem:[#allocation18 + $0x5ac] ss:$16 sps:$4 sm:$0xff]  }
 0x87d   : > { %6187 = vmatpush1.bf16.msra.mxu1 %v12761_v6  ;;  %6760 = vmatpush1.bf16.msra.mxu0 %v12764_v9  ;;  %v12856_v6 = vld [vmem:[#allocation18 + $0x7a4] ss:$16 sps:$4 sm:$0xff]   ;;  %v12851_v9 = vld [vmem:[#allocation18 + $0x5a8] ss:$16 sps:$4 sm:$0xff]  }
 0x87e   : > { %6188 = vmatprep.subr.bf16.mxu1 %v12769_v10  ;;  %6761 = vmatprep.subr.bf16.mxu0 %v12772_v11  ;;  %v12854_v10 = vld [vmem:[#allocation18 + $0x7a0] ss:$16 sps:$4 sm:$0xff]   ;;  %v12859_v11 = vld [vmem:[#allocation18 + $0x5cc] ss:$16 sps:$4 sm:$0xff]  }
 0x881   : > { %6189 = vmatpush1.bf16.msra.mxu1 %v12767_v12  ;;  %6762 = vmatpush1.bf16.msra.mxu0 %v12770_v14  ;;  %v12862_v12 = vld [vmem:[#allocation18 + $0x7c4] ss:$16 sps:$4 sm:$0xff]   ;;  %v12857_v14 = vld [vmem:[#allocation18 + $0x5c8] ss:$16 sps:$4 sm:$0xff]  }
 0x882   : > { %6481 = vmatprep.subr.bf16.mxu1 %v12775_v16  ;;  %7054 = vmatprep.subr.bf16.mxu0 %v12778_v17  ;;  %v12860_v16 = vld [vmem:[#allocation18 + $0x7c0] ss:$16 sps:$4 sm:$0xff]   ;;  %v12865_v17 = vld [vmem:[#allocation18 + $0x5ec] ss:$16 sps:$4 sm:$0xff]  }
 0x884   : > { %6207 = vmatmul.mubr.bf16.vlgmr.msra.gmra.mrb[96].mxu1 %v14489_v15  ;;  %6780 = vmatmul.mubr.bf16.vlgmr.msra.gmra.mrb[148].mxu0 %v14501_v13  ;;  %v12793_v15 = vld [vmem:[#allocation18 + $0x46c] ss:$16 sps:$4 sm:$0xff]  }
 0x885   : > { %6482 = vmatpush1.bf16.msra.mxu1 %v12773_v1  ;;  %7055 = vmatpush1.bf16.msra.mxu0 %v12776_v18  ;;  %v12863_v1 = vld [vmem:[#allocation18 + $0x5e8] ss:$16 sps:$4 sm:$0xff]   ;;  %v12866_v18 = vld [vmem:[#allocation18 + $0x7e0] ss:$16 sps:$4 sm:$0xff]  }
 0x886   : > { %6483 = vmatprep.subr.bf16.mxu1 %v12781_v21  ;;  %7056 = vmatprep.subr.bf16.mxu0 %v12784_v22  ;;  %v12871_v21 = vld [vmem:[#allocation18 + $0x60c] ss:$16 sps:$4 sm:$0xff]   ;;  %v12874_v22 = vld [vmem:[#allocation18 + $0x804] ss:$16 sps:$4 sm:$0xff]  }
 0x887   : > { %6513 = vmatprep.mubr.bf16.mxu1 %v13570_v20  ;;  %7086 = vmatprep.mubr.bf16.mxu0 %v13570_v20 }
 0x889   : > { %6484 = vmatpush1.bf16.msra.mxu1 %v12779_v7  ;;  %7057 = vmatpush1.bf16.msra.mxu0 %v12782_v23  ;;  %v7166_v7 = vld [vmem:[#allocation7 + $0x7] sm:$0x1]  ;;  %v12869_v23 = vld [vmem:[#allocation18 + $0x608] ss:$16 sps:$4 sm:$0xff]  }
 0x88a   : > { %6485 = vmatprep.subr.bf16.mxu1 %v12787_v24  ;;  %7058 = vmatprep.subr.bf16.mxu0 %v12790_v25  ;;  %v12872_v24 = vld [vmem:[#allocation18 + $0x800] ss:$16 sps:$4 sm:$0xff]   ;;  %v14513_v25 = vpack.c.bf16 %v7166_v7, %v7166_v7 }
 0x88d   : > { %6486 = vmatpush1.bf16.msra.mxu1 %v12785_v26  ;;  %7059 = vmatpush1.bf16.msra.mxu0 %v12788_v27  ;;  %v12877_v26 = vld [vmem:[#allocation18 + $0x62c] ss:$16 sps:$4 sm:$0xff]   ;;  %v12880_v27 = vld [vmem:[#allocation18 + $0x824] ss:$16 sps:$4 sm:$0xff]  }
 0x88e   : > { %6487 = vmatprep.subr.bf16.mxu1 %v12793_v15  ;;  %7060 = vmatprep.subr.bf16.mxu0 %v12796_v28  ;;  %v12875_v15 = vld [vmem:[#allocation18 + $0x628] ss:$16 sps:$4 sm:$0xff]   ;;  %v12878_v28 = vld [vmem:[#allocation18 + $0x820] ss:$16 sps:$4 sm:$0xff]  }
 0x891   : > { %6488 = vmatpush1.bf16.msra.mxu1 %v12791_v8  ;;  %7061 = vmatpush1.bf16.msra.mxu0 %v12794_v29  ;;  %v12883_v8 = vld [vmem:[#allocation18 + $0x64c] ss:$16 sps:$4 sm:$0xff]   ;;  %v12886_v29 = vld [vmem:[#allocation18 + $0x844] ss:$16 sps:$4 sm:$0xff]  }
 0x892   : > { %6489 = vmatprep.subr.bf16.mxu1 %v12799_v30  ;;  %7062 = vmatprep.subr.bf16.mxu0 %v12802_v31  ;;  %v12881_v30 = vld [vmem:[#allocation18 + $0x648] ss:$16 sps:$4 sm:$0xff]   ;;  %v12884_v31 = vld [vmem:[#allocation18 + $0x840] ss:$16 sps:$4 sm:$0xff]  }
 0x895   : > { %6490 = vmatpush1.bf16.msra.mxu1 %v12797_v32  ;;  %7063 = vmatpush1.bf16.msra.mxu0 %v12800_v34  ;;  %v12892_v32 = vld [vmem:[#allocation18 + $0x864] ss:$16 sps:$4 sm:$0xff]   ;;  %v12887_v34 = vld [vmem:[#allocation18 + $0x668] ss:$16 sps:$4 sm:$0xff]  }
 0x896   : > { %6491 = vmatprep.subr.bf16.mxu1 %v12805_v35  ;;  %7064 = vmatprep.subr.bf16.mxu0 %v12808_v36  ;;  %v12890_v35 = vld [vmem:[#allocation18 + $0x860] ss:$16 sps:$4 sm:$0xff]   ;;  %v12895_v36 = vld [vmem:[#allocation18 + $0x68c] ss:$16 sps:$4 sm:$0xff]  }
 0x899   : > { %6492 = vmatpush1.bf16.msra.mxu1 %v12803_v33  ;;  %7065 = vmatpush1.bf16.msra.mxu0 %v12806_v37  ;;  %v12898_v33 = vld [vmem:[#allocation18 + $0x884] ss:$16 sps:$4 sm:$0xff]   ;;  %v12893_v37 = vld [vmem:[#allocation18 + $0x688] ss:$16 sps:$4 sm:$0xff]  }
 0x89a   : > { %6493 = vmatprep.subr.bf16.mxu1 %v12811_v38  ;;  %7066 = vmatprep.subr.bf16.mxu0 %v12814_v39  ;;  %v12896_v38 = vld [vmem:[#allocation18 + $0x880] ss:$16 sps:$4 sm:$0xff]   ;;  %v12901_v39 = vld [vmem:[#allocation18 + $0x6ac] ss:$16 sps:$4 sm:$0xff]  }
 0x89d   : > { %6494 = vmatpush1.bf16.msra.mxu1 %v12809_v19  ;;  %7067 = vmatpush1.bf16.msra.mxu0 %v12812_v41  ;;  %v12904_v19 = vld [vmem:[#allocation18 + $0x8a4] ss:$16 sps:$4 sm:$0xff]   ;;  %v12899_v41 = vld [vmem:[#allocation18 + $0x6a8] ss:$16 sps:$4 sm:$0xff]  }
 0x89e   : > { %6495 = vmatprep.subr.bf16.mxu1 %v12817_v42  ;;  %7068 = vmatprep.subr.bf16.mxu0 %v12820_v43  ;;  %v12902_v42 = vld [vmem:[#allocation18 + $0x8a0] ss:$16 sps:$4 sm:$0xff]   ;;  %v12907_v43 = vld [vmem:[#allocation18 + $0x6cc] ss:$16 sps:$4 sm:$0xff]  }
 0x8a1   : > { %6496 = vmatpush1.bf16.msra.mxu1 %v12815_v44  ;;  %7069 = vmatpush1.bf16.msra.mxu0 %v12818_v45  ;;  %v12910_v44 = vld [vmem:[#allocation18 + $0x8c4] ss:$16 sps:$4 sm:$0xff]  }
 0x8a2   : > { %6788 = vmatprep.subr.bf16.mxu1 %v12823_v47  ;;  %7361 = vmatprep.subr.bf16.mxu0 %v12826_v48 }
 0x8a4   : > { %6514 = vmatmul.mubr.bf16.vlgmr.msra.gmra.mrb[100].mxu1 %v14495_v46  ;;  %7087 = vmatmul.mubr.bf16.vlgmr.msra.gmra.mrb[152].mxu0 %v14507_v52  ;;  %v12841_v46 = vld [vmem:[#allocation18 + $0x56c] ss:$16 sps:$4 sm:$0xff]  }
 0x8a5   : > { %6789 = vmatpush1.bf16.msra.mxu1 %v12821_v50  ;;  %7362 = vmatpush1.bf16.msra.mxu0 %v12824_v51 }
 0x8a6   : > { %6790 = vmatprep.subr.bf16.mxu1 %v12829_v53  ;;  %7363 = vmatprep.subr.bf16.mxu0 %v12832_v54 }
 0x8a7   : > { %6820 = vmatprep.mubr.bf16.mxu1 %v13570_v20  ;;  %7393 = vmatprep.mubr.bf16.mxu0 %v13570_v20 }
 0x8a9   : > { %6791 = vmatpush1.bf16.msra.mxu1 %v12827_v40  ;;  %7364 = vmatpush1.bf16.msra.mxu0 %v12830_v55  ;;  %v12905_v40 = vld [vmem:[#allocation18 + $0x6c8] ss:$16 sps:$4 sm:$0xff]   ;;  %v12908_v55 = vld [vmem:[#allocation18 + $0x8c0] ss:$16 sps:$4 sm:$0xff]  }
 0x8aa   : > { %6792 = vmatprep.subr.bf16.mxu1 %v12835_v56  ;;  %7365 = vmatprep.subr.bf16.mxu0 %v12838_v57 }
 0x8ad   : > { %6793 = vmatpush1.bf16.msra.mxu1 %v12833_v58  ;;  %7366 = vmatpush1.bf16.msra.mxu0 %v12836_v59  ;;  %v12913_v58 = vld [vmem:[#allocation18 + $0x6ec] ss:$16 sps:$4 sm:$0xff]   ;;  %v12916_v59 = vld [vmem:[#allocation18 + $0x8e4] ss:$16 sps:$4 sm:$0xff]  }
 0x8ae   : > { %6794 = vmatprep.subr.bf16.mxu1 %v12841_v46  ;;  %7367 = vmatprep.subr.bf16.mxu0 %v12844_v60  ;;  %v12911_v46 = vld [vmem:[#allocation18 + $0x6e8] ss:$16 sps:$4 sm:$0xff]   ;;  %v12914_v60 = vld [vmem:[#allocation18 + $0x8e0] ss:$16 sps:$4 sm:$0xff]  }
 0x8b1   : > { %6795 = vmatpush1.bf16.msra.mxu1 %v12839_v61  ;;  %7368 = vmatpush1.bf16.msra.mxu0 %v12842_v62  ;;  %v12919_v61 = vld [vmem:[#allocation18 + $0x70c] ss:$16 sps:$4 sm:$0xff]   ;;  %v12922_v62 = vld [vmem:[#allocation18 + $0x904] ss:$16 sps:$4 sm:$0xff]  }
 0x8b2   : > { %6796 = vmatprep.subr.bf16.mxu1 %v12847_v63  ;;  %7369 = vmatprep.subr.bf16.mxu0 %v12850_v2  ;;  %v7473_v63 = vld [vmem:[#allocation7 + $0x8] sm:$0x1]  ;;  %v12917_v2 = vld [vmem:[#allocation18 + $0x708] ss:$16 sps:$4 sm:$0xff]  }
 0x8b5   : > { %6797 = vmatpush1.bf16.msra.mxu1 %v12845_v0  ;;  %7370 = vmatpush1.bf16.msra.mxu0 %v12848_v4  ;;  %v12920_v0 = vld [vmem:[#allocation18 + $0x900] ss:$16 sps:$4 sm:$0xff]   ;;  %v14531_v4 = vpack.c.bf16 %v7473_v63, %v7473_v63  ;;  %v12971_v63 = vld [vmem:[#allocation18 + $0x828] ss:$16 sps:$4 sm:$0xff]  }
 0x8b6   : > { %6798 = vmatprep.subr.bf16.mxu1 %v12853_v5  ;;  %7371 = vmatprep.subr.bf16.mxu0 %v12856_v6  ;;  %v12925_v5 = vld [vmem:[#allocation18 + $0x72c] ss:$16 sps:$4 sm:$0xff]   ;;  %v12928_v6 = vld [vmem:[#allocation18 + $0x924] ss:$16 sps:$4 sm:$0xff]  }
 0x8b9   : > { %6799 = vmatpush1.bf16.msra.mxu1 %v12851_v9  ;;  %7372 = vmatpush1.bf16.msra.mxu0 %v12854_v10  ;;  %v12923_v9 = vld [vmem:[#allocation18 + $0x728] ss:$16 sps:$4 sm:$0xff]   ;;  %v12926_v10 = vld [vmem:[#allocation18 + $0x920] ss:$16 sps:$4 sm:$0xff]  }
 0x8ba   : > { %6800 = vmatprep.subr.bf16.mxu1 %v12859_v11  ;;  %7373 = vmatprep.subr.bf16.mxu0 %v12862_v12  ;;  %v12931_v11 = vld [vmem:[#allocation18 + $0x74c] ss:$16 sps:$4 sm:$0xff]   ;;  %v12934_v12 = vld [vmem:[#allocation18 + $0x944] ss:$16 sps:$4 sm:$0xff]  }
 0x8bd   : > { %6801 = vmatpush1.bf16.msra.mxu1 %v12857_v14  ;;  %7374 = vmatpush1.bf16.msra.mxu0 %v12860_v16  ;;  %v12929_v14 = vld [vmem:[#allocation18 + $0x748] ss:$16 sps:$4 sm:$0xff]   ;;  %v12932_v16 = vld [vmem:[#allocation18 + $0x940] ss:$16 sps:$4 sm:$0xff]  }
 0x8be   : > { %6802 = vmatprep.subr.bf16.mxu1 %v12865_v17  ;;  %7375 = vmatprep.subr.bf16.mxu0 %v12868_v3  ;;  %v12940_v17 = vld [vmem:[#allocation18 + $0x964] ss:$16 sps:$4 sm:$0xff]   ;;  %v12935_v3 = vld [vmem:[#allocation18 + $0x768] ss:$16 sps:$4 sm:$0xff]  }
 0x8c1   : > { %6803 = vmatpush1.bf16.msra.mxu1 %v12863_v1  ;;  %7376 = vmatpush1.bf16.msra.mxu0 %v12866_v18  ;;  %v12938_v1 = vld [vmem:[#allocation18 + $0x960] ss:$16 sps:$4 sm:$0xff]   ;;  %v12943_v18 = vld [vmem:[#allocation18 + $0x78c] ss:$16 sps:$4 sm:$0xff]  }
 0x8c2   : > { %7095 = vmatprep.subr.bf16.mxu1 %v12871_v21  ;;  %7668 = vmatprep.subr.bf16.mxu0 %v12874_v22  ;;  %v12946_v21 = vld [vmem:[#allocation18 + $0x984] ss:$16 sps:$4 sm:$0xff]   ;;  %v13571_v22 = vmov 1966171168  }
 0x8c3   : > { %v5301_v7 = vunpack.c.l.s4 %v13571_v22  ;;  %v13003_v22 = vld [vmem:[#allocation18 + $0x8cc] ss:$16 sps:$4 sm:$0xff]  }
 0x8c4   : > { %6821 = vmatmul.mubr.bf16.vlgmr.msra.gmra.mrb[104].mxu1 %v14501_v13  ;;  %7394 = vmatmul.mubr.bf16.vlgmr.msra.gmra.mrb[156].mxu0 %v14513_v25  ;;  %v12889_v13 = vld [vmem:[#allocation18 + $0x66c] ss:$16 sps:$4 sm:$0xff]  }
 0x8c5   : > { %7096 = vmatpush1.bf16.msra.mxu1 %v12869_v23  ;;  %7669 = vmatpush1.bf16.msra.mxu0 %v12872_v24  ;;  %v5303_v23 = vlaneseq  ;;  %v12941_v24 = vld [vmem:[#allocation18 + $0x788] ss:$16 sps:$4 sm:$0xff]  }
 0x8c6   : > { %7097 = vmatprep.subr.bf16.mxu1 %v12877_v26  ;;  %7670 = vmatprep.subr.bf16.mxu0 %v12880_v27  ;;  %v12944_v26 = vld [vmem:[#allocation18 + $0x980] ss:$16 sps:$4 sm:$0xff]   ;;  %v12949_v27 = vld [vmem:[#allocation18 + $0x7ac] ss:$16 sps:$4 sm:$0xff]  }
 0x8c7   : > { %7127 = vmatprep.mubr.bf16.mxu1 %v13570_v20  ;;  %7700 = vmatprep.mubr.bf16.mxu0 %v13570_v20  ;;  %vm9931_vm3 = vcmp.lt.s32.totalorder %v5303_v23, 512 }
 0x8c9   : > { %7098 = vmatpush1.bf16.msra.mxu1 %v12875_v15  ;;  %7671 = vmatpush1.bf16.msra.mxu0 %v12878_v28  ;;  %v12952_v15 = vld [vmem:[#allocation18 + $0x9a4] ss:$16 sps:$4 sm:$0xff]   ;;  %v5302_v28 = vunpack.c.0.s8 %v5301_v7 }
 0x8ca   : > { %7099 = vmatprep.subr.bf16.mxu1 %v12883_v8  ;;  %7672 = vmatprep.subr.bf16.mxu0 %v12886_v29  ;;  %v5304_v8 = vshrl.u32 %v5303_v23, 7  ;;  %v12947_v29 = vld [vmem:[#allocation18 + $0x7a8] ss:$16 sps:$4 sm:$0xff]   ;;  %v13006_v7 = vld [vmem:[#allocation18 + $0xac4] ss:$16 sps:$4 sm:$0xff]  }
 0x8cd   : > { %7100 = vmatpush1.bf16.msra.mxu1 %v12881_v30  ;;  %7673 = vmatpush1.bf16.msra.mxu0 %v12884_v31  ;;  %v12950_v30 = vld [vmem:[#allocation18 + $0x9a0] ss:$16 sps:$4 sm:$0xff]   ;;  %v12955_v31 = vld [vmem:[#allocation18 + $0x7cc] ss:$16 sps:$4 sm:$0xff]  }
 0x8ce   : > { %7101 = vmatprep.subr.bf16.mxu1 %v12889_v13  ;;  %7674 = vmatprep.subr.bf16.mxu0 %v12892_v32  ;;  %v12958_v13 = vld [vmem:[#allocation18 + $0x9c4] ss:$16 sps:$4 sm:$0xff]   ;;  %v14538_v32 = vsub.s32 %v5302_v28, %v5304_v8 }
 0x8d1   : > { %7102 = vmatpush1.bf16.msra.mxu1 %v12887_v34  ;;  %7675 = vmatpush1.bf16.msra.mxu0 %v12890_v35 }
 0x8d2   : > { %7103 = vmatprep.subr.bf16.mxu1 %v12895_v36  ;;  %7676 = vmatprep.subr.bf16.mxu0 %v12898_v33 }
 0x8d5   : > { %7104 = vmatpush1.bf16.msra.mxu1 %v12893_v37  ;;  %7677 = vmatpush1.bf16.msra.mxu0 %v12896_v38 }
 0x8d6   : > { %7105 = vmatprep.subr.bf16.mxu1 %v12901_v39  ;;  %7678 = vmatprep.subr.bf16.mxu0 %v12904_v19 }
 0x8d7   : > { %v14519_v45 = vpop.f32.mrb[80].mxu1  ;;  %v14521_v47 = vpop.f32.mrb[132].mxu0 }
 0x8d8   : > { %v14523_v48 = vpop.f32.mrb[81].mxu1  ;;  %v14525_v49 = vpop.f32.mrb[133].mxu0 }
 0x8d9   : > { %v5298_v50 = vcombine.low %v14519_v45, %v14523_v48  ;;  %v5605_v51 = vcombine.low %v14521_v47, %v14525_v49  ;;  %7106 = vmatpush1.bf16.msra.mxu1 %v12899_v41  ;;  %7679 = vmatpush1.bf16.msra.mxu0 %v12902_v42  ;;  %v5250_v53 = vpop.f32.mrb[82].mxu1  ;;  %v5557_v54 = vpop.f32.mrb[134].mxu0  ;;  %v12953_v41 = vld [vmem:[#allocation18 + $0x7c8] ss:$16 sps:$4 sm:$0xff]   ;;  %v12956_v42 = vld [vmem:[#allocation18 + $0x9c0] ss:$16 sps:$4 sm:$0xff]  }
 0x8da   : > { %v5251_v56 = vpop.f32.mrb[83].mxu1  ;;  %v5558_v57 = vpop.f32.mrb[135].mxu0  ;;  %7107 = vmatprep.subr.bf16.mxu1 %v12907_v43  ;;  %7680 = vmatprep.subr.bf16.mxu0 %v12910_v44  ;;  %v12961_v53 = vld [vmem:[#allocation18 + $0x7ec] ss:$16 sps:$4 sm:$0xff]   ;;  %v12964_v54 = vld [vmem:[#allocation18 + $0x9e4] ss:$16 sps:$4 sm:$0xff]  }
 0x8db   : > { %v12959_v57 = vld [vmem:[#allocation18 + $0x7e8] ss:$16 sps:$4 sm:$0xff]   ;;  %v12968_v48 = vld [vmem:[#allocation18 + $0xa00] ss:$16 sps:$4 sm:$0xff]  }
 0x8dc   : > { %v12965_v45 = vld [vmem:[#allocation18 + $0x808] ss:$16 sps:$4 sm:$0xff]   ;;  %v8087_v49 = vld [vmem:[#allocation7 + $0xa] sm:$0x1] }
 0x8dd   : > { %7108 = vmatpush1.bf16.msra.mxu1 %v12905_v40  ;;  %7681 = vmatpush1.bf16.msra.mxu0 %v12908_v55  ;;  %v14550_v40 = vrot.slane %v5298_v50, %v14538_v32 }
 0x8de   : > { %7109 = vmatprep.subr.bf16.mxu1 %v12913_v58  ;;  %7682 = vmatprep.subr.bf16.mxu0 %v12916_v59  ;;  %v12962_v58 = vld [vmem:[#allocation18 + $0x9e0] ss:$16 sps:$4 sm:$0xff]   ;;  %v12967_v59 = vld [vmem:[#allocation18 + $0x80c] ss:$16 sps:$4 sm:$0xff]  }
 0x8e1   : > { %7110 = vmatpush1.bf16.msra.mxu1 %v12911_v46  ;;  %7683 = vmatpush1.bf16.msra.mxu0 %v12914_v60  ;;  %v12970_v46 = vld [vmem:[#allocation18 + $0xa04] ss:$16 sps:$4 sm:$0xff]   ;;  %v7780_v60 = vld [vmem:[#allocation7 + $0x9] sm:$0x1] }
 0x8e2   : > { %7402 = vmatprep.subr.bf16.mxu1 %v12919_v61  ;;  %7975 = vmatprep.subr.bf16.mxu0 %v12922_v62  ;;  %v14557_v50 = vpack.c.bf16 %v7780_v60, %v7780_v60  ;;  %v12973_v61 = vld [vmem:[#allocation18 + $0x82c] ss:$16 sps:$4 sm:$0xff]   ;;  %v12976_v62 = vld [vmem:[#allocation18 + $0xa24] ss:$16 sps:$4 sm:$0xff]  }
 0x8e3   : > { %v13024_v60 = vld [vmem:[#allocation18 + $0xb24] ss:$16 sps:$4 sm:$0xff]  }
 0x8e4   : > { %7128 = vmatmul.mubr.bf16.vlgmr.msra.gmra.mrb[108].mxu1 %v14507_v52  ;;  %7701 = vmatmul.mubr.bf16.vlgmr.msra.gmra.mrb[160].mxu0 %v14531_v4  ;;  %v12937_v52 = vld [vmem:[#allocation18 + $0x76c] ss:$16 sps:$4 sm:$0xff]  }
 0x8e5   : > { %7403 = vmatpush1.bf16.msra.mxu1 %v12917_v2  ;;  %7976 = vmatpush1.bf16.msra.mxu0 %v12920_v0  ;;  %v12974_v2 = vld [vmem:[#allocation18 + $0xa20] ss:$16 sps:$4 sm:$0xff]   ;;  %v12979_v0 = vld [vmem:[#allocation18 + $0x84c] ss:$16 sps:$4 sm:$0xff]  }
 0x8e6   : > { %7404 = vmatprep.subr.bf16.mxu1 %v12925_v5  ;;  %7977 = vmatprep.subr.bf16.mxu0 %v12928_v6  ;;  %v12982_v5 = vld [vmem:[#allocation18 + $0xa44] ss:$16 sps:$4 sm:$0xff]   ;;  %v12977_v6 = vld [vmem:[#allocation18 + $0x848] ss:$16 sps:$4 sm:$0xff]  }
 0x8e7   : > { %7434 = vmatprep.mubr.bf16.mxu1 %v13570_v20  ;;  %8007 = vmatprep.mubr.bf16.mxu0 %v13570_v20 }
 0x8e9   : > { %7405 = vmatpush1.bf16.msra.mxu1 %v12923_v9  ;;  %7978 = vmatpush1.bf16.msra.mxu0 %v12926_v10  ;;  %v12980_v9 = vld [vmem:[#allocation18 + $0xa40] ss:$16 sps:$4 sm:$0xff]   ;;  %v12988_v10 = vld [vmem:[#allocation18 + $0xa64] ss:$16 sps:$4 sm:$0xff]  }
 0x8ea   : > { %7406 = vmatprep.subr.bf16.mxu1 %v12931_v11  ;;  %7979 = vmatprep.subr.bf16.mxu0 %v12934_v12  ;;  %v12983_v11 = vld [vmem:[#allocation18 + $0x868] ss:$16 sps:$4 sm:$0xff]   ;;  %v12986_v12 = vld [vmem:[#allocation18 + $0xa60] ss:$16 sps:$4 sm:$0xff]  }
 0x8ed   : > { %7407 = vmatpush1.bf16.msra.mxu1 %v12929_v14  ;;  %7980 = vmatpush1.bf16.msra.mxu0 %v12932_v16  ;;  %v12991_v14 = vld [vmem:[#allocation18 + $0x88c] ss:$16 sps:$4 sm:$0xff]   ;;  %v12994_v16 = vld [vmem:[#allocation18 + $0xa84] ss:$16 sps:$4 sm:$0xff]  }
 0x8ee   : > { %7408 = vmatprep.subr.bf16.mxu1 %v12937_v52  ;;  %7981 = vmatprep.subr.bf16.mxu0 %v12940_v17  ;;  %v12989_v52 = vld [vmem:[#allocation18 + $0x888] ss:$16 sps:$4 sm:$0xff]   ;;  %v12992_v17 = vld [vmem:[#allocation18 + $0xa80] ss:$16 sps:$4 sm:$0xff]  }
 0x8f1   : > { %7409 = vmatpush1.bf16.msra.mxu1 %v12935_v3  ;;  %7982 = vmatpush1.bf16.msra.mxu0 %v12938_v1  ;;  %v12997_v3 = vld [vmem:[#allocation18 + $0x8ac] ss:$16 sps:$4 sm:$0xff]   ;;  %v13000_v1 = vld [vmem:[#allocation18 + $0xaa4] ss:$16 sps:$4 sm:$0xff]  }
 0x8f2   : > { %7410 = vmatprep.subr.bf16.mxu1 %v12943_v18  ;;  %7983 = vmatprep.subr.bf16.mxu0 %v12946_v21  ;;  %v12995_v18 = vld [vmem:[#allocation18 + $0x8a8] ss:$16 sps:$4 sm:$0xff]   ;;  %v12998_v21 = vld [vmem:[#allocation18 + $0xaa0] ss:$16 sps:$4 sm:$0xff]  }
 0x8f5   : > { %7411 = vmatpush1.bf16.msra.mxu1 %v12941_v24  ;;  %7984 = vmatpush1.bf16.msra.mxu0 %v12944_v26 }
 0x8f6   : > { %7412 = vmatprep.subr.bf16.mxu1 %v12949_v27  ;;  %7985 = vmatprep.subr.bf16.mxu0 %v12952_v15 }
 0x8f7   : > { %v5287_v34 = vpop.f32.mrb[84].mxu1  ;;  %v14540_v35 = vpop.f32.mrb[136].mxu0 }
 0x8f8   : > { %v5289_v36 = vpop.f32.mrb[85].mxu1  ;;  %v14542_v33 = vpop.f32.mrb[137].mxu0 }
 0x8f9   : > { %v5299_v37 = vcombine.low %v5287_v34, %v5289_v36  ;;  %v5912_v38 = vcombine.low %v14540_v35, %v14542_v33  ;;  %v5291_v39 = vpop.f32.mrb[86].mxu1  ;;  %v5864_v19 = vpop.f32.mrb[138].mxu0  ;;  %7413 = vmatpush1.bf16.msra.mxu1 %v12947_v29  ;;  %7986 = vmatpush1.bf16.msra.mxu0 %v12950_v30  ;;  %v13061_v35 = vld [vmem:[#allocation18 + $0xa08] ss:$16 sps:$4 sm:$0xff]   ;;  %v13064_v33 = vld [vmem:[#allocation18 + $0xc00] ss:$16 sps:$4 sm:$0xff]  }
 0x8fa   : > { %v5292_v43 = vpop.f32.mrb[87].mxu1  ;;  %v5865_v44 = vpop.f32.mrb[139].mxu0  ;;  %7414 = vmatprep.subr.bf16.mxu1 %v12955_v31  ;;  %7987 = vmatprep.subr.bf16.mxu0 %v12958_v13  ;;  %v13001_v31 = vld [vmem:[#allocation18 + $0x8c8] ss:$16 sps:$4 sm:$0xff]   ;;  %v13004_v13 = vld [vmem:[#allocation18 + $0xac0] ss:$16 sps:$4 sm:$0xff]   ;;  %v5613_v19 = vrot.slane %v5605_v51, %v14538_v32 }
 0x8fb   : > { %v14553_v55 = vrot.slane %v5299_v37, %v14538_v32  ;;  %v13009_v37 = vld [vmem:[#allocation18 + $0x8ec] ss:$16 sps:$4 sm:$0xff]   ;;  %v13012_v39 = vld [vmem:[#allocation18 + $0xae4] ss:$16 sps:$4 sm:$0xff]   ;;  %v5017_v43 = vld [vmem:[#allocation19] sm:$0xf] }
 0x8fd   : > { %v5314_v56 = vcombine.low %v14550_v40, %v14553_v55  ;;  %7415 = vmatpush1.bf16.msra.mxu1 %v12953_v41  ;;  %7988 = vmatpush1.bf16.msra.mxu0 %v12956_v42  ;;  %v13013_v40 = vld [vmem:[#allocation18 + $0x908] ss:$16 sps:$4 sm:$0xff]   ;;  %v13016_v55 = vld [vmem:[#allocation18 + $0xb00] ss:$16 sps:$4 sm:$0xff]  }
 0x8fe   : > { %7416 = vmatprep.subr.bf16.mxu1 %v12961_v53  ;;  %7989 = vmatprep.subr.bf16.mxu0 %v12964_v54  ;;  %v13007_v53 = vld [vmem:[#allocation18 + $0x8e8] ss:$16 sps:$4 sm:$0xff]   ;;  %v13010_v54 = vld [vmem:[#allocation18 + $0xae0] ss:$16 sps:$4 sm:$0xff]  }
 0x8ff   : > { %v5321_v41 = vrot.slane %v5314_v56, %v14538_v32  ;;  %v14581_v56 = vpack.c.bf16 %v8087_v49, %v8087_v49  ;;  %v13070_v49 = vld [vmem:[#allocation18 + $0xc20] ss:$16 sps:$4 sm:$0xff]  }
 0x901   : > { %7417 = vmatpush1.bf16.msra.mxu1 %v12959_v57  ;;  %7990 = vmatpush1.bf16.msra.mxu0 %v12962_v58  ;;  %v13015_v57 = vld [vmem:[#allocation18 + $0x90c] ss:$16 sps:$4 sm:$0xff]   ;;  %v13018_v58 = vld [vmem:[#allocation18 + $0xb04] ss:$16 sps:$4 sm:$0xff]  }
 0x902   : > { %7709 = vmatprep.subr.bf16.mxu1 %v12967_v59  ;;  %8282 = vmatprep.subr.bf16.mxu0 %v12970_v46  ;;  %v5323_v59 = vadd.f32 %v5321_v41, %v5017_v43  ;;  %v13021_v46 = vld [vmem:[#allocation18 + $0x92c] ss:$16 sps:$4 sm:$0xff]   ;;  %v13055_v41 = vld [vmem:[#allocation18 + $0x9e8] ss:$16 sps:$4 sm:$0xff]  }
 0x903   : > { %v13063_v43 = vld [vmem:[#allocation18 + $0xa0c] ss:$16 sps:$4 sm:$0xff]  }
 0x904   : > { %7435 = vmatmul.mubr.bf16.vlgmr.msra.gmra.mrb[112].mxu1 %v14513_v25  ;;  %8008 = vmatmul.mubr.bf16.vlgmr.msra.gmra.mrb[164].mxu0 %v14557_v50  ;;  %v12985_v25 = vld [vmem:[#allocation18 + $0x86c] ss:$16 sps:$4 sm:$0xff]  }
 0x905   : > { %7710 = vmatpush1.bf16.msra.mxu1 %v12965_v45  ;;  %8283 = vmatpush1.bf16.msra.mxu0 %v12968_v48  ;;  %v13019_v45 = vld [vmem:[#allocation18 + $0x928] ss:$16 sps:$4 sm:$0xff]   ;;  %v13022_v48 = vld [vmem:[#allocation18 + $0xb20] ss:$16 sps:$4 sm:$0xff]  }
 0x906   : > { %7711 = vmatprep.subr.bf16.mxu1 %v12973_v61  ;;  %8284 = vmatprep.subr.bf16.mxu0 %v12976_v62  ;;  %v13027_v61 = vld [vmem:[#allocation18 + $0x94c] ss:$16 sps:$4 sm:$0xff]   ;;  %v13030_v62 = vld [vmem:[#allocation18 + $0xb44] ss:$16 sps:$4 sm:$0xff]  }
 0x907   : > { %7741 = vmatprep.mubr.bf16.mxu1 %v13570_v20  ;;  %8314 = vmatprep.mubr.bf16.mxu0 %v13570_v20 }
 0x909   : > { %7712 = vmatpush1.bf16.msra.mxu1 %v12971_v63  ;;  %8285 = vmatpush1.bf16.msra.mxu0 %v12974_v2  ;;  %v13025_v63 = vld [vmem:[#allocation18 + $0x948] ss:$16 sps:$4 sm:$0xff]   ;;  %v13028_v2 = vld [vmem:[#allocation18 + $0xb40] ss:$16 sps:$4 sm:$0xff]  }
 0x90a   : > { %7713 = vmatprep.subr.bf16.mxu1 %v12979_v0  ;;  %8286 = vmatprep.subr.bf16.mxu0 %v12982_v5  ;;  %v13036_v0 = vld [vmem:[#allocation18 + $0xb64] ss:$16 sps:$4 sm:$0xff]   ;;  %v13031_v5 = vld [vmem:[#allocation18 + $0x968] ss:$16 sps:$4 sm:$0xff]  }
 0x90d   : > { %7714 = vmatpush1.bf16.msra.mxu1 %v12977_v6  ;;  %8287 = vmatpush1.bf16.msra.mxu0 %v12980_v9  ;;  %v13034_v6 = vld [vmem:[#allocation18 + $0xb60] ss:$16 sps:$4 sm:$0xff]   ;;  %v13039_v9 = vld [vmem:[#allocation18 + $0x98c] ss:$16 sps:$4 sm:$0xff]  }
 0x90e   : > { %7715 = vmatprep.subr.bf16.mxu1 %v12985_v25  ;;  %8288 = vmatprep.subr.bf16.mxu0 %v12988_v10  ;;  %v13042_v25 = vld [vmem:[#allocation18 + $0xb84] ss:$16 sps:$4 sm:$0xff]   ;;  %v13037_v10 = vld [vmem:[#allocation18 + $0x988] ss:$16 sps:$4 sm:$0xff]  }
 0x911   : > { %7716 = vmatpush1.bf16.msra.mxu1 %v12983_v11  ;;  %8289 = vmatpush1.bf16.msra.mxu0 %v12986_v12  ;;  %v13040_v11 = vld [vmem:[#allocation18 + $0xb80] ss:$16 sps:$4 sm:$0xff]   ;;  %v13045_v12 = vld [vmem:[#allocation18 + $0x9ac] ss:$16 sps:$4 sm:$0xff]  }
 0x912   : > { %7717 = vmatprep.subr.bf16.mxu1 %v12991_v14  ;;  %8290 = vmatprep.subr.bf16.mxu0 %v12994_v16  ;;  %v13048_v14 = vld [vmem:[#allocation18 + $0xba4] ss:$16 sps:$4 sm:$0xff]   ;;  %v13043_v16 = vld [vmem:[#allocation18 + $0x9a8] ss:$16 sps:$4 sm:$0xff]  }
 0x915   : > { %7718 = vmatpush1.bf16.msra.mxu1 %v12989_v52  ;;  %8291 = vmatpush1.bf16.msra.mxu0 %v12992_v17  ;;  %v13046_v52 = vld [vmem:[#allocation18 + $0xba0] ss:$16 sps:$4 sm:$0xff]   ;;  %v13051_v17 = vld [vmem:[#allocation18 + $0x9cc] ss:$16 sps:$4 sm:$0xff]  }
 0x916   : > { %7719 = vmatprep.subr.bf16.mxu1 %v12997_v3  ;;  %8292 = vmatprep.subr.bf16.mxu0 %v13000_v1  ;;  %v13054_v3 = vld [vmem:[#allocation18 + $0xbc4] ss:$16 sps:$4 sm:$0xff]  }
 0x917   : > { %v5594_v24 = vpop.f32.mrb[88].mxu1  ;;  %v14563_v26 = vpop.f32.mrb[140].mxu0 }
 0x918   : > { %v5596_v27 = vpop.f32.mrb[89].mxu1  ;;  %v14565_v15 = vpop.f32.mrb[141].mxu0 }
 0x919   : > { %v5606_v28 = vcombine.low %v5594_v24, %v5596_v27  ;;  %v6219_v8 = vcombine.low %v14563_v26, %v14565_v15  ;;  %v5598_v29 = vpop.f32.mrb[90].mxu1  ;;  %v6171_v30 = vpop.f32.mrb[142].mxu0  ;;  %7720 = vmatpush1.bf16.msra.mxu1 %v12995_v18  ;;  %8293 = vmatpush1.bf16.msra.mxu0 %v12998_v21  ;;  %v13109_v26 = vld [vmem:[#allocation18 + $0xb08] ss:$16 sps:$4 sm:$0xff]   ;;  %v13112_v15 = vld [vmem:[#allocation18 + $0xd00] ss:$16 sps:$4 sm:$0xff]  }
 0x91a   : > { %v5599_v34 = vpop.f32.mrb[91].mxu1  ;;  %v6172_v36 = vpop.f32.mrb[143].mxu0  ;;  %7721 = vmatprep.subr.bf16.mxu1 %v13003_v22  ;;  %8294 = vmatprep.subr.bf16.mxu0 %v13006_v7  ;;  %v13049_v29 = vld [vmem:[#allocation18 + $0x9c8] ss:$16 sps:$4 sm:$0xff]   ;;  %v13052_v30 = vld [vmem:[#allocation18 + $0xbc0] ss:$16 sps:$4 sm:$0xff]  }
 0x91b   : > { %v5620_v42 = vrot.slane %v5606_v28, %v14538_v32  ;;  %v13057_v34 = vld [vmem:[#allocation18 + $0x9ec] ss:$16 sps:$4 sm:$0xff]   ;;  %v13060_v36 = vld [vmem:[#allocation18 + $0xbe4] ss:$16 sps:$4 sm:$0xff]  }
 0x91d   : > { %v5621_v44 = vcombine.low %v5613_v19, %v5620_v42  ;;  %7722 = vmatpush1.bf16.msra.mxu1 %v13001_v31  ;;  %8295 = vmatpush1.bf16.msra.mxu0 %v13004_v13  ;;  %v13058_v42 = vld [vmem:[#allocation18 + $0xbe0] ss:$16 sps:$4 sm:$0xff]  }
 0x91e   : > { %7723 = vmatprep.subr.bf16.mxu1 %v13009_v37  ;;  %8296 = vmatprep.subr.bf16.mxu0 %v13012_v39  ;;  %v5920_v37 = vrot.slane %v5912_v38, %v14538_v32 }
 0x91f   : > { %v5628_v47 = vrot.slane %v5621_v44, %v14538_v32  ;;  %v13066_v44 = vld [vmem:[#allocation18 + $0xc04] ss:$16 sps:$4 sm:$0xff]  }
 0x921   : > { %v14579_v51 = vadd.f32 %v5628_v47, %v5323_v59  ;;  %7724 = vmatpush1.bf16.msra.mxu1 %v13007_v53  ;;  %8297 = vmatpush1.bf16.msra.mxu0 %v13010_v54  ;;  %v8394_v54 = vld [vmem:[#allocation7 + $0xb] sm:$0x1]  ;;  %v13072_v59 = vld [vmem:[#allocation18 + $0xc24] ss:$16 sps:$4 sm:$0xff]   ;;  %v13067_v47 = vld [vmem:[#allocation18 + $0xa28] ss:$16 sps:$4 sm:$0xff]  }
 0x922   : > { %8016 = vmatprep.subr.bf16.mxu1 %v13015_v57  ;;  %8589 = vmatprep.subr.bf16.mxu0 %v13018_v58  ;;  %v14602_v38 = vpack.c.bf16 %v8394_v54, %v8394_v54  ;;  %v13069_v58 = vld [vmem:[#allocation18 + $0xa2c] ss:$16 sps:$4 sm:$0xff]   ;;  %v13118_v54 = vld [vmem:[#allocation18 + $0xd20] ss:$16 sps:$4 sm:$0xff]  }
 0x924   : > { %7742 = vmatmul.mubr.bf16.vlgmr.msra.gmra.mrb[116].mxu1 %v14531_v4  ;;  %8315 = vmatmul.mubr.bf16.vlgmr.msra.gmra.mrb[168].mxu0 %v14581_v56  ;;  %v13033_v4 = vld [vmem:[#allocation18 + $0x96c] ss:$16 sps:$4 sm:$0xff]  }
 0x925   : > { %8017 = vmatpush1.bf16.msra.mxu1 %v13013_v40  ;;  %8590 = vmatpush1.bf16.msra.mxu0 %v13016_v55  ;;  %v13078_v40 = vld [vmem:[#allocation18 + $0xc44] ss:$16 sps:$4 sm:$0xff]   ;;  %v13073_v55 = vld [vmem:[#allocation18 + $0xa48] ss:$16 sps:$4 sm:$0xff]  }
 0x926   : > { %8018 = vmatprep.subr.bf16.mxu1 %v13021_v46  ;;  %8591 = vmatprep.subr.bf16.mxu0 %v13024_v60  ;;  %v13076_v46 = vld [vmem:[#allocation18 + $0xc40] ss:$16 sps:$4 sm:$0xff]   ;;  %v13084_v60 = vld [vmem:[#allocation18 + $0xc64] ss:$16 sps:$4 sm:$0xff]  }
 0x927   : > { %8048 = vmatprep.mubr.bf16.mxu1 %v13570_v20  ;;  %8621 = vmatprep.mubr.bf16.mxu0 %v13570_v20 }
 0x929   : > { %8019 = vmatpush1.bf16.msra.mxu1 %v13019_v45  ;;  %8592 = vmatpush1.bf16.msra.mxu0 %v13022_v48  ;;  %v13079_v45 = vld [vmem:[#allocation18 + $0xa68] ss:$16 sps:$4 sm:$0xff]   ;;  %v13082_v48 = vld [vmem:[#allocation18 + $0xc60] ss:$16 sps:$4 sm:$0xff]  }
 0x92a   : > { %8020 = vmatprep.subr.bf16.mxu1 %v13027_v61  ;;  %8593 = vmatprep.subr.bf16.mxu0 %v13030_v62  ;;  %v13087_v61 = vld [vmem:[#allocation18 + $0xa8c] ss:$16 sps:$4 sm:$0xff]   ;;  %v13090_v62 = vld [vmem:[#allocation18 + $0xc84] ss:$16 sps:$4 sm:$0xff]  }
 0x92d   : > { %8021 = vmatpush1.bf16.msra.mxu1 %v13025_v63  ;;  %8594 = vmatpush1.bf16.msra.mxu0 %v13028_v2  ;;  %v13085_v63 = vld [vmem:[#allocation18 + $0xa88] ss:$16 sps:$4 sm:$0xff]   ;;  %v13088_v2 = vld [vmem:[#allocation18 + $0xc80] ss:$16 sps:$4 sm:$0xff]  }
 0x92e   : > { %8022 = vmatprep.subr.bf16.mxu1 %v13033_v4  ;;  %8595 = vmatprep.subr.bf16.mxu0 %v13036_v0  ;;  %v13093_v4 = vld [vmem:[#allocation18 + $0xaac] ss:$16 sps:$4 sm:$0xff]   ;;  %v13096_v0 = vld [vmem:[#allocation18 + $0xca4] ss:$16 sps:$4 sm:$0xff]  }
 0x931   : > { %8023 = vmatpush1.bf16.msra.mxu1 %v13031_v5  ;;  %8596 = vmatpush1.bf16.msra.mxu0 %v13034_v6  ;;  %v13091_v5 = vld [vmem:[#allocation18 + $0xaa8] ss:$16 sps:$4 sm:$0xff]   ;;  %v13094_v6 = vld [vmem:[#allocation18 + $0xca0] ss:$16 sps:$4 sm:$0xff]  }
 0x932   : > { %8024 = vmatprep.subr.bf16.mxu1 %v13039_v9  ;;  %8597 = vmatprep.subr.bf16.mxu0 %v13042_v25  ;;  %v13099_v9 = vld [vmem:[#allocation18 + $0xacc] ss:$16 sps:$4 sm:$0xff]   ;;  %v13102_v25 = vld [vmem:[#allocation18 + $0xcc4] ss:$16 sps:$4 sm:$0xff]  }
 0x935   : > { %8025 = vmatpush1.bf16.msra.mxu1 %v13037_v10  ;;  %8598 = vmatpush1.bf16.msra.mxu0 %v13040_v11 }
 0x936   : > { %8026 = vmatprep.subr.bf16.mxu1 %v13045_v12  ;;  %8599 = vmatprep.subr.bf16.mxu0 %v13048_v14 }
 0x937   : > { %v5901_v1 = vpop.f32.mrb[92].mxu1  ;;  %v14587_v18 = vpop.f32.mrb[144].mxu0 }
 0x938   : > { %v5903_v21 = vpop.f32.mrb[93].mxu1  ;;  %v14589_v22 = vpop.f32.mrb[145].mxu0 }
 0x939   : > { %v5913_v7 = vcombine.low %v5901_v1, %v5903_v21  ;;  %v6526_v24 = vcombine.low %v14587_v18, %v14589_v22  ;;  %v5905_v27 = vpop.f32.mrb[94].mxu1  ;;  %v6478_v28 = vpop.f32.mrb[146].mxu0  ;;  %8027 = vmatpush1.bf16.msra.mxu1 %v13043_v16  ;;  %8600 = vmatpush1.bf16.msra.mxu0 %v13046_v52  ;;  %v13097_v1 = vld [vmem:[#allocation18 + $0xac8] ss:$16 sps:$4 sm:$0xff]   ;;  %v13100_v21 = vld [vmem:[#allocation18 + $0xcc0] ss:$16 sps:$4 sm:$0xff]  }
 0x93a   : > { %v5906_v31 = vpop.f32.mrb[95].mxu1  ;;  %v6479_v13 = vpop.f32.mrb[147].mxu0  ;;  %8028 = vmatprep.subr.bf16.mxu1 %v13051_v17  ;;  %8601 = vmatprep.subr.bf16.mxu0 %v13054_v3  ;;  %v13105_v28 = vld [vmem:[#allocation18 + $0xaec] ss:$16 sps:$4 sm:$0xff]   ;;  %v13157_v18 = vld [vmem:[#allocation18 + $0xc08] ss:$16 sps:$4 sm:$0xff]  }
 0x93b   : > { %v5927_v39 = vrot.slane %v5913_v7, %v14538_v32  ;;  %v13160_v22 = vld [vmem:[#allocation18 + $0xe00] ss:$16 sps:$4 sm:$0xff]  }
 0x93d   : > { %v5928_v19 = vcombine.low %v5920_v37, %v5927_v39  ;;  %8029 = vmatpush1.bf16.msra.mxu1 %v13049_v29  ;;  %8602 = vmatpush1.bf16.msra.mxu0 %v13052_v30  ;;  %v13108_v29 = vld [vmem:[#allocation18 + $0xce4] ss:$16 sps:$4 sm:$0xff]   ;;  %v6227_v30 = vrot.slane %v6219_v8, %v14538_v32  ;;  %v13111_v37 = vld [vmem:[#allocation18 + $0xb0c] ss:$16 sps:$4 sm:$0xff]  }
 0x93e   : > { %8030 = vmatprep.subr.bf16.mxu1 %v13057_v34  ;;  %8603 = vmatprep.subr.bf16.mxu0 %v13060_v36  ;;  %v13103_v34 = vld [vmem:[#allocation18 + $0xae8] ss:$16 sps:$4 sm:$0xff]   ;;  %v13106_v36 = vld [vmem:[#allocation18 + $0xce0] ss:$16 sps:$4 sm:$0xff]   ;;  %v13114_v39 = vld [vmem:[#allocation18 + $0xd04] ss:$16 sps:$4 sm:$0xff]  }
 0x93f   : > { %v5935_v53 = vrot.slane %v5928_v19, %v14538_v32 }
 0x941   : > { %v14600_v57 = vadd.f32 %v5935_v53, %v14579_v51  ;;  %8031 = vmatpush1.bf16.msra.mxu1 %v13055_v41  ;;  %8604 = vmatpush1.bf16.msra.mxu0 %v13058_v42  ;;  %v13075_v51 = vld [vmem:[#allocation18 + $0xa4c] ss:$16 sps:$4 sm:$0xff]   ;;  %v8701_v41 = vld [vmem:[#allocation7 + $0xc] sm:$0x1]  ;;  %v13115_v53 = vld [vmem:[#allocation18 + $0xb28] ss:$16 sps:$4 sm:$0xff]  }
 0x942   : > { %8323 = vmatprep.subr.bf16.mxu1 %v13063_v43  ;;  %8896 = vmatprep.subr.bf16.mxu0 %v13066_v44  ;;  %v14623_v8 = vpack.c.bf16 %v8701_v41, %v8701_v41  ;;  %v13117_v43 = vld [vmem:[#allocation18 + $0xb2c] ss:$16 sps:$4 sm:$0xff]   ;;  %v13120_v44 = vld [vmem:[#allocation18 + $0xd24] ss:$16 sps:$4 sm:$0xff]   ;;  %v13166_v41 = vld [vmem:[#allocation18 + $0xe20] ss:$16 sps:$4 sm:$0xff]  }
 0x944   : > { %8049 = vmatmul.mubr.bf16.vlgmr.msra.gmra.mrb[120].mxu1 %v14557_v50  ;;  %8622 = vmatmul.mubr.bf16.vlgmr.msra.gmra.mrb[172].mxu0 %v14602_v38  ;;  %v13081_v50 = vld [vmem:[#allocation18 + $0xa6c] ss:$16 sps:$4 sm:$0xff]  }
 0x945   : > { %8324 = vmatpush1.bf16.msra.mxu1 %v13061_v35  ;;  %8897 = vmatpush1.bf16.msra.mxu0 %v13064_v33  ;;  %v13126_v35 = vld [vmem:[#allocation18 + $0xd44] ss:$16 sps:$4 sm:$0xff]   ;;  %v13121_v33 = vld [vmem:[#allocation18 + $0xb48] ss:$16 sps:$4 sm:$0xff]  }
 0x946   : > { %8325 = vmatprep.subr.bf16.mxu1 %v13069_v58  ;;  %8898 = vmatprep.subr.bf16.mxu0 %v13072_v59  ;;  %v13124_v58 = vld [vmem:[#allocation18 + $0xd40] ss:$16 sps:$4 sm:$0xff]   ;;  %v13132_v59 = vld [vmem:[#allocation18 + $0xd64] ss:$16 sps:$4 sm:$0xff]  }
 0x947   : > { %8355 = vmatprep.mubr.bf16.mxu1 %v13570_v20  ;;  %8928 = vmatprep.mubr.bf16.mxu0 %v13570_v20 }
 0x949   : > { %8326 = vmatpush1.bf16.msra.mxu1 %v13067_v47  ;;  %8899 = vmatpush1.bf16.msra.mxu0 %v13070_v49  ;;  %v13127_v47 = vld [vmem:[#allocation18 + $0xb68] ss:$16 sps:$4 sm:$0xff]   ;;  %v13130_v49 = vld [vmem:[#allocation18 + $0xd60] ss:$16 sps:$4 sm:$0xff]  }
 0x94a   : > { %8327 = vmatprep.subr.bf16.mxu1 %v13075_v51  ;;  %8900 = vmatprep.subr.bf16.mxu0 %v13078_v40  ;;  %v13135_v51 = vld [vmem:[#allocation18 + $0xb8c] ss:$16 sps:$4 sm:$0xff]   ;;  %v13138_v40 = vld [vmem:[#allocation18 + $0xd84] ss:$16 sps:$4 sm:$0xff]  }
 0x94d   : > { %8328 = vmatpush1.bf16.msra.mxu1 %v13073_v55  ;;  %8901 = vmatpush1.bf16.msra.mxu0 %v13076_v46  ;;  %v13133_v55 = vld [vmem:[#allocation18 + $0xb88] ss:$16 sps:$4 sm:$0xff]   ;;  %v13136_v46 = vld [vmem:[#allocation18 + $0xd80] ss:$16 sps:$4 sm:$0xff]  }
 0x94e   : > { %8329 = vmatprep.subr.bf16.mxu1 %v13081_v50  ;;  %8902 = vmatprep.subr.bf16.mxu0 %v13084_v60  ;;  %v13141_v50 = vld [vmem:[#allocation18 + $0xbac] ss:$16 sps:$4 sm:$0xff]   ;;  %v13144_v60 = vld [vmem:[#allocation18 + $0xda4] ss:$16 sps:$4 sm:$0xff]  }
 0x951   : > { %8330 = vmatpush1.bf16.msra.mxu1 %v13079_v45  ;;  %8903 = vmatpush1.bf16.msra.mxu0 %v13082_v48  ;;  %v13139_v45 = vld [vmem:[#allocation18 + $0xba8] ss:$16 sps:$4 sm:$0xff]   ;;  %v13142_v48 = vld [vmem:[#allocation18 + $0xda0] ss:$16 sps:$4 sm:$0xff]  }
 0x952   : > { %8331 = vmatprep.subr.bf16.mxu1 %v13087_v61  ;;  %8904 = vmatprep.subr.bf16.mxu0 %v13090_v62  ;;  %v13147_v61 = vld [vmem:[#allocation18 + $0xbcc] ss:$16 sps:$4 sm:$0xff]   ;;  %v13150_v62 = vld [vmem:[#allocation18 + $0xdc4] ss:$16 sps:$4 sm:$0xff]  }
 0x955   : > { %8332 = vmatpush1.bf16.msra.mxu1 %v13085_v63  ;;  %8905 = vmatpush1.bf16.msra.mxu0 %v13088_v2 }
 0x956   : > { %8333 = vmatprep.subr.bf16.mxu1 %v13093_v4  ;;  %8906 = vmatprep.subr.bf16.mxu0 %v13096_v0 }
 0x957   : > { %v6208_v10 = vpop.f32.mrb[96].mxu1  ;;  %v14608_v11 = vpop.f32.mrb[148].mxu0 }
 0x958   : > { %v6210_v12 = vpop.f32.mrb[97].mxu1  ;;  %v14610_v14 = vpop.f32.mrb[149].mxu0 }
 0x959   : > { %v6220_v16 = vcombine.low %v6208_v10, %v6210_v12  ;;  %v6833_v52 = vcombine.low %v14608_v11, %v14610_v14  ;;  %v6212_v17 = vpop.f32.mrb[98].mxu1  ;;  %v6785_v3 = vpop.f32.mrb[150].mxu0  ;;  %8334 = vmatpush1.bf16.msra.mxu1 %v13091_v5  ;;  %8907 = vmatpush1.bf16.msra.mxu0 %v13094_v6  ;;  %v13145_v10 = vld [vmem:[#allocation18 + $0xbc8] ss:$16 sps:$4 sm:$0xff]   ;;  %v13148_v12 = vld [vmem:[#allocation18 + $0xdc0] ss:$16 sps:$4 sm:$0xff]  }
 0x95a   : > { %v6213_v7 = vpop.f32.mrb[99].mxu1  ;;  %v6786_v27 = vpop.f32.mrb[151].mxu0  ;;  %8335 = vmatprep.subr.bf16.mxu1 %v13099_v9  ;;  %8908 = vmatprep.subr.bf16.mxu0 %v13102_v25  ;;  %v13153_v3 = vld [vmem:[#allocation18 + $0xbec] ss:$16 sps:$4 sm:$0xff]   ;;  %v13205_v11 = vld [vmem:[#allocation18 + $0xd08] ss:$16 sps:$4 sm:$0xff]  }
 0x95b   : > { %v6234_v31 = vrot.slane %v6220_v16, %v14538_v32  ;;  %v13208_v14 = vld [vmem:[#allocation18 + $0xf00] ss:$16 sps:$4 sm:$0xff]  }
 0x95d   : > { %v6235_v13 = vcombine.low %v6227_v30, %v6234_v31  ;;  %8336 = vmatpush1.bf16.msra.mxu1 %v13097_v1  ;;  %8909 = vmatpush1.bf16.msra.mxu0 %v13100_v21  ;;  %v13156_v1 = vld [vmem:[#allocation18 + $0xde4] ss:$16 sps:$4 sm:$0xff]   ;;  %v6534_v21 = vrot.slane %v6526_v24, %v14538_v32  ;;  %v13159_v30 = vld [vmem:[#allocation18 + $0xc0c] ss:$16 sps:$4 sm:$0xff]  }
 0x95e   : > { %8337 = vmatprep.subr.bf16.mxu1 %v13105_v28  ;;  %8910 = vmatprep.subr.bf16.mxu0 %v13108_v29  ;;  %v13151_v28 = vld [vmem:[#allocation18 + $0xbe8] ss:$16 sps:$4 sm:$0xff]   ;;  %v13154_v29 = vld [vmem:[#allocation18 + $0xde0] ss:$16 sps:$4 sm:$0xff]   ;;  %v13162_v31 = vld [vmem:[#allocation18 + $0xe04] ss:$16 sps:$4 sm:$0xff]  }
 0x95f   : > { %v6242_v19 = vrot.slane %v6235_v13, %v14538_v32 }
 0x961   : > { %v14621_v42 = vadd.f32 %v6242_v19, %v14600_v57  ;;  %8338 = vmatpush1.bf16.msra.mxu1 %v13103_v34  ;;  %8911 = vmatpush1.bf16.msra.mxu0 %v13106_v36  ;;  %v13123_v57 = vld [vmem:[#allocation18 + $0xb4c] ss:$16 sps:$4 sm:$0xff]   ;;  %v9008_v34 = vld [vmem:[#allocation7 + $0xd] sm:$0x1]  ;;  %v13163_v19 = vld [vmem:[#allocation18 + $0xc28] ss:$16 sps:$4 sm:$0xff]  }
 0x962   : > { %8630 = vmatprep.subr.bf16.mxu1 %v13111_v37  ;;  %9203 = vmatprep.subr.bf16.mxu0 %v13114_v39  ;;  %v14644_v24 = vpack.c.bf16 %v9008_v34, %v9008_v34  ;;  %v13165_v37 = vld [vmem:[#allocation18 + $0xc2c] ss:$16 sps:$4 sm:$0xff]   ;;  %v13168_v39 = vld [vmem:[#allocation18 + $0xe24] ss:$16 sps:$4 sm:$0xff]   ;;  %v13214_v34 = vld [vmem:[#allocation18 + $0xf20] ss:$16 sps:$4 sm:$0xff]  }
 0x964   : > { %8356 = vmatmul.mubr.bf16.vlgmr.msra.gmra.mrb[124].mxu1 %v14581_v56  ;;  %8929 = vmatmul.mubr.bf16.vlgmr.msra.gmra.mrb[176].mxu0 %v14623_v8  ;;  %v13129_v56 = vld [vmem:[#allocation18 + $0xb6c] ss:$16 sps:$4 sm:$0xff]  }
 0x965   : > { %8631 = vmatpush1.bf16.msra.mxu1 %v13109_v26  ;;  %9204 = vmatpush1.bf16.msra.mxu0 %v13112_v15  ;;  %v13174_v26 = vld [vmem:[#allocation18 + $0xe44] ss:$16 sps:$4 sm:$0xff]   ;;  %v13169_v15 = vld [vmem:[#allocation18 + $0xc48] ss:$16 sps:$4 sm:$0xff]  }
 0x966   : > { %8632 = vmatprep.subr.bf16.mxu1 %v13117_v43  ;;  %9205 = vmatprep.subr.bf16.mxu0 %v13120_v44  ;;  %v13172_v43 = vld [vmem:[#allocation18 + $0xe40] ss:$16 sps:$4 sm:$0xff]   ;;  %v13180_v44 = vld [vmem:[#allocation18 + $0xe64] ss:$16 sps:$4 sm:$0xff]  }
 0x967   : > { %8662 = vmatprep.mubr.bf16.mxu1 %v13570_v20  ;;  %9235 = vmatprep.mubr.bf16.mxu0 %v13570_v20 }
 0x969   : > { %8633 = vmatpush1.bf16.msra.mxu1 %v13115_v53  ;;  %9206 = vmatpush1.bf16.msra.mxu0 %v13118_v54  ;;  %v13175_v53 = vld [vmem:[#allocation18 + $0xc68] ss:$16 sps:$4 sm:$0xff]   ;;  %v13178_v54 = vld [vmem:[#allocation18 + $0xe60] ss:$16 sps:$4 sm:$0xff]  }
 0x96a   : > { %8634 = vmatprep.subr.bf16.mxu1 %v13123_v57  ;;  %9207 = vmatprep.subr.bf16.mxu0 %v13126_v35  ;;  %v13183_v57 = vld [vmem:[#allocation18 + $0xc8c] ss:$16 sps:$4 sm:$0xff]   ;;  %v13186_v35 = vld [vmem:[#allocation18 + $0xe84] ss:$16 sps:$4 sm:$0xff]  }
 0x96d   : > { %8635 = vmatpush1.bf16.msra.mxu1 %v13121_v33  ;;  %9208 = vmatpush1.bf16.msra.mxu0 %v13124_v58  ;;  %v13181_v33 = vld [vmem:[#allocation18 + $0xc88] ss:$16 sps:$4 sm:$0xff]   ;;  %v13184_v58 = vld [vmem:[#allocation18 + $0xe80] ss:$16 sps:$4 sm:$0xff]  }
 0x96e   : > { %8636 = vmatprep.subr.bf16.mxu1 %v13129_v56  ;;  %9209 = vmatprep.subr.bf16.mxu0 %v13132_v59  ;;  %v13189_v56 = vld [vmem:[#allocation18 + $0xcac] ss:$16 sps:$4 sm:$0xff]   ;;  %v13192_v59 = vld [vmem:[#allocation18 + $0xea4] ss:$16 sps:$4 sm:$0xff]  }
 0x971   : > { %8637 = vmatpush1.bf16.msra.mxu1 %v13127_v47  ;;  %9210 = vmatpush1.bf16.msra.mxu0 %v13130_v49  ;;  %v13187_v47 = vld [vmem:[#allocation18 + $0xca8] ss:$16 sps:$4 sm:$0xff]   ;;  %v13190_v49 = vld [vmem:[#allocation18 + $0xea0] ss:$16 sps:$4 sm:$0xff]  }
 0x972   : > { %8638 = vmatprep.subr.bf16.mxu1 %v13135_v51  ;;  %9211 = vmatprep.subr.bf16.mxu0 %v13138_v40  ;;  %v13195_v51 = vld [vmem:[#allocation18 + $0xccc] ss:$16 sps:$4 sm:$0xff]   ;;  %v13198_v40 = vld [vmem:[#allocation18 + $0xec4] ss:$16 sps:$4 sm:$0xff]  }
 0x975   : > { %8639 = vmatpush1.bf16.msra.mxu1 %v13133_v55  ;;  %9212 = vmatpush1.bf16.msra.mxu0 %v13136_v46 }
 0x976   : > { %8640 = vmatprep.subr.bf16.mxu1 %v13141_v50  ;;  %9213 = vmatprep.subr.bf16.mxu0 %v13144_v60 }
 0x977   : > { %v6515_v63 = vpop.f32.mrb[100].mxu1  ;;  %v14629_v2 = vpop.f32.mrb[152].mxu0 }
 0x978   : > { %v6517_v4 = vpop.f32.mrb[101].mxu1  ;;  %v14631_v0 = vpop.f32.mrb[153].mxu0 }
 0x979   : > { %v6527_v5 = vcombine.low %v6515_v63, %v6517_v4  ;;  %v7140_v6 = vcombine.low %v14629_v2, %v14631_v0  ;;  %v6519_v9 = vpop.f32.mrb[102].mxu1  ;;  %v7092_v25 = vpop.f32.mrb[154].mxu0  ;;  %8641 = vmatpush1.bf16.msra.mxu1 %v13139_v45  ;;  %9214 = vmatpush1.bf16.msra.mxu0 %v13142_v48  ;;  %v13193_v63 = vld [vmem:[#allocation18 + $0xcc8] ss:$16 sps:$4 sm:$0xff]   ;;  %v13196_v4 = vld [vmem:[#allocation18 + $0xec0] ss:$16 sps:$4 sm:$0xff]  }
 0x97a   : > { %v6520_v16 = vpop.f32.mrb[103].mxu1  ;;  %v7093_v17 = vpop.f32.mrb[155].mxu0  ;;  %8642 = vmatprep.subr.bf16.mxu1 %v13147_v61  ;;  %9215 = vmatprep.subr.bf16.mxu0 %v13150_v62  ;;  %v13201_v25 = vld [vmem:[#allocation18 + $0xcec] ss:$16 sps:$4 sm:$0xff]  }
 0x97b   : > { %v6541_v7 = vrot.slane %v6527_v5, %v14538_v32  ;;  %v13258_v0 = vld [vmem:[#allocation18 + $0xe2c] ss:$16 sps:$4 sm:$0xff]  }
 0x97d   : > { %v6542_v27 = vcombine.low %v6534_v21, %v6541_v7  ;;  %8643 = vmatpush1.bf16.msra.mxu1 %v13145_v10  ;;  %9216 = vmatpush1.bf16.msra.mxu0 %v13148_v12  ;;  %v13204_v10 = vld [vmem:[#allocation18 + $0xee4] ss:$16 sps:$4 sm:$0xff]   ;;  %v6841_v12 = vrot.slane %v6833_v52, %v14538_v32  ;;  %v13207_v21 = vld [vmem:[#allocation18 + $0xd0c] ss:$16 sps:$4 sm:$0xff]  }
 0x97e   : > { %8644 = vmatprep.subr.bf16.mxu1 %v13153_v3  ;;  %9217 = vmatprep.subr.bf16.mxu0 %v13156_v1  ;;  %v13199_v3 = vld [vmem:[#allocation18 + $0xce8] ss:$16 sps:$4 sm:$0xff]   ;;  %v13202_v1 = vld [vmem:[#allocation18 + $0xee0] ss:$16 sps:$4 sm:$0xff]   ;;  %v13210_v7 = vld [vmem:[#allocation18 + $0xf04] ss:$16 sps:$4 sm:$0xff]  }
 0x97f   : > { %v6549_v13 = vrot.slane %v6542_v27, %v14538_v32 }
 0x981   : > { %v14642_v36 = vadd.f32 %v6549_v13, %v14621_v42  ;;  %8645 = vmatpush1.bf16.msra.mxu1 %v13151_v28  ;;  %9218 = vmatpush1.bf16.msra.mxu0 %v13154_v29  ;;  %v13171_v42 = vld [vmem:[#allocation18 + $0xc4c] ss:$16 sps:$4 sm:$0xff]   ;;  %v9315_v28 = vld [vmem:[#allocation7 + $0xe] sm:$0x1]  ;;  %v13211_v13 = vld [vmem:[#allocation18 + $0xd28] ss:$16 sps:$4 sm:$0xff]  }
 0x982   : > { %8937 = vmatprep.subr.bf16.mxu1 %v13159_v30  ;;  %9510 = vmatprep.subr.bf16.mxu0 %v13162_v31  ;;  %v14665_v52 = vpack.c.bf16 %v9315_v28, %v9315_v28  ;;  %v13213_v30 = vld [vmem:[#allocation18 + $0xd2c] ss:$16 sps:$4 sm:$0xff]   ;;  %v13216_v31 = vld [vmem:[#allocation18 + $0xf24] ss:$16 sps:$4 sm:$0xff]   ;;  %v13262_v28 = vld [vmem:[#allocation18 + $0xe68] ss:$16 sps:$4 sm:$0xff]  }
 0x984   : > { %8663 = vmatmul.mubr.bf16.vlgmr.msra.gmra.mrb[128].mxu1 %v14602_v38  ;;  %9236 = vmatmul.mubr.bf16.vlgmr.msra.gmra.mrb[180].mxu0 %v14644_v24  ;;  %v13177_v38 = vld [vmem:[#allocation18 + $0xc6c] ss:$16 sps:$4 sm:$0xff]  }
 0x985   : > { %8938 = vmatpush1.bf16.msra.mxu1 %v13157_v18  ;;  %9511 = vmatpush1.bf16.msra.mxu0 %v13160_v22  ;;  %v13222_v18 = vld [vmem:[#allocation18 + $0xf44] ss:$16 sps:$4 sm:$0xff]   ;;  %v13217_v22 = vld [vmem:[#allocation18 + $0xd48] ss:$16 sps:$4 sm:$0xff]  }
 0x986   : > { %8939 = vmatprep.subr.bf16.mxu1 %v13165_v37  ;;  %9512 = vmatprep.subr.bf16.mxu0 %v13168_v39  ;;  %v13220_v37 = vld [vmem:[#allocation18 + $0xf40] ss:$16 sps:$4 sm:$0xff]   ;;  %v13228_v39 = vld [vmem:[#allocation18 + $0xf64] ss:$16 sps:$4 sm:$0xff]  }
 0x987   : > { %8969 = vmatprep.mubr.bf16.mxu1 %v13570_v20  ;;  %9542 = vmatprep.mubr.bf16.mxu0 %v13570_v20 }
 0x989   : > { %8940 = vmatpush1.bf16.msra.mxu1 %v13163_v19  ;;  %9513 = vmatpush1.bf16.msra.mxu0 %v13166_v41  ;;  %v13223_v19 = vld [vmem:[#allocation18 + $0xd68] ss:$16 sps:$4 sm:$0xff]   ;;  %v13226_v41 = vld [vmem:[#allocation18 + $0xf60] ss:$16 sps:$4 sm:$0xff]  }
 0x98a   : > { %8941 = vmatprep.subr.bf16.mxu1 %v13171_v42  ;;  %9514 = vmatprep.subr.bf16.mxu0 %v13174_v26  ;;  %v13231_v42 = vld [vmem:[#allocation18 + $0xd8c] ss:$16 sps:$4 sm:$0xff]   ;;  %v13234_v26 = vld [vmem:[#allocation18 + $0xf84] ss:$16 sps:$4 sm:$0xff]  }
 0x98d   : > { %8942 = vmatpush1.bf16.msra.mxu1 %v13169_v15  ;;  %9515 = vmatpush1.bf16.msra.mxu0 %v13172_v43  ;;  %v13229_v15 = vld [vmem:[#allocation18 + $0xd88] ss:$16 sps:$4 sm:$0xff]   ;;  %v13232_v43 = vld [vmem:[#allocation18 + $0xf80] ss:$16 sps:$4 sm:$0xff]  }
 0x98e   : > { %8943 = vmatprep.subr.bf16.mxu1 %v13177_v38  ;;  %9516 = vmatprep.subr.bf16.mxu0 %v13180_v44  ;;  %v13237_v38 = vld [vmem:[#allocation18 + $0xdac] ss:$16 sps:$4 sm:$0xff]   ;;  %v13240_v44 = vld [vmem:[#allocation18 + $0xfa4] ss:$16 sps:$4 sm:$0xff]  }
 0x991   : > { %8944 = vmatpush1.bf16.msra.mxu1 %v13175_v53  ;;  %9517 = vmatpush1.bf16.msra.mxu0 %v13178_v54  ;;  %v13235_v53 = vld [vmem:[#allocation18 + $0xda8] ss:$16 sps:$4 sm:$0xff]   ;;  %v13238_v54 = vld [vmem:[#allocation18 + $0xfa0] ss:$16 sps:$4 sm:$0xff]  }
 0x992   : > { %8945 = vmatprep.subr.bf16.mxu1 %v13183_v57  ;;  %9518 = vmatprep.subr.bf16.mxu0 %v13186_v35  ;;  %v13243_v57 = vld [vmem:[#allocation18 + $0xdcc] ss:$16 sps:$4 sm:$0xff]   ;;  %v13246_v35 = vld [vmem:[#allocation18 + $0xfc4] ss:$16 sps:$4 sm:$0xff]  }
 0x995   : > { %8946 = vmatpush1.bf16.msra.mxu1 %v13181_v33  ;;  %9519 = vmatpush1.bf16.msra.mxu0 %v13184_v58 }
 0x996   : > { %8947 = vmatprep.subr.bf16.mxu1 %v13189_v56  ;;  %9520 = vmatprep.subr.bf16.mxu0 %v13192_v59 }
 0x997   : > { %v6822_v55 = vpop.f32.mrb[104].mxu1  ;;  %v14650_v46 = vpop.f32.mrb[156].mxu0 }
 0x998   : > { %v6824_v50 = vpop.f32.mrb[105].mxu1  ;;  %v14652_v60 = vpop.f32.mrb[157].mxu0 }
 0x999   : > { %v6834_v45 = vcombine.low %v6822_v55, %v6824_v50  ;;  %v7447_v48 = vcombine.low %v14650_v46, %v14652_v60  ;;  %v6826_v61 = vpop.f32.mrb[106].mxu1  ;;  %v7399_v62 = vpop.f32.mrb[158].mxu0  ;;  %8948 = vmatpush1.bf16.msra.mxu1 %v13187_v47  ;;  %9521 = vmatpush1.bf16.msra.mxu0 %v13190_v49  ;;  %v13241_v55 = vld [vmem:[#allocation18 + $0xdc8] ss:$16 sps:$4 sm:$0xff]   ;;  %v13244_v50 = vld [vmem:[#allocation18 + $0xfc0] ss:$16 sps:$4 sm:$0xff]  }
 0x99a   : > { %v6827_v5 = vpop.f32.mrb[107].mxu1  ;;  %v7400_v9 = vpop.f32.mrb[159].mxu0  ;;  %8949 = vmatprep.subr.bf16.mxu1 %v13195_v51  ;;  %9522 = vmatprep.subr.bf16.mxu0 %v13198_v40  ;;  %v13249_v62 = vld [vmem:[#allocation18 + $0xdec] ss:$16 sps:$4 sm:$0xff]   ;;  %v13283_v60 = vld [vmem:[#allocation18 + $0xf48] ss:$16 sps:$4 sm:$0xff]  }
 0x99b   : > { %v6848_v16 = vrot.slane %v6834_v45, %v14538_v32  ;;  %v13285_v46 = vld [vmem:[#allocation18 + $0xf4c] ss:$16 sps:$4 sm:$0xff]  }
 0x99d   : > { %v6849_v17 = vcombine.low %v6841_v12, %v6848_v16  ;;  %8950 = vmatpush1.bf16.msra.mxu1 %v13193_v63  ;;  %9523 = vmatpush1.bf16.msra.mxu0 %v13196_v4  ;;  %v13252_v63 = vld [vmem:[#allocation18 + $0xfe4] ss:$16 sps:$4 sm:$0xff]   ;;  %v7148_v4 = vrot.slane %v7140_v6, %v14538_v32  ;;  %v13255_v12 = vld [vmem:[#allocation18 + $0xe0c] ss:$16 sps:$4 sm:$0xff]   ;;  %v13256_v6 = vld [vmem:[#allocation18 + $0xe28] ss:$16 sps:$4 sm:$0xff]  }
 0x99e   : > { %8951 = vmatprep.subr.bf16.mxu1 %v13201_v25  ;;  %9524 = vmatprep.subr.bf16.mxu0 %v13204_v10  ;;  %v13247_v25 = vld [vmem:[#allocation18 + $0xde8] ss:$16 sps:$4 sm:$0xff]   ;;  %v13250_v10 = vld [vmem:[#allocation18 + $0xfe0] ss:$16 sps:$4 sm:$0xff]  }
 0x99f   : > { %v6856_v27 = vrot.slane %v6849_v17, %v14538_v32  ;;  %v9622_v17 = vld [vmem:[#allocation7 + $0xf] sm:$0x1] }
 0x9a0   : > { %v14684_v2 = vpack.c.bf16 %v9622_v17, %v9622_v17 }
 0x9a1   : > { %v14663_v29 = vadd.f32 %v6856_v27, %v14642_v36  ;;  %8952 = vmatpush1.bf16.msra.mxu1 %v13199_v3  ;;  %9525 = vmatpush1.bf16.msra.mxu0 %v13202_v1  ;;  %v13219_v36 = vld [vmem:[#allocation18 + $0xd4c] ss:$16 sps:$4 sm:$0xff]   ;;  %v13253_v1 = vld [vmem:[#allocation18 + $0xe08] ss:$16 sps:$4 sm:$0xff]  }
 0x9a2   : > { %9244 = vmatprep.subr.bf16.mxu1 %v13207_v21  ;;  %9817 = vmatprep.subr.bf16.mxu0 %v13210_v7  ;;  %v13261_v21 = vld [vmem:[#allocation18 + $0xe4c] ss:$16 sps:$4 sm:$0xff]   ;;  %v13259_v7 = vld [vmem:[#allocation18 + $0xe48] ss:$16 sps:$4 sm:$0xff]  }
 0x9a3   : > { %v13264_v27 = vld [vmem:[#allocation18 + $0xe6c] ss:$16 sps:$4 sm:$0xff]  }
 0x9a4   : > { %8970 = vmatmul.mubr.bf16.vlgmr.msra.gmra.mrb[132].mxu1 %v14623_v8  ;;  %9543 = vmatmul.mubr.bf16.vlgmr.msra.gmra.mrb[184].mxu0 %v14665_v52  ;;  %v13225_v8 = vld [vmem:[#allocation18 + $0xd6c] ss:$16 sps:$4 sm:$0xff]  }
 0x9a5   : > { %9245 = vmatpush1.bf16.msra.mxu1 %v13205_v11  ;;  %9818 = vmatpush1.bf16.msra.mxu0 %v13208_v14  ;;  %v13265_v11 = vld [vmem:[#allocation18 + $0xe88] ss:$16 sps:$4 sm:$0xff]  }
 0x9a6   : > { %9246 = vmatprep.subr.bf16.mxu1 %v13213_v30  ;;  %9819 = vmatprep.subr.bf16.mxu0 %v13216_v31  ;;  %v13268_v14 = vld [vmem:[#allocation18 + $0xea8] ss:$16 sps:$4 sm:$0xff]   ;;  %v13273_v30 = vld [vmem:[#allocation18 + $0xecc] ss:$16 sps:$4 sm:$0xff]  }
 0x9a7   : > { %9276 = vmatprep.mubr.bf16.mxu1 %v13570_v20  ;;  %9849 = vmatprep.mubr.bf16.mxu0 %v13570_v20 }
 0x9a9   : > { %9247 = vmatpush1.bf16.msra.mxu1 %v13211_v13  ;;  %9820 = vmatpush1.bf16.msra.mxu0 %v13214_v34 }
 0x9aa   : > { %9248 = vmatprep.subr.bf16.mxu1 %v13219_v36  ;;  %9821 = vmatprep.subr.bf16.mxu0 %v13222_v18 }
 0x9ad   : > { %9249 = vmatpush1.bf16.msra.mxu1 %v13217_v22  ;;  %9822 = vmatpush1.bf16.msra.mxu0 %v13220_v37 }
 0x9ae   : > { %9250 = vmatprep.subr.bf16.mxu1 %v13225_v8  ;;  %9823 = vmatprep.subr.bf16.mxu0 %v13228_v39  ;;  %v13271_v39 = vld [vmem:[#allocation18 + $0xec8] ss:$16 sps:$4 sm:$0xff]  }
 0x9b1   : > { %9251 = vmatpush1.bf16.msra.mxu1 %v13223_v19  ;;  %9824 = vmatpush1.bf16.msra.mxu0 %v13226_v41 }
 0x9b2   : > { %9252 = vmatprep.subr.bf16.mxu1 %v13231_v42  ;;  %9825 = vmatprep.subr.bf16.mxu0 %v13234_v26  ;;  %v13276_v42 = vld [vmem:[#allocation18 + $0xeec] ss:$16 sps:$4 sm:$0xff]   ;;  %v7455_v26 = vrot.slane %v7447_v48, %v14538_v32 }
 0x9b3   : > { %v13288_v48 = vld [vmem:[#allocation18 + $0xf6c] ss:$16 sps:$4 sm:$0xff]  }
 0x9b5   : > { %9253 = vmatpush1.bf16.msra.mxu1 %v13229_v15  ;;  %9826 = vmatpush1.bf16.msra.mxu0 %v13232_v43 }
 0x9b6   : > { %9254 = vmatprep.subr.bf16.mxu1 %v13237_v38  ;;  %9827 = vmatprep.subr.bf16.mxu0 %v13240_v44  ;;  %v13274_v38 = vld [vmem:[#allocation18 + $0xee8] ss:$16 sps:$4 sm:$0xff]   ;;  %v13279_v44 = vld [vmem:[#allocation18 + $0xf0c] ss:$16 sps:$4 sm:$0xff]  }
 0x9b7   : > { %v7129_v33 = vpop.f32.mrb[108].mxu1  ;;  %v14671_v58 = vpop.f32.mrb[160].mxu0 }
 0x9b8   : > { %v7131_v56 = vpop.f32.mrb[109].mxu1  ;;  %v14673_v59 = vpop.f32.mrb[161].mxu0 }
 0x9b9   : > { %v7141_v47 = vcombine.low %v7129_v33, %v7131_v56  ;;  %v7754_v49 = vcombine.low %v14671_v58, %v14673_v59  ;;  %v7133_v51 = vpop.f32.mrb[110].mxu1  ;;  %v7706_v40 = vpop.f32.mrb[162].mxu0  ;;  %9255 = vmatpush1.bf16.msra.mxu1 %v13235_v53  ;;  %9828 = vmatpush1.bf16.msra.mxu0 %v13238_v54  ;;  %v13280_v33 = vld [vmem:[#allocation18 + $0xf28] ss:$16 sps:$4 sm:$0xff]  }
 0x9ba   : > { %v7134_v45 = vpop.f32.mrb[111].mxu1  ;;  %v7707_v61 = vpop.f32.mrb[163].mxu0  ;;  %9256 = vmatprep.subr.bf16.mxu1 %v13243_v57  ;;  %9829 = vmatprep.subr.bf16.mxu0 %v13246_v35  ;;  %v13277_v57 = vld [vmem:[#allocation18 + $0xf08] ss:$16 sps:$4 sm:$0xff]   ;;  %v13282_v35 = vld [vmem:[#allocation18 + $0xf2c] ss:$16 sps:$4 sm:$0xff]  }
 0x9bb   : > { %v7155_v5 = vrot.slane %v7141_v47, %v14538_v32  ;;  %v13286_v56 = vld [vmem:[#allocation18 + $0xf68] ss:$16 sps:$4 sm:$0xff]   ;;  %v13291_v47 = vld [vmem:[#allocation18 + $0xf8c] ss:$16 sps:$4 sm:$0xff]  }
 0x9bc   : > { %v13289_v51 = vld [vmem:[#allocation18 + $0xf88] ss:$16 sps:$4 sm:$0xff]   ;;  %v13294_v40 = vld [vmem:[#allocation18 + $0xfac] ss:$16 sps:$4 sm:$0xff]  }
 0x9bd   : > { %v7156_v9 = vcombine.low %v7148_v4, %v7155_v5  ;;  %9257 = vmatpush1.bf16.msra.mxu1 %v13241_v55  ;;  %9830 = vmatpush1.bf16.msra.mxu0 %v13244_v50  ;;  %v13297_v55 = vld [vmem:[#allocation18 + $0xfcc] ss:$16 sps:$4 sm:$0xff]  }
 0x9be   : > { %9258 = vmatprep.subr.bf16.mxu1 %v13249_v62  ;;  %9831 = vmatprep.subr.bf16.mxu0 %v13252_v63 }
 0x9bf   : > { %v7163_v16 = vrot.slane %v7156_v9, %v14538_v32  ;;  %v13295_v9 = vld [vmem:[#allocation18 + $0xfc8] ss:$16 sps:$4 sm:$0xff]  }
 0x9c1   : > { %v7165_v3 = vadd.f32 %v7163_v16, %v14663_v29  ;;  %9259 = vmatpush1.bf16.msra.mxu1 %v13247_v25  ;;  %9832 = vmatpush1.bf16.msra.mxu0 %v13250_v10  ;;  %v13267_v29 = vld [vmem:[#allocation18 + $0xe8c] ss:$16 sps:$4 sm:$0xff]   ;;  %v7762_v16 = vrot.slane %v7754_v49, %v14538_v32 }
 0x9c2   : > { %9551 = vmatprep.subr.bf16.mxu1 %v13255_v12  ;;  %v13300_v12 = vld [vmem:[#allocation18 + $0xfec] ss:$16 sps:$4 sm:$0xff]  }
 0x9c4   : > { %9277 = vmatmul.mubr.bf16.vlgmr.msra.gmra.mrb[136].mxu1 %v14644_v24  ;;  %9850 = vmatmul.mubr.bf16.vlgmr.msra.gmra.mrb[188].mxu0 %v14684_v2  ;;  %v13270_v24 = vld [vmem:[#allocation18 + $0xeac] ss:$16 sps:$4 sm:$0xff]  }
 0x9c5   : > { %9552 = vmatpush1.bf16.msra.mxu1 %v13253_v1  ;;  %9583 = vmatprep.mubr.bf16.mxu1 %v13570_v20  ;;  %v13298_v1 = vld [vmem:[#allocation18 + $0xfe8] ss:$16 sps:$4 sm:$0xff]  }
 0x9c6   : > { %9553 = vmatprep.subr.bf16.mxu1 %v13258_v0 }
 0x9c9   : > { %9554 = vmatpush1.bf16.msra.mxu1 %v13256_v6 }
 0x9ca   : > { %9555 = vmatprep.subr.bf16.mxu1 %v13261_v21 }
 0x9cd   : > { %9556 = vmatpush1.bf16.msra.mxu1 %v13259_v7 }
 0x9ce   : > { %9557 = vmatprep.subr.bf16.mxu1 %v13264_v27 }
 0x9d1   : > { %9558 = vmatpush1.bf16.msra.mxu1 %v13262_v28 }
 0x9d2   : > { %9559 = vmatprep.subr.bf16.mxu1 %v13267_v29 }
 0x9d5   : > { %9560 = vmatpush1.bf16.msra.mxu1 %v13265_v11 }
 0x9d6   : > { %9561 = vmatprep.subr.bf16.mxu1 %v13270_v24 }
 0x9d7   : > { %v7436_v31 = vpop.f32.mrb[112].mxu1  ;;  %v14689_v13 = vpop.f32.mrb[164].mxu0 }
 0x9d8   : > { %v7438_v34 = vpop.f32.mrb[113].mxu1  ;;  %v14691_v36 = vpop.f32.mrb[165].mxu0 }
 0x9d9   : > { %v7448_v18 = vcombine.low %v7436_v31, %v7438_v34  ;;  %v8061_v22 = vcombine.low %v14689_v13, %v14691_v36  ;;  %v7440_v37 = vpop.f32.mrb[114].mxu1  ;;  %v8013_v8 = vpop.f32.mrb[166].mxu0  ;;  %9562 = vmatpush1.bf16.msra.mxu1 %v13268_v14 }
 0x9da   : > { %v7441_v19 = vpop.f32.mrb[115].mxu1  ;;  %v8014_v41 = vpop.f32.mrb[167].mxu0  ;;  %9563 = vmatprep.subr.bf16.mxu1 %v13273_v30 }
 0x9db   : > { %v7462_v15 = vrot.slane %v7448_v18, %v14538_v32  ;;  %v8069_v14 = vrot.slane %v8061_v22, %v14538_v32 }
 0x9dd   : > { %v7463_v43 = vcombine.low %v7455_v26, %v7462_v15  ;;  %9564 = vmatpush1.bf16.msra.mxu1 %v13271_v39 }
 0x9de   : > { %9565 = vmatprep.subr.bf16.mxu1 %v13276_v42 }
 0x9df   : > { %v7470_v53 = vrot.slane %v7463_v43, %v14538_v32 }
 0x9e1   : > { %v7472_v54 = vadd.f32 %v7470_v53, %v7165_v3  ;;  %9566 = vmatpush1.bf16.msra.mxu1 %v13274_v38 }
 0x9e2   : > { %9858 = vmatprep.subr.bf16.mxu1 %v13279_v44 }
 0x9e4   : > { %9584 = vmatmul.mubr.bf16.vlgmr.msra.gmra.mrb[140].mxu1 %v14665_v52  ;;  %v13292_v52 = vld [vmem:[#allocation18 + $0xfa8] ss:$16 sps:$4 sm:$0xff]  }
 0x9e5   : > { %9859 = vmatpush1.bf16.msra.mxu1 %v13277_v57  ;;  %9890 = vmatprep.mubr.bf16.mxu1 %v13570_v20 }
 0x9e6   : > { %9860 = vmatprep.subr.bf16.mxu1 %v13282_v35 }
 0x9e9   : > { %9861 = vmatpush1.bf16.msra.mxu1 %v13280_v33 }
 0x9ea   : > { %9862 = vmatprep.subr.bf16.mxu1 %v13285_v46 }
 0x9ed   : > { %9863 = vmatpush1.bf16.msra.mxu1 %v13283_v60 }
 0x9ee   : > { %9864 = vmatprep.subr.bf16.mxu1 %v13288_v48 }
 0x9f1   : > { %9865 = vmatpush1.bf16.msra.mxu1 %v13286_v56 }
 0x9f2   : > { %9866 = vmatprep.subr.bf16.mxu1 %v13291_v47 }
 0x9f5   : > { %9867 = vmatpush1.bf16.msra.mxu1 %v13289_v51 }
 0x9f6   : > { %9868 = vmatprep.subr.bf16.mxu1 %v13294_v40 }
 0x9f7   : > { %v7743_v50 = vpop.f32.mrb[116].mxu1  ;;  %v8316_v20 = vpop.f32.mrb[168].mxu0 }
 0x9f8   : > { %v7745_v45 = vpop.f32.mrb[117].mxu1  ;;  %v8318_v61 = vpop.f32.mrb[169].mxu0 }
 0x9f9   : > { %v7755_v62 = vcombine.low %v7743_v50, %v7745_v45  ;;  %v8368_v63 = vcombine.low %v8316_v20, %v8318_v61  ;;  %v7747_v4 = vpop.f32.mrb[118].mxu1  ;;  %v8320_v5 = vpop.f32.mrb[170].mxu0  ;;  %9869 = vmatpush1.bf16.msra.mxu1 %v13292_v52 }
 0x9fa   : > { %v7748_v25 = vpop.f32.mrb[119].mxu1  ;;  %v8321_v10 = vpop.f32.mrb[171].mxu0  ;;  %9870 = vmatprep.subr.bf16.mxu1 %v13297_v55 }
 0x9fb   : > { %v7769_v17 = vrot.slane %v7755_v62, %v14538_v32  ;;  %v8376_v38 = vrot.slane %v8368_v63, %v14538_v32 }
 0x9fd   : > { %v7770_v3 = vcombine.low %v7762_v16, %v7769_v17  ;;  %9871 = vmatpush1.bf16.msra.mxu1 %v13295_v9 }
 0x9fe   : > { %9872 = vmatprep.subr.bf16.mxu1 %v13300_v12 }
 0x9ff   : > { %v7777_v0 = vrot.slane %v7770_v3, %v14538_v32 }
 0xa01   : > { %v7779_v6 = vadd.f32 %v7777_v0, %v7472_v54  ;;  %9873 = vmatpush1.bf16.msra.mxu1 %v13298_v1 }
 0xa04   : > { %9891 = vmatmul.mubr.bf16.vlgmr.msra.gmra.mrb[144].mxu1 %v14684_v2 }
 0xa17   : > { %v8050_v21 = vpop.f32.mrb[120].mxu1  ;;  %v8623_v7 = vpop.f32.mrb[172].mxu0 }
 0xa18   : > { %v8052_v27 = vpop.f32.mrb[121].mxu1  ;;  %v8625_v28 = vpop.f32.mrb[173].mxu0 }
 0xa19   : > { %v8062_v29 = vcombine.low %v8050_v21, %v8052_v27  ;;  %v8675_v11 = vcombine.low %v8623_v7, %v8625_v28  ;;  %v8054_v58 = vpop.f32.mrb[122].mxu1  ;;  %v8627_v59 = vpop.f32.mrb[174].mxu0 }
 0xa1a   : > { %v8055_v49 = vpop.f32.mrb[123].mxu1  ;;  %v8628_v24 = vpop.f32.mrb[175].mxu0 }
 0xa1b   : > { %v8076_v30 = vrot.slane %v8062_v29, %v14538_v32  ;;  %v8683_v51 = vrot.slane %v8675_v11, %v14538_v32 }
 0xa1d   : > { %v8077_v31 = vcombine.low %v8069_v14, %v8076_v30 }
 0xa1f   : > { %v8084_v2 = vrot.slane %v8077_v31, %v14538_v32 }
 0xa21   : > { %v8086_v34 = vadd.f32 %v8084_v2, %v7779_v6 }
 0xa37   : > { %v8357_v18 = vpop.f32.mrb[124].mxu1  ;;  %v8930_v37 = vpop.f32.mrb[176].mxu0 }
 0xa38   : > { %v8359_v8 = vpop.f32.mrb[125].mxu1  ;;  %v8932_v39 = vpop.f32.mrb[177].mxu0 }
 0xa39   : > { %v8369_v19 = vcombine.low %v8357_v18, %v8359_v8  ;;  %v8982_v41 = vcombine.low %v8930_v37, %v8932_v39  ;;  %v8361_v42 = vpop.f32.mrb[126].mxu1  ;;  %v8934_v26 = vpop.f32.mrb[178].mxu0 }
 0xa3a   : > { %v8362_v15 = vpop.f32.mrb[127].mxu1  ;;  %v8935_v43 = vpop.f32.mrb[179].mxu0 }
 0xa3b   : > { %v8383_v13 = vrot.slane %v8369_v19, %v14538_v32  ;;  %v8990_v12 = vrot.slane %v8982_v41, %v14538_v32 }
 0xa3d   : > { %v8384_v36 = vcombine.low %v8376_v38, %v8383_v13 }
 0xa3f   : > { %v8391_v22 = vrot.slane %v8384_v36, %v14538_v32 }
 0xa41   : > { %v8393_v44 = vadd.f32 %v8391_v22, %v8086_v34 }
 0xa57   : > { %v8664_v53 = vpop.f32.mrb[128].mxu1  ;;  %v9237_v54 = vpop.f32.mrb[180].mxu0 }
 0xa58   : > { %v8666_v57 = vpop.f32.mrb[129].mxu1  ;;  %v9239_v35 = vpop.f32.mrb[181].mxu0 }
 0xa59   : > { %v8676_v33 = vcombine.low %v8664_v53, %v8666_v57  ;;  %v9289_v46 = vcombine.low %v9237_v54, %v9239_v35  ;;  %v8668_v60 = vpop.f32.mrb[130].mxu1  ;;  %v9241_v48 = vpop.f32.mrb[182].mxu0 }
 0xa5a   : > { %v8669_v56 = vpop.f32.mrb[131].mxu1  ;;  %v9242_v47 = vpop.f32.mrb[183].mxu0 }
 0xa5b   : > { %v8690_v40 = vrot.slane %v8676_v33, %v14538_v32  ;;  %v9297_v49 = vrot.slane %v9289_v46, %v14538_v32 }
 0xa5d   : > { %v8691_v52 = vcombine.low %v8683_v51, %v8690_v40 }
 0xa5f   : > { %v8698_v55 = vrot.slane %v8691_v52, %v14538_v32 }
 0xa61   : > { %v8700_v50 = vadd.f32 %v8698_v55, %v8393_v44 }
 0xa77   : > { %v8971_v20 = vpop.f32.mrb[132].mxu1  ;;  %v9544_v45 = vpop.f32.mrb[184].mxu0 }
 0xa78   : > { %v8973_v61 = vpop.f32.mrb[133].mxu1  ;;  %v9546_v62 = vpop.f32.mrb[185].mxu0 }
 0xa79   : > { %v8983_v63 = vcombine.low %v8971_v20, %v8973_v61  ;;  %v9596_v4 = vcombine.low %v9544_v45, %v9546_v62  ;;  %v8975_v5 = vpop.f32.mrb[134].mxu1  ;;  %v9548_v9 = vpop.f32.mrb[186].mxu0 }
 0xa7a   : > { %v8976_v25 = vpop.f32.mrb[135].mxu1  ;;  %v9549_v10 = vpop.f32.mrb[187].mxu0 }
 0xa7b   : > { %v8997_v16 = vrot.slane %v8983_v63, %v14538_v32  ;;  %v9604_v39 = vrot.slane %v9596_v4, %v14538_v32 }
 0xa7d   : > { %v8998_v17 = vcombine.low %v8990_v12, %v8997_v16 }
 0xa7f   : > { %v9005_v3 = vrot.slane %v8998_v17, %v14538_v32 }
 0xa81   : > { %v9007_v1 = vadd.f32 %v9005_v3, %v8700_v50 }
 0xa97   : > { %v9278_v0 = vpop.f32.mrb[136].mxu1  ;;  %v9851_v6 = vpop.f32.mrb[188].mxu0 }
 0xa98   : > { %v9280_v21 = vpop.f32.mrb[137].mxu1  ;;  %v9853_v7 = vpop.f32.mrb[189].mxu0 }
 0xa99   : > { %v9290_v27 = vcombine.low %v9278_v0, %v9280_v21  ;;  %v9903_v28 = vcombine.low %v9851_v6, %v9853_v7  ;;  %v9282_v29 = vpop.f32.mrb[138].mxu1  ;;  %v9855_v11 = vpop.f32.mrb[190].mxu0 }
 0xa9a   : > { %v9283_v58 = vpop.f32.mrb[139].mxu1  ;;  %v9856_v59 = vpop.f32.mrb[191].mxu0 }
 0xa9b   : > { %v9304_v24 = vrot.slane %v9290_v27, %v14538_v32  ;;  %v9911_v22 = vrot.slane %v9903_v28, %v14538_v32 }
 0xa9d   : > { %v9305_v14 = vcombine.low %v9297_v49, %v9304_v24 }
 0xa9f   : > { %v9312_v30 = vrot.slane %v9305_v14, %v14538_v32 }
 0xaa1   : > { %v9314_v31 = vadd.f32 %v9312_v30, %v9007_v1 }
 0xab7   : > { %v9585_v2 = vpop.f32.mrb[140].mxu1 }
 0xab8   : > { %v9587_v34 = vpop.f32.mrb[141].mxu1 }
 0xab9   : > { %v9597_v18 = vcombine.low %v9585_v2, %v9587_v34  ;;  %v9589_v37 = vpop.f32.mrb[142].mxu1 }
 0xaba   : > { %v9590_v8 = vpop.f32.mrb[143].mxu1 }
 0xabb   : > { %v9611_v19 = vrot.slane %v9597_v18, %v14538_v32 }
 0xabd   : > { %v9612_v41 = vcombine.low %v9604_v39, %v9611_v19 }
 0xabf   : > { %v9619_v42 = vrot.slane %v9612_v41, %v14538_v32 }
 0xac1   : > { %v9621_v26 = vadd.f32 %v9619_v42, %v9314_v31 }
 0xad7   : > { %v9892_v15 = vpop.f32.mrb[144].mxu1 }
 0xad8   : > { %v9894_v43 = vpop.f32.mrb[145].mxu1 }
 0xad9   : > { %v9904_v38 = vcombine.low %v9892_v15, %v9894_v43  ;;  %v9896_v13 = vpop.f32.mrb[146].mxu1 }
 0xada   : > { %v9897_v36 = vpop.f32.mrb[147].mxu1 }
 0xadb   : > { %v9918_v44 = vrot.slane %v9904_v38, %v14538_v32 }
 0xadd   : > { %v9919_v53 = vcombine.low %v9911_v22, %v9918_v44 }
 0xadf   : > { %v9926_v54 = vrot.slane %v9919_v53, %v14538_v32 }
 0xae1   : > { %v9928_v57 = vadd.f32 %v9926_v54, %v9621_v26 }
 0xae3   : > { %9933 = vst.msk [vmem:[%s441_s17] sm:$0xf] %vm9931_vm3, %v9928_v57 }
 0xae4 PF: > { %s24_s30 = sadd.s32 1, %s13554_s30  }
 0xae5   : > { %p21_p0 = scmp.ge.s32.totalorder %s24_s30, 4  }
 0xae7   :  { %23 = sbr.rel (!%p21_p0) target bundleno = 5 (0x5), region = 322 }
 0xaee   :  { %9953 = vsyncpa [#allocation9], 1 }
 0xaef   :  { %9955 = vsyncpa [#allocation9 + $0x1], 1 }
 0xaf0   :  { %9956 = vsyncpa [#allocation11], 1 }
 0xaf1   :  { %9957 = vsyncpa [#allocation14], 1 }
 0xaf2   :  { %9958 = vsyncpa [#allocation17], 1 }
 0xaf3   :  { %9959 = vsyncpa [#allocation20], 1 }

</bundles_post_ra>
